<compile_context>
chip_gen: v5e
topology: v5e:2x2
jax: 0.10.0
libtpu: 0.0.40
codegen_flags: <defaults>
</compile_context>

<pallas_src>
from functools import partial

import jax
import jax.numpy as jnp
from jax.experimental import pallas as pl
from jax.experimental.pallas import tpu as pltpu


def _round_up(x, m):
    return (x + m - 1) // m * m


# --------------------------------------------------------------------------------------
# Kernel
# --------------------------------------------------------------------------------------
def _dialogue_kernel(spk_ref,      # SMEM  (T, 2)        per-step (lambda, 1-lambda)
                     emb_ref,      # VMEM  (T*B, D)      all utterance embeddings (bf16/f32)
                     wx_ref,       # VMEM  (D, 8H)       fused input->gates weights (both cells)
                     wh_ref,       # VMEM  (H, 8H)       fused hidden->gates weights (both cells)
                     b_ref,        # VMEM  (1, 8H) f32   fused bias (b_ih + b_hh, both cells)
                     wfc_ref,      # VMEM  (H, H)        fc weight, pre-transposed (W^T)
                     bfc_ref,      # VMEM  (1, H)  f32   fc bias
                     h_out_ref,    # VMEM  (B, H)  f32   fc(h_T)
                     c_out_ref,    # VMEM  (B, H)  f32   c_T
                     xproj_ref):   # VMEM  (T*B, 8H) f32 scratch: hoisted x-projection
    T = spk_ref.shape[0]
    TB, _ = emb_ref.shape
    B = TB // T
    H = c_out_ref.shape[-1]        # padded hidden size (multiple of 128)

    # ---- Hoisted: one big MXU matmul for all T steps, bias folded in. -----------------
    xproj_ref[...] = (jnp.dot(emb_ref[...], wx_ref[...],
                              preferred_element_type=jnp.float32)
                      + b_ref[...])

    w_h = wh_ref[...]              # resident across the whole recurrence

    # Column layout (each H wide): [i_s, f_s, o_s, i_a, f_a, o_a, g_s, g_a]
    def step(t, carry):
        h, c = carry
        base = pl.multiple_of(t * B, B)
        gates = (xproj_ref[pl.ds(base, B), :]
                 + jnp.dot(h.astype(w_h.dtype), w_h,
                           preferred_element_type=jnp.float32))        # (B, 8H) f32

        sig = jax.nn.sigmoid(gates[:, :6 * H])      # one EUP slab for all 6 sigmoid gates
        tnh = jnp.tanh(gates[:, 6 * H:])            # one EUP slab for both cell inputs

        i_s, f_s, o_s = sig[:, 0:H], sig[:, H:2 * H], sig[:, 2 * H:3 * H]
        i_a, f_a, o_a = sig[:, 3 * H:4 * H], sig[:, 4 * H:5 * H], sig[:, 5 * H:6 * H]
        g_s, g_a = tnh[:, 0:H], tnh[:, H:2 * H]

        c_s = f_s * c + i_s * g_s
        c_a = f_a * c + i_a * g_a
        h_s = o_s * jnp.tanh(c_s)
        h_a = o_a * jnp.tanh(c_a)

        lam = spk_ref[t, 0]
        one_m_lam = spk_ref[t, 1]
        h_n = lam * h_s + one_m_lam * h_a
        c_n = lam * c_s + one_m_lam * c_a
        return h_n, c_n

    h0 = jnp.zeros((B, H), jnp.float32)
    c0 = jnp.zeros((B, H), jnp.float32)
    h_n, c_n = jax.lax.fori_loop(0, T, step, (h0, c0), unroll=min(T, 8))

    h_out_ref[...] = (jnp.dot(h_n.astype(wfc_ref.dtype), wfc_ref[...],
                              preferred_element_type=jnp.float32)
                      + bfc_ref[...])
    c_out_ref[...] = c_n


# --------------------------------------------------------------------------------------
# One-time parameter repacking (outside the jitted hot path)
# --------------------------------------------------------------------------------------
def prepare_params(params, compute_dtype=jnp.bfloat16, lane=128):
    """Repack torch-layout weights into the kernel's canonical, lane-aligned layout.

    * Gate column order (each block H_pad wide, 8*H_pad total):
        [i_store, f_store, o_store, i_affect, f_affect, o_affect, g_store, g_affect]
      so sigmoid runs on one contiguous 6*H_pad slab and tanh on the trailing 2*H_pad slab,
      with every slice boundary on a 128-lane multiple.
    * Hidden size padded to a multiple of `lane` with ZERO rows/cols: padded bias/weights are
      zero, so padded c/h state columns stay exactly 0 through the recurrence and contribute
      nothing to the real outputs (sliced off in the wrapper).
    * Matmul weights are cast to `compute_dtype` (bf16 by default); biases stay f32.
    """
    H = params["wfc"].shape[0]
    H_pad = _round_up(H, lane)

    def gate_rows(w):                       # torch LSTMCell row order: i, f, g, o
        return w[0:H], w[H:2 * H], w[2 * H:3 * H], w[3 * H:4 * H]

    def pad_rows(w):                        # (H, cols) -> (H_pad, cols), zero fill
        return jnp.pad(w, ((0, H_pad - H), (0, 0)))

    def pack(w_store, w_affect):
        i_s, f_s, g_s, o_s = gate_rows(w_store)
        i_a, f_a, g_a, o_a = gate_rows(w_affect)
        blocks = [i_s, f_s, o_s, i_a, f_a, o_a, g_s, g_a]
        return jnp.concatenate([pad_rows(blk) for blk in blocks], axis=0)   # (8H_pad, cols)

    w_x = pack(params["wih_store"], params["wih_affect"]).T                 # (D, 8H_pad)

    w_h = pack(params["whh_store"], params["whh_affect"])                   # (8H_pad, H)
    w_h = jnp.pad(w_h, ((0, 0), (0, H_pad - H))).T                          # (H_pad, 8H_pad)

    b = pack(params["b_store"][:, None], params["b_affect"][:, None]).T     # (1, 8H_pad)

    wfc_pad = jnp.pad(params["wfc"], ((0, H_pad - H), (0, H_pad - H)))      # (H_pad, H_pad)
    bfc = jnp.pad(params["bfc"], (0, H_pad - H))[None, :]                   # (1, H_pad)

    return {
        "w_x": w_x.astype(compute_dtype),
        "w_h": w_h.astype(compute_dtype),
        "b": jnp.asarray(b, jnp.float32),
        "wfc_t": wfc_pad.T.astype(compute_dtype),
        "bfc": jnp.asarray(bfc, jnp.float32),
    }


# --------------------------------------------------------------------------------------
# Wrapper
# --------------------------------------------------------------------------------------
@partial(jax.jit, static_argnames=("hidden_size",))
def dialogue_infer(embs, speakers, packed, hidden_size):
    """embs: (T, B, D) f32, speakers: (T,) f32, packed: prepare_params() output."""
    T, B, D = embs.shape
    H = hidden_size
    H_pad = packed["wfc_t"].shape[0]
    G = 8 * H_pad
    B_pad = _round_up(B, 8)
    compute_dtype = packed["w_x"].dtype

    # Pad batch to a sublane multiple and flatten (T, B, D) -> (T*B, D) once, outside the
    # kernel, so the hoisted x-projection is a single large matmul with no in-kernel reshape.
    emb_flat = jnp.pad(embs, ((0, 0), (0, B_pad - B), (0, 0))) \
                  .astype(compute_dtype).reshape(T * B_pad, D)

    lam = speakers.astype(jnp.float32)
    spk = jnp.stack([lam, 1.0 - lam], axis=-1)                              # (T, 2) -> SMEM

    vmem = pl.BlockSpec(memory_space=pltpu.MemorySpace.VMEM)
    smem = pl.BlockSpec(memory_space=pltpu.MemorySpace.SMEM)

    h_out, c_out = pl.pallas_call(
        _dialogue_kernel,
        out_shape=(
            jax.ShapeDtypeStruct((B_pad, H_pad), jnp.float32),
            jax.ShapeDtypeStruct((B_pad, H_pad), jnp.float32),
        ),
        in_specs=[smem, vmem, vmem, vmem, vmem, vmem, vmem],
        out_specs=(vmem, vmem),
        scratch_shapes=[pltpu.VMEM((T * B_pad, G), jnp.float32)],
    )(spk, emb_flat, packed["w_x"], packed["w_h"], packed["b"],
      packed["wfc_t"], packed["bfc"])

    return h_out[:B, :H], c_out[:B, :H]


# --------------------------------------------------------------------------------------
# Parameter init (torch LSTMCell / Linear shapes) + pure-JAX reference
# --------------------------------------------------------------------------------------
def init_params(key, input_size, hidden_size):
    D, H = input_size, hidden_size
    k = 1.0 / jnp.sqrt(jnp.float32(H))
    keys = jax.random.split(key, 10)
    u = lambda kk, shape: jax.random.uniform(kk, shape, jnp.float32, -k, k)
    return {
        "wih_store": u(keys[0], (4 * H, D)),
        "whh_store": u(keys[1], (4 * H, H)),
        "b_store": u(keys[2], (4 * H,)) + u(keys[3], (4 * H,)),      # b_ih + b_hh
        "wih_affect": u(keys[4], (4 * H, D)),
        "whh_affect": u(keys[5], (4 * H, H)),
        "b_affect": u(keys[6], (4 * H,)) + u(keys[7], (4 * H,)),
        "wfc": u(keys[8], (H, H)),
        "bfc": u(keys[9], (H,)),
    }


def reference(embs, speakers, params):
    """Pure-JAX f32 reference of the PyTorch forward pass."""
    T, B, D = embs.shape
    H = params["wfc"].shape[0]
    h = jnp.zeros((B, H), jnp.float32)
    c = jnp.zeros((B, H), jnp.float32)

    def cell(x, h, c, wih, whh, b):
        g = x @ wih.T + h @ whh.T + b
        i, f, gg, o = jnp.split(g, 4, axis=-1)
        c_new = jax.nn.sigmoid(f) * c + jax.nn.sigmoid(i) * jnp.tanh(gg)
        h_new = jax.nn.sigmoid(o) * jnp.tanh(c_new)
        return h_new, c_new

    for t in range(T):
        x, lam = embs[t], speakers[t]
        hs, cs = cell(x, h, c, params["wih_store"], params["whh_store"], params["b_store"])
        ha, ca = cell(x, h, c, params["wih_affect"], params["whh_affect"], params["b_affect"])
        h = lam * hs + (1.0 - lam) * ha
        c = lam * cs + (1.0 - lam) * ca
    return h @ params["wfc"].T + params["bfc"], c


if __name__ == "__main__":
    B, D, H, T = 4, 16, 32, 8   # batch, input_size, hidden_size, num utterances

    key = jax.random.PRNGKey(0)
    k_emb, k_spk, _ = jax.random.split(key, 3)

    embs = jax.random.normal(k_emb, (T, B, D), jnp.float32)
    speakers = jax.random.bernoulli(k_spk, 0.5, (T,)).astype(jnp.float32)
    params = init_params(jax.random.PRNGKey(42), D, H)

    h_ref, c_ref = reference(embs, speakers, params)

    # 1) f32 compute path: exact check against the reference.
    packed_f32 = prepare_params(params, compute_dtype=jnp.float32)
    h32, c32 = dialogue_infer(embs, speakers, packed_f32, H)
    jax.block_until_ready((h32, c32))
    assert h32.shape == h_ref.shape and c32.shape == c_ref.shape, "shape mismatch (f32)"
    assert jnp.allclose(h32, h_ref, atol=1e-4, rtol=1e-4), "h mismatch (f32)"
    assert jnp.allclose(c32, c_ref, atol=1e-4, rtol=1e-4), "c mismatch (f32)"

    # 2) bf16 compute path (production default): looser tolerance for bf16 matmul rounding;
    #    carries/accumulation stay f32 inside the kernel.
    packed_bf16 = prepare_params(params, compute_dtype=jnp.bfloat16)
    h16, c16 = dialogue_infer(embs, speakers, packed_bf16, H)
    jax.block_until_ready((h16, c16))
    assert h16.shape == h_ref.shape and c16.shape == c_ref.shape, "shape mismatch (bf16)"
    assert jnp.allclose(h16, h_ref, atol=3e-2, rtol=3e-2), "h mismatch (bf16)"
    assert jnp.allclose(c16, c_ref, atol=3e-2, rtol=3e-2), "c mismatch (bf16)"

    print("KERNEL_OK")
</pallas_src>

<mosaic_0001>
module attributes {stable_mosaic.version = 11 : i64} {
  func.func @_dialogue_kernel(%arg0: memref<8x2xf32, #tpu.memory_space<smem>>, %arg1: memref<64x16xf32, #tpu.memory_space<vmem>>, %arg2: memref<16x1024xf32, #tpu.memory_space<vmem>>, %arg3: memref<128x1024xf32, #tpu.memory_space<vmem>>, %arg4: memref<1x1024xf32, #tpu.memory_space<vmem>>, %arg5: memref<128x128xf32, #tpu.memory_space<vmem>>, %arg6: memref<1x128xf32, #tpu.memory_space<vmem>>, %arg7: memref<8x128xf32, #tpu.memory_space<vmem>>, %arg8: memref<8x128xf32, #tpu.memory_space<vmem>>, %arg9: memref<64x1024xf32, #tpu.memory_space<vmem>>) attributes {dimension_semantics = [], scalar_prefetch = 0 : i64, scratch_operands = 1 : i64, tpu.core_type = #tpu.core_type<tc>} {
    %c0 = arith.constant 0 : index
    %c0_0 = arith.constant 0 : index
    %0 = vector.load %arg1[%c0, %c0_0] : memref<64x16xf32, #tpu.memory_space<vmem>>, vector<64x16xf32>
    %c0_1 = arith.constant 0 : index
    %c0_2 = arith.constant 0 : index
    %1 = vector.load %arg2[%c0_1, %c0_2] : memref<16x1024xf32, #tpu.memory_space<vmem>>, vector<16x1024xf32>
    %cst = arith.constant dense<0.000000e+00> : vector<64x1024xf32>
    %2 = tpu.matmul %0, %1, %cst {dimension_numbers = #tpu.dot_dimension_numbers<[1], [0], [0], [1], [0, 0, 1, 1], [], []>} : vector<64x16xf32>, vector<16x1024xf32>, vector<64x1024xf32> -> vector<64x1024xf32>
    %c0_3 = arith.constant 0 : index
    %c0_4 = arith.constant 0 : index
    %3 = vector.load %arg4[%c0_3, %c0_4] : memref<1x1024xf32, #tpu.memory_space<vmem>>, vector<1x1024xf32>
    %4 = vector.broadcast %3 : vector<1x1024xf32> to vector<64x1024xf32>
    %5 = arith.addf %2, %4 : vector<64x1024xf32>
    %c0_5 = arith.constant 0 : index
    %c0_6 = arith.constant 0 : index
    %6 = vector.load %arg9[%c0_5, %c0_6] : memref<64x1024xf32, #tpu.memory_space<vmem>>, vector<64x1024xf32>
    tpu.vector_store %arg9[%c0_5, %c0_6], %5 {strides = array<i32>} : memref<64x1024xf32, #tpu.memory_space<vmem>>, vector<64x1024xf32>,
    %c0_7 = arith.constant 0 : index
    %c0_8 = arith.constant 0 : index
    %7 = vector.load %arg3[%c0_7, %c0_8] : memref<128x1024xf32, #tpu.memory_space<vmem>>, vector<128x1024xf32>
    %cst_9 = arith.constant 0.000000e+00 : f32
    %8 = vector.broadcast %cst_9 : f32 to vector<8x128xf32>
    %cst_10 = arith.constant 0.000000e+00 : f32
    %9 = vector.broadcast %cst_10 : f32 to vector<8x128xf32>
    %c0_i32 = arith.constant 0 : i32
    %c8_i32 = arith.constant 8 : i32
    %10 = arith.muli %c0_i32, %c8_i32 : i32
    %11 = tpu.assume_multiple %10, 8 : i32
    %12 = arith.index_cast %11 : i32 to index
    %c0_11 = arith.constant 0 : index
    %13 = vector.load %arg9[%12, %c0_11] : memref<64x1024xf32, #tpu.memory_space<vmem>>, vector<8x1024xf32>
    %cst_12 = arith.constant dense<0.000000e+00> : vector<8x1024xf32>
    %14 = tpu.matmul %8, %7, %cst_12 {dimension_numbers = #tpu.dot_dimension_numbers<[1], [0], [0], [1], [0, 0, 1, 1], [], []>} : vector<8x128xf32>, vector<128x1024xf32>, vector<8x1024xf32> -> vector<8x1024xf32>
    %15 = arith.addf %13, %14 : vector<8x1024xf32>
    %16 = vector.extract_strided_slice %15 {offsets = [0, 0], sizes = [8, 768], strides = [1, 1]} : vector<8x1024xf32> to vector<8x768xf32>
    %17 = arith.negf %16 : vector<8x768xf32>
    %18 = math.exp %17 : vector<8x768xf32>
    %cst_13 = arith.constant 1.000000e+00 : f32
    %19 = vector.broadcast %cst_13 : f32 to vector<8x768xf32>
    %20 = arith.addf %19, %18 : vector<8x768xf32>
    %21 = arith.divf %19, %20 : vector<8x768xf32>
    %22 = vector.extract_strided_slice %15 {offsets = [0, 768], sizes = [8, 256], strides = [1, 1]} : vector<8x1024xf32> to vector<8x256xf32>
    %23 = math.tanh %22 : vector<8x256xf32>
    %24 = vector.extract_strided_slice %21 {offsets = [0, 0], sizes = [8, 128], strides = [1, 1]} : vector<8x768xf32> to vector<8x128xf32>
    %25 = vector.extract_strided_slice %21 {offsets = [0, 128], sizes = [8, 128], strides = [1, 1]} : vector<8x768xf32> to vector<8x128xf32>
    %26 = vector.extract_strided_slice %21 {offsets = [0, 256], sizes = [8, 128], strides = [1, 1]} : vector<8x768xf32> to vector<8x128xf32>
    %27 = vector.extract_strided_slice %21 {offsets = [0, 384], sizes = [8, 128], strides = [1, 1]} : vector<8x768xf32> to vector<8x128xf32>
    %28 = vector.extract_strided_slice %21 {offsets = [0, 512], sizes = [8, 128], strides = [1, 1]} : vector<8x768xf32> to vector<8x128xf32>
    %29 = vector.extract_strided_slice %21 {offsets = [0, 640], sizes = [8, 128], strides = [1, 1]} : vector<8x768xf32> to vector<8x128xf32>
    %30 = vector.extract_strided_slice %23 {offsets = [0, 0], sizes = [8, 128], strides = [1, 1]} : vector<8x256xf32> to vector<8x128xf32>
    %31 = vector.extract_strided_slice %23 {offsets = [0, 128], sizes = [8, 128], strides = [1, 1]} : vector<8x256xf32> to vector<8x128xf32>
    %32 = arith.mulf %25, %9 : vector<8x128xf32>
    %33 = arith.mulf %24, %30 : vector<8x128xf32>
    %34 = arith.addf %32, %33 : vector<8x128xf32>
    %35 = arith.mulf %28, %9 : vector<8x128xf32>
    %36 = arith.mulf %27, %31 : vector<8x128xf32>
    %37 = arith.addf %35, %36 : vector<8x128xf32>
    %38 = math.tanh %34 : vector<8x128xf32>
    %39 = arith.mulf %26, %38 : vector<8x128xf32>
    %40 = math.tanh %37 : vector<8x128xf32>
    %41 = arith.mulf %29, %40 : vector<8x128xf32>
    %42 = arith.index_cast %c0_i32 : i32 to index
    %c0_14 = arith.constant 0 : index
    %43 = memref.load %arg0[%42, %c0_14] : memref<8x2xf32, #tpu.memory_space<smem>>
    %44 = arith.index_cast %c0_i32 : i32 to index
    %c1 = arith.constant 1 : index
    %45 = memref.load %arg0[%44, %c1] : memref<8x2xf32, #tpu.memory_space<smem>>
    %46 = vector.broadcast %43 : f32 to vector<8x128xf32>
    %47 = arith.mulf %46, %39 : vector<8x128xf32>
    %48 = vector.broadcast %45 : f32 to vector<8x128xf32>
    %49 = arith.mulf %48, %41 : vector<8x128xf32>
    %50 = arith.addf %47, %49 : vector<8x128xf32>
    %51 = vector.broadcast %43 : f32 to vector<8x128xf32>
    %52 = arith.mulf %51, %34 : vector<8x128xf32>
    %53 = vector.broadcast %45 : f32 to vector<8x128xf32>
    %54 = arith.mulf %53, %37 : vector<8x128xf32>
    %55 = arith.addf %52, %54 : vector<8x128xf32>
    %c1_i32 = arith.constant 1 : i32
    %c8_i32_15 = arith.constant 8 : i32
    %56 = arith.muli %c1_i32, %c8_i32_15 : i32
    %57 = tpu.assume_multiple %56, 8 : i32
    %58 = arith.index_cast %57 : i32 to index
    %c0_16 = arith.constant 0 : index
    %59 = vector.load %arg9[%58, %c0_16] : memref<64x1024xf32, #tpu.memory_space<vmem>>, vector<8x1024xf32>
    %cst_17 = arith.constant dense<0.000000e+00> : vector<8x1024xf32>
    %60 = tpu.matmul %50, %7, %cst_17 {dimension_numbers = #tpu.dot_dimension_numbers<[1], [0], [0], [1], [0, 0, 1, 1], [], []>} : vector<8x128xf32>, vector<128x1024xf32>, vector<8x1024xf32> -> vector<8x1024xf32>
    %61 = arith.addf %59, %60 : vector<8x1024xf32>
    %62 = vector.extract_strided_slice %61 {offsets = [0, 0], sizes = [8, 768], strides = [1, 1]} : vector<8x1024xf32> to vector<8x768xf32>
    %63 = arith.negf %62 : vector<8x768xf32>
    %64 = math.exp %63 : vector<8x768xf32>
    %cst_18 = arith.constant 1.000000e+00 : f32
    %65 = vector.broadcast %cst_18 : f32 to vector<8x768xf32>
    %66 = arith.addf %65, %64 : vector<8x768xf32>
    %67 = arith.divf %65, %66 : vector<8x768xf32>
    %68 = vector.extract_strided_slice %61 {offsets = [0, 768], sizes = [8, 256], strides = [1, 1]} : vector<8x1024xf32> to vector<8x256xf32>
    %69 = math.tanh %68 : vector<8x256xf32>
    %70 = vector.extract_strided_slice %67 {offsets = [0, 0], sizes = [8, 128], strides = [1, 1]} : vector<8x768xf32> to vector<8x128xf32>
    %71 = vector.extract_strided_slice %67 {offsets = [0, 128], sizes = [8, 128], strides = [1, 1]} : vector<8x768xf32> to vector<8x128xf32>
    %72 = vector.extract_strided_slice %67 {offsets = [0, 256], sizes = [8, 128], strides = [1, 1]} : vector<8x768xf32> to vector<8x128xf32>
    %73 = vector.extract_strided_slice %67 {offsets = [0, 384], sizes = [8, 128], strides = [1, 1]} : vector<8x768xf32> to vector<8x128xf32>
    %74 = vector.extract_strided_slice %67 {offsets = [0, 512], sizes = [8, 128], strides = [1, 1]} : vector<8x768xf32> to vector<8x128xf32>
    %75 = vector.extract_strided_slice %67 {offsets = [0, 640], sizes = [8, 128], strides = [1, 1]} : vector<8x768xf32> to vector<8x128xf32>
    %76 = vector.extract_strided_slice %69 {offsets = [0, 0], sizes = [8, 128], strides = [1, 1]} : vector<8x256xf32> to vector<8x128xf32>
    %77 = vector.extract_strided_slice %69 {offsets = [0, 128], sizes = [8, 128], strides = [1, 1]} : vector<8x256xf32> to vector<8x128xf32>
    %78 = arith.mulf %71, %55 : vector<8x128xf32>
    %79 = arith.mulf %70, %76 : vector<8x128xf32>
    %80 = arith.addf %78, %79 : vector<8x128xf32>
    %81 = arith.mulf %74, %55 : vector<8x128xf32>
    %82 = arith.mulf %73, %77 : vector<8x128xf32>
    %83 = arith.addf %81, %82 : vector<8x128xf32>
    %84 = math.tanh %80 : vector<8x128xf32>
    %85 = arith.mulf %72, %84 : vector<8x128xf32>
    %86 = math.tanh %83 : vector<8x128xf32>
    %87 = arith.mulf %75, %86 : vector<8x128xf32>
    %88 = arith.index_cast %c1_i32 : i32 to index
    %c0_19 = arith.constant 0 : index
    %89 = memref.load %arg0[%88, %c0_19] : memref<8x2xf32, #tpu.memory_space<smem>>
    %90 = arith.index_cast %c1_i32 : i32 to index
    %c1_20 = arith.constant 1 : index
    %91 = memref.load %arg0[%90, %c1_20] : memref<8x2xf32, #tpu.memory_space<smem>>
    %92 = vector.broadcast %89 : f32 to vector<8x128xf32>
    %93 = arith.mulf %92, %85 : vector<8x128xf32>
    %94 = vector.broadcast %91 : f32 to vector<8x128xf32>
    %95 = arith.mulf %94, %87 : vector<8x128xf32>
    %96 = arith.addf %93, %95 : vector<8x128xf32>
    %97 = vector.broadcast %89 : f32 to vector<8x128xf32>
    %98 = arith.mulf %97, %80 : vector<8x128xf32>
    %99 = vector.broadcast %91 : f32 to vector<8x128xf32>
    %100 = arith.mulf %99, %83 : vector<8x128xf32>
    %101 = arith.addf %98, %100 : vector<8x128xf32>
    %c2_i32 = arith.constant 2 : i32
    %c8_i32_21 = arith.constant 8 : i32
    %102 = arith.muli %c2_i32, %c8_i32_21 : i32
    %103 = tpu.assume_multiple %102, 8 : i32
    %104 = arith.index_cast %103 : i32 to index
    %c0_22 = arith.constant 0 : index
    %105 = vector.load %arg9[%104, %c0_22] : memref<64x1024xf32, #tpu.memory_space<vmem>>, vector<8x1024xf32>
    %cst_23 = arith.constant dense<0.000000e+00> : vector<8x1024xf32>
    %106 = tpu.matmul %96, %7, %cst_23 {dimension_numbers = #tpu.dot_dimension_numbers<[1], [0], [0], [1], [0, 0, 1, 1], [], []>} : vector<8x128xf32>, vector<128x1024xf32>, vector<8x1024xf32> -> vector<8x1024xf32>
    %107 = arith.addf %105, %106 : vector<8x1024xf32>
    %108 = vector.extract_strided_slice %107 {offsets = [0, 0], sizes = [8, 768], strides = [1, 1]} : vector<8x1024xf32> to vector<8x768xf32>
    %109 = arith.negf %108 : vector<8x768xf32>
    %110 = math.exp %109 : vector<8x768xf32>
    %cst_24 = arith.constant 1.000000e+00 : f32
    %111 = vector.broadcast %cst_24 : f32 to vector<8x768xf32>
    %112 = arith.addf %111, %110 : vector<8x768xf32>
    %113 = arith.divf %111, %112 : vector<8x768xf32>
    %114 = vector.extract_strided_slice %107 {offsets = [0, 768], sizes = [8, 256], strides = [1, 1]} : vector<8x1024xf32> to vector<8x256xf32>
    %115 = math.tanh %114 : vector<8x256xf32>
    %116 = vector.extract_strided_slice %113 {offsets = [0, 0], sizes = [8, 128], strides = [1, 1]} : vector<8x768xf32> to vector<8x128xf32>
    %117 = vector.extract_strided_slice %113 {offsets = [0, 128], sizes = [8, 128], strides = [1, 1]} : vector<8x768xf32> to vector<8x128xf32>
    %118 = vector.extract_strided_slice %113 {offsets = [0, 256], sizes = [8, 128], strides = [1, 1]} : vector<8x768xf32> to vector<8x128xf32>
    %119 = vector.extract_strided_slice %113 {offsets = [0, 384], sizes = [8, 128], strides = [1, 1]} : vector<8x768xf32> to vector<8x128xf32>
    %120 = vector.extract_strided_slice %113 {offsets = [0, 512], sizes = [8, 128], strides = [1, 1]} : vector<8x768xf32> to vector<8x128xf32>
    %121 = vector.extract_strided_slice %113 {offsets = [0, 640], sizes = [8, 128], strides = [1, 1]} : vector<8x768xf32> to vector<8x128xf32>
    %122 = vector.extract_strided_slice %115 {offsets = [0, 0], sizes = [8, 128], strides = [1, 1]} : vector<8x256xf32> to vector<8x128xf32>
    %123 = vector.extract_strided_slice %115 {offsets = [0, 128], sizes = [8, 128], strides = [1, 1]} : vector<8x256xf32> to vector<8x128xf32>
    %124 = arith.mulf %117, %101 : vector<8x128xf32>
    %125 = arith.mulf %116, %122 : vector<8x128xf32>
    %126 = arith.addf %124, %125 : vector<8x128xf32>
    %127 = arith.mulf %120, %101 : vector<8x128xf32>
    %128 = arith.mulf %119, %123 : vector<8x128xf32>
    %129 = arith.addf %127, %128 : vector<8x128xf32>
    %130 = math.tanh %126 : vector<8x128xf32>
    %131 = arith.mulf %118, %130 : vector<8x128xf32>
    %132 = math.tanh %129 : vector<8x128xf32>
    %133 = arith.mulf %121, %132 : vector<8x128xf32>
    %134 = arith.index_cast %c2_i32 : i32 to index
    %c0_25 = arith.constant 0 : index
    %135 = memref.load %arg0[%134, %c0_25] : memref<8x2xf32, #tpu.memory_space<smem>>
    %136 = arith.index_cast %c2_i32 : i32 to index
    %c1_26 = arith.constant 1 : index
    %137 = memref.load %arg0[%136, %c1_26] : memref<8x2xf32, #tpu.memory_space<smem>>
    %138 = vector.broadcast %135 : f32 to vector<8x128xf32>
    %139 = arith.mulf %138, %131 : vector<8x128xf32>
    %140 = vector.broadcast %137 : f32 to vector<8x128xf32>
    %141 = arith.mulf %140, %133 : vector<8x128xf32>
    %142 = arith.addf %139, %141 : vector<8x128xf32>
    %143 = vector.broadcast %135 : f32 to vector<8x128xf32>
    %144 = arith.mulf %143, %126 : vector<8x128xf32>
    %145 = vector.broadcast %137 : f32 to vector<8x128xf32>
    %146 = arith.mulf %145, %129 : vector<8x128xf32>
    %147 = arith.addf %144, %146 : vector<8x128xf32>
    %c3_i32 = arith.constant 3 : i32
    %c8_i32_27 = arith.constant 8 : i32
    %148 = arith.muli %c3_i32, %c8_i32_27 : i32
    %149 = tpu.assume_multiple %148, 8 : i32
    %150 = arith.index_cast %149 : i32 to index
    %c0_28 = arith.constant 0 : index
    %151 = vector.load %arg9[%150, %c0_28] : memref<64x1024xf32, #tpu.memory_space<vmem>>, vector<8x1024xf32>
    %cst_29 = arith.constant dense<0.000000e+00> : vector<8x1024xf32>
    %152 = tpu.matmul %142, %7, %cst_29 {dimension_numbers = #tpu.dot_dimension_numbers<[1], [0], [0], [1], [0, 0, 1, 1], [], []>} : vector<8x128xf32>, vector<128x1024xf32>, vector<8x1024xf32> -> vector<8x1024xf32>
    %153 = arith.addf %151, %152 : vector<8x1024xf32>
    %154 = vector.extract_strided_slice %153 {offsets = [0, 0], sizes = [8, 768], strides = [1, 1]} : vector<8x1024xf32> to vector<8x768xf32>
    %155 = arith.negf %154 : vector<8x768xf32>
    %156 = math.exp %155 : vector<8x768xf32>
    %cst_30 = arith.constant 1.000000e+00 : f32
    %157 = vector.broadcast %cst_30 : f32 to vector<8x768xf32>
    %158 = arith.addf %157, %156 : vector<8x768xf32>
    %159 = arith.divf %157, %158 : vector<8x768xf32>
    %160 = vector.extract_strided_slice %153 {offsets = [0, 768], sizes = [8, 256], strides = [1, 1]} : vector<8x1024xf32> to vector<8x256xf32>
    %161 = math.tanh %160 : vector<8x256xf32>
    %162 = vector.extract_strided_slice %159 {offsets = [0, 0], sizes = [8, 128], strides = [1, 1]} : vector<8x768xf32> to vector<8x128xf32>
    %163 = vector.extract_strided_slice %159 {offsets = [0, 128], sizes = [8, 128], strides = [1, 1]} : vector<8x768xf32> to vector<8x128xf32>
    %164 = vector.extract_strided_slice %159 {offsets = [0, 256], sizes = [8, 128], strides = [1, 1]} : vector<8x768xf32> to vector<8x128xf32>
    %165 = vector.extract_strided_slice %159 {offsets = [0, 384], sizes = [8, 128], strides = [1, 1]} : vector<8x768xf32> to vector<8x128xf32>
    %166 = vector.extract_strided_slice %159 {offsets = [0, 512], sizes = [8, 128], strides = [1, 1]} : vector<8x768xf32> to vector<8x128xf32>
    %167 = vector.extract_strided_slice %159 {offsets = [0, 640], sizes = [8, 128], strides = [1, 1]} : vector<8x768xf32> to vector<8x128xf32>
    %168 = vector.extract_strided_slice %161 {offsets = [0, 0], sizes = [8, 128], strides = [1, 1]} : vector<8x256xf32> to vector<8x128xf32>
    %169 = vector.extract_strided_slice %161 {offsets = [0, 128], sizes = [8, 128], strides = [1, 1]} : vector<8x256xf32> to vector<8x128xf32>
    %170 = arith.mulf %163, %147 : vector<8x128xf32>
    %171 = arith.mulf %162, %168 : vector<8x128xf32>
    %172 = arith.addf %170, %171 : vector<8x128xf32>
    %173 = arith.mulf %166, %147 : vector<8x128xf32>
    %174 = arith.mulf %165, %169 : vector<8x128xf32>
    %175 = arith.addf %173, %174 : vector<8x128xf32>
    %176 = math.tanh %172 : vector<8x128xf32>
    %177 = arith.mulf %164, %176 : vector<8x128xf32>
    %178 = math.tanh %175 : vector<8x128xf32>
    %179 = arith.mulf %167, %178 : vector<8x128xf32>
    %180 = arith.index_cast %c3_i32 : i32 to index
    %c0_31 = arith.constant 0 : index
    %181 = memref.load %arg0[%180, %c0_31] : memref<8x2xf32, #tpu.memory_space<smem>>
    %182 = arith.index_cast %c3_i32 : i32 to index
    %c1_32 = arith.constant 1 : index
    %183 = memref.load %arg0[%182, %c1_32] : memref<8x2xf32, #tpu.memory_space<smem>>
    %184 = vector.broadcast %181 : f32 to vector<8x128xf32>
    %185 = arith.mulf %184, %177 : vector<8x128xf32>
    %186 = vector.broadcast %183 : f32 to vector<8x128xf32>
    %187 = arith.mulf %186, %179 : vector<8x128xf32>
    %188 = arith.addf %185, %187 : vector<8x128xf32>
    %189 = vector.broadcast %181 : f32 to vector<8x128xf32>
    %190 = arith.mulf %189, %172 : vector<8x128xf32>
    %191 = vector.broadcast %183 : f32 to vector<8x128xf32>
    %192 = arith.mulf %191, %175 : vector<8x128xf32>
    %193 = arith.addf %190, %192 : vector<8x128xf32>
    %c4_i32 = arith.constant 4 : i32
    %c8_i32_33 = arith.constant 8 : i32
    %194 = arith.muli %c4_i32, %c8_i32_33 : i32
    %195 = tpu.assume_multiple %194, 8 : i32
    %196 = arith.index_cast %195 : i32 to index
    %c0_34 = arith.constant 0 : index
    %197 = vector.load %arg9[%196, %c0_34] : memref<64x1024xf32, #tpu.memory_space<vmem>>, vector<8x1024xf32>
    %cst_35 = arith.constant dense<0.000000e+00> : vector<8x1024xf32>
    %198 = tpu.matmul %188, %7, %cst_35 {dimension_numbers = #tpu.dot_dimension_numbers<[1], [0], [0], [1], [0, 0, 1, 1], [], []>} : vector<8x128xf32>, vector<128x1024xf32>, vector<8x1024xf32> -> vector<8x1024xf32>
    %199 = arith.addf %197, %198 : vector<8x1024xf32>
    %200 = vector.extract_strided_slice %199 {offsets = [0, 0], sizes = [8, 768], strides = [1, 1]} : vector<8x1024xf32> to vector<8x768xf32>
    %201 = arith.negf %200 : vector<8x768xf32>
    %202 = math.exp %201 : vector<8x768xf32>
    %cst_36 = arith.constant 1.000000e+00 : f32
    %203 = vector.broadcast %cst_36 : f32 to vector<8x768xf32>
    %204 = arith.addf %203, %202 : vector<8x768xf32>
    %205 = arith.divf %203, %204 : vector<8x768xf32>
    %206 = vector.extract_strided_slice %199 {offsets = [0, 768], sizes = [8, 256], strides = [1, 1]} : vector<8x1024xf32> to vector<8x256xf32>
    %207 = math.tanh %206 : vector<8x256xf32>
    %208 = vector.extract_strided_slice %205 {offsets = [0, 0], sizes = [8, 128], strides = [1, 1]} : vector<8x768xf32> to vector<8x128xf32>
    %209 = vector.extract_strided_slice %205 {offsets = [0, 128], sizes = [8, 128], strides = [1, 1]} : vector<8x768xf32> to vector<8x128xf32>
    %210 = vector.extract_strided_slice %205 {offsets = [0, 256], sizes = [8, 128], strides = [1, 1]} : vector<8x768xf32> to vector<8x128xf32>
    %211 = vector.extract_strided_slice %205 {offsets = [0, 384], sizes = [8, 128], strides = [1, 1]} : vector<8x768xf32> to vector<8x128xf32>
    %212 = vector.extract_strided_slice %205 {offsets = [0, 512], sizes = [8, 128], strides = [1, 1]} : vector<8x768xf32> to vector<8x128xf32>
    %213 = vector.extract_strided_slice %205 {offsets = [0, 640], sizes = [8, 128], strides = [1, 1]} : vector<8x768xf32> to vector<8x128xf32>
    %214 = vector.extract_strided_slice %207 {offsets = [0, 0], sizes = [8, 128], strides = [1, 1]} : vector<8x256xf32> to vector<8x128xf32>
    %215 = vector.extract_strided_slice %207 {offsets = [0, 128], sizes = [8, 128], strides = [1, 1]} : vector<8x256xf32> to vector<8x128xf32>
    %216 = arith.mulf %209, %193 : vector<8x128xf32>
    %217 = arith.mulf %208, %214 : vector<8x128xf32>
    %218 = arith.addf %216, %217 : vector<8x128xf32>
    %219 = arith.mulf %212, %193 : vector<8x128xf32>
    %220 = arith.mulf %211, %215 : vector<8x128xf32>
    %221 = arith.addf %219, %220 : vector<8x128xf32>
    %222 = math.tanh %218 : vector<8x128xf32>
    %223 = arith.mulf %210, %222 : vector<8x128xf32>
    %224 = math.tanh %221 : vector<8x128xf32>
    %225 = arith.mulf %213, %224 : vector<8x128xf32>
    %226 = arith.index_cast %c4_i32 : i32 to index
    %c0_37 = arith.constant 0 : index
    %227 = memref.load %arg0[%226, %c0_37] : memref<8x2xf32, #tpu.memory_space<smem>>
    %228 = arith.index_cast %c4_i32 : i32 to index
    %c1_38 = arith.constant 1 : index
    %229 = memref.load %arg0[%228, %c1_38] : memref<8x2xf32, #tpu.memory_space<smem>>
    %230 = vector.broadcast %227 : f32 to vector<8x128xf32>
    %231 = arith.mulf %230, %223 : vector<8x128xf32>
    %232 = vector.broadcast %229 : f32 to vector<8x128xf32>
    %233 = arith.mulf %232, %225 : vector<8x128xf32>
    %234 = arith.addf %231, %233 : vector<8x128xf32>
    %235 = vector.broadcast %227 : f32 to vector<8x128xf32>
    %236 = arith.mulf %235, %218 : vector<8x128xf32>
    %237 = vector.broadcast %229 : f32 to vector<8x128xf32>
    %238 = arith.mulf %237, %221 : vector<8x128xf32>
    %239 = arith.addf %236, %238 : vector<8x128xf32>
    %c5_i32 = arith.constant 5 : i32
    %c8_i32_39 = arith.constant 8 : i32
    %240 = arith.muli %c5_i32, %c8_i32_39 : i32
    %241 = tpu.assume_multiple %240, 8 : i32
    %242 = arith.index_cast %241 : i32 to index
    %c0_40 = arith.constant 0 : index
    %243 = vector.load %arg9[%242, %c0_40] : memref<64x1024xf32, #tpu.memory_space<vmem>>, vector<8x1024xf32>
    %cst_41 = arith.constant dense<0.000000e+00> : vector<8x1024xf32>
    %244 = tpu.matmul %234, %7, %cst_41 {dimension_numbers = #tpu.dot_dimension_numbers<[1], [0], [0], [1], [0, 0, 1, 1], [], []>} : vector<8x128xf32>, vector<128x1024xf32>, vector<8x1024xf32> -> vector<8x1024xf32>
    %245 = arith.addf %243, %244 : vector<8x1024xf32>
    %246 = vector.extract_strided_slice %245 {offsets = [0, 0], sizes = [8, 768], strides = [1, 1]} : vector<8x1024xf32> to vector<8x768xf32>
    %247 = arith.negf %246 : vector<8x768xf32>
    %248 = math.exp %247 : vector<8x768xf32>
    %cst_42 = arith.constant 1.000000e+00 : f32
    %249 = vector.broadcast %cst_42 : f32 to vector<8x768xf32>
    %250 = arith.addf %249, %248 : vector<8x768xf32>
    %251 = arith.divf %249, %250 : vector<8x768xf32>
    %252 = vector.extract_strided_slice %245 {offsets = [0, 768], sizes = [8, 256], strides = [1, 1]} : vector<8x1024xf32> to vector<8x256xf32>
    %253 = math.tanh %252 : vector<8x256xf32>
    %254 = vector.extract_strided_slice %251 {offsets = [0, 0], sizes = [8, 128], strides = [1, 1]} : vector<8x768xf32> to vector<8x128xf32>
    %255 = vector.extract_strided_slice %251 {offsets = [0, 128], sizes = [8, 128], strides = [1, 1]} : vector<8x768xf32> to vector<8x128xf32>
    %256 = vector.extract_strided_slice %251 {offsets = [0, 256], sizes = [8, 128], strides = [1, 1]} : vector<8x768xf32> to vector<8x128xf32>
    %257 = vector.extract_strided_slice %251 {offsets = [0, 384], sizes = [8, 128], strides = [1, 1]} : vector<8x768xf32> to vector<8x128xf32>
    %258 = vector.extract_strided_slice %251 {offsets = [0, 512], sizes = [8, 128], strides = [1, 1]} : vector<8x768xf32> to vector<8x128xf32>
    %259 = vector.extract_strided_slice %251 {offsets = [0, 640], sizes = [8, 128], strides = [1, 1]} : vector<8x768xf32> to vector<8x128xf32>
    %260 = vector.extract_strided_slice %253 {offsets = [0, 0], sizes = [8, 128], strides = [1, 1]} : vector<8x256xf32> to vector<8x128xf32>
    %261 = vector.extract_strided_slice %253 {offsets = [0, 128], sizes = [8, 128], strides = [1, 1]} : vector<8x256xf32> to vector<8x128xf32>
    %262 = arith.mulf %255, %239 : vector<8x128xf32>
    %263 = arith.mulf %254, %260 : vector<8x128xf32>
    %264 = arith.addf %262, %263 : vector<8x128xf32>
    %265 = arith.mulf %258, %239 : vector<8x128xf32>
    %266 = arith.mulf %257, %261 : vector<8x128xf32>
    %267 = arith.addf %265, %266 : vector<8x128xf32>
    %268 = math.tanh %264 : vector<8x128xf32>
    %269 = arith.mulf %256, %268 : vector<8x128xf32>
    %270 = math.tanh %267 : vector<8x128xf32>
    %271 = arith.mulf %259, %270 : vector<8x128xf32>
    %272 = arith.index_cast %c5_i32 : i32 to index
    %c0_43 = arith.constant 0 : index
    %273 = memref.load %arg0[%272, %c0_43] : memref<8x2xf32, #tpu.memory_space<smem>>
    %274 = arith.index_cast %c5_i32 : i32 to index
    %c1_44 = arith.constant 1 : index
    %275 = memref.load %arg0[%274, %c1_44] : memref<8x2xf32, #tpu.memory_space<smem>>
    %276 = vector.broadcast %273 : f32 to vector<8x128xf32>
    %277 = arith.mulf %276, %269 : vector<8x128xf32>
    %278 = vector.broadcast %275 : f32 to vector<8x128xf32>
    %279 = arith.mulf %278, %271 : vector<8x128xf32>
    %280 = arith.addf %277, %279 : vector<8x128xf32>
    %281 = vector.broadcast %273 : f32 to vector<8x128xf32>
    %282 = arith.mulf %281, %264 : vector<8x128xf32>
    %283 = vector.broadcast %275 : f32 to vector<8x128xf32>
    %284 = arith.mulf %283, %267 : vector<8x128xf32>
    %285 = arith.addf %282, %284 : vector<8x128xf32>
    %c6_i32 = arith.constant 6 : i32
    %c8_i32_45 = arith.constant 8 : i32
    %286 = arith.muli %c6_i32, %c8_i32_45 : i32
    %287 = tpu.assume_multiple %286, 8 : i32
    %288 = arith.index_cast %287 : i32 to index
    %c0_46 = arith.constant 0 : index
    %289 = vector.load %arg9[%288, %c0_46] : memref<64x1024xf32, #tpu.memory_space<vmem>>, vector<8x1024xf32>
    %cst_47 = arith.constant dense<0.000000e+00> : vector<8x1024xf32>
    %290 = tpu.matmul %280, %7, %cst_47 {dimension_numbers = #tpu.dot_dimension_numbers<[1], [0], [0], [1], [0, 0, 1, 1], [], []>} : vector<8x128xf32>, vector<128x1024xf32>, vector<8x1024xf32> -> vector<8x1024xf32>
    %291 = arith.addf %289, %290 : vector<8x1024xf32>
    %292 = vector.extract_strided_slice %291 {offsets = [0, 0], sizes = [8, 768], strides = [1, 1]} : vector<8x1024xf32> to vector<8x768xf32>
    %293 = arith.negf %292 : vector<8x768xf32>
    %294 = math.exp %293 : vector<8x768xf32>
    %cst_48 = arith.constant 1.000000e+00 : f32
    %295 = vector.broadcast %cst_48 : f32 to vector<8x768xf32>
    %296 = arith.addf %295, %294 : vector<8x768xf32>
    %297 = arith.divf %295, %296 : vector<8x768xf32>
    %298 = vector.extract_strided_slice %291 {offsets = [0, 768], sizes = [8, 256], strides = [1, 1]} : vector<8x1024xf32> to vector<8x256xf32>
    %299 = math.tanh %298 : vector<8x256xf32>
    %300 = vector.extract_strided_slice %297 {offsets = [0, 0], sizes = [8, 128], strides = [1, 1]} : vector<8x768xf32> to vector<8x128xf32>
    %301 = vector.extract_strided_slice %297 {offsets = [0, 128], sizes = [8, 128], strides = [1, 1]} : vector<8x768xf32> to vector<8x128xf32>
    %302 = vector.extract_strided_slice %297 {offsets = [0, 256], sizes = [8, 128], strides = [1, 1]} : vector<8x768xf32> to vector<8x128xf32>
    %303 = vector.extract_strided_slice %297 {offsets = [0, 384], sizes = [8, 128], strides = [1, 1]} : vector<8x768xf32> to vector<8x128xf32>
    %304 = vector.extract_strided_slice %297 {offsets = [0, 512], sizes = [8, 128], strides = [1, 1]} : vector<8x768xf32> to vector<8x128xf32>
    %305 = vector.extract_strided_slice %297 {offsets = [0, 640], sizes = [8, 128], strides = [1, 1]} : vector<8x768xf32> to vector<8x128xf32>
    %306 = vector.extract_strided_slice %299 {offsets = [0, 0], sizes = [8, 128], strides = [1, 1]} : vector<8x256xf32> to vector<8x128xf32>
    %307 = vector.extract_strided_slice %299 {offsets = [0, 128], sizes = [8, 128], strides = [1, 1]} : vector<8x256xf32> to vector<8x128xf32>
    %308 = arith.mulf %301, %285 : vector<8x128xf32>
    %309 = arith.mulf %300, %306 : vector<8x128xf32>
    %310 = arith.addf %308, %309 : vector<8x128xf32>
    %311 = arith.mulf %304, %285 : vector<8x128xf32>
    %312 = arith.mulf %303, %307 : vector<8x128xf32>
    %313 = arith.addf %311, %312 : vector<8x128xf32>
    %314 = math.tanh %310 : vector<8x128xf32>
    %315 = arith.mulf %302, %314 : vector<8x128xf32>
    %316 = math.tanh %313 : vector<8x128xf32>
    %317 = arith.mulf %305, %316 : vector<8x128xf32>
    %318 = arith.index_cast %c6_i32 : i32 to index
    %c0_49 = arith.constant 0 : index
    %319 = memref.load %arg0[%318, %c0_49] : memref<8x2xf32, #tpu.memory_space<smem>>
    %320 = arith.index_cast %c6_i32 : i32 to index
    %c1_50 = arith.constant 1 : index
    %321 = memref.load %arg0[%320, %c1_50] : memref<8x2xf32, #tpu.memory_space<smem>>
    %322 = vector.broadcast %319 : f32 to vector<8x128xf32>
    %323 = arith.mulf %322, %315 : vector<8x128xf32>
    %324 = vector.broadcast %321 : f32 to vector<8x128xf32>
    %325 = arith.mulf %324, %317 : vector<8x128xf32>
    %326 = arith.addf %323, %325 : vector<8x128xf32>
    %327 = vector.broadcast %319 : f32 to vector<8x128xf32>
    %328 = arith.mulf %327, %310 : vector<8x128xf32>
    %329 = vector.broadcast %321 : f32 to vector<8x128xf32>
    %330 = arith.mulf %329, %313 : vector<8x128xf32>
    %331 = arith.addf %328, %330 : vector<8x128xf32>
    %c7_i32 = arith.constant 7 : i32
    %c8_i32_51 = arith.constant 8 : i32
    %332 = arith.muli %c7_i32, %c8_i32_51 : i32
    %333 = tpu.assume_multiple %332, 8 : i32
    %334 = arith.index_cast %333 : i32 to index
    %c0_52 = arith.constant 0 : index
    %335 = vector.load %arg9[%334, %c0_52] : memref<64x1024xf32, #tpu.memory_space<vmem>>, vector<8x1024xf32>
    %cst_53 = arith.constant dense<0.000000e+00> : vector<8x1024xf32>
    %336 = tpu.matmul %326, %7, %cst_53 {dimension_numbers = #tpu.dot_dimension_numbers<[1], [0], [0], [1], [0, 0, 1, 1], [], []>} : vector<8x128xf32>, vector<128x1024xf32>, vector<8x1024xf32> -> vector<8x1024xf32>
    %337 = arith.addf %335, %336 : vector<8x1024xf32>
    %338 = vector.extract_strided_slice %337 {offsets = [0, 0], sizes = [8, 768], strides = [1, 1]} : vector<8x1024xf32> to vector<8x768xf32>
    %339 = arith.negf %338 : vector<8x768xf32>
    %340 = math.exp %339 : vector<8x768xf32>
    %cst_54 = arith.constant 1.000000e+00 : f32
    %341 = vector.broadcast %cst_54 : f32 to vector<8x768xf32>
    %342 = arith.addf %341, %340 : vector<8x768xf32>
    %343 = arith.divf %341, %342 : vector<8x768xf32>
    %344 = vector.extract_strided_slice %337 {offsets = [0, 768], sizes = [8, 256], strides = [1, 1]} : vector<8x1024xf32> to vector<8x256xf32>
    %345 = math.tanh %344 : vector<8x256xf32>
    %346 = vector.extract_strided_slice %343 {offsets = [0, 0], sizes = [8, 128], strides = [1, 1]} : vector<8x768xf32> to vector<8x128xf32>
    %347 = vector.extract_strided_slice %343 {offsets = [0, 128], sizes = [8, 128], strides = [1, 1]} : vector<8x768xf32> to vector<8x128xf32>
    %348 = vector.extract_strided_slice %343 {offsets = [0, 256], sizes = [8, 128], strides = [1, 1]} : vector<8x768xf32> to vector<8x128xf32>
    %349 = vector.extract_strided_slice %343 {offsets = [0, 384], sizes = [8, 128], strides = [1, 1]} : vector<8x768xf32> to vector<8x128xf32>
    %350 = vector.extract_strided_slice %343 {offsets = [0, 512], sizes = [8, 128], strides = [1, 1]} : vector<8x768xf32> to vector<8x128xf32>
    %351 = vector.extract_strided_slice %343 {offsets = [0, 640], sizes = [8, 128], strides = [1, 1]} : vector<8x768xf32> to vector<8x128xf32>
    %352 = vector.extract_strided_slice %345 {offsets = [0, 0], sizes = [8, 128], strides = [1, 1]} : vector<8x256xf32> to vector<8x128xf32>
    %353 = vector.extract_strided_slice %345 {offsets = [0, 128], sizes = [8, 128], strides = [1, 1]} : vector<8x256xf32> to vector<8x128xf32>
    %354 = arith.mulf %347, %331 : vector<8x128xf32>
    %355 = arith.mulf %346, %352 : vector<8x128xf32>
    %356 = arith.addf %354, %355 : vector<8x128xf32>
    %357 = arith.mulf %350, %331 : vector<8x128xf32>
    %358 = arith.mulf %349, %353 : vector<8x128xf32>
    %359 = arith.addf %357, %358 : vector<8x128xf32>
    %360 = math.tanh %356 : vector<8x128xf32>
    %361 = arith.mulf %348, %360 : vector<8x128xf32>
    %362 = math.tanh %359 : vector<8x128xf32>
    %363 = arith.mulf %351, %362 : vector<8x128xf32>
    %364 = arith.index_cast %c7_i32 : i32 to index
    %c0_55 = arith.constant 0 : index
    %365 = memref.load %arg0[%364, %c0_55] : memref<8x2xf32, #tpu.memory_space<smem>>
    %366 = arith.index_cast %c7_i32 : i32 to index
    %c1_56 = arith.constant 1 : index
    %367 = memref.load %arg0[%366, %c1_56] : memref<8x2xf32, #tpu.memory_space<smem>>
    %368 = vector.broadcast %365 : f32 to vector<8x128xf32>
    %369 = arith.mulf %368, %361 : vector<8x128xf32>
    %370 = vector.broadcast %367 : f32 to vector<8x128xf32>
    %371 = arith.mulf %370, %363 : vector<8x128xf32>
    %372 = arith.addf %369, %371 : vector<8x128xf32>
    %373 = vector.broadcast %365 : f32 to vector<8x128xf32>
    %374 = arith.mulf %373, %356 : vector<8x128xf32>
    %375 = vector.broadcast %367 : f32 to vector<8x128xf32>
    %376 = arith.mulf %375, %359 : vector<8x128xf32>
    %377 = arith.addf %374, %376 : vector<8x128xf32>
    %c8_i32_57 = arith.constant 8 : i32
    %c0_58 = arith.constant 0 : index
    %c0_59 = arith.constant 0 : index
    %378 = vector.load %arg5[%c0_58, %c0_59] : memref<128x128xf32, #tpu.memory_space<vmem>>, vector<128x128xf32>
    %cst_60 = arith.constant dense<0.000000e+00> : vector<8x128xf32>
    %379 = tpu.matmul %372, %378, %cst_60 {dimension_numbers = #tpu.dot_dimension_numbers<[1], [0], [0], [1], [0, 0, 1, 1], [], []>} : vector<8x128xf32>, vector<128x128xf32>, vector<8x128xf32> -> vector<8x128xf32>
    %c0_61 = arith.constant 0 : index
    %c0_62 = arith.constant 0 : index
    %380 = vector.load %arg6[%c0_61, %c0_62] : memref<1x128xf32, #tpu.memory_space<vmem>>, vector<1x128xf32>
    %381 = vector.broadcast %380 : vector<1x128xf32> to vector<8x128xf32>
    %382 = arith.addf %379, %381 : vector<8x128xf32>
    %c0_63 = arith.constant 0 : index
    %c0_64 = arith.constant 0 : index
    %383 = vector.load %arg7[%c0_63, %c0_64] : memref<8x128xf32, #tpu.memory_space<vmem>>, vector<8x128xf32>
    tpu.vector_store %arg7[%c0_63, %c0_64], %382 {strides = array<i32>} : memref<8x128xf32, #tpu.memory_space<vmem>>, vector<8x128xf32>,
    %c0_65 = arith.constant 0 : index
    %c0_66 = arith.constant 0 : index
    %384 = vector.load %arg8[%c0_65, %c0_66] : memref<8x128xf32, #tpu.memory_space<vmem>>, vector<8x128xf32>
    tpu.vector_store %arg8[%c0_65, %c0_66], %377 {strides = array<i32>} : memref<8x128xf32, #tpu.memory_space<vmem>>, vector<8x128xf32>,
    return
  }
}

</mosaic_0001>

<bundles_post_ra>
// kernel: dialogue_infer.1
= control target key start
LH: loop header
LB: loop body
LE: loop exit
PB: predicated region body
PF: predicated region fallthrough
CT: control target
= control target key end

     0   :  { %14 = vsyncpa [#allocation5], 0  ;;  %s7354_s0 = inlined_call_operand.vmem [shape: f32[8,2], index: 0, kind: input, shape index: {}]   ;;  %s7355_s1 = inlined_call_operand.vmem [shape: f32[64,16], index: 1, kind: input, shape index: {}]   ;;  %s7356_s2 = inlined_call_operand.hbm [shape: f32[16,1024], index: 2, kind: input, shape index: {}]   ;;  %s7357_s3 = inlined_call_operand.hbm [shape: f32[128,1024], index: 3, kind: input, shape index: {}]   ;;  %s7358_s4 = inlined_call_operand.vmem [shape: f32[1,1024], index: 4, kind: input, shape index: {}]   ;;  %s7359_s5 = inlined_call_operand.hbm [shape: f32[128,128], index: 5, kind: input, shape index: {}]   ;;  %s7360_s6 = inlined_call_operand.vmem [shape: f32[1,128], index: 6, kind: input, shape index: {}]   ;;  %s7361_s7 = inlined_call_operand.vmem [shape: f32[8,128], index: 7, kind: output, shape index: {0}]   ;;  %s7362_s8 = inlined_call_operand.vmem [shape: f32[8,128], index: 8, kind: output, shape index: {1}]  }
   0x1   :  { %15 = vsyncpa [#allocation4], 0 }
   0x2   :  { %16 = vsyncpa [#allocation8], 0  ;;  %s45_s29 = sshll.u32 %s7357_s3, 4  ;;  %s4128_s30 = smov [#allocation7]   ;;  %s46_s29 = int_to_ptr.hbm [resolvable:$true] %s45_s29 }
   0x3   :  { %s47_s9 = sshll.u32 %s4128_s30, 4  ;;  %s22_s12 = sshll.u32 %s7354_s0, 4  ;;  %s48_s9 = int_to_ptr.vmem [resolvable:$true] %s47_s9  ;;  %s23_s12 = int_to_ptr.vmem [resolvable:$true] %s22_s12 }
   0x4   :  { %s4129_s13 = smov 1024   ;;  %s4130_s14 = smov 64  }
   0x5   :  { %53 = dma.hbm_to_vmem [thread:$0]  %s46_s29, 16384, %s48_s9, [#allocation8], %s4129_s13, %s4129_s13, %s4130_s14  }
   0x6   :  { %s4131_s15 = smov [#allocation3]   ;;  %s32_s18 = sshll.u32 %s7356_s2, 4  ;;  %s33_s18 = int_to_ptr.hbm [resolvable:$true] %s32_s18 }
   0x7   :  { %25 = dma.vmem_to_smem %s23_s12, 128, %s4131_s15, [#allocation5]  }
   0x8   :  { %s4132_s3 = smov [#allocation6]   ;;  %s60_s22 = sshll.u32 %s7359_s5, 4  ;;  %s61_s22 = int_to_ptr.hbm [resolvable:$true] %s60_s22 }
   0x9   :  { %s34_s19 = sshll.u32 %s4132_s3, 4  ;;  %s4133_s0 = smov [#allocation9]   ;;  %s35_s19 = int_to_ptr.vmem [resolvable:$true] %s34_s19 }
   0xa   :  { %40 = dma.hbm_to_vmem [thread:$0]  %s33_s18, 2048, %s35_s19, [#allocation4], %s4129_s13, %s4129_s13, %s4130_s14  }
   0xb   :  { %s62_s23 = sshll.u32 %s4133_s0, 4  ;;  %s4134_s24 = smov 128   ;;  %s63_s23 = int_to_ptr.vmem [resolvable:$true] %s62_s23 }
   0xc   :  { %s4135_s25 = smov 8  }
   0xd   :  { %68 = dma.hbm_to_vmem [thread:$0]  %s61_s22, 2048, %s63_s23, [#allocation8], %s4134_s24, %s4134_s24, %s4135_s25  }
   0xe   :  { %4122 = dma.done.wait [#allocation5], 128  }
   0xf   :  { %4123 = vsyncadd [#allocation5], 4294967168 }
  0x10   :  { %4124 = dma.done.wait [#allocation4], 2048  }
  0x11   :  { %4125 = vsyncadd [#allocation4], 4294965248 }
  0x12   :  { %4126 = dma.done.wait [#allocation8], 18432  }
  0x13   :  { %4127 = vsyncadd [#allocation8], 4294948864 }
  0x14   :  { %87 = sfence }
  0x15   :  { %v104_v0 = vld [vmem:[#allocation6 + $0x40] sm:$0xff]  ;;  %vm130_vm0 = vcmask 130048   ;;  %v4202_v3 = vld [vmem:[%s7355_s1 + $0x28] sm:$0xff]  ;;  %v4207_v4 = vld [vmem:[%s7355_s1 + $0x30] sm:$0xff]  ;;  %s5156_s3 = sld [smem:[#allocation3 + $0x1]] }
  0x16   :  { %v96_v1 = vld [vmem:[#allocation6] sm:$0xff]  ;;  %169 = vmatpush.msra.mxu0 %v104_v0  ;;  %3382 = vmatpush.msra.mxu1 %v104_v0  ;;  %v4212_v5 = vld [vmem:[%s7355_s1 + $0x38] sm:$0xff]  ;;  %v105_v7 = vld [vmem:[#allocation6 + $0x48] sm:$0xff]  ;;  %s5575_s19 = sld [smem:[#allocation3 + $0x80]] }
  0x17   :  { %3383 = vmatpush.msra.mxu2 %v104_v0  ;;  %3384 = vmatpush.msra.mxu3 %v104_v0  ;;  %v4197_v2 = vld [vmem:[%s7355_s1] sm:$0xff]  ;;  %v107_v6 = vld [vmem:[#allocation6 + $0x58] sm:$0xff]  ;;  %v106_v8 = vld [vmem:[#allocation6 + $0x50] sm:$0xff]  ;;  %s5618_s20 = sld [smem:[#allocation3 + $0x81]] }
  0x18   :  { %170 = vmatpush.msra.mxu0 %v96_v1  ;;  %3385 = vmatpush.msra.mxu1 %v96_v1  ;;  %v99_v9 = vld [vmem:[#allocation6 + $0x18] sm:$0xff]  ;;  %v97_v10 = vld [vmem:[#allocation6 + $0x8] sm:$0xff]  ;;  %v108_v11 = vld [vmem:[#allocation6 + $0x60] sm:$0xff]  ;;  %s5791_s21 = sld [smem:[#allocation3 + $0x100]] }
  0x19   :  { %3386 = vmatpush.msra.mxu2 %v96_v1  ;;  %3387 = vmatpush.msra.mxu3 %v96_v1  ;;  %v98_v12 = vld [vmem:[#allocation6 + $0x10] sm:$0xff]  ;;  %v111_v13 = vld [vmem:[#allocation6 + $0x78] sm:$0xff]  ;;  %v109_v14 = vld [vmem:[#allocation6 + $0x68] sm:$0xff]  ;;  %s5834_s22 = sld [smem:[#allocation3 + $0x101]] }
  0x1a   :  { %3255 = vmatmul.msk.f32.vlgmr.msra.gmra.mxu0 %vm130_vm0, %v4197_v2  ;;  %3260 = vmatmul.msk.f32.vlgmr.msra.gmra.mxu1 %vm130_vm0, %v4202_v3  ;;  %v110_v15 = vld [vmem:[#allocation6 + $0x70] sm:$0xff]  ;;  %v100_v16 = vld [vmem:[#allocation6 + $0x20] sm:$0xff]  ;;  %v4225_v17 = vld [vmem:[%s7355_s1 + $0x8] sm:$0xff]  ;;  %s6263_s0 = sld [smem:[#allocation3 + $0x180]] }
  0x1b   :  { %3261 = vmatmul.msk.f32.vlgmr.msra.gmra.mxu2 %vm130_vm0, %v4207_v4  ;;  %3262 = vmatmul.msk.f32.vlgmr.msra.gmra.mxu3 %vm130_vm0, %v4212_v5  ;;  %v103_v18 = vld [vmem:[#allocation6 + $0x38] sm:$0xff]  ;;  %v101_v19 = vld [vmem:[#allocation6 + $0x28] sm:$0xff]  ;;  %v4238_v20 = vld [vmem:[%s7355_s1 + $0x10] sm:$0xff]  ;;  %s6306_s23 = sld [smem:[#allocation3 + $0x181]] }
  0x1c   :  { %292 = vmatpush.msrb.mxu3 %v107_v6  ;;  %210 = vmatpush.msrb.mxu1 %v105_v7  ;;  %v4248_v21 = vld [vmem:[#allocation7 + $0x3c0] sm:$0xff]  ;;  %v102_v22 = vld [vmem:[#allocation6 + $0x30] sm:$0xff]  ;;  %v4259_v25 = vld [vmem:[%s7355_s1 + $0x18] sm:$0xff]  ;;  %s6479_s24 = sld [smem:[#allocation3 + $0x200]] }
  0x1d   :  { %251 = vmatpush.msrb.mxu2 %v106_v8  ;;  %333 = vmatpush.msrb.mxu0 %v108_v11  ;;  %v4250_v23 = vld [vmem:[#allocation7 + $0x380] sm:$0xff]  ;;  %v4313_v35 = vld [vmem:[#allocation7 + $0x3d8] sm:$0xff]  ;;  %v4319_v37 = vld [vmem:[#allocation7 + $0x3c8] sm:$0xff]  ;;  %s6522_s25 = sld [smem:[#allocation3 + $0x201]] }
  0x1e   :  { %293 = vmatpush.msrb.mxu3 %v99_v9  ;;  %211 = vmatpush.msrb.mxu1 %v97_v10  ;;  %v4253_v24 = vld [vmem:[#allocation7 + $0x340] sm:$0xff]  ;;  %v4317_v36 = vld [vmem:[#allocation7 + $0x398] sm:$0xff]  ;;  %v4341_v42 = vld [vmem:[#allocation7 + $0x388] sm:$0xff]  ;;  %s6951_s2 = sld [smem:[#allocation3 + $0x280]] }
  0x1f   :  { %252 = vmatpush.msrb.mxu2 %v98_v12  ;;  %334 = vmatpush.msrb.mxu0 %v100_v16  ;;  %v4266_v26 = vld [vmem:[#allocation7 + $0x300] sm:$0xff]  ;;  %v4339_v41 = vld [vmem:[#allocation7 + $0x358] sm:$0xff]  ;;  %v4345_v43 = vld [vmem:[#allocation7 + $0x3d0] sm:$0xff]  ;;  %s6994_s5 = sld [smem:[#allocation3 + $0x281]] }
  0x20   :  { %456 = vmatpush.msra.mxu3 %v111_v13  ;;  %374 = vmatpush.msra.mxu1 %v109_v14  ;;  %v4272_v27 = vld [vmem:[#allocation7 + $0x2c0] sm:$0xff]  ;;  %v4347_v44 = vld [vmem:[#allocation7 + $0x390] sm:$0xff]  ;;  %v4353_v46 = vld [vmem:[#allocation7 + $0x318] sm:$0xff]  ;;  %s7167_s26 = sld [smem:[#allocation3 + $0x300]] }
  0x21   :  { %415 = vmatpush.msra.mxu2 %v110_v15  ;;  %686 = vmatpush.msra.mxu0 %v4248_v21  ;;  %v4275_v28 = vld [vmem:[#allocation7 + $0x280] sm:$0xff]  ;;  %v4355_v47 = vld [vmem:[#allocation7 + $0x348] sm:$0xff]  ;;  %v4359_v48 = vld [vmem:[#allocation7 + $0x350] sm:$0xff]  ;;  %s7210_s27 = sld [smem:[#allocation3 + $0x301]] }
  0x22   :  { %3256 = vmatmul.msk.f32.gmra.mxu0 %vm130_vm0, %v4225_v17  ;;  %3263 = vmatmul.msk.f32.vlgmr.msrb.gmra.mxu1 %vm130_vm0, %v4197_v2  ;;  %v4281_v29 = vld [vmem:[%s7355_s1 + $0x20] sm:$0xff]  ;;  %v4373_v51 = vld [vmem:[#allocation7 + $0x308] sm:$0xff]  ;;  %v4375_v52 = vld [vmem:[#allocation7 + $0x310] sm:$0xff]  ;;  %s7314_s28 = sld [smem:[#allocation3 + $0x380]] }
  0x23   :  { %3271 = vmatmul.msk.f32.vlgmr.msrb.gmra.mxu2 %vm130_vm0, %v4197_v2  ;;  %3279 = vmatmul.msk.f32.vlgmr.msrb.gmra.mxu3 %vm130_vm0, %v4197_v2  ;;  %v4284_v30 = vld [vmem:[#allocation7 + $0x240] sm:$0xff]  ;;  %v4381_v53 = vld [vmem:[#allocation7 + $0x2d8] sm:$0xff]  ;;  %v4383_v54 = vld [vmem:[#allocation7 + $0x2c8] sm:$0xff]  ;;  %s7319_s29 = sld [smem:[#allocation3 + $0x381]] }
  0x24   :  { %457 = vmatpush.msra.mxu3 %v103_v18  ;;  %375 = vmatpush.msra.mxu1 %v101_v19  ;;  %v4294_v31 = vld [vmem:[#allocation7 + $0x200] sm:$0xff]  ;;  %v4389_v56 = vld [vmem:[#allocation7 + $0x2d0] sm:$0xff]  ;;  %v4393_v57 = vld [vmem:[#allocation7 + $0x288] sm:$0xff] }
  0x25   :  { %416 = vmatpush.msra.mxu2 %v102_v22  ;;  %687 = vmatpush.msra.mxu0 %v4250_v23  ;;  %v4297_v32 = vld [vmem:[#allocation7 + $0x1c0] sm:$0xff]  ;;  %v4395_v58 = vld [vmem:[#allocation7 + $0x298] sm:$0xff]  ;;  %v4401_v60 = vld [vmem:[#allocation7 + $0x290] sm:$0xff] }
  0x26   :  { %v4301_v33 = vld [vmem:[#allocation7 + $0x180] sm:$0xff]  ;;  %746 = vmatpush.msrb.mxu3 %v4313_v35  ;;  %706 = vmatpush.msrb.mxu1 %v4319_v37  ;;  %v4411_v62 = vld [vmem:[#allocation7 + $0x248] sm:$0xff]  ;;  %v4417_v63 = vld [vmem:[#allocation7 + $0x250] sm:$0xff] }
  0x27   :  { %688 = vmatpush.msra.mxu0 %v4253_v24  ;;  %v4311_v34 = vld [vmem:[#allocation7 + $0x140] sm:$0xff]  ;;  %726 = vmatpush.msrb.mxu2 %v4345_v43  ;;  %v4419_v0 = vld [vmem:[#allocation7 + $0x258] sm:$0xff]  ;;  %v4427_v6 = vld [vmem:[#allocation7 + $0x208] sm:$0xff] }
  0x28   :  { %v4321_v38 = vld [vmem:[#allocation7 + $0x100] sm:$0xff]  ;;  %747 = vmatpush.msrb.mxu3 %v4317_v36  ;;  %707 = vmatpush.msrb.mxu1 %v4341_v42  ;;  %v4431_v7 = vld [vmem:[#allocation7 + $0x210] sm:$0xff]  ;;  %v4433_v8 = vld [vmem:[#allocation7 + $0x218] sm:$0xff] }
  0x29   :  { %689 = vmatpush.msra.mxu0 %v4266_v26  ;;  %v4327_v39 = vld [vmem:[#allocation7 + $0xc0] sm:$0xff]  ;;  %727 = vmatpush.msrb.mxu2 %v4347_v44  ;;  %v4439_v10 = vld [vmem:[#allocation7 + $0x1c8] sm:$0xff]  ;;  %v4443_v11 = vld [vmem:[#allocation7 + $0x1d0] sm:$0xff] }
  0x2a   :  { %3257 = vmatmul.msk.f32.gmra.mxu0 %vm130_vm0, %v4238_v20  ;;  %3264 = vmatmul.msk.f32.gmra.mxu1 %vm130_vm0, %v4225_v17  ;;  %v4337_v40 = vld [vmem:[#allocation7 + $0x80] sm:$0xff]  ;;  %v4445_v12 = vld [vmem:[#allocation7 + $0x1d8] sm:$0xff]  ;;  %v4455_v14 = vld [vmem:[#allocation7 + $0x188] sm:$0xff] }
  0x2b   :  { %3272 = vmatmul.msk.f32.gmra.mxu2 %vm130_vm0, %v4225_v17  ;;  %3280 = vmatmul.msk.f32.gmra.mxu3 %vm130_vm0, %v4225_v17  ;;  %v4349_v45 = vld [vmem:[#allocation7 + $0x40] sm:$0xff]  ;;  %7726 = vst [vmem:[#allocation15_spill] sm:$0xff] %v4445_v12  ;;  %v4461_v15 = vld [vmem:[#allocation7 + $0x190] sm:$0xff]  ;;  %v4463_v16 = vld [vmem:[#allocation7 + $0x198] sm:$0xff] }
  0x2c   :  { %690 = vmatpush.msra.mxu0 %v4272_v27  ;;  %748 = vmatpush.msrb.mxu3 %v4339_v41  ;;  %v4364_v49 = vld [vmem:[#allocation7] sm:$0xff]  ;;  %7728 = vst [vmem:[#allocation17_spill] sm:$0xff] %v4455_v14  ;;  %v4471_v19 = vld [vmem:[#allocation7 + $0x148] sm:$0xff]  ;;  %v4475_v22 = vld [vmem:[#allocation7 + $0x150] sm:$0xff] }
  0x2d   :  { %708 = vmatpush.msrb.mxu1 %v4355_v47  ;;  %728 = vmatpush.msrb.mxu2 %v4359_v48  ;;  %v4371_v50 = vld [vmem:[#allocation7 + $0x3e0] sm:$0xff]  ;;  %7729 = vst [vmem:[#allocation18_spill] sm:$0xff] %v4463_v16 }
  0x2e   :  { %691 = vmatpush.msra.mxu0 %v4275_v28  ;;  %749 = vmatpush.msrb.mxu3 %v4353_v46  ;;  %v4386_v55 = vld [vmem:[#allocation7 + $0x3a0] sm:$0xff]  ;;  %7731 = vst [vmem:[#allocation20_spill] sm:$0xff] %v4471_v19 }
  0x2f   :  { %709 = vmatpush.msrb.mxu1 %v4373_v51  ;;  %729 = vmatpush.msrb.mxu2 %v4375_v52  ;;  %v4397_v59 = vld [vmem:[#allocation7 + $0x360] sm:$0xff]  ;;  %7732 = vst [vmem:[#allocation21_spill] sm:$0xff] %v4475_v22 }
  0x30   :  { %692 = vmatpush.msra.mxu0 %v4284_v30  ;;  %750 = vmatpush.msrb.mxu3 %v4381_v53  ;;  %v4408_v61 = vld [vmem:[#allocation7 + $0x320] sm:$0xff] }
  0x31   :  { %710 = vmatpush.msrb.mxu1 %v4383_v54  ;;  %730 = vmatpush.msrb.mxu2 %v4389_v56  ;;  %v4425_v1 = vld [vmem:[#allocation7 + $0x2e0] sm:$0xff] }
  0x32   :  { %3258 = vmatmul.msk.f32.gmra.mxu0 %vm130_vm0, %v4259_v25  ;;  %3265 = vmatmul.msk.f32.gmra.mxu1 %vm130_vm0, %v4238_v20  ;;  %7724 = vst [vmem:[#allocation13_spill] sm:$0xff] %v4425_v1  ;;  %v4435_v9 = vld [vmem:[#allocation7 + $0x2a0] sm:$0xff] }
  0x33   :  { %3273 = vmatmul.msk.f32.gmra.mxu2 %vm130_vm0, %v4238_v20  ;;  %3281 = vmatmul.msk.f32.gmra.mxu3 %vm130_vm0, %v4238_v20  ;;  %7725 = vst [vmem:[#allocation14_spill] sm:$0xff] %v4435_v9  ;;  %v4451_v13 = vld [vmem:[#allocation7 + $0x260] sm:$0xff] }
  0x34   :  { %693 = vmatpush.msra.mxu0 %v4294_v31  ;;  %711 = vmatpush.msrb.mxu1 %v4393_v57  ;;  %7727 = vst [vmem:[#allocation16_spill] sm:$0xff] %v4451_v13  ;;  %v4469_v18 = vld [vmem:[#allocation7 + $0x220] sm:$0xff] }
  0x35   :  { %751 = vmatpush.msrb.mxu3 %v4395_v58  ;;  %731 = vmatpush.msrb.mxu2 %v4401_v60  ;;  %7730 = vst [vmem:[#allocation19_spill] sm:$0xff] %v4469_v18 }
  0x36   :  { %694 = vmatpush.msra.mxu0 %v4297_v32  ;;  %712 = vmatpush.msrb.mxu1 %v4411_v62 }
  0x37   :  { %732 = vmatpush.msrb.mxu2 %v4417_v63  ;;  %752 = vmatpush.msrb.mxu3 %v4419_v0 }
  0x38   :  { %695 = vmatpush.msra.mxu0 %v4301_v33  ;;  %713 = vmatpush.msrb.mxu1 %v4427_v6 }
  0x39   :  { %733 = vmatpush.msrb.mxu2 %v4431_v7  ;;  %753 = vmatpush.msrb.mxu3 %v4433_v8 }
  0x3a   :  { %3259 = vmatmul.msk.f32.gmra.mxu0 %vm130_vm0, %v4281_v29  ;;  %3266 = vmatmul.msk.f32.gmra.mxu1 %vm130_vm0, %v4259_v25 }
  0x3b   :  { %3274 = vmatmul.msk.f32.gmra.mxu2 %vm130_vm0, %v4259_v25  ;;  %3282 = vmatmul.msk.f32.gmra.mxu3 %vm130_vm0, %v4259_v25 }
  0x3c   :  { %696 = vmatpush.msra.mxu0 %v4311_v34  ;;  %714 = vmatpush.msrb.mxu1 %v4439_v10 }
  0x3d   :  { %734 = vmatpush.msrb.mxu2 %v4443_v11  ;;  %754 = vmatpush.msrb.mxu3 %v4445_v12  ;;  %v4483_v12 = vld [vmem:[#allocation7 + $0x108] sm:$0xff] }
  0x3e   :  { %697 = vmatpush.msra.mxu0 %v4321_v38  ;;  %715 = vmatpush.msrb.mxu1 %v4455_v14  ;;  %7735 = vst [vmem:[#allocation24_spill] sm:$0xff] %v4483_v12  ;;  %v4495_v14 = vld [vmem:[#allocation7 + $0x1a0] sm:$0xff] }
  0x3f   :  { %735 = vmatpush.msrb.mxu2 %v4461_v15  ;;  %755 = vmatpush.msrb.mxu3 %v4463_v16  ;;  %7738 = vst [vmem:[#allocation27_spill] sm:$0xff] %v4495_v14  ;;  %v4527_v16 = vld [vmem:[#allocation7 + $0x48] sm:$0xff] }
  0x40   :  { %698 = vmatpush.msra.mxu0 %v4327_v39  ;;  %716 = vmatpush.msrb.mxu1 %v4471_v19  ;;  %v4505_v19 = vld [vmem:[#allocation7 + $0xd0] sm:$0xff]  ;;  %7746 = vst [vmem:[#allocation35_spill] sm:$0xff] %v4527_v16 }
  0x41   :  { %736 = vmatpush.msrb.mxu2 %v4475_v22  ;;  %v4523_v22 = vld [vmem:[#allocation7 + $0x120] sm:$0xff] }
  0x42   :  { %3267 = vmatmul.msk.f32.gmra.mxu1 %vm130_vm0, %v4281_v29  ;;  %3287 = vmatmul.msk.f32.vlgmr.msrb.gmra.mxu0 %vm130_vm0, %v4197_v2  ;;  %7745 = vst [vmem:[#allocation34_spill] sm:$0xff] %v4523_v22 }
  0x43   :  { %3275 = vmatmul.msk.f32.gmra.mxu2 %vm130_vm0, %v4281_v29  ;;  %3283 = vmatmul.msk.f32.gmra.mxu3 %vm130_vm0, %v4281_v29 }
  0x44   :  { %699 = vmatpush.msra.mxu0 %v4337_v40  ;;  %717 = vmatpush.msrb.mxu1 %v4483_v12  ;;  %v4519_v12 = vld [vmem:[#allocation7 + $0x90] sm:$0xff] }
  0x45   :  { %7743 = vst [vmem:[#allocation32_spill] sm:$0xff] %v4519_v12 }
  0x46   :  { %700 = vmatpush.msra.mxu0 %v4349_v45 }
  0x48   :  { %701 = vmatpush.msra.mxu0 %v4364_v49 }
  0x4a   :  { %3268 = vmatmul.msk.f32.gmra.mxu1 %vm130_vm0, %v4202_v3  ;;  %3288 = vmatmul.msk.f32.gmra.mxu0 %vm130_vm0, %v4225_v17 }
  0x4b   :  { %3276 = vmatmul.msk.f32.gmra.mxu2 %vm130_vm0, %v4202_v3  ;;  %3284 = vmatmul.msk.f32.gmra.mxu3 %vm130_vm0, %v4202_v3 }
  0x4c   :  { %766 = vmatpush.msrb.mxu0 %v4371_v50 }
  0x4e   :  { %767 = vmatpush.msrb.mxu0 %v4386_v55 }
  0x50   :  { %768 = vmatpush.msrb.mxu0 %v4397_v59 }
  0x52   :  { %3269 = vmatmul.msk.f32.gmra.mxu1 %vm130_vm0, %v4207_v4  ;;  %3289 = vmatmul.msk.f32.gmra.mxu0 %vm130_vm0, %v4238_v20 }
  0x53   :  { %3277 = vmatmul.msk.f32.gmra.mxu2 %vm130_vm0, %v4207_v4  ;;  %3285 = vmatmul.msk.f32.gmra.mxu3 %vm130_vm0, %v4207_v4 }
  0x54   :  { %769 = vmatpush.msrb.mxu0 %v4408_v61 }
  0x56   :  { %770 = vmatpush.msrb.mxu0 %v4425_v1  ;;  %v4479_v1 = vld [vmem:[#allocation7 + $0x1e0] sm:$0xff] }
  0x57   :  { %7734 = vst [vmem:[#allocation23_spill] sm:$0xff] %v4479_v1 }
  0x58   :  { %771 = vmatpush.msrb.mxu0 %v4435_v9  ;;  %v4477_v9 = vld [vmem:[#allocation7 + $0x158] sm:$0xff] }
  0x59   :  { %7733 = vst [vmem:[#allocation22_spill] sm:$0xff] %v4477_v9  ;;  %756 = vmatpush.msrb.mxu3 %v4477_v9  ;;  %v4507_v9 = vld [vmem:[#allocation7 + $0xd8] sm:$0xff] }
  0x5a   :  { %3270 = vmatmul.msk.f32.gmra.mxu1 %vm130_vm0, %v4212_v5  ;;  %3290 = vmatmul.msk.f32.gmra.mxu0 %vm130_vm0, %v4259_v25  ;;  %7740 = vst [vmem:[#allocation29_spill] sm:$0xff] %v4507_v9 }
  0x5b   :  { %3278 = vmatmul.msk.f32.gmra.mxu2 %vm130_vm0, %v4212_v5  ;;  %3286 = vmatmul.msk.f32.gmra.mxu3 %vm130_vm0, %v4212_v5 }
  0x5c   :  { %772 = vmatpush.msrb.mxu0 %v4451_v13  ;;  %v4489_v13 = vld [vmem:[#allocation7 + $0x118] sm:$0xff] }
  0x5d   :  { %7737 = vst [vmem:[#allocation26_spill] sm:$0xff] %v4489_v13  ;;  %757 = vmatpush.msrb.mxu3 %v4489_v13  ;;  %v4515_v13 = vld [vmem:[#allocation7 + $0x88] sm:$0xff] }
  0x5e   :  { %773 = vmatpush.msrb.mxu0 %v4469_v18  ;;  %v4499_v18 = vld [vmem:[#allocation7 + $0xc8] sm:$0xff]  ;;  %7742 = vst [vmem:[#allocation31_spill] sm:$0xff] %v4515_v13 }
  0x5f   :  { %7739 = vst [vmem:[#allocation28_spill] sm:$0xff] %v4499_v18  ;;  %718 = vmatpush.msrb.mxu1 %v4499_v18  ;;  %758 = vmatpush.msrb.mxu3 %v4507_v9  ;;  %v4539_v18 = vld [vmem:[#allocation7 + $0xe0] sm:$0xff]  ;;  %v4571_v9 = vld [vmem:[#allocation7 + $0x3a8] sm:$0xff] }
  0x60   :  { %774 = vmatpush.msrb.mxu0 %v4479_v1  ;;  %v4513_v1 = vld [vmem:[#allocation7 + $0x160] sm:$0xff]  ;;  %7749 = vst [vmem:[#allocation38_spill] sm:$0xff] %v4539_v18 }
  0x61   :  { %7741 = vst [vmem:[#allocation30_spill] sm:$0xff] %v4513_v1  ;;  %719 = vmatpush.msrb.mxu1 %v4515_v13  ;;  %v4549_v13 = vld [vmem:[#allocation7 + $0x10] sm:$0xff] }
  0x62   :  { %3291 = vmatmul.msk.f32.gmra.mxu0 %vm130_vm0, %v4281_v29  ;;  %3295 = vmatmul.msk.f32.vlgmr.msra.gmra.mxu1 %vm130_vm0, %v4197_v2  ;;  %7756 = vst [vmem:[#allocation45_spill] sm:$0xff] %v4571_v9 }
  0x63   :  { %3303 = vmatmul.msk.f32.vlgmr.msra.gmra.mxu2 %vm130_vm0, %v4197_v2  ;;  %3311 = vmatmul.msk.f32.vlgmr.msra.gmra.mxu3 %vm130_vm0, %v4197_v2  ;;  %v4487_v2 = vld [vmem:[#allocation7 + $0x110] sm:$0xff] }
  0x64   :  { %7736 = vst [vmem:[#allocation25_spill] sm:$0xff] %v4487_v2  ;;  %737 = vmatpush.msrb.mxu2 %v4487_v2  ;;  %775 = vmatpush.msrb.mxu0 %v4495_v14  ;;  %v4521_v2 = vld [vmem:[#allocation7 + $0x98] sm:$0xff] }
  0x65   :  { %7744 = vst [vmem:[#allocation33_spill] sm:$0xff] %v4521_v2  ;;  %v4533_v14 = vld [vmem:[#allocation7 + $0x58] sm:$0xff]  ;;  %759 = vmatpush.msrb.mxu3 %v4521_v2  ;;  %720 = vmatpush.msrb.mxu1 %v4527_v16  ;;  %v4563_v16 = vld [vmem:[#allocation7 + $0x3f0] sm:$0xff] }
  0x66   :  { %738 = vmatpush.msrb.mxu2 %v4505_v19  ;;  %776 = vmatpush.msrb.mxu0 %v4513_v1  ;;  %7748 = vst [vmem:[#allocation37_spill] sm:$0xff] %v4533_v14  ;;  %v4543_v1 = vld [vmem:[#allocation7 + $0x8] sm:$0xff]  ;;  %v4551_v2 = vld [vmem:[#allocation7 + $0x18] sm:$0xff] }
  0x67   :  { %760 = vmatpush.msrb.mxu3 %v4533_v14  ;;  %7750 = vst [vmem:[#allocation39_spill] sm:$0xff] %v4543_v1  ;;  %v4559_v14 = vld [vmem:[#allocation7 + $0x3e8] sm:$0xff]  ;;  %721 = vmatpush.msrb.mxu1 %v4543_v1  ;;  %v4583_v1 = vld [vmem:[#allocation7 + $0x20] sm:$0xff] }
  0x68   :  { %739 = vmatpush.msrb.mxu2 %v4519_v12  ;;  %777 = vmatpush.msrb.mxu0 %v4523_v22  ;;  %v4557_v22 = vld [vmem:[#allocation7 + $0xa0] sm:$0xff]  ;;  %7752 = vst [vmem:[#allocation41_spill] sm:$0xff] %v4559_v14 }
  0x69   :  { %7751 = vst [vmem:[#allocation40_spill] sm:$0xff] %v4557_v22  ;;  %v4567_v12 = vld [vmem:[#allocation7 + $0x60] sm:$0xff]  ;;  %761 = vmatpush.msrb.mxu3 %v4551_v2  ;;  %786 = vmatpush.msra.mxu1 %v4559_v14  ;;  %v4614_v14 = vld [vmem:[#allocation7 + $0x2f0] sm:$0xff] }
  0x6a   :  { %3292 = vmatmul.msk.f32.gmra.mxu0 %vm130_vm0, %v4202_v3  ;;  %3296 = vmatmul.msk.f32.gmra.mxu1 %vm130_vm0, %v4225_v17  ;;  %7753 = vst [vmem:[#allocation42_spill] sm:$0xff] %v4563_v16 }
  0x6b   :  { %3304 = vmatmul.msk.f32.gmra.mxu2 %vm130_vm0, %v4225_v17  ;;  %3312 = vmatmul.msk.f32.gmra.mxu3 %vm130_vm0, %v4225_v17  ;;  %v4531_v17 = vld [vmem:[#allocation7 + $0x50] sm:$0xff]  ;;  %7755 = vst [vmem:[#allocation44_spill] sm:$0xff] %v4567_v12 }
  0x6c   :  { %7747 = vst [vmem:[#allocation36_spill] sm:$0xff] %v4531_v17  ;;  %740 = vmatpush.msrb.mxu2 %v4531_v17  ;;  %778 = vmatpush.msrb.mxu0 %v4539_v18  ;;  %v4565_v17 = vld [vmem:[#allocation7 + $0x3f8] sm:$0xff] }
  0x6d   :  { %7754 = vst [vmem:[#allocation43_spill] sm:$0xff] %v4565_v17  ;;  %v4577_v18 = vld [vmem:[#allocation7 + $0x3b8] sm:$0xff]  ;;  %826 = vmatpush.msra.mxu3 %v4565_v17  ;;  %787 = vmatpush.msra.mxu1 %v4571_v9  ;;  %v4611_v9 = vld [vmem:[#allocation7 + $0x2e8] sm:$0xff] }
  0x6e   :  { %741 = vmatpush.msrb.mxu2 %v4549_v13  ;;  %779 = vmatpush.msrb.mxu0 %v4557_v22  ;;  %7758 = vst [vmem:[#allocation47_spill] sm:$0xff] %v4577_v18  ;;  %v4587_v22 = vld [vmem:[#allocation7 + $0x368] sm:$0xff]  ;;  %v4595_v17 = vld [vmem:[#allocation7 + $0x378] sm:$0xff] }
  0x6f   :  { %7759 = vst [vmem:[#allocation48_spill] sm:$0xff] %v4583_v1  ;;  %827 = vmatpush.msra.mxu3 %v4577_v18  ;;  %788 = vmatpush.msra.mxu1 %v4587_v22  ;;  %v4605_v18 = vld [vmem:[#allocation7 + $0x330] sm:$0xff] }
  0x70   :  { %806 = vmatpush.msra.mxu2 %v4563_v16  ;;  %780 = vmatpush.msrb.mxu0 %v4567_v12  ;;  %v4593_v16 = vld [vmem:[#allocation7 + $0x370] sm:$0xff]  ;;  %7761 = vst [vmem:[#allocation50_spill] sm:$0xff] %v4595_v17  ;;  %v4601_v12 = vld [vmem:[#allocation7 + $0x328] sm:$0xff] }
  0x71   :  { %7760 = vst [vmem:[#allocation49_spill] sm:$0xff] %v4593_v16  ;;  %828 = vmatpush.msra.mxu3 %v4595_v17  ;;  %789 = vmatpush.msra.mxu1 %v4601_v12  ;;  %v4625_v17 = vld [vmem:[#allocation7 + $0x2b0] sm:$0xff] }
  0x72   :  { %3293 = vmatmul.msk.f32.gmra.mxu0 %vm130_vm0, %v4207_v4  ;;  %3297 = vmatmul.msk.f32.gmra.mxu1 %vm130_vm0, %v4238_v20  ;;  %7762 = vst [vmem:[#allocation51_spill] sm:$0xff] %v4601_v12  ;;  %v7405_v12 = vmov 0.0  }
  0x73   :  { %3305 = vmatmul.msk.f32.gmra.mxu2 %vm130_vm0, %v4238_v20  ;;  %3313 = vmatmul.msk.f32.gmra.mxu3 %vm130_vm0, %v4238_v20  ;;  %v4575_v20 = vld [vmem:[#allocation7 + $0x3b0] sm:$0xff]  ;;  %7764 = vst [vmem:[#allocation53_spill] sm:$0xff] %v4611_v9 }
  0x74   :  { %7757 = vst [vmem:[#allocation46_spill] sm:$0xff] %v4575_v20  ;;  %807 = vmatpush.msra.mxu2 %v4575_v20  ;;  %781 = vmatpush.msrb.mxu0 %v4583_v1  ;;  %v4607_v20 = vld [vmem:[#allocation7 + $0x338] sm:$0xff]  ;;  %v4623_v1 = vld [vmem:[#allocation7 + $0x2a8] sm:$0xff] }
  0x75   :  { %7763 = vst [vmem:[#allocation52_spill] sm:$0xff] %v4607_v20  ;;  %829 = vmatpush.msra.mxu3 %v4607_v20  ;;  %790 = vmatpush.msra.mxu1 %v4611_v9  ;;  %v4642_v9 = vld [vmem:[#allocation7 + $0x278] sm:$0xff]  ;;  %v4647_v20 = vld [vmem:[#allocation7 + $0x230] sm:$0xff] }
  0x76   :  { %808 = vmatpush.msra.mxu2 %v4593_v16  ;;  %7765 = vst [vmem:[#allocation54_spill] sm:$0xff] %v4614_v14  ;;  %v4630_v16 = vld [vmem:[#allocation7 + $0x2b8] sm:$0xff] }
  0x77   :  { %7767 = vst [vmem:[#allocation56_spill] sm:$0xff] %v4625_v17  ;;  %791 = vmatpush.msra.mxu1 %v4623_v1 }
  0x78   :  { %809 = vmatpush.msra.mxu2 %v4605_v18  ;;  %7768 = vst [vmem:[#allocation57_spill] sm:$0xff] %v4630_v16 }
  0x79   :  { %7769 = vst [vmem:[#allocation58_spill] sm:$0xff] %v4642_v9 }
  0x7a   :  { %3294 = vmatmul.msk.f32.gmra.mxu0 %vm130_vm0, %v4212_v5  ;;  %3298 = vmatmul.msk.f32.gmra.mxu1 %vm130_vm0, %v4259_v25  ;;  %7771 = vst [vmem:[#allocation60_spill] sm:$0xff] %v4647_v20 }
  0x7b   :  { %3306 = vmatmul.msk.f32.gmra.mxu2 %vm130_vm0, %v4259_v25  ;;  %3314 = vmatmul.msk.f32.gmra.mxu3 %vm130_vm0, %v4259_v25  ;;  %v4616_v25 = vld [vmem:[#allocation7 + $0x2f8] sm:$0xff] }
  0x7c   :  { %7766 = vst [vmem:[#allocation55_spill] sm:$0xff] %v4616_v25  ;;  %810 = vmatpush.msra.mxu2 %v4614_v14  ;;  %830 = vmatpush.msra.mxu3 %v4616_v25  ;;  %v4636_v14 = vld [vmem:[#allocation7 + $0x268] sm:$0xff]  ;;  %v4638_v25 = vld [vmem:[#allocation7 + $0x270] sm:$0xff] }
  0x7d   :  { %792 = vmatpush.msra.mxu1 %v4636_v14 }
  0x7e   :  { %811 = vmatpush.msra.mxu2 %v4625_v17  ;;  %831 = vmatpush.msra.mxu3 %v4630_v16  ;;  %v4659_v16 = vld [vmem:[#allocation7 + $0x1e8] sm:$0xff]  ;;  %v4661_v17 = vld [vmem:[#allocation7 + $0x1f0] sm:$0xff] }
  0x7f   :  { %7773 = vst [vmem:[#allocation62_spill] sm:$0xff] %v4659_v16 }
  0x80   :  { %812 = vmatpush.msra.mxu2 %v4638_v25  ;;  %832 = vmatpush.msra.mxu3 %v4642_v9  ;;  %v4667_v9 = vld [vmem:[#allocation7 + $0x1f8] sm:$0xff] }
  0x81   :  { %7775 = vst [vmem:[#allocation63_spill] sm:$0xff] %v4667_v9 }
  0x82   :  { %3299 = vmatmul.msk.f32.gmra.mxu1 %vm130_vm0, %v4281_v29  ;;  %702 = vmatmul.f32.vlgmr.msra.gmra.mxu0 %v7405_v12  ;;  %v4645_v12 = vld [vmem:[#allocation7 + $0x228] sm:$0xff] }
  0x83   :  { %3307 = vmatmul.msk.f32.gmra.mxu2 %vm130_vm0, %v4281_v29  ;;  %3315 = vmatmul.msk.f32.gmra.mxu3 %vm130_vm0, %v4281_v29  ;;  %7770 = vst [vmem:[#allocation59_spill] sm:$0xff] %v4645_v12  ;;  %v4652_v29 = vld [vmem:[#allocation7 + $0x238] sm:$0xff] }
  0x84   :  { %1001 = vmatpush.msra.mxu0 %v4248_v21  ;;  %7772 = vst [vmem:[#allocation61_spill] sm:$0xff] %v4652_v29  ;;  %793 = vmatpush.msra.mxu1 %v4645_v12  ;;  %v7774_v21 = vmov 0.0   ;;  %v4684_v12 = vld [vmem:[#allocation7 + $0x170] sm:$0xff] }
  0x85   :  { %813 = vmatpush.msra.mxu2 %v4647_v20  ;;  %833 = vmatpush.msra.mxu3 %v4652_v29  ;;  %v4675_v29 = vld [vmem:[#allocation7 + $0x1b0] sm:$0xff]  ;;  %v4682_v20 = vld [vmem:[#allocation7 + $0x168] sm:$0xff]  ;;  %7778 = vst [vmem:[#allocation66_spill] sm:$0xff] %v4684_v12 }
  0x86   :  { %1002 = vmatpush.msra.mxu0 %v4250_v23  ;;  %v4673_v23 = vld [vmem:[#allocation7 + $0x1a8] sm:$0xff]  ;;  %794 = vmatpush.msra.mxu1 %v4659_v16  ;;  %7777 = vst [vmem:[#allocation65_spill] sm:$0xff] %v4682_v20  ;;  %v4692_v16 = vld [vmem:[#allocation7 + $0x130] sm:$0xff] }
  0x87   :  { %814 = vmatpush.msra.mxu2 %v4661_v17  ;;  %834 = vmatpush.msra.mxu3 %v4667_v9  ;;  %7780 = vst [vmem:[#allocation68_spill] sm:$0xff] %v4692_v16  ;;  %v4698_v9 = vld [vmem:[#allocation7 + $0x128] sm:$0xff] }
  0x88   :  { %1003 = vmatpush.msra.mxu0 %v4253_v24  ;;  %v4679_v24 = vld [vmem:[#allocation7 + $0x1b8] sm:$0xff]  ;;  %795 = vmatpush.msra.mxu1 %v4673_v23  ;;  %7781 = vst [vmem:[#allocation69_spill] sm:$0xff] %v4698_v9 }
  0x89   :  { %7776 = vst [vmem:[#allocation64_spill] sm:$0xff] %v4679_v24  ;;  %815 = vmatpush.msra.mxu2 %v4675_v29  ;;  %835 = vmatpush.msra.mxu3 %v4679_v24  ;;  %v4706_v24 = vld [vmem:[#allocation7 + $0xf0] sm:$0xff] }
  0x8a   :  { %3300 = vmatmul.msk.f32.gmra.mxu1 %vm130_vm0, %v4202_v3  ;;  %782 = vmatmul.f32.vlgmr.msrb.gmra.mxu0 %v7774_v21 }
  0x8b   :  { %3308 = vmatmul.msk.f32.gmra.mxu2 %vm130_vm0, %v4202_v3  ;;  %3316 = vmatmul.msk.f32.gmra.mxu3 %vm130_vm0, %v4202_v3  ;;  %v4689_v3 = vld [vmem:[#allocation7 + $0x178] sm:$0xff] }
  0x8c   :  { %1004 = vmatpush.msra.mxu0 %v4266_v26  ;;  %7779 = vst [vmem:[#allocation67_spill] sm:$0xff] %v4689_v3  ;;  %796 = vmatpush.msra.mxu1 %v4682_v20  ;;  %v4700_v26 = vld [vmem:[#allocation7 + $0x138] sm:$0xff] }
  0x8d   :  { %816 = vmatpush.msra.mxu2 %v4684_v12  ;;  %836 = vmatpush.msra.mxu3 %v4689_v3  ;;  %7782 = vst [vmem:[#allocation70_spill] sm:$0xff] %v4700_v26  ;;  %v4714_v3 = vld [vmem:[#allocation7 + $0xf8] sm:$0xff] }
  0x8e   :  { %1005 = vmatpush.msra.mxu0 %v4272_v27  ;;  %v4712_v27 = vld [vmem:[#allocation7 + $0xe8] sm:$0xff]  ;;  %7783 = vst [vmem:[#allocation71_spill] sm:$0xff] %v4714_v3  ;;  %797 = vmatpush.msra.mxu1 %v4698_v9  ;;  %v4723_v12 = vld [vmem:[#allocation7 + $0xb8] sm:$0xff] }
  0x8f   :  { %817 = vmatpush.msra.mxu2 %v4692_v16  ;;  %837 = vmatpush.msra.mxu3 %v4700_v26  ;;  %v4721_v16 = vld [vmem:[#allocation7 + $0xa8] sm:$0xff]  ;;  %v4735_v26 = vld [vmem:[#allocation7 + $0x78] sm:$0xff] }
  0x90   :  { %1006 = vmatpush.msra.mxu0 %v4275_v28  ;;  %v4718_v28 = vld [vmem:[#allocation7 + $0xb0] sm:$0xff]  ;;  %798 = vmatpush.msra.mxu1 %v4712_v27  ;;  %7787 = vst [vmem:[#allocation75_spill] sm:$0xff] %v4735_v26 }
  0x91   :  { %818 = vmatpush.msra.mxu2 %v4706_v24  ;;  %838 = vmatpush.msra.mxu3 %v4714_v3  ;;  %v4743_v3 = vld [vmem:[#allocation7 + $0x30] sm:$0xff] }
  0x92   :  { %3301 = vmatmul.msk.f32.gmra.mxu1 %vm130_vm0, %v4207_v4  ;;  %1007 = vmatpush.msra.mxu0 %v4284_v30  ;;  %v4740_v30 = vld [vmem:[#allocation7 + $0x68] sm:$0xff] }
  0x93   :  { %3309 = vmatmul.msk.f32.gmra.mxu2 %vm130_vm0, %v4207_v4  ;;  %3317 = vmatmul.msk.f32.gmra.mxu3 %vm130_vm0, %v4207_v4  ;;  %v4728_v4 = vld [vmem:[#allocation7 + $0x70] sm:$0xff] }
  0x94   :  { %7784 = vst [vmem:[#allocation72_spill] sm:$0xff] %v4728_v4  ;;  %819 = vmatpush.msra.mxu2 %v4718_v28  ;;  %1008 = vmatpush.msra.mxu0 %v4294_v31  ;;  %v4755_v31 = vld [vmem:[#allocation7 + $0x28] sm:$0xff] }
  0x95   :  { %799 = vmatpush.msra.mxu1 %v4721_v16  ;;  %839 = vmatpush.msra.mxu3 %v4723_v12 }
  0x96   :  { %820 = vmatpush.msra.mxu2 %v4728_v4  ;;  %1009 = vmatpush.msra.mxu0 %v4297_v32 }
  0x97   :  { %v4730_v20 = vpop.f32.mrf.mxu0  ;;  %v4732_v9 = vpop.f32.mrf.mxu1  ;;  %840 = vmatpush.msra.mxu3 %v4735_v26  ;;  %800 = vmatpush.msra.mxu1 %v4740_v30 }
  0x98   :  { %7785 = vst [vmem:[#allocation73_spill] sm:$0xff] %v4730_v20  ;;  %821 = vmatpush.msra.mxu2 %v4743_v3  ;;  %1010 = vmatpush.msra.mxu0 %v4301_v33 }
  0x99   :  { %7786 = vst [vmem:[#allocation74_spill] sm:$0xff] %v4732_v9  ;;  %v4749_v9 = vld [vmem:[#allocation7 + $0x38] sm:$0xff]  ;;  %801 = vmatpush.msra.mxu1 %v4755_v31 }
  0x9a   :  { %3302 = vmatmul.msk.f32.gmra.mxu1 %vm130_vm0, %v4212_v5  ;;  %841 = vmatpush.msra.mxu3 %v4749_v9 }
  0x9b   :  { %3310 = vmatmul.msk.f32.gmra.mxu2 %vm130_vm0, %v4212_v5  ;;  %3318 = vmatmul.msk.f32.gmra.mxu3 %vm130_vm0, %v4212_v5 }
  0x9c   :  { %1011 = vmatpush.msra.mxu0 %v4311_v34 }
  0x9e   :  { %v4761_v32 = vpop.f32.mrf.mxu2  ;;  %v4763_v20 = vpop.f32.mrf.mxu3  ;;  %1012 = vmatpush.msra.mxu0 %v4321_v38 }
  0x9f   :  { %7788 = vst [vmem:[#allocation76_spill] sm:$0xff] %v4761_v32  ;;  %v4766_v26 = vpop.f32.mrf.mxu0  ;;  %v4768_v4 = vpop.f32.mrf.mxu1 }
  0xa0   :  { %7789 = vst [vmem:[#allocation77_spill] sm:$0xff] %v4763_v20  ;;  %1013 = vmatpush.msra.mxu0 %v4327_v39 }
  0xa2   :  { %722 = vmatmul.f32.vlgmr.msrb.gmra.mxu1 %v7774_v21  ;;  %1014 = vmatpush.msra.mxu0 %v4337_v40 }
  0xa3   :  { %742 = vmatmul.f32.vlgmr.msrb.gmra.mxu2 %v7774_v21  ;;  %762 = vmatmul.f32.vlgmr.msrb.gmra.mxu3 %v7774_v21 }
  0xa4   :  { %1021 = vmatpush.msrb.mxu1 %v4319_v37  ;;  %1041 = vmatpush.msrb.mxu2 %v4345_v43 }
  0xa5   :  { %1061 = vmatpush.msrb.mxu3 %v4313_v35  ;;  %1015 = vmatpush.msra.mxu0 %v4349_v45  ;;  %v7798_v45 = vld [vmem:[#allocation13_spill] sm:$0xff] }
  0xa6   :  { %v4779_v5 = vpop.f32.mrf.mxu2  ;;  %v4781_v33 = vpop.f32.mrf.mxu3  ;;  %1022 = vmatpush.msrb.mxu1 %v4341_v42  ;;  %1042 = vmatpush.msrb.mxu2 %v4347_v44  ;;  %v7795_v42 = vld [vmem:[#allocation15_spill] sm:$0xff] }
  0xa7   :  { %v4785_v34 = vpop.f32.mrf.mxu0  ;;  %v4787_v38 = vpop.f32.mrf.mxu1  ;;  %1062 = vmatpush.msrb.mxu3 %v4317_v36  ;;  %1016 = vmatpush.msra.mxu0 %v4364_v49  ;;  %v7802_v49 = vld [vmem:[#allocation14_spill] sm:$0xff] }
  0xa8   :  { %7790 = vst [vmem:[#allocation78_spill] sm:$0xff] %v4785_v34  ;;  %1023 = vmatpush.msrb.mxu1 %v4355_v47  ;;  %1043 = vmatpush.msrb.mxu2 %v4359_v48  ;;  %v7800_v47 = vld [vmem:[#allocation18_spill] sm:$0xff]  ;;  %v7801_v48 = vld [vmem:[#allocation21_spill] sm:$0xff]  ;;  %v5331_v34 = vld [vmem:[#allocation7 + $0xd0] sm:$0xff] }
  0xa9   :  { %1063 = vmatpush.msrb.mxu3 %v4339_v41  ;;  %1081 = vmatpush.msrb.mxu0 %v4371_v50  ;;  %v7803_v50 = vld [vmem:[#allocation20_spill] sm:$0xff] }
  0xaa   :  { %802 = vmatmul.f32.vlgmr.msra.gmra.mxu1 %v7774_v21  ;;  %1044 = vmatpush.msrb.mxu2 %v4375_v52  ;;  %v7805_v52 = vld [vmem:[#allocation25_spill] sm:$0xff] }
  0xab   :  { %822 = vmatmul.f32.vlgmr.msra.gmra.mxu2 %v7774_v21  ;;  %842 = vmatmul.f32.vlgmr.msra.gmra.mxu3 %v7774_v21  ;;  %v7824_v21 = vld [vmem:[#allocation39_spill] sm:$0xff] }
  0xac   :  { %1024 = vmatpush.msrb.mxu1 %v4373_v51  ;;  %1064 = vmatpush.msrb.mxu3 %v4353_v46  ;;  %v7799_v46 = vld [vmem:[#allocation17_spill] sm:$0xff]  ;;  %v7804_v51 = vld [vmem:[#allocation22_spill] sm:$0xff] }
  0xad   :  { %1045 = vmatpush.msrb.mxu2 %v4389_v56  ;;  %1082 = vmatpush.msrb.mxu0 %v4386_v55  ;;  %v7808_v55 = vld [vmem:[#allocation26_spill] sm:$0xff]  ;;  %v7809_v56 = vld [vmem:[#allocation19_spill] sm:$0xff] }
  0xae   :  { %v4803_v35 = vpop.f32.mrf.mxu2  ;;  %v4805_v36 = vpop.f32.mrf.mxu3  ;;  %1025 = vmatpush.msrb.mxu1 %v4383_v54  ;;  %1065 = vmatpush.msrb.mxu3 %v4381_v53  ;;  %v7806_v53 = vld [vmem:[#allocation16_spill] sm:$0xff] }
  0xaf   :  { %v4809_v37 = vpop.f32.mrf.mxu0  ;;  %v4811_v39 = vpop.f32.mrf.mxu1  ;;  %1046 = vmatpush.msrb.mxu2 %v4401_v60  ;;  %1083 = vmatpush.msrb.mxu0 %v4397_v59  ;;  %v7807_v54 = vld [vmem:[#allocation24_spill] sm:$0xff]  ;;  %v7813_v60 = vld [vmem:[#allocation29_spill] sm:$0xff] }
  0xb0   :  { %7791 = vst [vmem:[#allocation79_spill] sm:$0xff] %v4809_v37  ;;  %1026 = vmatpush.msrb.mxu1 %v4393_v57  ;;  %1066 = vmatpush.msrb.mxu3 %v4395_v58  ;;  %v7812_v59 = vld [vmem:[#allocation28_spill] sm:$0xff]  ;;  %v5307_v37 = vld [vmem:[#allocation7 + $0x150] sm:$0xff] }
  0xb1   :  { %7792 = vst [vmem:[#allocation80_spill] sm:$0xff] %v4811_v39  ;;  %1047 = vmatpush.msrb.mxu2 %v4417_v63  ;;  %1084 = vmatpush.msrb.mxu0 %v4408_v61  ;;  %v7815_v63 = vld [vmem:[#allocation32_spill] sm:$0xff]  ;;  %v5328_v39 = vld [vmem:[#allocation7 + $0xc8] sm:$0xff] }
  0xb2   :  { %1027 = vmatpush.msrb.mxu1 %v4411_v62  ;;  %1067 = vmatpush.msrb.mxu3 %v4419_v0  ;;  %v7816_v0 = vld [vmem:[#allocation23_spill] sm:$0xff] }
  0xb3   :  { %1048 = vmatpush.msrb.mxu2 %v4431_v7  ;;  %1085 = vmatpush.msrb.mxu0 %v7798_v45  ;;  %v7818_v7 = vld [vmem:[#allocation33_spill] sm:$0xff] }
  0xb4   :  { %1028 = vmatpush.msrb.mxu1 %v4427_v6  ;;  %1068 = vmatpush.msrb.mxu3 %v4433_v8  ;;  %v7817_v6 = vld [vmem:[#allocation31_spill] sm:$0xff]  ;;  %v7819_v8 = vld [vmem:[#allocation36_spill] sm:$0xff]  ;;  %v7825_v45 = vld [vmem:[#allocation41_spill] sm:$0xff] }
  0xb5   :  { %1049 = vmatpush.msrb.mxu2 %v4443_v11  ;;  %1086 = vmatpush.msrb.mxu0 %v7802_v49  ;;  %v7821_v11 = vld [vmem:[#allocation35_spill] sm:$0xff] }
  0xb6   :  { %v4827_v40 = vpop.f32.mrf.mxu2  ;;  %v4829_v41 = vpop.f32.mrf.mxu3  ;;  %1029 = vmatpush.msrb.mxu1 %v4439_v10  ;;  %1069 = vmatpush.msrb.mxu3 %v7795_v42  ;;  %v7820_v10 = vld [vmem:[#allocation27_spill] sm:$0xff]  ;;  %v4876_v42 = vld [vmem:[%s7358_s4] sm:$0xff]  ;;  %s5106_s4 = sld [smem:[#allocation3]] }
  0xb7   :  { %7793 = vst [vmem:[#allocation81_spill] sm:$0xff] %v4827_v40  ;;  %v4833_v43 = vpop.f32.mrf.mxu0  ;;  %v4835_v44 = vpop.f32.mrf.mxu1  ;;  %1050 = vmatpush.msrb.mxu2 %v4461_v15  ;;  %1087 = vmatpush.msrb.mxu0 %v7806_v53  ;;  %v7822_v15 = vld [vmem:[#allocation37_spill] sm:$0xff]  ;;  %v7829_v49 = vld [vmem:[#allocation43_spill] sm:$0xff]  ;;  %v7833_v53 = vld [vmem:[#allocation46_spill] sm:$0xff] }
  0xb8   :  { %7794 = vst [vmem:[#allocation82_spill] sm:$0xff] %v4829_v41  ;;  %1030 = vmatpush.msrb.mxu1 %v7799_v46  ;;  %1070 = vmatpush.msrb.mxu3 %v7800_v47  ;;  %v7826_v46 = vld [vmem:[#allocation42_spill] sm:$0xff]  ;;  %v4881_v47 = vperm.slane %v4876_v42, 4  ;;  %v5322_v41 = vld [vmem:[#allocation7 + $0x118] sm:$0xff]  ;;  %v5325_v40 = vld [vmem:[#allocation7 + $0xc0] sm:$0xff] }
  0xb9   :  { %7796 = vst [vmem:[#allocation15_spill] sm:$0xff] %v4833_v43  ;;  %1051 = vmatpush.msrb.mxu2 %v7801_v48  ;;  %1088 = vmatpush.msrb.mxu0 %v7809_v56  ;;  %v7835_v56 = vld [vmem:[#allocation38_spill] sm:$0xff]  ;;  %v5283_v43 = vld [vmem:[#allocation7 + $0x1d0] sm:$0xff] }
  0xba   :  { %7797 = vst [vmem:[#allocation83_spill] sm:$0xff] %v4835_v44  ;;  %1031 = vmatpush.msrb.mxu1 %v7803_v50  ;;  %1071 = vmatpush.msrb.mxu3 %v7804_v51  ;;  %v7830_v50 = vld [vmem:[#allocation34_spill] sm:$0xff] }
  0xbb   :  { %1052 = vmatpush.msrb.mxu2 %v7805_v52  ;;  %1089 = vmatpush.msrb.mxu0 %v7816_v0  ;;  %v7832_v52 = vld [vmem:[#allocation45_spill] sm:$0xff]  ;;  %v7839_v0 = vld [vmem:[#allocation51_spill] sm:$0xff]  ;;  %v5304_v44 = vld [vmem:[#allocation7 + $0x148] sm:$0xff] }
  0xbc   :  { %1032 = vmatpush.msrb.mxu1 %v7807_v54  ;;  %1072 = vmatpush.msrb.mxu3 %v7808_v55  ;;  %v7834_v55 = vld [vmem:[#allocation47_spill] sm:$0xff] }
  0xbd   :  { %1053 = vmatpush.msrb.mxu2 %v4505_v19  ;;  %1090 = vmatpush.msrb.mxu0 %v7820_v10  ;;  %v7823_v19 = vld [vmem:[#allocation30_spill] sm:$0xff] }
  0xbe   :  { %v4851_v57 = vpop.f32.mrf.mxu2  ;;  %v4853_v58 = vpop.f32.mrf.mxu3  ;;  %1033 = vmatpush.msrb.mxu1 %v7812_v59  ;;  %1073 = vmatpush.msrb.mxu3 %v7813_v60  ;;  %v7836_v59 = vld [vmem:[#allocation49_spill] sm:$0xff]  ;;  %v7837_v60 = vld [vmem:[#allocation50_spill] sm:$0xff] }
  0xbf   :  { %7810 = vst [vmem:[#allocation13_spill] sm:$0xff] %v4851_v57  ;;  %v4857_v61 = vpop.f32.mrf.mxu1  ;;  %v4859_v62 = vpop.f32.mrf.mxu0  ;;  %1054 = vmatpush.msrb.mxu2 %v7815_v63  ;;  %1091 = vmatpush.msrb.mxu0 %v7823_v19  ;;  %v7838_v63 = vld [vmem:[#allocation40_spill] sm:$0xff]  ;;  %v7843_v10 = vld [vmem:[#allocation54_spill] sm:$0xff]  ;;  %v5301_v57 = vld [vmem:[#allocation7 + $0x140] sm:$0xff] }
  0xc0   :  { %7811 = vst [vmem:[#allocation17_spill] sm:$0xff] %v4853_v58  ;;  %1034 = vmatpush.msrb.mxu1 %v7817_v6  ;;  %1074 = vmatpush.msrb.mxu3 %v7818_v7  ;;  %v7840_v6 = vld [vmem:[#allocation52_spill] sm:$0xff] }
  0xc1   :  { %7814 = vst [vmem:[#allocation18_spill] sm:$0xff] %v4857_v61  ;;  %1055 = vmatpush.msrb.mxu2 %v7819_v8  ;;  %1092 = vmatpush.msrb.mxu0 %v7830_v50  ;;  %v7841_v7 = vld [vmem:[#allocation44_spill] sm:$0xff]  ;;  %v7842_v8 = vld [vmem:[#allocation53_spill] sm:$0xff]  ;;  %v7852_v50 = vld [vmem:[#allocation58_spill] sm:$0xff] }
  0xc2   :  { %1035 = vmatpush.msrb.mxu1 %v7821_v11  ;;  %1075 = vmatpush.msrb.mxu3 %v7822_v15  ;;  %v7846_v15 = vld [vmem:[#allocation55_spill] sm:$0xff]  ;;  %v7847_v19 = vld [vmem:[#allocation48_spill] sm:$0xff]  ;;  %v5280_v61 = vld [vmem:[#allocation7 + $0x1c8] sm:$0xff] }
  0xc3   :  { %1056 = vmatpush.msrb.mxu2 %v4549_v13  ;;  %1093 = vmatpush.msrb.mxu0 %v7835_v56  ;;  %v5298_v58 = vld [vmem:[#allocation7 + $0x198] sm:$0xff] }
  0xc4   :  { %1036 = vmatpush.msrb.mxu1 %v7824_v21  ;;  %1076 = vmatpush.msrb.mxu3 %v4551_v2 }
  0xc5   :  { %1121 = vmatpush.msra.mxu2 %v7826_v46  ;;  %1094 = vmatpush.msrb.mxu0 %v7838_v63  ;;  %v7862_v63 = vld [vmem:[#allocation64_spill] sm:$0xff] }
  0xc6   :  { %1101 = vmatpush.msra.mxu1 %v7825_v45  ;;  %v4883_v48 = vpop.f32.mrf.mxu2  ;;  %v4885_v13 = vpop.f32.mrf.mxu3  ;;  %1141 = vmatpush.msra.mxu3 %v7829_v49  ;;  %v7851_v49 = vld [vmem:[#allocation57_spill] sm:$0xff]  ;;  %7915 = vst [vmem:[#allocation64_spill] sm:$0xff] %v5307_v37 }
  0xc7   :  { %7827 = vst [vmem:[#allocation21_spill] sm:$0xff] %v4883_v48  ;;  %v4889_v2 = vpop.f32.mrf.mxu1  ;;  %v339_v51 = vpop.f32.mrf.mxu0  ;;  %1122 = vmatpush.msra.mxu2 %v7833_v53  ;;  %1095 = vmatpush.msrb.mxu0 %v7841_v7  ;;  %v7855_v53 = vld [vmem:[#allocation61_spill] sm:$0xff] }
  0xc8   :  { %7828 = vst [vmem:[#allocation14_spill] sm:$0xff] %v4885_v13  ;;  %1102 = vmatpush.msra.mxu1 %v7832_v52  ;;  %v4894_v54 = vadd.f32 %v339_v51, %v4881_v47  ;;  %1142 = vmatpush.msra.mxu3 %v7834_v55  ;;  %v7853_v51 = vld [vmem:[#allocation59_spill] sm:$0xff]  ;;  %v7854_v52 = vld [vmem:[#allocation60_spill] sm:$0xff]  ;;  %v7866_v7 = vld [vmem:[#allocation69_spill] sm:$0xff] }
  0xc9   :  { %7831 = vst [vmem:[#allocation20_spill] sm:$0xff] %v4889_v2  ;;  %1123 = vmatpush.msra.mxu2 %v7836_v59  ;;  %1096 = vmatpush.msrb.mxu0 %v7847_v19  ;;  %v7859_v59 = vld [vmem:[#allocation63_spill] sm:$0xff]  ;;  %v5274_v13 = vld [vmem:[#allocation7 + $0x218] sm:$0xff]  ;;  %v5277_v48 = vld [vmem:[#allocation7 + $0x1c0] sm:$0xff] }
  0xca   :  { %1103 = vmatpush.msra.mxu1 %v4587_v22  ;;  %1143 = vmatpush.msra.mxu3 %v7837_v60  ;;  %7912 = vst [vmem:[#allocation61_spill] sm:$0xff] %v5298_v58 }
  0xcb   :  { %1124 = vmatpush.msra.mxu2 %v4605_v18  ;;  %v7849_v18 = vld [vmem:[#allocation56_spill] sm:$0xff]  ;;  %7914 = vst [vmem:[#allocation63_spill] sm:$0xff] %v5304_v44 }
  0xcc   :  { %1104 = vmatpush.msra.mxu1 %v7839_v0  ;;  %1144 = vmatpush.msra.mxu3 %v7840_v6  ;;  %v7863_v0 = vld [vmem:[#allocation65_spill] sm:$0xff]  ;;  %v7865_v6 = vld [vmem:[#allocation67_spill] sm:$0xff]  ;;  %7907 = vst [vmem:[#allocation56_spill] sm:$0xff] %v5283_v43 }
  0xcd   :  { %1125 = vmatpush.msra.mxu2 %v7843_v10  ;;  %v7868_v10 = vld [vmem:[#allocation70_spill] sm:$0xff] }
  0xce   :  { %1105 = vmatpush.msra.mxu1 %v7842_v8  ;;  %v4908_v11 = vpop.f32.mrf.mxu2  ;;  %v4910_v22 = vpop.f32.mrf.mxu3  ;;  %1145 = vmatpush.msra.mxu3 %v7846_v15  ;;  %v7867_v8 = vld [vmem:[#allocation68_spill] sm:$0xff]  ;;  %v7871_v15 = vld [vmem:[#allocation71_spill] sm:$0xff]  ;;  %7921 = vst [vmem:[#allocation70_spill] sm:$0xff] %v5325_v40 }
  0xcf   :  { %7844 = vst [vmem:[#allocation22_spill] sm:$0xff] %v4908_v11  ;;  %v4914_v21 = vpop.f32.mrf.mxu1  ;;  %v342_v45 = vpop.f32.mrf.mxu0  ;;  %1126 = vmatpush.msra.mxu2 %v7849_v18 }
  0xd0   :  { %7845 = vst [vmem:[#allocation25_spill] sm:$0xff] %v4910_v22  ;;  %1106 = vmatpush.msra.mxu1 %v4623_v1  ;;  %v4919_v46 = vadd.f32 %v342_v45, %v4881_v47  ;;  %1146 = vmatpush.msra.mxu3 %v7851_v49  ;;  %v7856_v1 = vld [vmem:[#allocation62_spill] sm:$0xff] }
  0xd1   :  { %7848 = vst [vmem:[#allocation16_spill] sm:$0xff] %v4914_v21  ;;  %1127 = vmatpush.msra.mxu2 %v4638_v25 }
  0xd2   :  { %7850 = vst [vmem:[#allocation24_spill] sm:$0xff] %v4919_v46  ;;  %1107 = vmatpush.msra.mxu1 %v4636_v14  ;;  %1147 = vmatpush.msra.mxu3 %v7852_v50  ;;  %v5319_v46 = vld [vmem:[#allocation7 + $0x110] sm:$0xff] }
  0xd3   :  { %1128 = vmatpush.msra.mxu2 %v7854_v52  ;;  %7913 = vst [vmem:[#allocation62_spill] sm:$0xff] %v5301_v57 }
  0xd4   :  { %1108 = vmatpush.msra.mxu1 %v7853_v51  ;;  %1148 = vmatpush.msra.mxu3 %v7855_v53  ;;  %7919 = vst [vmem:[#allocation69_spill] sm:$0xff] %v5319_v46 }
  0xd5   :  { %1129 = vmatpush.msra.mxu2 %v4661_v17  ;;  %v7864_v17 = vld [vmem:[#allocation66_spill] sm:$0xff]  ;;  %7920 = vst [vmem:[#allocation68_spill] sm:$0xff] %v5322_v41 }
  0xd6   :  { %1109 = vmatpush.msra.mxu1 %v7856_v1  ;;  %v4930_v55 = vpop.f32.mrf.mxu2  ;;  %v4932_v56 = vpop.f32.mrf.mxu3  ;;  %1149 = vmatpush.msra.mxu3 %v7859_v59  ;;  %7922 = vst [vmem:[#allocation71_spill] sm:$0xff] %v5328_v39 }
  0xd7   :  { %7857 = vst [vmem:[#allocation26_spill] sm:$0xff] %v4930_v55  ;;  %v4935_v14 = vpop.f32.mrf.mxu1  ;;  %v345_v25 = vpop.f32.mrf.mxu0  ;;  %1130 = vmatpush.msra.mxu2 %v4675_v29 }
  0xd8   :  { %7858 = vst [vmem:[#allocation19_spill] sm:$0xff] %v4932_v56  ;;  %1110 = vmatpush.msra.mxu1 %v4673_v23  ;;  %v4940_v60 = vadd.f32 %v345_v25, %v4881_v47  ;;  %1150 = vmatpush.msra.mxu3 %v7862_v63 }
  0xd9   :  { %7860 = vst [vmem:[#allocation28_spill] sm:$0xff] %v4935_v14  ;;  %1131 = vmatpush.msra.mxu2 %v7864_v17 }
  0xda   :  { %7861 = vst [vmem:[#allocation29_spill] sm:$0xff] %v4940_v60  ;;  %1111 = vmatpush.msra.mxu1 %v7863_v0  ;;  %1151 = vmatpush.msra.mxu3 %v7865_v6  ;;  %v5295_v60 = vld [vmem:[#allocation7 + $0x190] sm:$0xff] }
  0xdb   :  { %1132 = vmatpush.msra.mxu2 %v7867_v8  ;;  %7911 = vst [vmem:[#allocation60_spill] sm:$0xff] %v5295_v60 }
  0xdc   :  { %1112 = vmatpush.msra.mxu1 %v7866_v7  ;;  %1152 = vmatpush.msra.mxu3 %v7868_v10 }
  0xdd   :  { %1133 = vmatpush.msra.mxu2 %v4706_v24  ;;  %v7873_v24 = vld [vmem:[#allocation72_spill] sm:$0xff] }
  0xde   :  { %1113 = vmatpush.msra.mxu1 %v4712_v27  ;;  %v4951_v29 = vpop.f32.mrf.mxu2  ;;  %v4953_v23 = vpop.f32.mrf.mxu3  ;;  %1153 = vmatpush.msra.mxu3 %v7871_v15  ;;  %v7874_v27 = vld [vmem:[#allocation75_spill] sm:$0xff]  ;;  %7923 = vst [vmem:[#allocation72_spill] sm:$0xff] %v5331_v34 }
  0xdf   :  { %7869 = vst [vmem:[#allocation32_spill] sm:$0xff] %v4951_v29  ;;  %v348_v19 = vpop.f32.mrf.mxu0  ;;  %v4956_v45 = vpop.f32.mrf.mxu1  ;;  %1134 = vmatpush.msra.mxu2 %v4718_v28 }
  0xe0   :  { %7870 = vst [vmem:[#allocation23_spill] sm:$0xff] %v4953_v23  ;;  %1114 = vmatpush.msra.mxu1 %v4721_v16  ;;  %v4961_v18 = vadd.f32 %v348_v19, %v4881_v47  ;;  %1154 = vmatpush.msra.mxu3 %v4723_v12  ;;  %v4971_v16 = vperm.slane %v4876_v42, 5  ;;  %v7889_v23 = vld [vmem:[#allocation73_spill] sm:$0xff] }
  0xe1   :  { %1135 = vmatpush.msra.mxu2 %v7873_v24 }
  0xe2   :  { %7872 = vst [vmem:[#allocation31_spill] sm:$0xff] %v4961_v18  ;;  %1115 = vmatpush.msra.mxu1 %v4740_v30  ;;  %1155 = vmatpush.msra.mxu3 %v7874_v27  ;;  %v5271_v18 = vld [vmem:[#allocation7 + $0x210] sm:$0xff] }
  0xe3   :  { %1136 = vmatpush.msra.mxu2 %v4743_v3 }
  0xe4   :  { %1116 = vmatpush.msra.mxu1 %v4755_v31  ;;  %1156 = vmatpush.msra.mxu3 %v4749_v9  ;;  %v4984_v31 = vperm.slane %v4876_v42, 6  ;;  %v4987_v9 = vperm.slane %v4876_v42, 7 }
  0xe6   :  { %v4973_v28 = vpop.f32.mrf.mxu2  ;;  %v4975_v49 = vpop.f32.mrf.mxu3 }
  0xe7   :  { %v351_v12 = vpop.f32.mrf.mxu0  ;;  %v380_v50 = vpop.f32.mrf.mxu1 }
  0xe8   :  { %v4978_v30 = vadd.f32 %v351_v12, %v4881_v47  ;;  %v4981_v51 = vadd.f32 %v380_v50, %v4971_v16 }
  0xea   :  { %7875 = vst [vmem:[#allocation33_spill] sm:$0xff] %v4978_v30  ;;  %v460_v30 = vadd.f32 %v4975_v49, %v4987_v9 }
  0xee   :  { %v421_v3 = vpop.f32.mrf.mxu2  ;;  %v462_v52 = vpop.f32.mrf.mxu3 }
  0xef   :  { %v4990_v53 = vadd.f32 %v421_v3, %v4984_v31  ;;  %v4993_v1 = vadd.f32 %v462_v52, %v4987_v9  ;;  %v354_v59 = vpop.f32.mrf.mxu0  ;;  %v383_v25 = vpop.f32.mrf.mxu1 }
  0xf0   :  { %v4996_v63 = vadd.f32 %v354_v59, %v4881_v47  ;;  %v4999_v0 = vadd.f32 %v383_v25, %v4971_v16 }
  0xf2   :  { %7876 = vst [vmem:[#allocation36_spill] sm:$0xff] %v4996_v63 }
  0xf3   :  { %7877 = vst [vmem:[#allocation27_spill] sm:$0xff] %v4999_v0  ;;  %v5316_v0 = vld [vmem:[#allocation7 + $0x108] sm:$0xff] }
  0xf4   :  { %7918 = vst [vmem:[#allocation67_spill] sm:$0xff] %v5316_v0 }
  0xf6   :  { %v424_v17 = vpop.f32.mrf.mxu2  ;;  %v465_v6 = vpop.f32.mrf.mxu3 }
  0xf7   :  { %v5002_v7 = vadd.f32 %v424_v17, %v4984_v31  ;;  %v5005_v8 = vadd.f32 %v465_v6, %v4987_v9  ;;  %v357_v10 = vpop.f32.mrf.mxu0  ;;  %v386_v15 = vpop.f32.mrf.mxu1 }
  0xf8   :  { %v5008_v19 = vadd.f32 %v357_v10, %v4881_v47  ;;  %v5011_v24 = vadd.f32 %v386_v15, %v4971_v16 }
  0xf9   :  { %7878 = vst [vmem:[#allocation35_spill] sm:$0xff] %v5002_v7  ;;  %v5313_v7 = vld [vmem:[#allocation7 + $0x100] sm:$0xff] }
  0xfa   :  { %7879 = vst [vmem:[#allocation37_spill] sm:$0xff] %v5005_v8  ;;  %v5310_v8 = vld [vmem:[#allocation7 + $0x158] sm:$0xff] }
  0xfb   :  { %7880 = vst [vmem:[#allocation30_spill] sm:$0xff] %v5008_v19 }
  0xfc   :  { %7881 = vst [vmem:[#allocation39_spill] sm:$0xff] %v5011_v24  ;;  %v5292_v24 = vld [vmem:[#allocation7 + $0x188] sm:$0xff] }
  0xfd   :  { %7910 = vst [vmem:[#allocation59_spill] sm:$0xff] %v5292_v24 }
  0xfe   :  { %v427_v27 = vpop.f32.mrf.mxu2  ;;  %v468_v12 = vpop.f32.mrf.mxu3  ;;  %7916 = vst [vmem:[#allocation65_spill] sm:$0xff] %v5310_v8 }
  0xff   :  { %v5014_v50 = vadd.f32 %v427_v27, %v4984_v31  ;;  %v5017_v3 = vadd.f32 %v468_v12, %v4987_v9  ;;  %v389_v52 = vpop.f32.mrf.mxu1  ;;  %v703_v25 = vpop.f32.mrf.mxu0  ;;  %v5029_v27 = vperm.slane %v4876_v42, 0  ;;  %7917 = vst [vmem:[#allocation66_spill] sm:$0xff] %v5313_v7 }
 0x100   :  { %v5020_v59 = vadd.f32 %v389_v52, %v4971_v16 }
 0x101   :  { %7882 = vst [vmem:[#allocation41_spill] sm:$0xff] %v5014_v50  ;;  %v173_v52 = vadd.f32 %v7889_v23, %v5029_v27  ;;  %v5289_v50 = vld [vmem:[#allocation7 + $0x180] sm:$0xff] }
 0x102   :  { %7883 = vst [vmem:[#allocation42_spill] sm:$0xff] %v5017_v3  ;;  %v5286_v3 = vld [vmem:[#allocation7 + $0x1d8] sm:$0xff] }
 0x103   :  { %7884 = vst [vmem:[#allocation43_spill] sm:$0xff] %v5020_v59  ;;  %v846_v29 = vadd.f32 %v703_v25, %v173_v52  ;;  %v5268_v59 = vld [vmem:[#allocation7 + $0x208] sm:$0xff] }
 0x104   :  { %7887 = vst [vmem:[#allocation46_spill] sm:$0xff] %v5029_v27 }
 0x105   :  { %v3319_v21 = vmul.f32 -1.442695, %v846_v29  ;;  %7908 = vst [vmem:[#allocation57_spill] sm:$0xff] %v5286_v3 }
 0x106   :  { %v430_v17 = vpop.f32.mrf.mxu2  ;;  %v471_v6 = vpop.f32.mrf.mxu3  ;;  %7909 = vst [vmem:[#allocation58_spill] sm:$0xff] %v5289_v50 }
 0x107   :  { %v5023_v10 = vadd.f32 %v430_v17, %v4984_v31  ;;  %v5026_v15 = vadd.f32 %v471_v6, %v4987_v9  ;;  %v392_v19 = vpop.f32.mrf.mxu1  ;;  %v783_v14 = vpop.f32.mrf.mxu0  ;;  %v337_v17 = vadd.f32 %v4859_v62, %v4881_v47  ;;  %3398 = vpow2.f32 %v3319_v21 }
 0x108   :  { %v5032_v12 = vadd.f32 %v392_v19, %v4971_v16 }
 0x109   :  { %7885 = vst [vmem:[#allocation34_spill] sm:$0xff] %v5023_v10  ;;  %v850_v32 = vadd.f32 %v783_v14, %v337_v17 }
 0x10a   :  { %7886 = vst [vmem:[#allocation45_spill] sm:$0xff] %v5026_v15 }
 0x10b   :  { %7888 = vst [vmem:[#allocation47_spill] sm:$0xff] %v5032_v12  ;;  %v3323_v23 = vmul.f32 -1.442695, %v850_v32 }
 0x10d   :  { %3400 = vpow2.f32 %v3323_v23  ;;  %v3399_v29 = vpop.eup %3398 }
 0x10e   :  { %v433_v20 = vpop.f32.mrf.mxu2  ;;  %v474_v63 = vpop.f32.mrf.mxu3  ;;  %v5059_v14 = vadd.f32 1.0, %v3399_v29  ;;  %v5073_v29 = vperm.slane %v4876_v42, 3 }
 0x10f   :  { %v5039_v6 = vadd.f32 %v433_v20, %v4984_v31  ;;  %v5042_v56 = vadd.f32 %v474_v63, %v4987_v9  ;;  %v395_v55 = vpop.f32.mrf.mxu1 }
 0x110   :  { %v5045_v19 = vadd.f32 %v395_v55, %v4971_v16  ;;  %v5057_v55 = vperm.slane %v4876_v42, 1  ;;  %7900 = vst [vmem:[#allocation48_spill] sm:$0xff] %v5073_v29  ;;  %3402 = vrcp.f32 %v5059_v14  ;;  %vm883_vm2 = vweird.f32 %v5059_v14 }
 0x111   :  { %7890 = vst [vmem:[#allocation38_spill] sm:$0xff] %v5039_v6 }
 0x112   :  { %7891 = vst [vmem:[#allocation49_spill] sm:$0xff] %v5042_v56  ;;  %v214_v32 = vadd.f32 %v4768_v4, %v5057_v55 }
 0x113   :  { %7892 = vst [vmem:[#allocation50_spill] sm:$0xff] %v5045_v19  ;;  %v3401_v17 = vpop.eup %3400 }
 0x114   :  { %7896 = vst [vmem:[#allocation44_spill] sm:$0xff] %v5057_v55  ;;  %v5076_v4 = vadd.f32 1.0, %v3401_v17 }
 0x116   :  { %v436_v25 = vpop.f32.mrf.mxu2  ;;  %v477_v52 = vpop.f32.mrf.mxu3  ;;  %vm943_vm4 = vweird.f32 %v5076_v4  ;;  %v947_v15 = vand.u32 2147483647, %v5076_v4 }
 0x117   :  { %v5048_v12 = vadd.f32 %v436_v25, %v4984_v31  ;;  %v5051_v62 = vadd.f32 %v477_v52, %v4987_v9  ;;  %v398_v20 = vpop.f32.mrf.mxu1 }
 0x118   :  { %v5054_v47 = vadd.f32 %v398_v20, %v4971_v16  ;;  %vm948_vm14 = vcmp.eq.f32.partialorder %v947_v15, 8.507059e+37 }
 0x119   :  { %7893 = vst [vmem:[#allocation40_spill] sm:$0xff] %v5048_v12 }
 0x11a   :  { %7894 = vst [vmem:[#allocation51_spill] sm:$0xff] %v5051_v62 }
 0x11b   :  { %7895 = vst [vmem:[#allocation52_spill] sm:$0xff] %v5054_v47  ;;  %v5070_v47 = vperm.slane %v4876_v42, 2 }
 0x11d   :  { %7899 = vst [vmem:[#allocation55_spill] sm:$0xff] %v5070_v47 }
 0x11e   :  { %v439_v21 = vpop.f32.mrf.mxu2  ;;  %v480_v63 = vpop.f32.mrf.mxu3 }
 0x11f   :  { %v5064_v25 = vadd.f32 %v439_v21, %v4984_v31  ;;  %v5067_v52 = vadd.f32 %v480_v63, %v4987_v9  ;;  %v723_v20 = vpop.f32.mrf.mxu1  ;;  %v255_v21 = vadd.f32 %v4779_v5, %v5070_v47  ;;  %v296_v63 = vadd.f32 %v4781_v33, %v5073_v29 }
 0x120   :  { %v847_v23 = vadd.f32 %v723_v20, %v214_v32  ;;  %v378_v32 = vadd.f32 %v4956_v45, %v4971_v16  ;;  %v419_v16 = vadd.f32 %v4973_v28, %v4984_v31 }
 0x121   :  { %7897 = vst [vmem:[#allocation53_spill] sm:$0xff] %v5064_v25 }
 0x122   :  { %7898 = vst [vmem:[#allocation54_spill] sm:$0xff] %v5067_v52  ;;  %v3320_v62 = vmul.f32 -1.442695, %v847_v23  ;;  %v5085_v52 = vpop.eup %3402 }
 0x123   :  { %v879_v5 = vmul.f32 %v5085_v52, %v5059_v14  ;;  %vm884_vm1 = vweird.f32 %v5085_v52 }
 0x124   :  { %3404 = vpow2.f32 %v3320_v62  ;;  %vm5116_vm5 = vmor %vm883_vm2, %vm884_vm1 }
 0x125   :  { %3406 = vrcp.f32 %v5076_v4 }
 0x126   :  { %v743_v20 = vpop.f32.mrf.mxu2  ;;  %v763_v42 = vpop.f32.mrf.mxu3 }
 0x127   :  { %v848_v25 = vadd.f32 %v743_v20, %v255_v21  ;;  %v849_v17 = vadd.f32 %v763_v42, %v296_v63  ;;  %v803_v12 = vpop.f32.mrf.mxu1  ;;  %v880_v21 = vsub.f32 1.0, %v879_v5  ;;  %v887_v5 = vand.u32 2147483647, %v5059_v14 }
 0x128   :  { %v851_v23 = vadd.f32 %v803_v12, %v378_v32 }
 0x129   :  { %v3321_v62 = vmul.f32 -1.442695, %v848_v25  ;;  %v3322_v19 = vmul.f32 -1.442695, %v849_v17  ;;  %vm5120_vm6 = vcmp.eq.f32.partialorder %v887_v5, 8.507059e+37 }
 0x12a   :  { %v3405_v56 = vpop.eup %3404  ;;  %v3324_v33 = vmul.f32 -1.442695, %v851_v23 }
 0x12b   :  { %v873_v6 = vadd.f32 1.0, %v3405_v56  ;;  %3408 = vpow2.f32 %v3321_v62  ;;  %v5089_v45 = vpop.eup %3406  ;;  %v881_v56 = vmul.f32 %v5085_v52, %v880_v21 }
 0x12c   :  { %3410 = vpow2.f32 %v3322_v19  ;;  %v939_v12 = vmul.f32 %v5089_v45, %v5076_v4  ;;  %vm944_vm8 = vweird.f32 %v5089_v45 }
 0x12d   :  { %3412 = vrcp.f32 %v873_v6  ;;  %v882_v21 = vadd.f32 %v5085_v52, %v881_v56  ;;  %vm898_vm7 = vweird.f32 %v873_v6  ;;  %vm5148_vm11 = vmor %vm943_vm4, %vm944_vm8 }
 0x12e   :  { %3414 = vpow2.f32 %v3324_v33  ;;  %v823_v63 = vpop.f32.mrf.mxu2  ;;  %v940_v23 = vsub.f32 1.0, %v939_v12  ;;  %v889_v33 = vand.u32 2147483648, %v5059_v14  ;;  %v904_v12 = vand.u32 2147483648, %v873_v6 }
 0x12f   :  { %v852_v25 = vadd.f32 %v823_v63, %v419_v16  ;;  %v886_v14 = vsel %vm5116_vm5, %v5085_v52, %v882_v21 }
 0x130   :  { %v941_v63 = vmul.f32 %v5089_v45, %v940_v23  ;;  %v905_v22 = vor.u32 1.1754944e-38, %v904_v12 }
 0x131   :  { %v3409_v32 = vpop.eup %3408  ;;  %3416 = vtanh.f32 %v852_v25 }
 0x132   :  { %v3411_v20 = vpop.eup %3410  ;;  %v5095_v42 = vadd.f32 1.0, %v3409_v32  ;;  %v902_v32 = vand.u32 2147483647, %v873_v6 }
 0x133   :  { %v3413_v17 = vpop.eup %3412  ;;  %v5098_v19 = vadd.f32 1.0, %v3411_v20  ;;  %v843_v20 = vpop.f32.mrf.mxu3 }
 0x134   :  { %v3415_v28 = vpop.eup %3414  ;;  %v894_v31 = vmul.f32 %v3413_v17, %v873_v6  ;;  %3418 = vrcp.f32 %v5095_v42  ;;  %vm899_vm3 = vweird.f32 %v3413_v17  ;;  %v853_v11 = vadd.f32 %v843_v20, %v460_v30 }
 0x135   :  { %3420 = vrcp.f32 %v5098_v19  ;;  %v5102_v62 = vadd.f32 1.0, %v3415_v28  ;;  %vm900_vm9 = vmor %vm898_vm7, %vm899_vm3  ;;  %v949_v6 = vand.u32 2147483648, %v5076_v4  ;;  %vm903_vm10 = vcmp.eq.f32.partialorder %v902_v32, 8.507059e+37 }
 0x136   :  { %v895_v16 = vsub.f32 1.0, %v894_v31  ;;  %v890_v31 = vor.u32 1.1754944e-38, %v889_v33  ;;  %v942_v33 = vadd.f32 %v5089_v45, %v941_v63  ;;  %vm928_vm13 = vweird.f32 %v5098_v19 }
 0x137   :  { %3422 = vrcp.f32 %v5102_v62  ;;  %v3417_v28 = vpop.eup %3416  ;;  %v950_v4 = vor.u32 1.1754944e-38, %v949_v6  ;;  %v919_v15 = vand.u32 2147483648, %v5095_v42  ;;  %vm913_vm2 = vweird.f32 %v5095_v42 }
 0x138   :  { %v896_v25 = vmul.f32 %v3413_v17, %v895_v16  ;;  %v891_v21 = vsel %vm5120_vm6, %v890_v31, %v886_v14  ;;  %3424 = vtanh.f32 %v853_v11  ;;  %v932_v31 = vand.u32 2147483647, %v5098_v19 }
 0x139   :  { %v971_v20 = vmul.f32 %v3417_v28, %v891_v21  ;;  %vm958_vm5 = vweird.f32 %v5102_v62 }
 0x13a   :  { %v5124_v16 = vpop.eup %3418  ;;  %v897_v49 = vadd.f32 %v3413_v17, %v896_v25  ;;  %v982_v25 = vstv %s5106_s4  ;;  %vm933_vm0 = vcmp.eq.f32.partialorder %v932_v31, 8.507059e+37  ;;  %v920_v31 = vor.u32 1.1754944e-38, %v919_v15  ;;  %v5208_v15 = vld [vmem:[#allocation7 + $0x348] sm:$0xff] }
 0x13b   :  { %v3421_v9 = vpop.eup %3420  ;;  %v909_v5 = vmul.f32 %v5124_v16, %v5095_v42  ;;  %vm914_vm1 = vweird.f32 %v5124_v16 }
 0x13c   :  { %v924_v2 = vmul.f32 %v3421_v9, %v5098_v19  ;;  %v901_v56 = vsel %vm900_vm9, %v3413_v17, %v897_v49  ;;  %vm929_vm12 = vweird.f32 %v3421_v9  ;;  %vm915_vm4 = vmor %vm913_vm2, %vm914_vm1 }
 0x13d   :  { %v5136_v52 = vpop.eup %3422  ;;  %v906_v12 = vsel %vm903_vm10, %v905_v22, %v901_v56  ;;  %v910_v32 = vsub.f32 1.0, %v909_v5  ;;  %v934_v22 = vand.u32 2147483648, %v5098_v19  ;;  %vm930_vm15 = vmor %vm928_vm13, %vm929_vm12  ;;  %v984_v19 = vstv %s5156_s3 }
 0x13e   :  { %v925_v10 = vsub.f32 1.0, %v924_v2  ;;  %v954_v30 = vmul.f32 %v5136_v52, %v5102_v62  ;;  %v970_v63 = vmul.f32 0.0, %v906_v12  ;;  %v946_v2 = vsel %vm5148_vm11, %v5089_v45, %v942_v33 }
 0x13f   :  { %v911_v5 = vmul.f32 %v5124_v16, %v910_v32  ;;  %v935_v11 = vor.u32 1.1754944e-38, %v934_v22  ;;  %v951_v45 = vsel %vm948_vm14, %v950_v4, %v946_v2  ;;  %vm959_vm3 = vweird.f32 %v5136_v52 }
 0x140   :  { %v972_v23 = vadd.f32 %v971_v20, %v970_v63  ;;  %v926_v28 = vmul.f32 %v3421_v9, %v925_v10  ;;  %v955_v14 = vsub.f32 1.0, %v954_v30  ;;  %v3425_v10 = vpop.eup %3424  ;;  %v973_v6 = vmul.f32 0.0, %v951_v45  ;;  %vm960_vm6 = vmor %vm958_vm5, %vm959_vm3 }
 0x141   :  { %v912_v63 = vadd.f32 %v5124_v16, %v911_v5  ;;  %v964_v32 = vand.u32 2147483648, %v5102_v62 }
 0x142   :  { %v987_v49 = vmul.f32 %v982_v25, %v972_v23  ;;  %v927_v56 = vadd.f32 %v3421_v9, %v926_v28  ;;  %v956_v21 = vmul.f32 %v5136_v52, %v955_v14  ;;  %3426 = vtanh.f32 %v972_v23 }
 0x143   :  { %v916_v2 = vsel %vm915_vm4, %v5124_v16, %v912_v63  ;;  %v962_v23 = vand.u32 2147483647, %v5102_v62  ;;  %v965_v14 = vor.u32 1.1754944e-38, %v964_v32  ;;  %v5181_v62 = vld [vmem:[#allocation7 + $0x3c0] sm:$0xff]  ;;  %v5202_v63 = vld [vmem:[#allocation7 + $0x398] sm:$0xff]  ;;  %v5220_v32 = vld [vmem:[#allocation7 + $0x308] sm:$0xff] }
 0x144   :  { %v931_v33 = vsel %vm930_vm15, %v3421_v9, %v927_v56  ;;  %v917_v9 = vand.u32 2147483647, %v5095_v42  ;;  %v957_v17 = vadd.f32 %v5136_v52, %v956_v21 }
 0x145   :  { %v936_v12 = vsel %vm933_vm0, %v935_v11, %v931_v33  ;;  %vm963_vm8 = vcmp.eq.f32.partialorder %v962_v23, 8.507059e+37  ;;  %v5229_v23 = vld [vmem:[#allocation7 + $0x2c0] sm:$0xff] }
 0x146   :  { %v974_v30 = vmul.f32 %v3425_v10, %v936_v12  ;;  %vm918_vm7 = vcmp.eq.f32.partialorder %v917_v9, 8.507059e+37  ;;  %v961_v4 = vsel %vm960_vm6, %v5136_v52, %v957_v17  ;;  %v5184_v52 = vld [vmem:[#allocation7 + $0x3c8] sm:$0xff]  ;;  %v5190_v12 = vld [vmem:[#allocation7 + $0x3d8] sm:$0xff]  ;;  %v5217_v17 = vld [vmem:[#allocation7 + $0x300] sm:$0xff] }
 0x147   :  { %v921_v56 = vsel %vm918_vm7, %v920_v31, %v916_v2  ;;  %v966_v45 = vsel %vm963_vm8, %v965_v14, %v961_v4  ;;  %v5214_v9 = vld [vmem:[#allocation7 + $0x358] sm:$0xff]  ;;  %v5235_v31 = vld [vmem:[#allocation7 + $0x2d0] sm:$0xff]  ;;  %v5241_v14 = vld [vmem:[#allocation7 + $0x280] sm:$0xff] }
 0x148   :  { %v975_v20 = vadd.f32 %v974_v30, %v973_v6  ;;  %v3427_v28 = vpop.eup %3426  ;;  %v5196_v6 = vld [vmem:[#allocation7 + $0x388] sm:$0xff]  ;;  %v5199_v30 = vld [vmem:[#allocation7 + $0x390] sm:$0xff]  ;;  %v5226_v2 = vld [vmem:[#allocation7 + $0x318] sm:$0xff] }
 0x149   :  { %v977_v5 = vmul.f32 %v3427_v28, %v921_v56  ;;  %v5232_v28 = vld [vmem:[#allocation7 + $0x2c8] sm:$0xff]  ;;  %v5238_v4 = vld [vmem:[#allocation7 + $0x2d8] sm:$0xff] }
 0x14a   :  { %3428 = vtanh.f32 %v975_v20  ;;  %v988_v22 = vmul.f32 %v984_v19, %v975_v20  ;;  %v5211_v20 = vld [vmem:[#allocation7 + $0x350] sm:$0xff]  ;;  %v5244_v56 = vld [vmem:[#allocation7 + $0x288] sm:$0xff] }
 0x14b   :  { %v983_v33 = vmul.f32 %v982_v25, %v977_v5  ;;  %v5193_v25 = vld [vmem:[#allocation7 + $0x380] sm:$0xff]  ;;  %v5247_v5 = vld [vmem:[#allocation7 + $0x290] sm:$0xff] }
 0x14c   :  { %v5176_v42 = vadd.f32 %v988_v22, %v987_v49  ;;  %v5187_v49 = vld [vmem:[#allocation7 + $0x3d0] sm:$0xff] }
 0x14d   :  { %v5223_v22 = vld [vmem:[#allocation7 + $0x310] sm:$0xff] }
 0x150   :  { %v3429_v11 = vpop.eup %3428 }
 0x151   :  { %v979_v16 = vmul.f32 %v3429_v11, %v966_v45  ;;  %v5250_v11 = vld [vmem:[#allocation7 + $0x298] sm:$0xff]  ;;  %v5253_v45 = vld [vmem:[#allocation7 + $0x240] sm:$0xff] }
 0x153   :  { %v985_v10 = vmul.f32 %v984_v19, %v979_v16  ;;  %v5205_v19 = vld [vmem:[#allocation7 + $0x340] sm:$0xff]  ;;  %v5256_v16 = vld [vmem:[#allocation7 + $0x248] sm:$0xff] }
 0x155   :  { %v986_v21 = vadd.f32 %v985_v10, %v983_v33  ;;  %v5259_v33 = vld [vmem:[#allocation7 + $0x250] sm:$0xff]  ;;  %v5262_v10 = vld [vmem:[#allocation7 + $0x258] sm:$0xff] }
 0x157   :  { %1017 = vmatmul.f32.vlgmr.msra.gmra.mxu0 %v986_v21  ;;  %1037 = vmatmul.f32.vlgmr.msrb.gmra.mxu1 %v986_v21 }
 0x158   :  { %1057 = vmatmul.f32.vlgmr.msrb.gmra.mxu2 %v986_v21  ;;  %1077 = vmatmul.f32.vlgmr.msrb.gmra.mxu3 %v986_v21 }
 0x159   :  { %1316 = vmatpush.msra.mxu0 %v5181_v62  ;;  %1336 = vmatpush.msrb.mxu1 %v5184_v52 }
 0x15a   :  { %1356 = vmatpush.msrb.mxu2 %v5187_v49  ;;  %1376 = vmatpush.msrb.mxu3 %v5190_v12 }
 0x15b   :  { %1317 = vmatpush.msra.mxu0 %v5193_v25  ;;  %1337 = vmatpush.msrb.mxu1 %v5196_v6 }
 0x15c   :  { %1357 = vmatpush.msrb.mxu2 %v5199_v30  ;;  %1377 = vmatpush.msrb.mxu3 %v5202_v63 }
 0x15d   :  { %1318 = vmatpush.msra.mxu0 %v5205_v19  ;;  %1338 = vmatpush.msrb.mxu1 %v5208_v15 }
 0x15e   :  { %1358 = vmatpush.msrb.mxu2 %v5211_v20  ;;  %1378 = vmatpush.msrb.mxu3 %v5214_v9 }
 0x15f   :  { %1097 = vmatmul.f32.vlgmr.msrb.gmra.mxu0 %v986_v21  ;;  %1117 = vmatmul.f32.vlgmr.msra.gmra.mxu1 %v986_v21 }
 0x160   :  { %1137 = vmatmul.f32.vlgmr.msra.gmra.mxu2 %v986_v21  ;;  %1157 = vmatmul.f32.vlgmr.msra.gmra.mxu3 %v986_v21  ;;  %v5265_v21 = vld [vmem:[#allocation7 + $0x200] sm:$0xff] }
 0x161   :  { %1319 = vmatpush.msra.mxu0 %v5217_v17  ;;  %1339 = vmatpush.msrb.mxu1 %v5220_v32 }
 0x162   :  { %1359 = vmatpush.msrb.mxu2 %v5223_v22  ;;  %1379 = vmatpush.msrb.mxu3 %v5226_v2 }
 0x163   :  { %1320 = vmatpush.msra.mxu0 %v5229_v23  ;;  %1340 = vmatpush.msrb.mxu1 %v5232_v28 }
 0x164   :  { %1360 = vmatpush.msrb.mxu2 %v5235_v31  ;;  %1380 = vmatpush.msrb.mxu3 %v5238_v4 }
 0x165   :  { %1321 = vmatpush.msra.mxu0 %v5241_v14  ;;  %1341 = vmatpush.msrb.mxu1 %v5244_v56 }
 0x166   :  { %1361 = vmatpush.msrb.mxu2 %v5247_v5  ;;  %1381 = vmatpush.msrb.mxu3 %v5250_v11 }
 0x167   :  { %1322 = vmatpush.msra.mxu0 %v5253_v45  ;;  %1342 = vmatpush.msrb.mxu1 %v5256_v16 }
 0x168   :  { %1362 = vmatpush.msrb.mxu2 %v5259_v33  ;;  %1382 = vmatpush.msrb.mxu3 %v5262_v10 }
 0x169   :  { %1323 = vmatpush.msra.mxu0 %v5265_v21  ;;  %1343 = vmatpush.msrb.mxu1 %v5268_v59 }
 0x16a   :  { %1363 = vmatpush.msrb.mxu2 %v5271_v18  ;;  %1383 = vmatpush.msrb.mxu3 %v5274_v13 }
 0x16b   :  { %1324 = vmatpush.msra.mxu0 %v5277_v48  ;;  %1344 = vmatpush.msrb.mxu1 %v5280_v61 }
 0x16c   :  { %1364 = vmatpush.msrb.mxu2 %v5283_v43  ;;  %1384 = vmatpush.msrb.mxu3 %v5286_v3 }
 0x16d   :  { %1325 = vmatpush.msra.mxu0 %v5289_v50  ;;  %1345 = vmatpush.msrb.mxu1 %v5292_v24 }
 0x16e   :  { %1365 = vmatpush.msrb.mxu2 %v5295_v60  ;;  %1385 = vmatpush.msrb.mxu3 %v5298_v58 }
 0x16f   :  { %1326 = vmatpush.msra.mxu0 %v5301_v57  ;;  %1346 = vmatpush.msrb.mxu1 %v5304_v44  ;;  %v299_v57 = vadd.f32 %v4805_v36, %v5073_v29 }
 0x170   :  { %1366 = vmatpush.msrb.mxu2 %v5307_v37  ;;  %1386 = vmatpush.msrb.mxu3 %v5310_v8 }
 0x171   :  { %1327 = vmatpush.msra.mxu0 %v5313_v7  ;;  %1347 = vmatpush.msrb.mxu1 %v5316_v0  ;;  %v5334_v0 = vld [vmem:[#allocation7 + $0xd8] sm:$0xff] }
 0x172   :  { %1367 = vmatpush.msrb.mxu2 %v5319_v46  ;;  %1387 = vmatpush.msrb.mxu3 %v5322_v41  ;;  %7924 = vst [vmem:[#allocation75_spill] sm:$0xff] %v5334_v0  ;;  %v5337_v46 = vld [vmem:[#allocation7 + $0x80] sm:$0xff]  ;;  %v5340_v41 = vld [vmem:[#allocation7 + $0x88] sm:$0xff] }
 0x173   :  { %1328 = vmatpush.msra.mxu0 %v5325_v40  ;;  %1348 = vmatpush.msrb.mxu1 %v5328_v39  ;;  %7925 = vst [vmem:[#allocation73_spill] sm:$0xff] %v5337_v46  ;;  %v5343_v40 = vld [vmem:[#allocation7 + $0x90] sm:$0xff]  ;;  %v5346_v39 = vld [vmem:[#allocation7 + $0x98] sm:$0xff] }
 0x174   :  { %1368 = vmatpush.msrb.mxu2 %v5331_v34  ;;  %1388 = vmatpush.msrb.mxu3 %v5334_v0  ;;  %7926 = vst [vmem:[#allocation84_spill] sm:$0xff] %v5340_v41  ;;  %v5349_v34 = vld [vmem:[#allocation7 + $0x40] sm:$0xff]  ;;  %v5352_v0 = vld [vmem:[#allocation7 + $0x48] sm:$0xff] }
 0x175   :  { %1329 = vmatpush.msra.mxu0 %v5337_v46  ;;  %1349 = vmatpush.msrb.mxu1 %v5340_v41  ;;  %7927 = vst [vmem:[#allocation85_spill] sm:$0xff] %v5343_v40  ;;  %v5355_v46 = vld [vmem:[#allocation7 + $0x50] sm:$0xff]  ;;  %v5358_v41 = vld [vmem:[#allocation7 + $0x58] sm:$0xff] }
 0x176   :  { %1369 = vmatpush.msrb.mxu2 %v5343_v40  ;;  %7928 = vst [vmem:[#allocation86_spill] sm:$0xff] %v5346_v39  ;;  %1389 = vmatpush.msrb.mxu3 %v5346_v39  ;;  %v5361_v40 = vld [vmem:[#allocation7] sm:$0xff]  ;;  %v5364_v39 = vld [vmem:[#allocation7 + $0x8] sm:$0xff] }
 0x177   :  { %7929 = vst [vmem:[#allocation87_spill] sm:$0xff] %v5349_v34  ;;  %1330 = vmatpush.msra.mxu0 %v5349_v34  ;;  %1350 = vmatpush.msrb.mxu1 %v5352_v0  ;;  %v5367_v34 = vld [vmem:[#allocation7 + $0x10] sm:$0xff] }
 0x178   :  { %7930 = vst [vmem:[#allocation88_spill] sm:$0xff] %v5352_v0  ;;  %1370 = vmatpush.msrb.mxu2 %v5355_v46  ;;  %1390 = vmatpush.msrb.mxu3 %v5358_v41  ;;  %v5370_v0 = vld [vmem:[#allocation7 + $0x18] sm:$0xff] }
 0x179   :  { %7931 = vst [vmem:[#allocation89_spill] sm:$0xff] %v5355_v46  ;;  %1331 = vmatpush.msra.mxu0 %v5361_v40  ;;  %1351 = vmatpush.msrb.mxu1 %v5364_v39  ;;  %v5373_v46 = vld [vmem:[#allocation7 + $0x3e0] sm:$0xff] }
 0x17a   :  { %7932 = vst [vmem:[#allocation90_spill] sm:$0xff] %v5358_v41  ;;  %1371 = vmatpush.msrb.mxu2 %v5367_v34  ;;  %1391 = vmatpush.msrb.mxu3 %v5370_v0  ;;  %v5376_v41 = vld [vmem:[#allocation7 + $0x3e8] sm:$0xff] }
 0x17b   :  { %7933 = vst [vmem:[#allocation91_spill] sm:$0xff] %v5361_v40  ;;  %1396 = vmatpush.msrb.mxu0 %v5373_v46  ;;  %1416 = vmatpush.msra.mxu1 %v5376_v41  ;;  %v5379_v40 = vld [vmem:[#allocation7 + $0x3f0] sm:$0xff] }
 0x17c   :  { %7934 = vst [vmem:[#allocation92_spill] sm:$0xff] %v5364_v39  ;;  %1436 = vmatpush.msra.mxu2 %v5379_v40  ;;  %v5382_v39 = vld [vmem:[#allocation7 + $0x3f8] sm:$0xff] }
 0x17d   :  { %7935 = vst [vmem:[#allocation93_spill] sm:$0xff] %v5367_v34  ;;  %1456 = vmatpush.msra.mxu3 %v5382_v39  ;;  %v5385_v34 = vld [vmem:[#allocation7 + $0x3a0] sm:$0xff] }
 0x17e   :  { %7936 = vst [vmem:[#allocation94_spill] sm:$0xff] %v5370_v0  ;;  %1397 = vmatpush.msrb.mxu0 %v5385_v34  ;;  %v5388_v0 = vld [vmem:[#allocation7 + $0x3a8] sm:$0xff] }
 0x17f   :  { %7937 = vst [vmem:[#allocation95_spill] sm:$0xff] %v5373_v46  ;;  %1417 = vmatpush.msra.mxu1 %v5388_v0  ;;  %v5391_v46 = vld [vmem:[#allocation7 + $0x3b0] sm:$0xff] }
 0x180   :  { %7938 = vst [vmem:[#allocation96_spill] sm:$0xff] %v5376_v41  ;;  %1437 = vmatpush.msra.mxu2 %v5391_v46  ;;  %v5394_v41 = vld [vmem:[#allocation7 + $0x3b8] sm:$0xff] }
 0x181   :  { %7939 = vst [vmem:[#allocation97_spill] sm:$0xff] %v5379_v40  ;;  %1457 = vmatpush.msra.mxu3 %v5394_v41  ;;  %v5397_v40 = vld [vmem:[#allocation7 + $0x360] sm:$0xff] }
 0x182   :  { %7940 = vst [vmem:[#allocation98_spill] sm:$0xff] %v5382_v39  ;;  %1398 = vmatpush.msrb.mxu0 %v5397_v40  ;;  %v5400_v39 = vld [vmem:[#allocation7 + $0x368] sm:$0xff] }
 0x183   :  { %7941 = vst [vmem:[#allocation99_spill] sm:$0xff] %v5385_v34  ;;  %1418 = vmatpush.msra.mxu1 %v5400_v39  ;;  %v5403_v34 = vld [vmem:[#allocation7 + $0x370] sm:$0xff] }
 0x184   :  { %7942 = vst [vmem:[#allocation100_spill] sm:$0xff] %v5388_v0  ;;  %1438 = vmatpush.msra.mxu2 %v5403_v34  ;;  %v5406_v0 = vld [vmem:[#allocation7 + $0x378] sm:$0xff] }
 0x185   :  { %7943 = vst [vmem:[#allocation101_spill] sm:$0xff] %v5391_v46  ;;  %1458 = vmatpush.msra.mxu3 %v5406_v0  ;;  %v5409_v46 = vld [vmem:[#allocation7 + $0x320] sm:$0xff] }
 0x186   :  { %7944 = vst [vmem:[#allocation102_spill] sm:$0xff] %v5394_v41  ;;  %1399 = vmatpush.msrb.mxu0 %v5409_v46  ;;  %v5412_v41 = vld [vmem:[#allocation7 + $0x328] sm:$0xff] }
 0x187   :  { %7945 = vst [vmem:[#allocation103_spill] sm:$0xff] %v5397_v40  ;;  %1419 = vmatpush.msra.mxu1 %v5412_v41  ;;  %v5415_v40 = vld [vmem:[#allocation7 + $0x330] sm:$0xff] }
 0x188   :  { %7946 = vst [vmem:[#allocation104_spill] sm:$0xff] %v5400_v39  ;;  %1439 = vmatpush.msra.mxu2 %v5415_v40  ;;  %v5418_v39 = vld [vmem:[#allocation7 + $0x338] sm:$0xff] }
 0x189   :  { %7947 = vst [vmem:[#allocation105_spill] sm:$0xff] %v5403_v34  ;;  %1459 = vmatpush.msra.mxu3 %v5418_v39  ;;  %v5421_v34 = vld [vmem:[#allocation7 + $0x2e0] sm:$0xff] }
 0x18a   :  { %7948 = vst [vmem:[#allocation106_spill] sm:$0xff] %v5406_v0  ;;  %1400 = vmatpush.msrb.mxu0 %v5421_v34  ;;  %v5424_v0 = vld [vmem:[#allocation7 + $0x2e8] sm:$0xff] }
 0x18b   :  { %7949 = vst [vmem:[#allocation107_spill] sm:$0xff] %v5409_v46  ;;  %1420 = vmatpush.msra.mxu1 %v5424_v0  ;;  %v5427_v46 = vld [vmem:[#allocation7 + $0x2f0] sm:$0xff] }
 0x18c   :  { %7950 = vst [vmem:[#allocation108_spill] sm:$0xff] %v5412_v41  ;;  %1440 = vmatpush.msra.mxu2 %v5427_v46  ;;  %v5430_v41 = vld [vmem:[#allocation7 + $0x2f8] sm:$0xff] }
 0x18d   :  { %7951 = vst [vmem:[#allocation109_spill] sm:$0xff] %v5415_v40  ;;  %1460 = vmatpush.msra.mxu3 %v5430_v41  ;;  %v5433_v40 = vld [vmem:[#allocation7 + $0x2a0] sm:$0xff] }
 0x18e   :  { %7952 = vst [vmem:[#allocation110_spill] sm:$0xff] %v5418_v39  ;;  %1401 = vmatpush.msrb.mxu0 %v5433_v40  ;;  %v5436_v39 = vld [vmem:[#allocation7 + $0x2a8] sm:$0xff] }
 0x18f   :  { %7953 = vst [vmem:[#allocation111_spill] sm:$0xff] %v5421_v34  ;;  %1421 = vmatpush.msra.mxu1 %v5436_v39  ;;  %v5439_v34 = vld [vmem:[#allocation7 + $0x2b0] sm:$0xff] }
 0x190   :  { %7954 = vst [vmem:[#allocation112_spill] sm:$0xff] %v5424_v0  ;;  %1441 = vmatpush.msra.mxu2 %v5439_v34  ;;  %v5442_v0 = vld [vmem:[#allocation7 + $0x2b8] sm:$0xff] }
 0x191   :  { %7955 = vst [vmem:[#allocation113_spill] sm:$0xff] %v5427_v46  ;;  %1461 = vmatpush.msra.mxu3 %v5442_v0  ;;  %v5445_v46 = vld [vmem:[#allocation7 + $0x260] sm:$0xff] }
 0x192   :  { %7956 = vst [vmem:[#allocation114_spill] sm:$0xff] %v5430_v41  ;;  %1402 = vmatpush.msrb.mxu0 %v5445_v46  ;;  %v5448_v41 = vld [vmem:[#allocation7 + $0x268] sm:$0xff] }
 0x193   :  { %7957 = vst [vmem:[#allocation115_spill] sm:$0xff] %v5433_v40  ;;  %1422 = vmatpush.msra.mxu1 %v5448_v41  ;;  %v5451_v40 = vld [vmem:[#allocation7 + $0x270] sm:$0xff] }
 0x194   :  { %7958 = vst [vmem:[#allocation116_spill] sm:$0xff] %v5436_v39  ;;  %1442 = vmatpush.msra.mxu2 %v5451_v40  ;;  %v5454_v39 = vld [vmem:[#allocation7 + $0x278] sm:$0xff] }
 0x195   :  { %7959 = vst [vmem:[#allocation117_spill] sm:$0xff] %v5439_v34  ;;  %1462 = vmatpush.msra.mxu3 %v5454_v39  ;;  %v5457_v34 = vld [vmem:[#allocation7 + $0x220] sm:$0xff] }
 0x196   :  { %7960 = vst [vmem:[#allocation118_spill] sm:$0xff] %v5442_v0  ;;  %1403 = vmatpush.msrb.mxu0 %v5457_v34  ;;  %v5460_v0 = vld [vmem:[#allocation7 + $0x228] sm:$0xff] }
 0x197   :  { %7961 = vst [vmem:[#allocation119_spill] sm:$0xff] %v5445_v46  ;;  %1423 = vmatpush.msra.mxu1 %v5460_v0  ;;  %v5463_v46 = vld [vmem:[#allocation7 + $0x230] sm:$0xff] }
 0x198   :  { %7962 = vst [vmem:[#allocation120_spill] sm:$0xff] %v5448_v41  ;;  %1443 = vmatpush.msra.mxu2 %v5463_v46  ;;  %v5466_v41 = vld [vmem:[#allocation7 + $0x238] sm:$0xff] }
 0x199   :  { %7963 = vst [vmem:[#allocation121_spill] sm:$0xff] %v5451_v40  ;;  %1463 = vmatpush.msra.mxu3 %v5466_v41  ;;  %v5469_v40 = vld [vmem:[#allocation7 + $0x1e0] sm:$0xff] }
 0x19a   :  { %7964 = vst [vmem:[#allocation122_spill] sm:$0xff] %v5454_v39  ;;  %1404 = vmatpush.msrb.mxu0 %v5469_v40  ;;  %v5472_v39 = vld [vmem:[#allocation7 + $0x1e8] sm:$0xff] }
 0x19b   :  { %7965 = vst [vmem:[#allocation123_spill] sm:$0xff] %v5457_v34  ;;  %1424 = vmatpush.msra.mxu1 %v5472_v39  ;;  %v5475_v34 = vld [vmem:[#allocation7 + $0x1f0] sm:$0xff] }
 0x19c   :  { %7966 = vst [vmem:[#allocation124_spill] sm:$0xff] %v5460_v0  ;;  %1444 = vmatpush.msra.mxu2 %v5475_v34  ;;  %v5478_v0 = vld [vmem:[#allocation7 + $0x1f8] sm:$0xff] }
 0x19d   :  { %7967 = vst [vmem:[#allocation125_spill] sm:$0xff] %v5463_v46  ;;  %1464 = vmatpush.msra.mxu3 %v5478_v0  ;;  %v5481_v46 = vld [vmem:[#allocation7 + $0x1a0] sm:$0xff] }
 0x19e   :  { %7968 = vst [vmem:[#allocation126_spill] sm:$0xff] %v5466_v41  ;;  %1405 = vmatpush.msrb.mxu0 %v5481_v46  ;;  %v5484_v41 = vld [vmem:[#allocation7 + $0x1a8] sm:$0xff] }
 0x19f   :  { %7969 = vst [vmem:[#allocation127_spill] sm:$0xff] %v5469_v40  ;;  %1425 = vmatpush.msra.mxu1 %v5484_v41  ;;  %v5487_v40 = vld [vmem:[#allocation7 + $0x1b0] sm:$0xff] }
 0x1a0   :  { %7970 = vst [vmem:[#allocation128_spill] sm:$0xff] %v5472_v39  ;;  %1445 = vmatpush.msra.mxu2 %v5487_v40  ;;  %v5490_v39 = vld [vmem:[#allocation7 + $0x1b8] sm:$0xff] }
 0x1a1   :  { %7971 = vst [vmem:[#allocation129_spill] sm:$0xff] %v5475_v34  ;;  %1465 = vmatpush.msra.mxu3 %v5490_v39  ;;  %v5493_v34 = vld [vmem:[#allocation7 + $0x160] sm:$0xff] }
 0x1a2   :  { %7972 = vst [vmem:[#allocation130_spill] sm:$0xff] %v5478_v0  ;;  %1406 = vmatpush.msrb.mxu0 %v5493_v34  ;;  %v5496_v0 = vld [vmem:[#allocation7 + $0x168] sm:$0xff] }
 0x1a3   :  { %7973 = vst [vmem:[#allocation131_spill] sm:$0xff] %v5481_v46  ;;  %1426 = vmatpush.msra.mxu1 %v5496_v0  ;;  %v5499_v46 = vld [vmem:[#allocation7 + $0x170] sm:$0xff] }
 0x1a4   :  { %7974 = vst [vmem:[#allocation132_spill] sm:$0xff] %v5484_v41  ;;  %1446 = vmatpush.msra.mxu2 %v5499_v46  ;;  %v5502_v41 = vld [vmem:[#allocation7 + $0x178] sm:$0xff] }
 0x1a5   :  { %7975 = vst [vmem:[#allocation133_spill] sm:$0xff] %v5487_v40  ;;  %1466 = vmatpush.msra.mxu3 %v5502_v41  ;;  %v5505_v40 = vld [vmem:[#allocation7 + $0x120] sm:$0xff] }
 0x1a6   :  { %7976 = vst [vmem:[#allocation134_spill] sm:$0xff] %v5490_v39  ;;  %1407 = vmatpush.msrb.mxu0 %v5505_v40  ;;  %v5508_v39 = vld [vmem:[#allocation7 + $0x128] sm:$0xff] }
 0x1a7   :  { %7977 = vst [vmem:[#allocation135_spill] sm:$0xff] %v5493_v34  ;;  %1427 = vmatpush.msra.mxu1 %v5508_v39  ;;  %v5511_v34 = vld [vmem:[#allocation7 + $0x130] sm:$0xff] }
 0x1a8   :  { %7978 = vst [vmem:[#allocation136_spill] sm:$0xff] %v5496_v0  ;;  %1447 = vmatpush.msra.mxu2 %v5511_v34  ;;  %v5514_v0 = vld [vmem:[#allocation7 + $0x138] sm:$0xff] }
 0x1a9   :  { %7979 = vst [vmem:[#allocation137_spill] sm:$0xff] %v5499_v46  ;;  %1467 = vmatpush.msra.mxu3 %v5514_v0  ;;  %v5517_v46 = vld [vmem:[#allocation7 + $0xe0] sm:$0xff] }
 0x1aa   :  { %7980 = vst [vmem:[#allocation138_spill] sm:$0xff] %v5502_v41  ;;  %1408 = vmatpush.msrb.mxu0 %v5517_v46  ;;  %v5520_v41 = vld [vmem:[#allocation7 + $0xe8] sm:$0xff] }
 0x1ab   :  { %7981 = vst [vmem:[#allocation139_spill] sm:$0xff] %v5505_v40  ;;  %1428 = vmatpush.msra.mxu1 %v5520_v41  ;;  %v5523_v40 = vld [vmem:[#allocation7 + $0xf0] sm:$0xff] }
 0x1ac   :  { %7982 = vst [vmem:[#allocation140_spill] sm:$0xff] %v5508_v39  ;;  %1448 = vmatpush.msra.mxu2 %v5523_v40  ;;  %v5526_v39 = vld [vmem:[#allocation7 + $0xf8] sm:$0xff] }
 0x1ad   :  { %7983 = vst [vmem:[#allocation141_spill] sm:$0xff] %v5511_v34  ;;  %1468 = vmatpush.msra.mxu3 %v5526_v39  ;;  %v5529_v34 = vld [vmem:[#allocation7 + $0xa0] sm:$0xff] }
 0x1ae   :  { %7984 = vst [vmem:[#allocation142_spill] sm:$0xff] %v5514_v0  ;;  %1409 = vmatpush.msrb.mxu0 %v5529_v34  ;;  %v5532_v0 = vld [vmem:[#allocation7 + $0xa8] sm:$0xff] }
 0x1af   :  { %7985 = vst [vmem:[#allocation143_spill] sm:$0xff] %v5517_v46  ;;  %1429 = vmatpush.msra.mxu1 %v5532_v0  ;;  %v5535_v46 = vld [vmem:[#allocation7 + $0xb0] sm:$0xff] }
 0x1b0   :  { %7986 = vst [vmem:[#allocation144_spill] sm:$0xff] %v5520_v41  ;;  %1449 = vmatpush.msra.mxu2 %v5535_v46  ;;  %v5538_v41 = vld [vmem:[#allocation7 + $0xb8] sm:$0xff] }
 0x1b1   :  { %7987 = vst [vmem:[#allocation145_spill] sm:$0xff] %v5523_v40  ;;  %1469 = vmatpush.msra.mxu3 %v5538_v41  ;;  %v5541_v40 = vld [vmem:[#allocation7 + $0x60] sm:$0xff] }
 0x1b2   :  { %7988 = vst [vmem:[#allocation146_spill] sm:$0xff] %v5526_v39  ;;  %1410 = vmatpush.msrb.mxu0 %v5541_v40  ;;  %v5544_v39 = vld [vmem:[#allocation7 + $0x68] sm:$0xff] }
 0x1b3   :  { %7989 = vst [vmem:[#allocation147_spill] sm:$0xff] %v5529_v34  ;;  %1430 = vmatpush.msra.mxu1 %v5544_v39  ;;  %v5547_v34 = vld [vmem:[#allocation7 + $0x70] sm:$0xff] }
 0x1b4   :  { %7990 = vst [vmem:[#allocation148_spill] sm:$0xff] %v5532_v0  ;;  %1450 = vmatpush.msra.mxu2 %v5547_v34  ;;  %v5550_v0 = vld [vmem:[#allocation7 + $0x78] sm:$0xff] }
 0x1b5   :  { %7991 = vst [vmem:[#allocation149_spill] sm:$0xff] %v5535_v46  ;;  %1470 = vmatpush.msra.mxu3 %v5550_v0  ;;  %v5553_v46 = vld [vmem:[#allocation7 + $0x20] sm:$0xff] }
 0x1b6   :  { %7992 = vst [vmem:[#allocation150_spill] sm:$0xff] %v5538_v41  ;;  %1411 = vmatpush.msrb.mxu0 %v5553_v46  ;;  %v5556_v41 = vld [vmem:[#allocation7 + $0x28] sm:$0xff] }
 0x1b7   :  { %7993 = vst [vmem:[#allocation151_spill] sm:$0xff] %v5541_v40  ;;  %1431 = vmatpush.msra.mxu1 %v5556_v41  ;;  %v5559_v40 = vld [vmem:[#allocation7 + $0x30] sm:$0xff] }
 0x1b8   :  { %7994 = vst [vmem:[#allocation152_spill] sm:$0xff] %v5544_v39  ;;  %1451 = vmatpush.msra.mxu2 %v5559_v40  ;;  %v5562_v39 = vld [vmem:[#allocation7 + $0x38] sm:$0xff] }
 0x1b9   :  { %7995 = vst [vmem:[#allocation153_spill] sm:$0xff] %v5547_v34  ;;  %1471 = vmatpush.msra.mxu3 %v5562_v39  ;;  %v176_v34 = vadd.f32 %v4766_v26, %v5029_v27 }
 0x1ba   :  { %7996 = vst [vmem:[#allocation154_spill] sm:$0xff] %v5550_v0  ;;  %v217_v0 = vadd.f32 %v4787_v38, %v5057_v55 }
 0x1bb   :  { %7997 = vst [vmem:[#allocation155_spill] sm:$0xff] %v5553_v46 }
 0x1bc   :  { %7998 = vst [vmem:[#allocation156_spill] sm:$0xff] %v5556_v41 }
 0x1bd   :  { %7999 = vst [vmem:[#allocation157_spill] sm:$0xff] %v5559_v40  ;;  %v258_v40 = vadd.f32 %v4803_v35, %v5070_v47 }
 0x1be   :  { %8000 = vst [vmem:[#allocation158_spill] sm:$0xff] %v5562_v39 }
 0x1d4   :  { %v1018_v7 = vpop.f32.mrf.mxu0  ;;  %v1038_v46 = vpop.f32.mrf.mxu1 }
 0x1d5   :  { %v1161_v8 = vadd.f32 %v1018_v7, %v176_v34  ;;  %v1162_v37 = vadd.f32 %v1038_v46, %v217_v0 }
 0x1d7   :  { %v3326_v44 = vmul.f32 -1.442695, %v1161_v8  ;;  %v3327_v41 = vmul.f32 -1.442695, %v1162_v37 }
 0x1d9   :  { %3430 = vpow2.f32 %v3326_v44 }
 0x1da   :  { %3432 = vpow2.f32 %v3327_v41 }
 0x1db   :  { %v1058_v39 = vpop.f32.mrf.mxu2  ;;  %v1078_v58 = vpop.f32.mrf.mxu3 }
 0x1dc   :  { %v1163_v26 = vadd.f32 %v1058_v39, %v258_v40  ;;  %v1164_v27 = vadd.f32 %v1078_v58, %v299_v57  ;;  %v1098_v60 = vpop.f32.mrf.mxu0  ;;  %v1118_v38 = vpop.f32.mrf.mxu1 }
 0x1dd   :  { %v1165_v55 = vadd.f32 %v1098_v60, %v4894_v54  ;;  %v1166_v34 = vadd.f32 %v1118_v38, %v4981_v51 }
 0x1de   :  { %v3328_v46 = vmul.f32 -1.442695, %v1163_v26  ;;  %v3329_v37 = vmul.f32 -1.442695, %v1164_v27 }
 0x1df   :  { %v3431_v44 = vpop.eup %3430  ;;  %v3330_v35 = vmul.f32 -1.442695, %v1165_v55  ;;  %v3331_v36 = vmul.f32 -1.442695, %v1166_v34 }
 0x1e0   :  { %v3433_v0 = vpop.eup %3432  ;;  %v1187_v7 = vadd.f32 1.0, %v3431_v44  ;;  %3434 = vpow2.f32 %v3328_v46 }
 0x1e1   :  { %v1188_v8 = vadd.f32 1.0, %v3433_v0  ;;  %3436 = vpow2.f32 %v3329_v37 }
 0x1e2   :  { %3438 = vrcp.f32 %v1187_v7  ;;  %v1202_v38 = vand.u32 2147483647, %v1187_v7  ;;  %vm1198_vm11 = vweird.f32 %v1187_v7 }
 0x1e3   :  { %3440 = vrcp.f32 %v1188_v8  ;;  %v1138_v39 = vpop.f32.mrf.mxu2  ;;  %v1158_v46 = vpop.f32.mrf.mxu3  ;;  %v1219_v0 = vand.u32 2147483648, %v1188_v8  ;;  %vm1213_vm12 = vweird.f32 %v1188_v8 }
 0x1e4   :  { %3442 = vpow2.f32 %v3330_v35  ;;  %v1167_v60 = vadd.f32 %v1138_v39, %v4990_v53  ;;  %v1217_v53 = vand.u32 2147483647, %v1188_v8  ;;  %v1168_v29 = vadd.f32 %v1158_v46, %v4993_v1 }
 0x1e5   :  { %3444 = vpow2.f32 %v3331_v36  ;;  %v1204_v36 = vand.u32 2147483648, %v1187_v7  ;;  %vm5594_vm13 = vcmp.eq.f32.partialorder %v1202_v38, 8.507059e+37  ;;  %v1220_v34 = vor.u32 1.1754944e-38, %v1219_v0 }
 0x1e6   :  { %v3435_v40 = vpop.eup %3434  ;;  %vm1218_vm15 = vcmp.eq.f32.partialorder %v1217_v53, 8.507059e+37 }
 0x1e7   :  { %v3437_v41 = vpop.eup %3436  ;;  %v5577_v57 = vadd.f32 1.0, %v3435_v40 }
 0x1e8   :  { %v3439_v58 = vpop.eup %3438  ;;  %v5579_v54 = vadd.f32 1.0, %v3437_v41 }
 0x1e9   :  { %v3441_v51 = vpop.eup %3440  ;;  %v1194_v27 = vmul.f32 %v3439_v58, %v1187_v7  ;;  %3446 = vrcp.f32 %v5577_v57  ;;  %vm1199_vm9 = vweird.f32 %v3439_v58  ;;  %vm1228_vm1 = vweird.f32 %v5577_v57 }
 0x1ea   :  { %v3443_v55 = vpop.eup %3442  ;;  %v1209_v26 = vmul.f32 %v3441_v51, %v1188_v8  ;;  %3448 = vrcp.f32 %v5579_v54  ;;  %vm1214_vm10 = vweird.f32 %v3441_v51  ;;  %vm1200_vm14 = vmor %vm1198_vm11, %vm1199_vm9  ;;  %v1249_v53 = vand.u32 2147483648, %v5579_v54 }
 0x1eb   :  { %v3445_v37 = vpop.eup %3444  ;;  %v1195_v44 = vsub.f32 1.0, %v1194_v27  ;;  %v5585_v35 = vadd.f32 1.0, %v3443_v55  ;;  %3450 = vtanh.f32 %v1167_v60  ;;  %v1205_v60 = vor.u32 1.1754944e-38, %v1204_v36  ;;  %vm1215_vm0 = vmor %vm1213_vm12, %vm1214_vm10 }
 0x1ec   :  { %v1210_v40 = vsub.f32 1.0, %v1209_v26  ;;  %v5587_v41 = vadd.f32 1.0, %v3445_v37  ;;  %vm1243_vm2 = vweird.f32 %v5579_v54 }
 0x1ed   :  { %3452 = vrcp.f32 %v5585_v35  ;;  %v1196_v39 = vmul.f32 %v3439_v58, %v1195_v44  ;;  %vm1258_vm9 = vweird.f32 %v5585_v35 }
 0x1ee   :  { %v1211_v47 = vmul.f32 %v3441_v51, %v1210_v40  ;;  %3454 = vrcp.f32 %v5587_v41  ;;  %v1234_v40 = vand.u32 2147483648, %v5577_v57 }
 0x1ef   :  { %v5592_v27 = vpop.eup %3446  ;;  %v1197_v55 = vadd.f32 %v3439_v58, %v1196_v39  ;;  %3456 = vtanh.f32 %v1168_v29 }
 0x1f0   :  { %v3449_v37 = vpop.eup %3448  ;;  %v1224_v44 = vmul.f32 %v5592_v27, %v5577_v57  ;;  %v1212_v1 = vadd.f32 %v3441_v51, %v1211_v47  ;;  %vm1229_vm4 = vweird.f32 %v5592_v27 }
 0x1f1   :  { %v1239_v7 = vmul.f32 %v3449_v37, %v5579_v54  ;;  %v1201_v8 = vsel %vm1200_vm14, %v3439_v58, %v1197_v55  ;;  %v3451_v38 = vpop.eup %3450  ;;  %vm1244_vm3 = vweird.f32 %v3449_v37  ;;  %vm5631_vm8 = vmor %vm1228_vm1, %vm1229_vm4  ;;  %vm1273_vm14 = vweird.f32 %v5587_v41 }
 0x1f2   :  { %v1225_v46 = vsub.f32 1.0, %v1224_v44  ;;  %v1206_v0 = vsel %vm5594_vm13, %v1205_v60, %v1201_v8  ;;  %v1216_v36 = vsel %vm1215_vm0, %v3441_v51, %v1212_v1  ;;  %v1264_v60 = vand.u32 2147483648, %v5585_v35  ;;  %vm1245_vm6 = vmor %vm1243_vm2, %vm1244_vm3 }
 0x1f3   :  { %v3453_v39 = vpop.eup %3452  ;;  %v1240_v24 = vsub.f32 1.0, %v1239_v7  ;;  %v1221_v50 = vsel %vm1218_vm15, %v1220_v34, %v1216_v36  ;;  %v1286_v47 = vmul.f32 %v3451_v38, %v1206_v0  ;;  %v1247_v34 = vand.u32 2147483647, %v5579_v54 }
 0x1f4   :  { %v5606_v3 = vpop.eup %3454  ;;  %v1226_v43 = vmul.f32 %v5592_v27, %v1225_v46  ;;  %v1254_v29 = vmul.f32 %v3453_v39, %v5585_v35  ;;  %v1285_v58 = vmul.f32 %v1221_v50, %v5176_v42  ;;  %vm1259_vm5 = vweird.f32 %v3453_v39 }
 0x1f5   :  { %v1269_v55 = vmul.f32 %v5606_v3, %v5587_v41  ;;  %v1241_v51 = vmul.f32 %v3449_v37, %v1240_v24  ;;  %v3457_v1 = vpop.eup %3456  ;;  %v1250_v8 = vor.u32 1.1754944e-38, %v1249_v53  ;;  %v8003_v24 = vstv %s5575_s19  ;;  %vm1260_vm10 = vmor %vm1258_vm9, %vm1259_vm5 }
 0x1f6   :  { %v1255_v26 = vsub.f32 1.0, %v1254_v29  ;;  %v1287_v44 = vadd.f32 %v1286_v47, %v1285_v58  ;;  %v1227_v7 = vadd.f32 %v5592_v27, %v1226_v43  ;;  %v1262_v0 = vand.u32 2147483647, %v5585_v35 }
 0x1f7   :  { %v1242_v50 = vadd.f32 %v3449_v37, %v1241_v51  ;;  %v1232_v36 = vand.u32 2147483647, %v5577_v57  ;;  %v1270_v47 = vsub.f32 1.0, %v1269_v55  ;;  %vm1248_vm7 = vcmp.eq.f32.partialorder %v1247_v34, 8.507059e+37 }
 0x1f8   :  { %v1256_v38 = vmul.f32 %v3453_v39, %v1255_v26  ;;  %3458 = vtanh.f32 %v1287_v44  ;;  %v1302_v46 = vmul.f32 %v8003_v24, %v1287_v44  ;;  %v1231_v58 = vsel %vm5631_vm8, %v5592_v27, %v1227_v7 }
 0x1f9   :  { %v1246_v29 = vsel %vm1245_vm6, %v3449_v37, %v1242_v50  ;;  %v1265_v37 = vor.u32 1.1754944e-38, %v1264_v60  ;;  %v1235_v51 = vor.u32 1.1754944e-38, %v1234_v40  ;;  %vm1263_vm11 = vcmp.eq.f32.partialorder %v1262_v0, 8.507059e+37 }
 0x1fa   :  { %v1251_v53 = vsel %vm1248_vm7, %v1250_v8, %v1246_v29  ;;  %v1257_v54 = vadd.f32 %v3453_v39, %v1256_v38  ;;  %vm1233_vm12 = vcmp.eq.f32.partialorder %v1232_v36, 8.507059e+37  ;;  %v1271_v57 = vmul.f32 %v5606_v3, %v1270_v47 }
 0x1fb   :  { %v1289_v55 = vmul.f32 %v3457_v1, %v1251_v53  ;;  %v1236_v35 = vsel %vm1233_vm12, %v1235_v51, %v1231_v58  ;;  %v1299_v38 = vstv %s5618_s20  ;;  %vm1274_vm13 = vweird.f32 %v5606_v3  ;;  %v8044_v58 = vld [vmem:[#allocation102_spill] sm:$0xff]  ;;  %v8047_v51 = vld [vmem:[#allocation105_spill] sm:$0xff] }
 0x1fc   :  { %v1261_v34 = vsel %vm1260_vm10, %v3453_v39, %v1257_v54  ;;  %v1272_v27 = vadd.f32 %v5606_v3, %v1271_v57  ;;  %v1279_v40 = vand.u32 2147483648, %v5587_v41  ;;  %v1277_v60 = vand.u32 2147483647, %v5587_v41  ;;  %vm1275_vm15 = vmor %vm1273_vm14, %vm1274_vm13  ;;  %v8042_v41 = vld [vmem:[#allocation100_spill] sm:$0xff]  ;;  %v8049_v57 = vld [vmem:[#allocation107_spill] sm:$0xff] }
 0x1fd   :  { %v1266_v26 = vsel %vm1263_vm11, %v1265_v37, %v1261_v34  ;;  %v8006_v29 = vstv %s5575_s19  ;;  %v8045_v37 = vld [vmem:[#allocation103_spill] sm:$0xff]  ;;  %v8048_v34 = vld [vmem:[#allocation106_spill] sm:$0xff] }
 0x1fe   :  { %v3459_v44 = vpop.eup %3458  ;;  %v1288_v50 = vmul.f32 %v1266_v26, %v5176_v42  ;;  %v1276_v42 = vsel %vm1275_vm15, %v5606_v3, %v1272_v27  ;;  %v1280_v7 = vor.u32 1.1754944e-38, %v1279_v40  ;;  %vm1278_vm0 = vcmp.eq.f32.partialorder %v1277_v60, 8.507059e+37  ;;  %v8007_v3 = vld [vmem:[#allocation56_spill] sm:$0xff]  ;;  %v8057_v27 = vld [vmem:[#allocation115_spill] sm:$0xff]  ;;  %v8060_v60 = vld [vmem:[#allocation118_spill] sm:$0xff] }
 0x1ff   :  { %v1292_v8 = vmul.f32 %v3459_v44, %v1236_v35  ;;  %v8050_v26 = vld [vmem:[#allocation108_spill] sm:$0xff]  ;;  %v8051_v44 = vld [vmem:[#allocation109_spill] sm:$0xff]  ;;  %v8052_v35 = vld [vmem:[#allocation110_spill] sm:$0xff] }
 0x200   :  { %v1290_v24 = vadd.f32 %v1289_v55, %v1288_v50  ;;  %v1281_v36 = vsel %vm1278_vm0, %v1280_v7, %v1276_v42  ;;  %v8046_v55 = vld [vmem:[#allocation104_spill] sm:$0xff]  ;;  %v8053_v50 = vld [vmem:[#allocation111_spill] sm:$0xff] }
 0x201   :  { %v1298_v43 = vmul.f32 %v8006_v29, %v1292_v8  ;;  %v8054_v8 = vld [vmem:[#allocation112_spill] sm:$0xff]  ;;  %v8061_v42 = vld [vmem:[#allocation119_spill] sm:$0xff] }
 0x202   :  { %3460 = vtanh.f32 %v1290_v24  ;;  %v1303_v39 = vmul.f32 %v1299_v38, %v1290_v24  ;;  %v8056_v24 = vld [vmem:[#allocation114_spill] sm:$0xff]  ;;  %v8058_v40 = vld [vmem:[#allocation116_spill] sm:$0xff] }
 0x203   :  { %v8062_v7 = vld [vmem:[#allocation120_spill] sm:$0xff] }
 0x204   :  { %v5648_v1 = vadd.f32 %v1303_v39, %v1302_v46  ;;  %v8043_v46 = vld [vmem:[#allocation101_spill] sm:$0xff]  ;;  %v8066_v29 = vld [vmem:[#allocation124_spill] sm:$0xff] }
 0x205   :  { %v8059_v39 = vld [vmem:[#allocation117_spill] sm:$0xff] }
 0x208   :  { %v3461_v0 = vpop.eup %3460 }
 0x209   :  { %v1294_v47 = vmul.f32 %v3461_v0, %v1281_v36  ;;  %v8063_v0 = vld [vmem:[#allocation121_spill] sm:$0xff]  ;;  %v8064_v36 = vld [vmem:[#allocation122_spill] sm:$0xff] }
 0x20b   :  { %v1300_v53 = vmul.f32 %v1299_v38, %v1294_v47  ;;  %v8055_v38 = vld [vmem:[#allocation113_spill] sm:$0xff]  ;;  %v8065_v47 = vld [vmem:[#allocation123_spill] sm:$0xff] }
 0x20d   :  { %v1301_v54 = vadd.f32 %v1300_v53, %v1298_v43  ;;  %v8067_v43 = vld [vmem:[#allocation125_spill] sm:$0xff]  ;;  %v8068_v53 = vld [vmem:[#allocation126_spill] sm:$0xff] }
 0x20f   :  { %1332 = vmatmul.f32.vlgmr.msra.gmra.mxu0 %v1301_v54  ;;  %1352 = vmatmul.f32.vlgmr.msrb.gmra.mxu1 %v1301_v54 }
 0x210   :  { %1372 = vmatmul.f32.vlgmr.msrb.gmra.mxu2 %v1301_v54  ;;  %1392 = vmatmul.f32.vlgmr.msrb.gmra.mxu3 %v1301_v54 }
 0x211   :  { %1631 = vmatpush.msra.mxu0 %v5181_v62  ;;  %1651 = vmatpush.msrb.mxu1 %v5184_v52  ;;  %v8008_v62 = vld [vmem:[#allocation57_spill] sm:$0xff]  ;;  %v8009_v52 = vld [vmem:[#allocation58_spill] sm:$0xff] }
 0x212   :  { %1671 = vmatpush.msrb.mxu2 %v5187_v49  ;;  %1691 = vmatpush.msrb.mxu3 %v5190_v12  ;;  %v8010_v49 = vld [vmem:[#allocation59_spill] sm:$0xff]  ;;  %v8011_v12 = vld [vmem:[#allocation60_spill] sm:$0xff] }
 0x213   :  { %1632 = vmatpush.msra.mxu0 %v5193_v25  ;;  %1652 = vmatpush.msrb.mxu1 %v5196_v6  ;;  %v8012_v25 = vld [vmem:[#allocation61_spill] sm:$0xff]  ;;  %v8018_v6 = vld [vmem:[#allocation67_spill] sm:$0xff] }
 0x214   :  { %1672 = vmatpush.msrb.mxu2 %v5199_v30  ;;  %1692 = vmatpush.msrb.mxu3 %v5202_v63  ;;  %v8019_v30 = vld [vmem:[#allocation69_spill] sm:$0xff]  ;;  %v8020_v63 = vld [vmem:[#allocation68_spill] sm:$0xff] }
 0x215   :  { %1633 = vmatpush.msra.mxu0 %v5205_v19  ;;  %1653 = vmatpush.msrb.mxu1 %v5208_v15  ;;  %v8021_v19 = vld [vmem:[#allocation70_spill] sm:$0xff]  ;;  %v8022_v15 = vld [vmem:[#allocation71_spill] sm:$0xff] }
 0x216   :  { %1673 = vmatpush.msrb.mxu2 %v5211_v20  ;;  %1693 = vmatpush.msrb.mxu3 %v5214_v9  ;;  %v8023_v20 = vld [vmem:[#allocation72_spill] sm:$0xff]  ;;  %v8024_v9 = vld [vmem:[#allocation75_spill] sm:$0xff] }
 0x217   :  { %1412 = vmatmul.f32.vlgmr.msrb.gmra.mxu0 %v1301_v54  ;;  %1432 = vmatmul.f32.vlgmr.msra.gmra.mxu1 %v1301_v54 }
 0x218   :  { %1452 = vmatmul.f32.vlgmr.msra.gmra.mxu2 %v1301_v54  ;;  %1472 = vmatmul.f32.vlgmr.msra.gmra.mxu3 %v1301_v54  ;;  %v8069_v54 = vld [vmem:[#allocation127_spill] sm:$0xff] }
 0x219   :  { %1634 = vmatpush.msra.mxu0 %v5217_v17  ;;  %1654 = vmatpush.msrb.mxu1 %v5220_v32  ;;  %v8025_v17 = vld [vmem:[#allocation73_spill] sm:$0xff]  ;;  %v8026_v32 = vld [vmem:[#allocation84_spill] sm:$0xff] }
 0x21a   :  { %1674 = vmatpush.msrb.mxu2 %v5223_v22  ;;  %1694 = vmatpush.msrb.mxu3 %v5226_v2  ;;  %v8027_v22 = vld [vmem:[#allocation85_spill] sm:$0xff]  ;;  %v8028_v2 = vld [vmem:[#allocation86_spill] sm:$0xff] }
 0x21b   :  { %1635 = vmatpush.msra.mxu0 %v5229_v23  ;;  %1655 = vmatpush.msrb.mxu1 %v5232_v28  ;;  %v8029_v23 = vld [vmem:[#allocation87_spill] sm:$0xff]  ;;  %v8030_v28 = vld [vmem:[#allocation88_spill] sm:$0xff] }
 0x21c   :  { %1675 = vmatpush.msrb.mxu2 %v5235_v31  ;;  %1695 = vmatpush.msrb.mxu3 %v5238_v4  ;;  %v8031_v31 = vld [vmem:[#allocation89_spill] sm:$0xff]  ;;  %v8032_v4 = vld [vmem:[#allocation90_spill] sm:$0xff] }
 0x21d   :  { %1636 = vmatpush.msra.mxu0 %v5241_v14  ;;  %1656 = vmatpush.msrb.mxu1 %v5244_v56  ;;  %v8033_v14 = vld [vmem:[#allocation91_spill] sm:$0xff]  ;;  %v8034_v56 = vld [vmem:[#allocation92_spill] sm:$0xff] }
 0x21e   :  { %1676 = vmatpush.msrb.mxu2 %v5247_v5  ;;  %1696 = vmatpush.msrb.mxu3 %v5250_v11  ;;  %v8035_v5 = vld [vmem:[#allocation93_spill] sm:$0xff]  ;;  %v8036_v11 = vld [vmem:[#allocation94_spill] sm:$0xff] }
 0x21f   :  { %1637 = vmatpush.msra.mxu0 %v5253_v45  ;;  %1657 = vmatpush.msrb.mxu1 %v5256_v16  ;;  %v8037_v45 = vld [vmem:[#allocation95_spill] sm:$0xff]  ;;  %v8038_v16 = vld [vmem:[#allocation96_spill] sm:$0xff] }
 0x220   :  { %1677 = vmatpush.msrb.mxu2 %v5259_v33  ;;  %1697 = vmatpush.msrb.mxu3 %v5262_v10  ;;  %v8039_v33 = vld [vmem:[#allocation97_spill] sm:$0xff]  ;;  %v8040_v10 = vld [vmem:[#allocation98_spill] sm:$0xff] }
 0x221   :  { %1638 = vmatpush.msra.mxu0 %v5265_v21  ;;  %1658 = vmatpush.msrb.mxu1 %v5268_v59  ;;  %v8013_v59 = vld [vmem:[#allocation62_spill] sm:$0xff]  ;;  %v8041_v21 = vld [vmem:[#allocation99_spill] sm:$0xff] }
 0x222   :  { %1678 = vmatpush.msrb.mxu2 %v5271_v18  ;;  %1698 = vmatpush.msrb.mxu3 %v5274_v13  ;;  %v8014_v18 = vld [vmem:[#allocation63_spill] sm:$0xff]  ;;  %v8015_v13 = vld [vmem:[#allocation64_spill] sm:$0xff] }
 0x223   :  { %1639 = vmatpush.msra.mxu0 %v5277_v48  ;;  %1659 = vmatpush.msrb.mxu1 %v5280_v61  ;;  %v8016_v48 = vld [vmem:[#allocation65_spill] sm:$0xff]  ;;  %v8017_v61 = vld [vmem:[#allocation66_spill] sm:$0xff] }
 0x224   :  { %1679 = vmatpush.msrb.mxu2 %v8007_v3  ;;  %1699 = vmatpush.msrb.mxu3 %v8008_v62  ;;  %v8070_v3 = vld [vmem:[#allocation128_spill] sm:$0xff]  ;;  %v8071_v62 = vld [vmem:[#allocation129_spill] sm:$0xff] }
 0x225   :  { %1640 = vmatpush.msra.mxu0 %v8009_v52  ;;  %1660 = vmatpush.msrb.mxu1 %v8010_v49  ;;  %v8072_v52 = vld [vmem:[#allocation130_spill] sm:$0xff]  ;;  %v8073_v49 = vld [vmem:[#allocation131_spill] sm:$0xff] }
 0x226   :  { %1680 = vmatpush.msrb.mxu2 %v8011_v12  ;;  %1700 = vmatpush.msrb.mxu3 %v8012_v25  ;;  %v8074_v12 = vld [vmem:[#allocation132_spill] sm:$0xff]  ;;  %v8075_v25 = vld [vmem:[#allocation133_spill] sm:$0xff] }
 0x227   :  { %1641 = vmatpush.msra.mxu0 %v8013_v59  ;;  %1661 = vmatpush.msrb.mxu1 %v8014_v18  ;;  %v8076_v59 = vld [vmem:[#allocation134_spill] sm:$0xff]  ;;  %v8077_v18 = vld [vmem:[#allocation135_spill] sm:$0xff] }
 0x228   :  { %1681 = vmatpush.msrb.mxu2 %v8015_v13  ;;  %1701 = vmatpush.msrb.mxu3 %v8016_v48  ;;  %v8078_v13 = vld [vmem:[#allocation136_spill] sm:$0xff]  ;;  %v8079_v48 = vld [vmem:[#allocation137_spill] sm:$0xff] }
 0x229   :  { %1642 = vmatpush.msra.mxu0 %v8017_v61  ;;  %1662 = vmatpush.msrb.mxu1 %v8018_v6  ;;  %v8080_v61 = vld [vmem:[#allocation138_spill] sm:$0xff]  ;;  %v8081_v6 = vld [vmem:[#allocation139_spill] sm:$0xff] }
 0x22a   :  { %1682 = vmatpush.msrb.mxu2 %v8019_v30  ;;  %1702 = vmatpush.msrb.mxu3 %v8020_v63  ;;  %v8082_v30 = vld [vmem:[#allocation140_spill] sm:$0xff]  ;;  %v8083_v63 = vld [vmem:[#allocation141_spill] sm:$0xff] }
 0x22b   :  { %1643 = vmatpush.msra.mxu0 %v8021_v19  ;;  %1663 = vmatpush.msrb.mxu1 %v8022_v15  ;;  %v8084_v19 = vld [vmem:[#allocation142_spill] sm:$0xff]  ;;  %v8085_v15 = vld [vmem:[#allocation143_spill] sm:$0xff] }
 0x22c   :  { %1683 = vmatpush.msrb.mxu2 %v8023_v20  ;;  %1703 = vmatpush.msrb.mxu3 %v8024_v9  ;;  %v8086_v20 = vld [vmem:[#allocation144_spill] sm:$0xff]  ;;  %v8087_v9 = vld [vmem:[#allocation145_spill] sm:$0xff] }
 0x22d   :  { %1644 = vmatpush.msra.mxu0 %v8025_v17  ;;  %1664 = vmatpush.msrb.mxu1 %v8026_v32  ;;  %v8088_v17 = vld [vmem:[#allocation146_spill] sm:$0xff]  ;;  %v8089_v32 = vld [vmem:[#allocation147_spill] sm:$0xff] }
 0x22e   :  { %1684 = vmatpush.msrb.mxu2 %v8027_v22  ;;  %1704 = vmatpush.msrb.mxu3 %v8028_v2  ;;  %v8090_v22 = vld [vmem:[#allocation148_spill] sm:$0xff]  ;;  %v8091_v2 = vld [vmem:[#allocation149_spill] sm:$0xff] }
 0x22f   :  { %1645 = vmatpush.msra.mxu0 %v8029_v23  ;;  %1665 = vmatpush.msrb.mxu1 %v8030_v28  ;;  %v8092_v23 = vld [vmem:[#allocation150_spill] sm:$0xff]  ;;  %v8093_v28 = vld [vmem:[#allocation151_spill] sm:$0xff] }
 0x230   :  { %1685 = vmatpush.msrb.mxu2 %v8031_v31  ;;  %1705 = vmatpush.msrb.mxu3 %v8032_v4  ;;  %v8094_v31 = vld [vmem:[#allocation152_spill] sm:$0xff]  ;;  %v8095_v4 = vld [vmem:[#allocation153_spill] sm:$0xff] }
 0x231   :  { %1646 = vmatpush.msra.mxu0 %v8033_v14  ;;  %1666 = vmatpush.msrb.mxu1 %v8034_v56  ;;  %v8096_v14 = vld [vmem:[#allocation154_spill] sm:$0xff]  ;;  %v8097_v56 = vld [vmem:[#allocation155_spill] sm:$0xff] }
 0x232   :  { %1686 = vmatpush.msrb.mxu2 %v8035_v5  ;;  %1706 = vmatpush.msrb.mxu3 %v8036_v11  ;;  %v8098_v5 = vld [vmem:[#allocation156_spill] sm:$0xff]  ;;  %v8099_v11 = vld [vmem:[#allocation157_spill] sm:$0xff] }
 0x233   :  { %1711 = vmatpush.msrb.mxu0 %v8037_v45  ;;  %1731 = vmatpush.msra.mxu1 %v8038_v16  ;;  %v8100_v45 = vld [vmem:[#allocation158_spill] sm:$0xff] }
 0x234   :  { %1751 = vmatpush.msra.mxu2 %v8039_v33  ;;  %1771 = vmatpush.msra.mxu3 %v8040_v10  ;;  %v8101_v16 = vld [vmem:[#allocation46_spill] sm:$0xff] }
 0x235   :  { %1712 = vmatpush.msrb.mxu0 %v8041_v21  ;;  %1732 = vmatpush.msra.mxu1 %v8042_v41  ;;  %v8102_v33 = vld [vmem:[#allocation78_spill] sm:$0xff]  ;;  %v8103_v21 = vld [vmem:[#allocation44_spill] sm:$0xff] }
 0x236   :  { %1752 = vmatpush.msra.mxu2 %v8043_v46  ;;  %1772 = vmatpush.msra.mxu3 %v8044_v58  ;;  %v179_v10 = vadd.f32 %v8102_v33, %v8101_v16  ;;  %v8104_v41 = vld [vmem:[#allocation80_spill] sm:$0xff] }
 0x237   :  { %1713 = vmatpush.msrb.mxu0 %v8045_v37  ;;  %1733 = vmatpush.msra.mxu1 %v8046_v55  ;;  %v220_v46 = vadd.f32 %v8104_v41, %v8103_v21 }
 0x238   :  { %1753 = vmatpush.msra.mxu2 %v8047_v51  ;;  %1773 = vmatpush.msra.mxu3 %v8048_v34 }
 0x239   :  { %1714 = vmatpush.msrb.mxu0 %v8049_v57  ;;  %1734 = vmatpush.msra.mxu1 %v8050_v26  ;;  %v8105_v26 = vld [vmem:[#allocation55_spill] sm:$0xff] }
 0x23a   :  { %1754 = vmatpush.msra.mxu2 %v8051_v44  ;;  %1774 = vmatpush.msra.mxu3 %v8052_v35  ;;  %v8106_v44 = vld [vmem:[#allocation81_spill] sm:$0xff] }
 0x23b   :  { %1715 = vmatpush.msrb.mxu0 %v8053_v50  ;;  %1735 = vmatpush.msra.mxu1 %v8054_v8  ;;  %v261_v35 = vadd.f32 %v8106_v44, %v8105_v26  ;;  %v8107_v50 = vld [vmem:[#allocation48_spill] sm:$0xff]  ;;  %v8108_v8 = vld [vmem:[#allocation82_spill] sm:$0xff] }
 0x23c   :  { %1755 = vmatpush.msra.mxu2 %v8055_v38  ;;  %1775 = vmatpush.msra.mxu3 %v8056_v24  ;;  %v302_v38 = vadd.f32 %v8108_v8, %v8107_v50 }
 0x23d   :  { %1716 = vmatpush.msrb.mxu0 %v8057_v27  ;;  %1736 = vmatpush.msra.mxu1 %v8058_v40 }
 0x23e   :  { %1756 = vmatpush.msra.mxu2 %v8059_v39  ;;  %1776 = vmatpush.msra.mxu3 %v8060_v60 }
 0x23f   :  { %1717 = vmatpush.msrb.mxu0 %v8061_v42  ;;  %1737 = vmatpush.msra.mxu1 %v8062_v7  ;;  %v8109_v7 = vld [vmem:[#allocation24_spill] sm:$0xff] }
 0x240   :  { %1757 = vmatpush.msra.mxu2 %v8063_v0  ;;  %1777 = vmatpush.msra.mxu3 %v8064_v36  ;;  %v8110_v36 = vld [vmem:[#allocation27_spill] sm:$0xff] }
 0x241   :  { %1718 = vmatpush.msrb.mxu0 %v8065_v47  ;;  %1738 = vmatpush.msra.mxu1 %v8066_v29 }
 0x242   :  { %1758 = vmatpush.msra.mxu2 %v8067_v43  ;;  %1778 = vmatpush.msra.mxu3 %v8068_v53 }
 0x243   :  { %1719 = vmatpush.msrb.mxu0 %v8069_v54  ;;  %1739 = vmatpush.msra.mxu1 %v8070_v3 }
 0x244   :  { %1759 = vmatpush.msra.mxu2 %v8071_v62  ;;  %1779 = vmatpush.msra.mxu3 %v8072_v52 }
 0x245   :  { %1720 = vmatpush.msrb.mxu0 %v8073_v49  ;;  %1740 = vmatpush.msra.mxu1 %v8074_v12 }
 0x246   :  { %1760 = vmatpush.msra.mxu2 %v8075_v25  ;;  %1780 = vmatpush.msra.mxu3 %v8076_v59 }
 0x247   :  { %1721 = vmatpush.msrb.mxu0 %v8077_v18  ;;  %1741 = vmatpush.msra.mxu1 %v8078_v13 }
 0x248   :  { %1761 = vmatpush.msra.mxu2 %v8079_v48  ;;  %1781 = vmatpush.msra.mxu3 %v8080_v61  ;;  %v8111_v61 = vld [vmem:[#allocation35_spill] sm:$0xff] }
 0x249   :  { %1722 = vmatpush.msrb.mxu0 %v8081_v6  ;;  %1742 = vmatpush.msra.mxu1 %v8082_v30 }
 0x24a   :  { %1762 = vmatpush.msra.mxu2 %v8083_v63  ;;  %1782 = vmatpush.msra.mxu3 %v8084_v19 }
 0x24b   :  { %1723 = vmatpush.msrb.mxu0 %v8085_v15  ;;  %1743 = vmatpush.msra.mxu1 %v8086_v20 }
 0x24c   :  { %1763 = vmatpush.msra.mxu2 %v8087_v9  ;;  %1783 = vmatpush.msra.mxu3 %v8088_v17  ;;  %v1612_v9 = vstv %s5791_s21 }
 0x24d   :  { %1724 = vmatpush.msrb.mxu0 %v8089_v32  ;;  %1744 = vmatpush.msra.mxu1 %v8090_v22 }
 0x24e   :  { %1764 = vmatpush.msra.mxu2 %v8091_v2  ;;  %1784 = vmatpush.msra.mxu3 %v8092_v23 }
 0x24f   :  { %1725 = vmatpush.msrb.mxu0 %v8093_v28  ;;  %1745 = vmatpush.msra.mxu1 %v8094_v31 }
 0x250   :  { %1765 = vmatpush.msra.mxu2 %v8095_v4  ;;  %1785 = vmatpush.msra.mxu3 %v8096_v14 }
 0x251   :  { %1726 = vmatpush.msrb.mxu0 %v8097_v56  ;;  %1746 = vmatpush.msra.mxu1 %v8098_v5  ;;  %v8112_v5 = vld [vmem:[#allocation37_spill] sm:$0xff] }
 0x252   :  { %1766 = vmatpush.msra.mxu2 %v8099_v11  ;;  %1786 = vmatpush.msra.mxu3 %v8100_v45 }
 0x28c   :  { %v1333_v58 = vpop.f32.mrf.mxu0  ;;  %v1353_v37 = vpop.f32.mrf.mxu1 }
 0x28d   :  { %v1476_v55 = vadd.f32 %v1333_v58, %v179_v10  ;;  %v1477_v51 = vadd.f32 %v1353_v37, %v220_v46 }
 0x28f   :  { %v3334_v34 = vmul.f32 -1.442695, %v1476_v55  ;;  %v3335_v57 = vmul.f32 -1.442695, %v1477_v51 }
 0x291   :  { %3462 = vpow2.f32 %v3334_v34 }
 0x292   :  { %3464 = vpow2.f32 %v3335_v57 }
 0x293   :  { %v1373_v24 = vpop.f32.mrf.mxu2  ;;  %v1393_v27 = vpop.f32.mrf.mxu3 }
 0x294   :  { %v1478_v40 = vadd.f32 %v1373_v24, %v261_v35  ;;  %v1479_v39 = vadd.f32 %v1393_v27, %v302_v38  ;;  %v1413_v60 = vpop.f32.mrf.mxu0  ;;  %v1433_v42 = vpop.f32.mrf.mxu1 }
 0x295   :  { %v1480_v0 = vadd.f32 %v1413_v60, %v8109_v7  ;;  %v1481_v47 = vadd.f32 %v1433_v42, %v8110_v36 }
 0x296   :  { %v3336_v29 = vmul.f32 -1.442695, %v1478_v40  ;;  %v3337_v43 = vmul.f32 -1.442695, %v1479_v39 }
 0x297   :  { %v3463_v53 = vpop.eup %3462  ;;  %v3338_v62 = vmul.f32 -1.442695, %v1480_v0  ;;  %v3339_v49 = vmul.f32 -1.442695, %v1481_v47 }
 0x298   :  { %v3465_v54 = vpop.eup %3464  ;;  %v1502_v3 = vadd.f32 1.0, %v3463_v53  ;;  %3466 = vpow2.f32 %v3336_v29 }
 0x299   :  { %v1503_v52 = vadd.f32 1.0, %v3465_v54  ;;  %3468 = vpow2.f32 %v3337_v43 }
 0x29a   :  { %3470 = vrcp.f32 %v1502_v3  ;;  %v1517_v20 = vand.u32 2147483647, %v1502_v3  ;;  %v1519_v28 = vand.u32 2147483648, %v1502_v3  ;;  %vm1513_vm3 = vweird.f32 %v1502_v3 }
 0x29b   :  { %3472 = vrcp.f32 %v1503_v52  ;;  %v1453_v12 = vpop.f32.mrf.mxu2  ;;  %v1473_v17 = vpop.f32.mrf.mxu3  ;;  %v1534_v2 = vand.u32 2147483648, %v1503_v52  ;;  %v1532_v14 = vand.u32 2147483647, %v1503_v52  ;;  %vm1528_vm4 = vweird.f32 %v1503_v52 }
 0x29c   :  { %3474 = vpow2.f32 %v3338_v62  ;;  %v1482_v6 = vadd.f32 %v1453_v12, %v8111_v61  ;;  %v1483_v11 = vadd.f32 %v1473_v17, %v8112_v5  ;;  %vm5810_vm5 = vcmp.eq.f32.partialorder %v1517_v20, 8.507059e+37 }
 0x29d   :  { %3476 = vpow2.f32 %v3339_v49  ;;  %v1520_v46 = vor.u32 1.1754944e-38, %v1519_v28  ;;  %v1535_v37 = vor.u32 1.1754944e-38, %v1534_v2  ;;  %vm1533_vm7 = vcmp.eq.f32.partialorder %v1532_v14, 8.507059e+37 }
 0x29e   :  { %v3467_v25 = vpop.eup %3466  ;;  %v1614_v5 = vstv %s5834_s22 }
 0x29f   :  { %v3469_v59 = vpop.eup %3468  ;;  %v5793_v18 = vadd.f32 1.0, %v3467_v25 }
 0x2a0   :  { %v3471_v13 = vpop.eup %3470  ;;  %v5795_v48 = vadd.f32 1.0, %v3469_v59 }
 0x2a1   :  { %v3473_v30 = vpop.eup %3472  ;;  %v1509_v63 = vmul.f32 %v3471_v13, %v1502_v3  ;;  %3478 = vrcp.f32 %v5793_v18  ;;  %vm1514_vm1 = vweird.f32 %v3471_v13  ;;  %vm1543_vm9 = vweird.f32 %v5793_v18 }
 0x2a2   :  { %v3475_v19 = vpop.eup %3474  ;;  %v1524_v15 = vmul.f32 %v3473_v30, %v1503_v52  ;;  %3480 = vrcp.f32 %v5795_v48  ;;  %vm1529_vm2 = vweird.f32 %v3473_v30  ;;  %vm1515_vm6 = vmor %vm1513_vm3, %vm1514_vm1  ;;  %v1549_v8 = vand.u32 2147483648, %v5793_v18 }
 0x2a3   :  { %v3477_v32 = vpop.eup %3476  ;;  %v1510_v22 = vsub.f32 1.0, %v1509_v63  ;;  %v5801_v23 = vadd.f32 1.0, %v3475_v19  ;;  %3482 = vtanh.f32 %v1482_v6  ;;  %vm1530_vm8 = vmor %vm1528_vm4, %vm1529_vm2  ;;  %v1564_v42 = vand.u32 2147483648, %v5795_v48  ;;  %v5962_v19 = vld [vmem:[#allocation7 + $0x218] sm:$0xff] }
 0x2a4   :  { %v1525_v31 = vsub.f32 1.0, %v1524_v15  ;;  %v5803_v4 = vadd.f32 1.0, %v3477_v32  ;;  %vm1558_vm10 = vweird.f32 %v5795_v48  ;;  %v1562_v53 = vand.u32 2147483647, %v5795_v48 }
 0x2a5   :  { %3484 = vrcp.f32 %v5801_v23  ;;  %v1511_v56 = vmul.f32 %v3471_v13, %v1510_v22  ;;  %v1579_v3 = vand.u32 2147483648, %v5801_v23  ;;  %v1565_v25 = vor.u32 1.1754944e-38, %v1564_v42  ;;  %v5899_v42 = vld [vmem:[#allocation7 + $0x350] sm:$0xff] }
 0x2a6   :  { %v1526_v45 = vmul.f32 %v3473_v30, %v1525_v31  ;;  %3486 = vrcp.f32 %v5803_v4  ;;  %v1577_v61 = vand.u32 2147483647, %v5801_v23  ;;  %v1547_v6 = vand.u32 2147483647, %v5793_v18 }
 0x2a7   :  { %v5808_v33 = vpop.eup %3478  ;;  %v1512_v10 = vadd.f32 %v3471_v13, %v1511_v56  ;;  %3488 = vtanh.f32 %v1483_v11  ;;  %vm1563_vm15 = vcmp.eq.f32.partialorder %v1562_v53, 8.507059e+37  ;;  %vm1573_vm1 = vweird.f32 %v5801_v23  ;;  %v5920_v53 = vld [vmem:[#allocation7 + $0x2c8] sm:$0xff] }
 0x2a8   :  { %v3481_v58 = vpop.eup %3480  ;;  %v1539_v55 = vmul.f32 %v5808_v33, %v5793_v18  ;;  %v1527_v51 = vadd.f32 %v3473_v30, %v1526_v45  ;;  %vm1544_vm12 = vweird.f32 %v5808_v33  ;;  %v1580_v17 = vor.u32 1.1754944e-38, %v1579_v3  ;;  %v5926_v3 = vld [vmem:[#allocation7 + $0x2d8] sm:$0xff] }
 0x2a9   :  { %v1554_v34 = vmul.f32 %v3481_v58, %v5795_v48  ;;  %v1516_v57 = vsel %vm1515_vm6, %v3471_v13, %v1512_v10  ;;  %v3483_v44 = vpop.eup %3482  ;;  %vm1559_vm11 = vweird.f32 %v3481_v58  ;;  %vm5847_vm0 = vmor %vm1543_vm9, %vm1544_vm12  ;;  %v1550_v22 = vor.u32 1.1754944e-38, %v1549_v8  ;;  %v5875_v8 = vld [vmem:[#allocation7 + $0x3d0] sm:$0xff] }
 0x2aa   :  { %v1540_v35 = vsub.f32 1.0, %v1539_v55  ;;  %v1521_v38 = vsel %vm5810_vm5, %v1520_v46, %v1516_v57  ;;  %v1531_v24 = vsel %vm1530_vm8, %v3473_v30, %v1527_v51  ;;  %vm1560_vm14 = vmor %vm1558_vm10, %vm1559_vm11  ;;  %vm1578_vm3 = vcmp.eq.f32.partialorder %v1577_v61, 8.507059e+37  ;;  %v5950_v61 = vld [vmem:[#allocation7 + $0x258] sm:$0xff] }
 0x2ab   :  { %v3485_v27 = vpop.eup %3484  ;;  %v1555_v40 = vsub.f32 1.0, %v1554_v34  ;;  %v1536_v39 = vsel %vm1533_vm7, %v1535_v37, %v1531_v24  ;;  %v1601_v60 = vmul.f32 %v3483_v44, %v1521_v38  ;;  %vm1548_vm4 = vcmp.eq.f32.partialorder %v1547_v6, 8.507059e+37  ;;  %v5878_v38 = vld [vmem:[#allocation7 + $0x3d8] sm:$0xff]  ;;  %v5884_v24 = vld [vmem:[#allocation7 + $0x388] sm:$0xff]  ;;  %v5953_v6 = vld [vmem:[#allocation7 + $0x200] sm:$0xff] }
 0x2ac   :  { %v5822_v7 = vpop.eup %3486  ;;  %v1541_v0 = vmul.f32 %v5808_v33, %v1540_v35  ;;  %v1569_v36 = vmul.f32 %v3485_v27, %v5801_v23  ;;  %v1600_v47 = vmul.f32 %v1536_v39, %v5648_v1  ;;  %vm1574_vm13 = vweird.f32 %v3485_v27  ;;  %v5869_v35 = vld [vmem:[#allocation7 + $0x3c0] sm:$0xff] }
 0x2ad   :  { %v1584_v29 = vmul.f32 %v5822_v7, %v5803_v4  ;;  %v1556_v43 = vmul.f32 %v3481_v58, %v1555_v40  ;;  %v3489_v52 = vpop.eup %3488  ;;  %vm1575_vm2 = vmor %vm1573_vm1, %vm1574_vm13  ;;  %vm1589_vm5 = vweird.f32 %v5822_v7  ;;  %vm1588_vm6 = vweird.f32 %v5803_v4  ;;  %v5890_v40 = vld [vmem:[#allocation7 + $0x398] sm:$0xff]  ;;  %v5893_v39 = vld [vmem:[#allocation7 + $0x340] sm:$0xff] }
 0x2ae   :  { %v1570_v54 = vsub.f32 1.0, %v1569_v36  ;;  %v1602_v62 = vadd.f32 %v1601_v60, %v1600_v47  ;;  %v1542_v49 = vadd.f32 %v5808_v33, %v1541_v0  ;;  %v1592_v41 = vand.u32 2147483647, %v5803_v4  ;;  %vm1590_vm7 = vmor %vm1588_vm6, %vm1589_vm5  ;;  %v5896_v60 = vld [vmem:[#allocation7 + $0x348] sm:$0xff]  ;;  %v5905_v0 = vld [vmem:[#allocation7 + $0x300] sm:$0xff] }
 0x2af   :  { %v1557_v12 = vadd.f32 %v3481_v58, %v1556_v43  ;;  %v1585_v30 = vsub.f32 1.0, %v1584_v29  ;;  %v5908_v36 = vld [vmem:[#allocation7 + $0x308] sm:$0xff]  ;;  %v5911_v47 = vld [vmem:[#allocation7 + $0x310] sm:$0xff]  ;;  %v5914_v29 = vld [vmem:[#allocation7 + $0x318] sm:$0xff] }
 0x2b0   :  { %v1571_v59 = vmul.f32 %v3485_v27, %v1570_v54  ;;  %3490 = vtanh.f32 %v1602_v62  ;;  %v1617_v13 = vmul.f32 %v1612_v9, %v1602_v62  ;;  %v1546_v20 = vsel %vm5847_vm0, %v5808_v33, %v1542_v49  ;;  %v5917_v43 = vld [vmem:[#allocation7 + $0x2c0] sm:$0xff]  ;;  %v5923_v54 = vld [vmem:[#allocation7 + $0x2d0] sm:$0xff] }
 0x2b1   :  { %v1561_v63 = vsel %vm1560_vm14, %v3481_v58, %v1557_v12  ;;  %v1586_v18 = vmul.f32 %v5822_v7, %v1585_v30  ;;  %v1551_v23 = vsel %vm1548_vm4, %v1550_v22, %v1546_v20  ;;  %v1594_v33 = vand.u32 2147483648, %v5803_v4  ;;  %v5872_v4 = vld [vmem:[#allocation7 + $0x3c8] sm:$0xff]  ;;  %v5929_v62 = vld [vmem:[#allocation7 + $0x280] sm:$0xff]  ;;  %v5935_v49 = vld [vmem:[#allocation7 + $0x290] sm:$0xff] }
 0x2b2   :  { %v1566_v15 = vsel %vm1563_vm15, %v1565_v25, %v1561_v63  ;;  %v1572_v48 = vadd.f32 %v3485_v27, %v1571_v59  ;;  %vm1593_vm8 = vcmp.eq.f32.partialorder %v1592_v41, 8.507059e+37  ;;  %v5938_v12 = vld [vmem:[#allocation7 + $0x298] sm:$0xff]  ;;  %v5941_v25 = vld [vmem:[#allocation7 + $0x240] sm:$0xff]  ;;  %v5944_v59 = vld [vmem:[#allocation7 + $0x248] sm:$0xff] }
 0x2b3   :  { %v1604_v32 = vmul.f32 %v3489_v52, %v1566_v15  ;;  %v1587_v45 = vadd.f32 %v5822_v7, %v1586_v18  ;;  %v1595_v58 = vor.u32 1.1754944e-38, %v1594_v33  ;;  %v5932_v52 = vld [vmem:[#allocation7 + $0x288] sm:$0xff]  ;;  %v5959_v63 = vld [vmem:[#allocation7 + $0x210] sm:$0xff]  ;;  %v5965_v15 = vld [vmem:[#allocation7 + $0x1c0] sm:$0xff] }
 0x2b4   :  { %v1576_v2 = vsel %vm1575_vm2, %v3485_v27, %v1572_v48  ;;  %v5887_v27 = vld [vmem:[#allocation7 + $0x390] sm:$0xff]  ;;  %v5956_v30 = vld [vmem:[#allocation7 + $0x208] sm:$0xff]  ;;  %v5986_v18 = vld [vmem:[#allocation7 + $0x198] sm:$0xff] }
 0x2b5   :  { %v1581_v28 = vsel %vm1578_vm3, %v1580_v17, %v1576_v2  ;;  %v5968_v48 = vld [vmem:[#allocation7 + $0x1c8] sm:$0xff]  ;;  %v5971_v20 = vld [vmem:[#allocation7 + $0x1d0] sm:$0xff]  ;;  %v5974_v17 = vld [vmem:[#allocation7 + $0x1d8] sm:$0xff]  ;;  %8122 = vst [vmem:[#allocation61_spill] sm:$0xff] %v5986_v18 }
 0x2b6   :  { %v3491_v31 = vpop.eup %3490  ;;  %v1603_v14 = vmul.f32 %v1581_v28, %v5648_v1  ;;  %v1591_v1 = vsel %vm1590_vm7, %v5822_v7, %v1587_v45  ;;  %v5902_v7 = vld [vmem:[#allocation7 + $0x358] sm:$0xff]  ;;  %8117 = vst [vmem:[#allocation56_spill] sm:$0xff] %v5971_v20  ;;  %v5980_v22 = vld [vmem:[#allocation7 + $0x188] sm:$0xff]  ;;  %v5983_v2 = vld [vmem:[#allocation7 + $0x190] sm:$0xff] }
 0x2b7   :  { %v1607_v56 = vmul.f32 %v3491_v31, %v1551_v23  ;;  %v1596_v55 = vsel %vm1593_vm8, %v1595_v58, %v1591_v1  ;;  %8118 = vst [vmem:[#allocation57_spill] sm:$0xff] %v5974_v17  ;;  %v5989_v28 = vld [vmem:[#allocation7 + $0x140] sm:$0xff]  ;;  %v5992_v31 = vld [vmem:[#allocation7 + $0x148] sm:$0xff]  ;;  %v5995_v23 = vld [vmem:[#allocation7 + $0x150] sm:$0xff] }
 0x2b8   :  { %v1605_v11 = vadd.f32 %v1604_v32, %v1603_v14  ;;  %v5977_v32 = vld [vmem:[#allocation7 + $0x180] sm:$0xff]  ;;  %8120 = vst [vmem:[#allocation59_spill] sm:$0xff] %v5980_v22  ;;  %v5998_v14 = vld [vmem:[#allocation7 + $0x158] sm:$0xff]  ;;  %v6019_v41 = vld [vmem:[#allocation7 + $0xd0] sm:$0xff] }
 0x2b9   :  { %v1613_v34 = vmul.f32 %v1612_v9, %v1607_v56  ;;  %v5881_v9 = vld [vmem:[#allocation7 + $0x380] sm:$0xff]  ;;  %8119 = vst [vmem:[#allocation58_spill] sm:$0xff] %v5977_v32  ;;  %v6010_v45 = vld [vmem:[#allocation7 + $0x118] sm:$0xff] }
 0x2ba   :  { %3492 = vtanh.f32 %v1605_v11  ;;  %v1618_v10 = vmul.f32 %v1614_v5, %v1605_v11  ;;  %8121 = vst [vmem:[#allocation60_spill] sm:$0xff] %v5983_v2  ;;  %v6001_v56 = vld [vmem:[#allocation7 + $0x100] sm:$0xff]  ;;  %v6007_v11 = vld [vmem:[#allocation7 + $0x110] sm:$0xff]  ;;  %v6022_v1 = vld [vmem:[#allocation7 + $0xd8] sm:$0xff] }
 0x2bb   :  { %8123 = vst [vmem:[#allocation62_spill] sm:$0xff] %v5989_v28  ;;  %v6013_v33 = vld [vmem:[#allocation7 + $0xc0] sm:$0xff] }
 0x2bc   :  { %v5864_v46 = vadd.f32 %v1618_v10, %v1617_v13  ;;  %v5947_v13 = vld [vmem:[#allocation7 + $0x250] sm:$0xff]  ;;  %8124 = vst [vmem:[#allocation63_spill] sm:$0xff] %v5992_v31  ;;  %v6016_v10 = vld [vmem:[#allocation7 + $0xc8] sm:$0xff]  ;;  %v6025_v58 = vld [vmem:[#allocation7 + $0x80] sm:$0xff] }
 0x2bd   :  { %8125 = vst [vmem:[#allocation64_spill] sm:$0xff] %v5995_v23 }
 0x2be   :  { %8126 = vst [vmem:[#allocation65_spill] sm:$0xff] %v5998_v14 }
 0x2bf   :  { %8127 = vst [vmem:[#allocation66_spill] sm:$0xff] %v6001_v56 }
 0x2c0   :  { %v3493_v37 = vpop.eup %3492  ;;  %8129 = vst [vmem:[#allocation69_spill] sm:$0xff] %v6007_v11 }
 0x2c1   :  { %v1609_v51 = vmul.f32 %v3493_v37, %v1596_v55  ;;  %8130 = vst [vmem:[#allocation68_spill] sm:$0xff] %v6010_v45  ;;  %v6028_v37 = vld [vmem:[#allocation7 + $0x88] sm:$0xff]  ;;  %v6031_v55 = vld [vmem:[#allocation7 + $0x90] sm:$0xff] }
 0x2c2   :  { %8131 = vst [vmem:[#allocation70_spill] sm:$0xff] %v6013_v33 }
 0x2c3   :  { %v1615_v57 = vmul.f32 %v1614_v5, %v1609_v51  ;;  %v6004_v5 = vld [vmem:[#allocation7 + $0x108] sm:$0xff]  ;;  %8132 = vst [vmem:[#allocation71_spill] sm:$0xff] %v6016_v10  ;;  %v6034_v51 = vld [vmem:[#allocation7 + $0x98] sm:$0xff] }
 0x2c4   :  { %8128 = vst [vmem:[#allocation67_spill] sm:$0xff] %v6004_v5 }
 0x2c5   :  { %v1616_v44 = vadd.f32 %v1615_v57, %v1613_v34  ;;  %8133 = vst [vmem:[#allocation72_spill] sm:$0xff] %v6019_v41  ;;  %v6037_v34 = vld [vmem:[#allocation7 + $0x40] sm:$0xff]  ;;  %v6040_v57 = vld [vmem:[#allocation7 + $0x48] sm:$0xff] }
 0x2c6   :  { %8134 = vst [vmem:[#allocation75_spill] sm:$0xff] %v6022_v1 }
 0x2c7   :  { %1647 = vmatmul.f32.vlgmr.msra.gmra.mxu0 %v1616_v44  ;;  %1667 = vmatmul.f32.vlgmr.msrb.gmra.mxu1 %v1616_v44  ;;  %8135 = vst [vmem:[#allocation73_spill] sm:$0xff] %v6025_v58 }
 0x2c8   :  { %1687 = vmatmul.f32.vlgmr.msrb.gmra.mxu2 %v1616_v44  ;;  %1707 = vmatmul.f32.vlgmr.msrb.gmra.mxu3 %v1616_v44  ;;  %8136 = vst [vmem:[#allocation84_spill] sm:$0xff] %v6028_v37 }
 0x2c9   :  { %1946 = vmatpush.msra.mxu0 %v5869_v35  ;;  %1966 = vmatpush.msrb.mxu1 %v5872_v4  ;;  %8137 = vst [vmem:[#allocation85_spill] sm:$0xff] %v6031_v55 }
 0x2ca   :  { %1986 = vmatpush.msrb.mxu2 %v5875_v8  ;;  %2006 = vmatpush.msrb.mxu3 %v5878_v38  ;;  %8138 = vst [vmem:[#allocation86_spill] sm:$0xff] %v6034_v51 }
 0x2cb   :  { %1947 = vmatpush.msra.mxu0 %v5881_v9  ;;  %1967 = vmatpush.msrb.mxu1 %v5884_v24  ;;  %8139 = vst [vmem:[#allocation87_spill] sm:$0xff] %v6037_v34 }
 0x2cc   :  { %1987 = vmatpush.msrb.mxu2 %v5887_v27  ;;  %2007 = vmatpush.msrb.mxu3 %v5890_v40  ;;  %8140 = vst [vmem:[#allocation88_spill] sm:$0xff] %v6040_v57 }
 0x2cd   :  { %1948 = vmatpush.msra.mxu0 %v5893_v39  ;;  %1968 = vmatpush.msrb.mxu1 %v5896_v60 }
 0x2ce   :  { %1988 = vmatpush.msrb.mxu2 %v5899_v42  ;;  %2008 = vmatpush.msrb.mxu3 %v5902_v7 }
 0x2cf   :  { %1727 = vmatmul.f32.vlgmr.msrb.gmra.mxu0 %v1616_v44  ;;  %1747 = vmatmul.f32.vlgmr.msra.gmra.mxu1 %v1616_v44 }
 0x2d0   :  { %1767 = vmatmul.f32.vlgmr.msra.gmra.mxu2 %v1616_v44  ;;  %1787 = vmatmul.f32.vlgmr.msra.gmra.mxu3 %v1616_v44  ;;  %v6043_v44 = vld [vmem:[#allocation7 + $0x50] sm:$0xff] }
 0x2d1   :  { %1949 = vmatpush.msra.mxu0 %v5905_v0  ;;  %1969 = vmatpush.msrb.mxu1 %v5908_v36  ;;  %8141 = vst [vmem:[#allocation89_spill] sm:$0xff] %v6043_v44 }
 0x2d2   :  { %1989 = vmatpush.msrb.mxu2 %v5911_v47  ;;  %2009 = vmatpush.msrb.mxu3 %v5914_v29 }
 0x2d3   :  { %1950 = vmatpush.msra.mxu0 %v5917_v43  ;;  %1970 = vmatpush.msrb.mxu1 %v5920_v53 }
 0x2d4   :  { %1990 = vmatpush.msrb.mxu2 %v5923_v54  ;;  %2010 = vmatpush.msrb.mxu3 %v5926_v3 }
 0x2d5   :  { %1951 = vmatpush.msra.mxu0 %v5929_v62  ;;  %1971 = vmatpush.msrb.mxu1 %v5932_v52 }
 0x2d6   :  { %1991 = vmatpush.msrb.mxu2 %v5935_v49  ;;  %2011 = vmatpush.msrb.mxu3 %v5938_v12 }
 0x2d7   :  { %1952 = vmatpush.msra.mxu0 %v5941_v25  ;;  %1972 = vmatpush.msrb.mxu1 %v5944_v59 }
 0x2d8   :  { %1992 = vmatpush.msrb.mxu2 %v5947_v13  ;;  %2012 = vmatpush.msrb.mxu3 %v5950_v61 }
 0x2d9   :  { %1953 = vmatpush.msra.mxu0 %v5953_v6  ;;  %1973 = vmatpush.msrb.mxu1 %v5956_v30 }
 0x2da   :  { %1993 = vmatpush.msrb.mxu2 %v5959_v63  ;;  %2013 = vmatpush.msrb.mxu3 %v5962_v19 }
 0x2db   :  { %1954 = vmatpush.msra.mxu0 %v5965_v15  ;;  %1974 = vmatpush.msrb.mxu1 %v5968_v48 }
 0x2dc   :  { %1994 = vmatpush.msrb.mxu2 %v5971_v20  ;;  %2014 = vmatpush.msrb.mxu3 %v5974_v17 }
 0x2dd   :  { %1955 = vmatpush.msra.mxu0 %v5977_v32  ;;  %1975 = vmatpush.msrb.mxu1 %v5980_v22 }
 0x2de   :  { %1995 = vmatpush.msrb.mxu2 %v5983_v2  ;;  %2015 = vmatpush.msrb.mxu3 %v5986_v18 }
 0x2df   :  { %1956 = vmatpush.msra.mxu0 %v5989_v28  ;;  %1976 = vmatpush.msrb.mxu1 %v5992_v31  ;;  %v8218_v28 = vld [vmem:[#allocation42_spill] sm:$0xff] }
 0x2e0   :  { %1996 = vmatpush.msrb.mxu2 %v5995_v23  ;;  %2016 = vmatpush.msrb.mxu3 %v5998_v14 }
 0x2e1   :  { %1957 = vmatpush.msra.mxu0 %v6001_v56  ;;  %1977 = vmatpush.msrb.mxu1 %v6004_v5  ;;  %v8214_v5 = vld [vmem:[#allocation17_spill] sm:$0xff] }
 0x2e2   :  { %1997 = vmatpush.msrb.mxu2 %v6007_v11  ;;  %2017 = vmatpush.msrb.mxu3 %v6010_v45  ;;  %v8213_v11 = vld [vmem:[#allocation13_spill] sm:$0xff]  ;;  %v305_v56 = vadd.f32 %v8214_v5, %v8107_v50 }
 0x2e3   :  { %1958 = vmatpush.msra.mxu0 %v6013_v33  ;;  %1978 = vmatpush.msrb.mxu1 %v6016_v10 }
 0x2e4   :  { %1998 = vmatpush.msrb.mxu2 %v6019_v41  ;;  %2018 = vmatpush.msrb.mxu3 %v6022_v1 }
 0x2e5   :  { %1959 = vmatpush.msra.mxu0 %v6025_v58  ;;  %1979 = vmatpush.msrb.mxu1 %v6028_v37  ;;  %v6046_v37 = vld [vmem:[#allocation7 + $0x58] sm:$0xff] }
 0x2e6   :  { %1999 = vmatpush.msrb.mxu2 %v6031_v55  ;;  %2019 = vmatpush.msrb.mxu3 %v6034_v51  ;;  %8142 = vst [vmem:[#allocation90_spill] sm:$0xff] %v6046_v37  ;;  %v6049_v55 = vld [vmem:[#allocation7] sm:$0xff]  ;;  %v6052_v51 = vld [vmem:[#allocation7 + $0x8] sm:$0xff] }
 0x2e7   :  { %1960 = vmatpush.msra.mxu0 %v6037_v34  ;;  %1980 = vmatpush.msrb.mxu1 %v6040_v57  ;;  %8143 = vst [vmem:[#allocation91_spill] sm:$0xff] %v6049_v55  ;;  %v6055_v34 = vld [vmem:[#allocation7 + $0x10] sm:$0xff]  ;;  %v6058_v57 = vld [vmem:[#allocation7 + $0x18] sm:$0xff] }
 0x2e8   :  { %2000 = vmatpush.msrb.mxu2 %v6043_v44  ;;  %2020 = vmatpush.msrb.mxu3 %v6046_v37  ;;  %8144 = vst [vmem:[#allocation92_spill] sm:$0xff] %v6052_v51  ;;  %v6061_v44 = vld [vmem:[#allocation7 + $0x3e0] sm:$0xff]  ;;  %v6064_v37 = vld [vmem:[#allocation7 + $0x3e8] sm:$0xff] }
 0x2e9   :  { %1961 = vmatpush.msra.mxu0 %v6049_v55  ;;  %1981 = vmatpush.msrb.mxu1 %v6052_v51  ;;  %8145 = vst [vmem:[#allocation93_spill] sm:$0xff] %v6055_v34  ;;  %v6067_v55 = vld [vmem:[#allocation7 + $0x3f0] sm:$0xff]  ;;  %v6070_v51 = vld [vmem:[#allocation7 + $0x3f8] sm:$0xff] }
 0x2ea   :  { %2001 = vmatpush.msrb.mxu2 %v6055_v34  ;;  %8146 = vst [vmem:[#allocation94_spill] sm:$0xff] %v6058_v57  ;;  %2021 = vmatpush.msrb.mxu3 %v6058_v57  ;;  %v6073_v34 = vld [vmem:[#allocation7 + $0x3a0] sm:$0xff]  ;;  %v6076_v57 = vld [vmem:[#allocation7 + $0x3a8] sm:$0xff] }
 0x2eb   :  { %8147 = vst [vmem:[#allocation95_spill] sm:$0xff] %v6061_v44  ;;  %2026 = vmatpush.msrb.mxu0 %v6061_v44  ;;  %2046 = vmatpush.msra.mxu1 %v6064_v37  ;;  %v6079_v44 = vld [vmem:[#allocation7 + $0x3b0] sm:$0xff] }
 0x2ec   :  { %8148 = vst [vmem:[#allocation96_spill] sm:$0xff] %v6064_v37  ;;  %2066 = vmatpush.msra.mxu2 %v6067_v55  ;;  %2086 = vmatpush.msra.mxu3 %v6070_v51  ;;  %v6082_v37 = vld [vmem:[#allocation7 + $0x3b8] sm:$0xff] }
 0x2ed   :  { %8149 = vst [vmem:[#allocation97_spill] sm:$0xff] %v6067_v55  ;;  %2027 = vmatpush.msrb.mxu0 %v6073_v34  ;;  %2047 = vmatpush.msra.mxu1 %v6076_v57  ;;  %v6085_v55 = vld [vmem:[#allocation7 + $0x360] sm:$0xff] }
 0x2ee   :  { %8150 = vst [vmem:[#allocation98_spill] sm:$0xff] %v6070_v51  ;;  %2067 = vmatpush.msra.mxu2 %v6079_v44  ;;  %2087 = vmatpush.msra.mxu3 %v6082_v37  ;;  %v6088_v51 = vld [vmem:[#allocation7 + $0x368] sm:$0xff] }
 0x2ef   :  { %8151 = vst [vmem:[#allocation99_spill] sm:$0xff] %v6073_v34  ;;  %2028 = vmatpush.msrb.mxu0 %v6085_v55  ;;  %2048 = vmatpush.msra.mxu1 %v6088_v51  ;;  %v6091_v34 = vld [vmem:[#allocation7 + $0x370] sm:$0xff] }
 0x2f0   :  { %8152 = vst [vmem:[#allocation100_spill] sm:$0xff] %v6076_v57  ;;  %2068 = vmatpush.msra.mxu2 %v6091_v34  ;;  %v6094_v57 = vld [vmem:[#allocation7 + $0x378] sm:$0xff] }
 0x2f1   :  { %8153 = vst [vmem:[#allocation101_spill] sm:$0xff] %v6079_v44  ;;  %2088 = vmatpush.msra.mxu3 %v6094_v57  ;;  %v6097_v44 = vld [vmem:[#allocation7 + $0x320] sm:$0xff] }
 0x2f2   :  { %8154 = vst [vmem:[#allocation102_spill] sm:$0xff] %v6082_v37  ;;  %2029 = vmatpush.msrb.mxu0 %v6097_v44  ;;  %v6100_v37 = vld [vmem:[#allocation7 + $0x328] sm:$0xff] }
 0x2f3   :  { %8155 = vst [vmem:[#allocation103_spill] sm:$0xff] %v6085_v55  ;;  %2049 = vmatpush.msra.mxu1 %v6100_v37  ;;  %v6103_v55 = vld [vmem:[#allocation7 + $0x330] sm:$0xff] }
 0x2f4   :  { %8156 = vst [vmem:[#allocation104_spill] sm:$0xff] %v6088_v51  ;;  %2069 = vmatpush.msra.mxu2 %v6103_v55  ;;  %v6106_v51 = vld [vmem:[#allocation7 + $0x338] sm:$0xff] }
 0x2f5   :  { %8157 = vst [vmem:[#allocation105_spill] sm:$0xff] %v6091_v34  ;;  %2089 = vmatpush.msra.mxu3 %v6106_v51  ;;  %v6109_v34 = vld [vmem:[#allocation7 + $0x2e0] sm:$0xff] }
 0x2f6   :  { %8158 = vst [vmem:[#allocation106_spill] sm:$0xff] %v6094_v57  ;;  %2030 = vmatpush.msrb.mxu0 %v6109_v34  ;;  %v6112_v57 = vld [vmem:[#allocation7 + $0x2e8] sm:$0xff] }
 0x2f7   :  { %8159 = vst [vmem:[#allocation107_spill] sm:$0xff] %v6097_v44  ;;  %2050 = vmatpush.msra.mxu1 %v6112_v57  ;;  %v6115_v44 = vld [vmem:[#allocation7 + $0x2f0] sm:$0xff] }
 0x2f8   :  { %8160 = vst [vmem:[#allocation108_spill] sm:$0xff] %v6100_v37  ;;  %2070 = vmatpush.msra.mxu2 %v6115_v44  ;;  %v6118_v37 = vld [vmem:[#allocation7 + $0x2f8] sm:$0xff] }
 0x2f9   :  { %8161 = vst [vmem:[#allocation109_spill] sm:$0xff] %v6103_v55  ;;  %2090 = vmatpush.msra.mxu3 %v6118_v37  ;;  %v6121_v55 = vld [vmem:[#allocation7 + $0x2a0] sm:$0xff] }
 0x2fa   :  { %8162 = vst [vmem:[#allocation110_spill] sm:$0xff] %v6106_v51  ;;  %2031 = vmatpush.msrb.mxu0 %v6121_v55  ;;  %v6124_v51 = vld [vmem:[#allocation7 + $0x2a8] sm:$0xff] }
 0x2fb   :  { %8163 = vst [vmem:[#allocation111_spill] sm:$0xff] %v6109_v34  ;;  %2051 = vmatpush.msra.mxu1 %v6124_v51  ;;  %v6127_v34 = vld [vmem:[#allocation7 + $0x2b0] sm:$0xff] }
 0x2fc   :  { %8164 = vst [vmem:[#allocation112_spill] sm:$0xff] %v6112_v57  ;;  %2071 = vmatpush.msra.mxu2 %v6127_v34  ;;  %v6130_v57 = vld [vmem:[#allocation7 + $0x2b8] sm:$0xff] }
 0x2fd   :  { %8165 = vst [vmem:[#allocation113_spill] sm:$0xff] %v6115_v44  ;;  %2091 = vmatpush.msra.mxu3 %v6130_v57  ;;  %v6133_v44 = vld [vmem:[#allocation7 + $0x260] sm:$0xff] }
 0x2fe   :  { %8166 = vst [vmem:[#allocation114_spill] sm:$0xff] %v6118_v37  ;;  %2032 = vmatpush.msrb.mxu0 %v6133_v44  ;;  %v6136_v37 = vld [vmem:[#allocation7 + $0x268] sm:$0xff] }
 0x2ff   :  { %8167 = vst [vmem:[#allocation115_spill] sm:$0xff] %v6121_v55  ;;  %2052 = vmatpush.msra.mxu1 %v6136_v37  ;;  %v6139_v55 = vld [vmem:[#allocation7 + $0x270] sm:$0xff] }
 0x300   :  { %8168 = vst [vmem:[#allocation116_spill] sm:$0xff] %v6124_v51  ;;  %2072 = vmatpush.msra.mxu2 %v6139_v55  ;;  %v6142_v51 = vld [vmem:[#allocation7 + $0x278] sm:$0xff] }
 0x301   :  { %8169 = vst [vmem:[#allocation117_spill] sm:$0xff] %v6127_v34  ;;  %2092 = vmatpush.msra.mxu3 %v6142_v51  ;;  %v6145_v34 = vld [vmem:[#allocation7 + $0x220] sm:$0xff] }
 0x302   :  { %8170 = vst [vmem:[#allocation118_spill] sm:$0xff] %v6130_v57  ;;  %2033 = vmatpush.msrb.mxu0 %v6145_v34  ;;  %v6148_v57 = vld [vmem:[#allocation7 + $0x228] sm:$0xff] }
 0x303   :  { %8171 = vst [vmem:[#allocation119_spill] sm:$0xff] %v6133_v44  ;;  %2053 = vmatpush.msra.mxu1 %v6148_v57  ;;  %v6151_v44 = vld [vmem:[#allocation7 + $0x230] sm:$0xff] }
 0x304   :  { %8172 = vst [vmem:[#allocation120_spill] sm:$0xff] %v6136_v37  ;;  %2073 = vmatpush.msra.mxu2 %v6151_v44  ;;  %v6154_v37 = vld [vmem:[#allocation7 + $0x238] sm:$0xff] }
 0x305   :  { %8173 = vst [vmem:[#allocation121_spill] sm:$0xff] %v6139_v55  ;;  %2093 = vmatpush.msra.mxu3 %v6154_v37  ;;  %v6157_v55 = vld [vmem:[#allocation7 + $0x1e0] sm:$0xff] }
 0x306   :  { %8174 = vst [vmem:[#allocation122_spill] sm:$0xff] %v6142_v51  ;;  %2034 = vmatpush.msrb.mxu0 %v6157_v55  ;;  %v6160_v51 = vld [vmem:[#allocation7 + $0x1e8] sm:$0xff] }
 0x307   :  { %8175 = vst [vmem:[#allocation123_spill] sm:$0xff] %v6145_v34  ;;  %2054 = vmatpush.msra.mxu1 %v6160_v51  ;;  %v6163_v34 = vld [vmem:[#allocation7 + $0x1f0] sm:$0xff] }
 0x308   :  { %8176 = vst [vmem:[#allocation124_spill] sm:$0xff] %v6148_v57  ;;  %2074 = vmatpush.msra.mxu2 %v6163_v34  ;;  %v6166_v57 = vld [vmem:[#allocation7 + $0x1f8] sm:$0xff] }
 0x309   :  { %8177 = vst [vmem:[#allocation125_spill] sm:$0xff] %v6151_v44  ;;  %2094 = vmatpush.msra.mxu3 %v6166_v57  ;;  %v6169_v44 = vld [vmem:[#allocation7 + $0x1a0] sm:$0xff] }
 0x30a   :  { %8178 = vst [vmem:[#allocation126_spill] sm:$0xff] %v6154_v37  ;;  %2035 = vmatpush.msrb.mxu0 %v6169_v44  ;;  %v6172_v37 = vld [vmem:[#allocation7 + $0x1a8] sm:$0xff] }
 0x30b   :  { %8179 = vst [vmem:[#allocation127_spill] sm:$0xff] %v6157_v55  ;;  %2055 = vmatpush.msra.mxu1 %v6172_v37  ;;  %v6175_v55 = vld [vmem:[#allocation7 + $0x1b0] sm:$0xff] }
 0x30c   :  { %8180 = vst [vmem:[#allocation128_spill] sm:$0xff] %v6160_v51  ;;  %2075 = vmatpush.msra.mxu2 %v6175_v55  ;;  %v6178_v51 = vld [vmem:[#allocation7 + $0x1b8] sm:$0xff] }
 0x30d   :  { %8181 = vst [vmem:[#allocation129_spill] sm:$0xff] %v6163_v34  ;;  %2095 = vmatpush.msra.mxu3 %v6178_v51  ;;  %v6181_v34 = vld [vmem:[#allocation7 + $0x160] sm:$0xff] }
 0x30e   :  { %8182 = vst [vmem:[#allocation130_spill] sm:$0xff] %v6166_v57  ;;  %2036 = vmatpush.msrb.mxu0 %v6181_v34  ;;  %v6184_v57 = vld [vmem:[#allocation7 + $0x168] sm:$0xff] }
 0x30f   :  { %8183 = vst [vmem:[#allocation131_spill] sm:$0xff] %v6169_v44  ;;  %2056 = vmatpush.msra.mxu1 %v6184_v57  ;;  %v6187_v44 = vld [vmem:[#allocation7 + $0x170] sm:$0xff] }
 0x310   :  { %8184 = vst [vmem:[#allocation132_spill] sm:$0xff] %v6172_v37  ;;  %2076 = vmatpush.msra.mxu2 %v6187_v44  ;;  %v6190_v37 = vld [vmem:[#allocation7 + $0x178] sm:$0xff] }
 0x311   :  { %8185 = vst [vmem:[#allocation133_spill] sm:$0xff] %v6175_v55  ;;  %2096 = vmatpush.msra.mxu3 %v6190_v37  ;;  %v6193_v55 = vld [vmem:[#allocation7 + $0x120] sm:$0xff] }
 0x312   :  { %8186 = vst [vmem:[#allocation134_spill] sm:$0xff] %v6178_v51  ;;  %2037 = vmatpush.msrb.mxu0 %v6193_v55  ;;  %v6196_v51 = vld [vmem:[#allocation7 + $0x128] sm:$0xff] }
 0x313   :  { %8187 = vst [vmem:[#allocation135_spill] sm:$0xff] %v6181_v34  ;;  %2057 = vmatpush.msra.mxu1 %v6196_v51  ;;  %v6199_v34 = vld [vmem:[#allocation7 + $0x130] sm:$0xff] }
 0x314   :  { %8188 = vst [vmem:[#allocation136_spill] sm:$0xff] %v6184_v57  ;;  %2077 = vmatpush.msra.mxu2 %v6199_v34  ;;  %v6202_v57 = vld [vmem:[#allocation7 + $0x138] sm:$0xff] }
 0x315   :  { %8189 = vst [vmem:[#allocation137_spill] sm:$0xff] %v6187_v44  ;;  %2097 = vmatpush.msra.mxu3 %v6202_v57  ;;  %v6205_v44 = vld [vmem:[#allocation7 + $0xe0] sm:$0xff] }
 0x316   :  { %8190 = vst [vmem:[#allocation138_spill] sm:$0xff] %v6190_v37  ;;  %2038 = vmatpush.msrb.mxu0 %v6205_v44  ;;  %v6208_v37 = vld [vmem:[#allocation7 + $0xe8] sm:$0xff] }
 0x317   :  { %8191 = vst [vmem:[#allocation139_spill] sm:$0xff] %v6193_v55  ;;  %2058 = vmatpush.msra.mxu1 %v6208_v37  ;;  %v6211_v55 = vld [vmem:[#allocation7 + $0xf0] sm:$0xff] }
 0x318   :  { %8192 = vst [vmem:[#allocation140_spill] sm:$0xff] %v6196_v51  ;;  %2078 = vmatpush.msra.mxu2 %v6211_v55  ;;  %v6214_v51 = vld [vmem:[#allocation7 + $0xf8] sm:$0xff] }
 0x319   :  { %8193 = vst [vmem:[#allocation141_spill] sm:$0xff] %v6199_v34  ;;  %2098 = vmatpush.msra.mxu3 %v6214_v51  ;;  %v6217_v34 = vld [vmem:[#allocation7 + $0xa0] sm:$0xff] }
 0x31a   :  { %8194 = vst [vmem:[#allocation142_spill] sm:$0xff] %v6202_v57  ;;  %2039 = vmatpush.msrb.mxu0 %v6217_v34  ;;  %v6220_v57 = vld [vmem:[#allocation7 + $0xa8] sm:$0xff] }
 0x31b   :  { %8195 = vst [vmem:[#allocation143_spill] sm:$0xff] %v6205_v44  ;;  %2059 = vmatpush.msra.mxu1 %v6220_v57  ;;  %v6223_v44 = vld [vmem:[#allocation7 + $0xb0] sm:$0xff] }
 0x31c   :  { %8196 = vst [vmem:[#allocation144_spill] sm:$0xff] %v6208_v37  ;;  %2079 = vmatpush.msra.mxu2 %v6223_v44  ;;  %v6226_v37 = vld [vmem:[#allocation7 + $0xb8] sm:$0xff] }
 0x31d   :  { %8197 = vst [vmem:[#allocation145_spill] sm:$0xff] %v6211_v55  ;;  %2099 = vmatpush.msra.mxu3 %v6226_v37  ;;  %v6229_v55 = vld [vmem:[#allocation7 + $0x60] sm:$0xff] }
 0x31e   :  { %8198 = vst [vmem:[#allocation146_spill] sm:$0xff] %v6214_v51  ;;  %2040 = vmatpush.msrb.mxu0 %v6229_v55  ;;  %v6232_v51 = vld [vmem:[#allocation7 + $0x68] sm:$0xff] }
 0x31f   :  { %8199 = vst [vmem:[#allocation147_spill] sm:$0xff] %v6217_v34  ;;  %2060 = vmatpush.msra.mxu1 %v6232_v51  ;;  %v6235_v34 = vld [vmem:[#allocation7 + $0x70] sm:$0xff] }
 0x320   :  { %8200 = vst [vmem:[#allocation148_spill] sm:$0xff] %v6220_v57  ;;  %2080 = vmatpush.msra.mxu2 %v6235_v34  ;;  %v6238_v57 = vld [vmem:[#allocation7 + $0x78] sm:$0xff] }
 0x321   :  { %8201 = vst [vmem:[#allocation149_spill] sm:$0xff] %v6223_v44  ;;  %2100 = vmatpush.msra.mxu3 %v6238_v57  ;;  %v6241_v44 = vld [vmem:[#allocation7 + $0x20] sm:$0xff] }
 0x322   :  { %8202 = vst [vmem:[#allocation150_spill] sm:$0xff] %v6226_v37  ;;  %2041 = vmatpush.msrb.mxu0 %v6241_v44  ;;  %v6244_v37 = vld [vmem:[#allocation7 + $0x28] sm:$0xff] }
 0x323   :  { %8203 = vst [vmem:[#allocation151_spill] sm:$0xff] %v6229_v55  ;;  %2061 = vmatpush.msra.mxu1 %v6244_v37  ;;  %v6247_v55 = vld [vmem:[#allocation7 + $0x30] sm:$0xff] }
 0x324   :  { %8204 = vst [vmem:[#allocation152_spill] sm:$0xff] %v6232_v51  ;;  %2081 = vmatpush.msra.mxu2 %v6247_v55  ;;  %v6250_v51 = vld [vmem:[#allocation7 + $0x38] sm:$0xff] }
 0x325   :  { %8205 = vst [vmem:[#allocation153_spill] sm:$0xff] %v6235_v34  ;;  %2101 = vmatpush.msra.mxu3 %v6250_v51  ;;  %v8211_v34 = vld [vmem:[#allocation79_spill] sm:$0xff] }
 0x326   :  { %8206 = vst [vmem:[#allocation154_spill] sm:$0xff] %v6238_v57  ;;  %v182_v58 = vadd.f32 %v8211_v34, %v8101_v16  ;;  %v8212_v57 = vld [vmem:[#allocation83_spill] sm:$0xff] }
 0x327   :  { %8207 = vst [vmem:[#allocation155_spill] sm:$0xff] %v6241_v44  ;;  %v223_v1 = vadd.f32 %v8212_v57, %v8103_v21  ;;  %v8215_v21 = vld [vmem:[#allocation29_spill] sm:$0xff] }
 0x328   :  { %8208 = vst [vmem:[#allocation156_spill] sm:$0xff] %v6244_v37 }
 0x329   :  { %8209 = vst [vmem:[#allocation157_spill] sm:$0xff] %v6247_v55  ;;  %v264_v55 = vadd.f32 %v8213_v11, %v8105_v26 }
 0x32a   :  { %8210 = vst [vmem:[#allocation158_spill] sm:$0xff] %v6250_v51 }
 0x344   :  { %v1648_v41 = vpop.f32.mrf.mxu0  ;;  %v1668_v44 = vpop.f32.mrf.mxu1 }
 0x345   :  { %v1791_v10 = vadd.f32 %v1648_v41, %v182_v58  ;;  %v1792_v33 = vadd.f32 %v1668_v44, %v223_v1  ;;  %v8216_v41 = vld [vmem:[#allocation39_spill] sm:$0xff] }
 0x347   :  { %v3342_v45 = vmul.f32 -1.442695, %v1791_v10  ;;  %v3343_v37 = vmul.f32 -1.442695, %v1792_v33 }
 0x349   :  { %3494 = vpow2.f32 %v3342_v45 }
 0x34a   :  { %3496 = vpow2.f32 %v3343_v37 }
 0x34b   :  { %v1688_v51 = vpop.f32.mrf.mxu2  ;;  %v1708_v14 = vpop.f32.mrf.mxu3 }
 0x34c   :  { %v1793_v34 = vadd.f32 %v1688_v51, %v264_v55  ;;  %v1794_v16 = vadd.f32 %v1708_v14, %v305_v56  ;;  %v1728_v23 = vpop.f32.mrf.mxu0  ;;  %v1748_v57 = vpop.f32.mrf.mxu1  ;;  %v8217_v55 = vld [vmem:[#allocation41_spill] sm:$0xff] }
 0x34d   :  { %v1795_v31 = vadd.f32 %v1728_v23, %v8215_v21  ;;  %v1796_v1 = vadd.f32 %v1748_v57, %v8216_v41 }
 0x34e   :  { %v3344_v10 = vmul.f32 -1.442695, %v1793_v34  ;;  %v3345_v33 = vmul.f32 -1.442695, %v1794_v16 }
 0x34f   :  { %v3495_v45 = vpop.eup %3494  ;;  %v3346_v11 = vmul.f32 -1.442695, %v1795_v31  ;;  %v3347_v5 = vmul.f32 -1.442695, %v1796_v1 }
 0x350   :  { %v3497_v58 = vpop.eup %3496  ;;  %v1817_v44 = vadd.f32 1.0, %v3495_v45  ;;  %3498 = vpow2.f32 %v3344_v10 }
 0x351   :  { %v1818_v26 = vadd.f32 1.0, %v3497_v58  ;;  %3500 = vpow2.f32 %v3345_v33 }
 0x352   :  { %3502 = vrcp.f32 %v1817_v44  ;;  %v1832_v1 = vand.u32 2147483647, %v1817_v44  ;;  %vm1828_vm11 = vweird.f32 %v1817_v44 }
 0x353   :  { %3504 = vrcp.f32 %v1818_v26  ;;  %v1768_v21 = vpop.f32.mrf.mxu2  ;;  %v1788_v33 = vpop.f32.mrf.mxu3  ;;  %vm1843_vm12 = vweird.f32 %v1818_v26 }
 0x354   :  { %3506 = vpow2.f32 %v3346_v11  ;;  %v1797_v31 = vadd.f32 %v1768_v21, %v8217_v55  ;;  %v1849_v11 = vand.u32 2147483648, %v1818_v26  ;;  %v1847_v21 = vand.u32 2147483647, %v1818_v26 }
 0x355   :  { %3508 = vpow2.f32 %v3347_v5  ;;  %v1798_v18 = vadd.f32 %v1788_v33, %v8218_v28  ;;  %vm6282_vm13 = vcmp.eq.f32.partialorder %v1832_v1, 8.507059e+37 }
 0x356   :  { %v3499_v23 = vpop.eup %3498  ;;  %v1850_v10 = vor.u32 1.1754944e-38, %v1849_v11  ;;  %vm1848_vm15 = vcmp.eq.f32.partialorder %v1847_v21, 8.507059e+37 }
 0x357   :  { %v3501_v14 = vpop.eup %3500  ;;  %v6265_v56 = vadd.f32 1.0, %v3499_v23  ;;  %v1834_v23 = vand.u32 2147483648, %v1817_v44 }
 0x358   :  { %v3503_v16 = vpop.eup %3502  ;;  %v6267_v37 = vadd.f32 1.0, %v3501_v14 }
 0x359   :  { %v3505_v51 = vpop.eup %3504  ;;  %v1824_v34 = vmul.f32 %v3503_v16, %v1817_v44  ;;  %3510 = vrcp.f32 %v6265_v56  ;;  %vm1829_vm9 = vweird.f32 %v3503_v16  ;;  %vm1858_vm1 = vweird.f32 %v6265_v56 }
 0x35a   :  { %v3507_v57 = vpop.eup %3506  ;;  %v1839_v41 = vmul.f32 %v3505_v51, %v1818_v26  ;;  %3512 = vrcp.f32 %v6267_v37  ;;  %vm1844_vm10 = vweird.f32 %v3505_v51  ;;  %vm1830_vm14 = vmor %vm1828_vm11, %vm1829_vm9  ;;  %v1879_v21 = vand.u32 2147483648, %v6267_v37 }
 0x35b   :  { %v3509_v45 = vpop.eup %3508  ;;  %v1825_v58 = vsub.f32 1.0, %v1824_v34  ;;  %v6273_v5 = vadd.f32 1.0, %v3507_v57  ;;  %3514 = vtanh.f32 %v1797_v31  ;;  %v1835_v31 = vor.u32 1.1754944e-38, %v1834_v23  ;;  %vm1845_vm0 = vmor %vm1843_vm12, %vm1844_vm10 }
 0x35c   :  { %v1840_v14 = vsub.f32 1.0, %v1839_v41  ;;  %v6275_v50 = vadd.f32 1.0, %v3509_v45  ;;  %vm1873_vm2 = vweird.f32 %v6267_v37 }
 0x35d   :  { %3516 = vrcp.f32 %v6273_v5  ;;  %v1826_v55 = vmul.f32 %v3503_v16, %v1825_v58  ;;  %vm1888_vm9 = vweird.f32 %v6273_v5 }
 0x35e   :  { %v1841_v2 = vmul.f32 %v3505_v51, %v1840_v14  ;;  %3518 = vrcp.f32 %v6275_v50  ;;  %v1864_v14 = vand.u32 2147483648, %v6265_v56 }
 0x35f   :  { %v6280_v34 = vpop.eup %3510  ;;  %v1827_v57 = vadd.f32 %v3503_v16, %v1826_v55  ;;  %3520 = vtanh.f32 %v1798_v18 }
 0x360   :  { %v3513_v45 = vpop.eup %3512  ;;  %v1854_v58 = vmul.f32 %v6280_v34, %v6265_v56  ;;  %v1842_v28 = vadd.f32 %v3505_v51, %v1841_v2  ;;  %vm1859_vm4 = vweird.f32 %v6280_v34 }
 0x361   :  { %v1869_v44 = vmul.f32 %v3513_v45, %v6267_v37  ;;  %v1831_v26 = vsel %vm1830_vm14, %v3503_v16, %v1827_v57  ;;  %v3515_v1 = vpop.eup %3514  ;;  %vm1874_vm3 = vweird.f32 %v3513_v45  ;;  %vm6319_vm8 = vmor %vm1858_vm1, %vm1859_vm4  ;;  %vm1903_vm14 = vweird.f32 %v6275_v50 }
 0x362   :  { %v1855_v33 = vsub.f32 1.0, %v1854_v58  ;;  %v1836_v11 = vsel %vm6282_vm13, %v1835_v31, %v1831_v26  ;;  %v1846_v23 = vsel %vm1845_vm0, %v3505_v51, %v1842_v28  ;;  %v1894_v31 = vand.u32 2147483648, %v6273_v5  ;;  %vm1875_vm6 = vmor %vm1873_vm2, %vm1874_vm3 }
 0x363   :  { %v3517_v55 = vpop.eup %3516  ;;  %v1870_v22 = vsub.f32 1.0, %v1869_v44  ;;  %v1851_v32 = vsel %vm1848_vm15, %v1850_v10, %v1846_v23  ;;  %v1916_v2 = vmul.f32 %v3515_v1, %v1836_v11  ;;  %v1877_v10 = vand.u32 2147483647, %v6267_v37 }
 0x364   :  { %v6294_v17 = vpop.eup %3518  ;;  %v1856_v20 = vmul.f32 %v6280_v34, %v1855_v33  ;;  %v1884_v18 = vmul.f32 %v3517_v55, %v6273_v5  ;;  %v1915_v16 = vmul.f32 %v1851_v32, %v5864_v46  ;;  %vm1889_vm5 = vweird.f32 %v3517_v55 }
 0x365   :  { %v1899_v57 = vmul.f32 %v6294_v17, %v6275_v50  ;;  %v1871_v51 = vmul.f32 %v3513_v45, %v1870_v22  ;;  %v3521_v28 = vpop.eup %3520  ;;  %v1880_v26 = vor.u32 1.1754944e-38, %v1879_v21  ;;  %v8221_v22 = vstv %s6263_s0  ;;  %vm1890_vm10 = vmor %vm1888_vm9, %vm1889_vm5 }
 0x366   :  { %v1885_v41 = vsub.f32 1.0, %v1884_v18  ;;  %v1917_v58 = vadd.f32 %v1916_v2, %v1915_v16  ;;  %v1857_v44 = vadd.f32 %v6280_v34, %v1856_v20  ;;  %v1892_v11 = vand.u32 2147483647, %v6273_v5 }
 0x367   :  { %v1872_v32 = vadd.f32 %v3513_v45, %v1871_v51  ;;  %v1862_v23 = vand.u32 2147483647, %v6265_v56  ;;  %v1900_v2 = vsub.f32 1.0, %v1899_v57  ;;  %vm1878_vm7 = vcmp.eq.f32.partialorder %v1877_v10, 8.507059e+37 }
 0x368   :  { %v1886_v1 = vmul.f32 %v3517_v55, %v1885_v41  ;;  %3522 = vtanh.f32 %v1917_v58  ;;  %v1932_v33 = vmul.f32 %v8221_v22, %v1917_v58  ;;  %v1861_v16 = vsel %vm6319_vm8, %v6280_v34, %v1857_v44 }
 0x369   :  { %v1876_v18 = vsel %vm1875_vm6, %v3513_v45, %v1872_v32  ;;  %v1895_v45 = vor.u32 1.1754944e-38, %v1894_v31  ;;  %v1865_v51 = vor.u32 1.1754944e-38, %v1864_v14  ;;  %vm1893_vm11 = vcmp.eq.f32.partialorder %v1892_v11, 8.507059e+37 }
 0x36a   :  { %v1881_v21 = vsel %vm1878_vm7, %v1880_v26, %v1876_v18  ;;  %v1887_v37 = vadd.f32 %v3517_v55, %v1886_v1  ;;  %vm1863_vm12 = vcmp.eq.f32.partialorder %v1862_v23, 8.507059e+37  ;;  %v1901_v56 = vmul.f32 %v6294_v17, %v1900_v2 }
 0x36b   :  { %v1919_v57 = vmul.f32 %v3521_v28, %v1881_v21  ;;  %v1866_v5 = vsel %vm1863_vm12, %v1865_v51, %v1861_v16  ;;  %v1929_v1 = vstv %s6306_s23  ;;  %vm1904_vm13 = vweird.f32 %v6294_v17  ;;  %v8262_v16 = vld [vmem:[#allocation102_spill] sm:$0xff]  ;;  %v8265_v51 = vld [vmem:[#allocation105_spill] sm:$0xff] }
 0x36c   :  { %v1891_v10 = vsel %vm1890_vm10, %v3517_v55, %v1887_v37  ;;  %v1902_v34 = vadd.f32 %v6294_v17, %v1901_v56  ;;  %v1909_v14 = vand.u32 2147483648, %v6275_v50  ;;  %v1907_v31 = vand.u32 2147483647, %v6275_v50  ;;  %vm1905_vm15 = vmor %vm1903_vm14, %vm1904_vm13  ;;  %v8225_v50 = vld [vmem:[#allocation56_spill] sm:$0xff]  ;;  %v8267_v56 = vld [vmem:[#allocation107_spill] sm:$0xff] }
 0x36d   :  { %v1896_v41 = vsel %vm1893_vm11, %v1895_v45, %v1891_v10  ;;  %v8224_v18 = vstv %s6263_s0  ;;  %v8263_v45 = vld [vmem:[#allocation103_spill] sm:$0xff]  ;;  %v8266_v10 = vld [vmem:[#allocation106_spill] sm:$0xff] }
 0x36e   :  { %v3523_v58 = vpop.eup %3522  ;;  %v1918_v32 = vmul.f32 %v1896_v41, %v5864_v46  ;;  %v1906_v46 = vsel %vm1905_vm15, %v6294_v17, %v1902_v34  ;;  %v1910_v44 = vor.u32 1.1754944e-38, %v1909_v14  ;;  %vm1908_vm0 = vcmp.eq.f32.partialorder %v1907_v31, 8.507059e+37  ;;  %v8260_v17 = vld [vmem:[#allocation100_spill] sm:$0xff]  ;;  %v8275_v34 = vld [vmem:[#allocation115_spill] sm:$0xff]  ;;  %v8278_v31 = vld [vmem:[#allocation118_spill] sm:$0xff] }
 0x36f   :  { %v1922_v26 = vmul.f32 %v3523_v58, %v1866_v5  ;;  %v8268_v41 = vld [vmem:[#allocation108_spill] sm:$0xff]  ;;  %v8269_v58 = vld [vmem:[#allocation109_spill] sm:$0xff]  ;;  %v8270_v5 = vld [vmem:[#allocation110_spill] sm:$0xff] }
 0x370   :  { %v1920_v22 = vadd.f32 %v1919_v57, %v1918_v32  ;;  %v1911_v23 = vsel %vm1908_vm0, %v1910_v44, %v1906_v46  ;;  %v8264_v57 = vld [vmem:[#allocation104_spill] sm:$0xff]  ;;  %v8271_v32 = vld [vmem:[#allocation111_spill] sm:$0xff] }
 0x371   :  { %v1928_v20 = vmul.f32 %v8224_v18, %v1922_v26  ;;  %v8272_v26 = vld [vmem:[#allocation112_spill] sm:$0xff]  ;;  %v8279_v46 = vld [vmem:[#allocation119_spill] sm:$0xff] }
 0x372   :  { %3524 = vtanh.f32 %v1920_v22  ;;  %v1933_v55 = vmul.f32 %v1929_v1, %v1920_v22  ;;  %v8274_v22 = vld [vmem:[#allocation114_spill] sm:$0xff]  ;;  %v8276_v14 = vld [vmem:[#allocation116_spill] sm:$0xff] }
 0x373   :  { %v8280_v44 = vld [vmem:[#allocation120_spill] sm:$0xff] }
 0x374   :  { %v6336_v28 = vadd.f32 %v1933_v55, %v1932_v33  ;;  %v8261_v33 = vld [vmem:[#allocation101_spill] sm:$0xff]  ;;  %v8284_v18 = vld [vmem:[#allocation124_spill] sm:$0xff] }
 0x375   :  { %v8277_v55 = vld [vmem:[#allocation117_spill] sm:$0xff] }
 0x378   :  { %v3525_v11 = vpop.eup %3524 }
 0x379   :  { %v1924_v2 = vmul.f32 %v3525_v11, %v1911_v23  ;;  %v8281_v11 = vld [vmem:[#allocation121_spill] sm:$0xff]  ;;  %v8282_v23 = vld [vmem:[#allocation122_spill] sm:$0xff] }
 0x37b   :  { %v1930_v21 = vmul.f32 %v1929_v1, %v1924_v2  ;;  %v8273_v1 = vld [vmem:[#allocation113_spill] sm:$0xff]  ;;  %v8283_v2 = vld [vmem:[#allocation123_spill] sm:$0xff] }
 0x37d   :  { %v1931_v37 = vadd.f32 %v1930_v21, %v1928_v20  ;;  %v8285_v20 = vld [vmem:[#allocation125_spill] sm:$0xff]  ;;  %v8286_v21 = vld [vmem:[#allocation126_spill] sm:$0xff] }
 0x37f   :  { %1962 = vmatmul.f32.vlgmr.msra.gmra.mxu0 %v1931_v37  ;;  %1982 = vmatmul.f32.vlgmr.msrb.gmra.mxu1 %v1931_v37 }
 0x380   :  { %2002 = vmatmul.f32.vlgmr.msrb.gmra.mxu2 %v1931_v37  ;;  %2022 = vmatmul.f32.vlgmr.msrb.gmra.mxu3 %v1931_v37 }
 0x381   :  { %2261 = vmatpush.msra.mxu0 %v5869_v35  ;;  %2281 = vmatpush.msrb.mxu1 %v5872_v4  ;;  %v8226_v35 = vld [vmem:[#allocation57_spill] sm:$0xff]  ;;  %v8227_v4 = vld [vmem:[#allocation58_spill] sm:$0xff] }
 0x382   :  { %2301 = vmatpush.msrb.mxu2 %v5875_v8  ;;  %2321 = vmatpush.msrb.mxu3 %v5878_v38  ;;  %v8228_v8 = vld [vmem:[#allocation59_spill] sm:$0xff]  ;;  %v8229_v38 = vld [vmem:[#allocation60_spill] sm:$0xff] }
 0x383   :  { %2262 = vmatpush.msra.mxu0 %v5881_v9  ;;  %2282 = vmatpush.msrb.mxu1 %v5884_v24  ;;  %v8230_v9 = vld [vmem:[#allocation61_spill] sm:$0xff]  ;;  %v8231_v24 = vld [vmem:[#allocation62_spill] sm:$0xff] }
 0x384   :  { %2302 = vmatpush.msrb.mxu2 %v5887_v27  ;;  %2322 = vmatpush.msrb.mxu3 %v5890_v40  ;;  %v8232_v27 = vld [vmem:[#allocation63_spill] sm:$0xff]  ;;  %v8233_v40 = vld [vmem:[#allocation64_spill] sm:$0xff] }
 0x385   :  { %2263 = vmatpush.msra.mxu0 %v5893_v39  ;;  %2283 = vmatpush.msrb.mxu1 %v5896_v60  ;;  %v8234_v39 = vld [vmem:[#allocation65_spill] sm:$0xff]  ;;  %v8235_v60 = vld [vmem:[#allocation66_spill] sm:$0xff] }
 0x386   :  { %2303 = vmatpush.msrb.mxu2 %v5899_v42  ;;  %2323 = vmatpush.msrb.mxu3 %v5902_v7  ;;  %v8236_v42 = vld [vmem:[#allocation67_spill] sm:$0xff]  ;;  %v8237_v7 = vld [vmem:[#allocation69_spill] sm:$0xff] }
 0x387   :  { %2042 = vmatmul.f32.vlgmr.msrb.gmra.mxu0 %v1931_v37  ;;  %2062 = vmatmul.f32.vlgmr.msra.gmra.mxu1 %v1931_v37 }
 0x388   :  { %2082 = vmatmul.f32.vlgmr.msra.gmra.mxu2 %v1931_v37  ;;  %2102 = vmatmul.f32.vlgmr.msra.gmra.mxu3 %v1931_v37  ;;  %v8287_v37 = vld [vmem:[#allocation127_spill] sm:$0xff] }
 0x389   :  { %2264 = vmatpush.msra.mxu0 %v5905_v0  ;;  %2284 = vmatpush.msrb.mxu1 %v5908_v36  ;;  %v8238_v0 = vld [vmem:[#allocation68_spill] sm:$0xff]  ;;  %v8239_v36 = vld [vmem:[#allocation70_spill] sm:$0xff] }
 0x38a   :  { %2304 = vmatpush.msrb.mxu2 %v5911_v47  ;;  %2324 = vmatpush.msrb.mxu3 %v5914_v29  ;;  %v8240_v47 = vld [vmem:[#allocation71_spill] sm:$0xff]  ;;  %v8241_v29 = vld [vmem:[#allocation72_spill] sm:$0xff] }
 0x38b   :  { %2265 = vmatpush.msra.mxu0 %v5917_v43  ;;  %2285 = vmatpush.msrb.mxu1 %v5920_v53  ;;  %v8242_v43 = vld [vmem:[#allocation75_spill] sm:$0xff]  ;;  %v8243_v53 = vld [vmem:[#allocation73_spill] sm:$0xff] }
 0x38c   :  { %2305 = vmatpush.msrb.mxu2 %v5923_v54  ;;  %2325 = vmatpush.msrb.mxu3 %v5926_v3  ;;  %v8244_v54 = vld [vmem:[#allocation84_spill] sm:$0xff]  ;;  %v8245_v3 = vld [vmem:[#allocation85_spill] sm:$0xff] }
 0x38d   :  { %2266 = vmatpush.msra.mxu0 %v5929_v62  ;;  %2286 = vmatpush.msrb.mxu1 %v5932_v52  ;;  %v8246_v62 = vld [vmem:[#allocation86_spill] sm:$0xff]  ;;  %v8247_v52 = vld [vmem:[#allocation87_spill] sm:$0xff] }
 0x38e   :  { %2306 = vmatpush.msrb.mxu2 %v5935_v49  ;;  %2326 = vmatpush.msrb.mxu3 %v5938_v12  ;;  %v8248_v49 = vld [vmem:[#allocation88_spill] sm:$0xff]  ;;  %v8249_v12 = vld [vmem:[#allocation89_spill] sm:$0xff] }
 0x38f   :  { %2267 = vmatpush.msra.mxu0 %v5941_v25  ;;  %2287 = vmatpush.msrb.mxu1 %v5944_v59  ;;  %v8250_v25 = vld [vmem:[#allocation90_spill] sm:$0xff]  ;;  %v8251_v59 = vld [vmem:[#allocation91_spill] sm:$0xff] }
 0x390   :  { %2307 = vmatpush.msrb.mxu2 %v5947_v13  ;;  %2327 = vmatpush.msrb.mxu3 %v5950_v61  ;;  %v8252_v13 = vld [vmem:[#allocation92_spill] sm:$0xff]  ;;  %v8253_v61 = vld [vmem:[#allocation93_spill] sm:$0xff] }
 0x391   :  { %2268 = vmatpush.msra.mxu0 %v5953_v6  ;;  %2288 = vmatpush.msrb.mxu1 %v5956_v30  ;;  %v8254_v6 = vld [vmem:[#allocation94_spill] sm:$0xff]  ;;  %v8255_v30 = vld [vmem:[#allocation95_spill] sm:$0xff] }
 0x392   :  { %2308 = vmatpush.msrb.mxu2 %v5959_v63  ;;  %2328 = vmatpush.msrb.mxu3 %v5962_v19  ;;  %v8256_v63 = vld [vmem:[#allocation96_spill] sm:$0xff]  ;;  %v8257_v19 = vld [vmem:[#allocation97_spill] sm:$0xff] }
 0x393   :  { %2269 = vmatpush.msra.mxu0 %v5965_v15  ;;  %2289 = vmatpush.msrb.mxu1 %v5968_v48  ;;  %v8258_v15 = vld [vmem:[#allocation98_spill] sm:$0xff]  ;;  %v8259_v48 = vld [vmem:[#allocation99_spill] sm:$0xff] }
 0x394   :  { %2309 = vmatpush.msrb.mxu2 %v8225_v50  ;;  %2329 = vmatpush.msrb.mxu3 %v8226_v35  ;;  %v8288_v50 = vld [vmem:[#allocation128_spill] sm:$0xff]  ;;  %v8289_v35 = vld [vmem:[#allocation129_spill] sm:$0xff] }
 0x395   :  { %2270 = vmatpush.msra.mxu0 %v8227_v4  ;;  %2290 = vmatpush.msrb.mxu1 %v8228_v8  ;;  %v8290_v4 = vld [vmem:[#allocation130_spill] sm:$0xff]  ;;  %v8291_v8 = vld [vmem:[#allocation131_spill] sm:$0xff] }
 0x396   :  { %2310 = vmatpush.msrb.mxu2 %v8229_v38  ;;  %2330 = vmatpush.msrb.mxu3 %v8230_v9  ;;  %v8292_v38 = vld [vmem:[#allocation132_spill] sm:$0xff]  ;;  %v8293_v9 = vld [vmem:[#allocation133_spill] sm:$0xff] }
 0x397   :  { %2271 = vmatpush.msra.mxu0 %v8231_v24  ;;  %2291 = vmatpush.msrb.mxu1 %v8232_v27  ;;  %v8294_v24 = vld [vmem:[#allocation134_spill] sm:$0xff]  ;;  %v8295_v27 = vld [vmem:[#allocation135_spill] sm:$0xff] }
 0x398   :  { %2311 = vmatpush.msrb.mxu2 %v8233_v40  ;;  %2331 = vmatpush.msrb.mxu3 %v8234_v39  ;;  %v8296_v40 = vld [vmem:[#allocation136_spill] sm:$0xff]  ;;  %v8297_v39 = vld [vmem:[#allocation137_spill] sm:$0xff] }
 0x399   :  { %2272 = vmatpush.msra.mxu0 %v8235_v60  ;;  %2292 = vmatpush.msrb.mxu1 %v8236_v42  ;;  %v8298_v60 = vld [vmem:[#allocation138_spill] sm:$0xff]  ;;  %v8299_v42 = vld [vmem:[#allocation139_spill] sm:$0xff] }
 0x39a   :  { %2312 = vmatpush.msrb.mxu2 %v8237_v7  ;;  %2332 = vmatpush.msrb.mxu3 %v8238_v0  ;;  %v8300_v7 = vld [vmem:[#allocation140_spill] sm:$0xff]  ;;  %v8301_v0 = vld [vmem:[#allocation141_spill] sm:$0xff] }
 0x39b   :  { %2273 = vmatpush.msra.mxu0 %v8239_v36  ;;  %2293 = vmatpush.msrb.mxu1 %v8240_v47  ;;  %v8302_v36 = vld [vmem:[#allocation142_spill] sm:$0xff]  ;;  %v8303_v47 = vld [vmem:[#allocation143_spill] sm:$0xff] }
 0x39c   :  { %2313 = vmatpush.msrb.mxu2 %v8241_v29  ;;  %2333 = vmatpush.msrb.mxu3 %v8242_v43  ;;  %v8304_v29 = vld [vmem:[#allocation144_spill] sm:$0xff]  ;;  %v8305_v43 = vld [vmem:[#allocation145_spill] sm:$0xff] }
 0x39d   :  { %2274 = vmatpush.msra.mxu0 %v8243_v53  ;;  %2294 = vmatpush.msrb.mxu1 %v8244_v54  ;;  %v8306_v53 = vld [vmem:[#allocation146_spill] sm:$0xff]  ;;  %v8307_v54 = vld [vmem:[#allocation147_spill] sm:$0xff] }
 0x39e   :  { %2314 = vmatpush.msrb.mxu2 %v8245_v3  ;;  %2334 = vmatpush.msrb.mxu3 %v8246_v62  ;;  %v8308_v3 = vld [vmem:[#allocation148_spill] sm:$0xff]  ;;  %v8309_v62 = vld [vmem:[#allocation149_spill] sm:$0xff] }
 0x39f   :  { %2275 = vmatpush.msra.mxu0 %v8247_v52  ;;  %2295 = vmatpush.msrb.mxu1 %v8248_v49  ;;  %v8310_v52 = vld [vmem:[#allocation150_spill] sm:$0xff]  ;;  %v8311_v49 = vld [vmem:[#allocation151_spill] sm:$0xff] }
 0x3a0   :  { %2315 = vmatpush.msrb.mxu2 %v8249_v12  ;;  %2335 = vmatpush.msrb.mxu3 %v8250_v25  ;;  %v8312_v12 = vld [vmem:[#allocation152_spill] sm:$0xff]  ;;  %v8313_v25 = vld [vmem:[#allocation153_spill] sm:$0xff] }
 0x3a1   :  { %2276 = vmatpush.msra.mxu0 %v8251_v59  ;;  %2296 = vmatpush.msrb.mxu1 %v8252_v13  ;;  %v8314_v59 = vld [vmem:[#allocation154_spill] sm:$0xff]  ;;  %v8315_v13 = vld [vmem:[#allocation155_spill] sm:$0xff] }
 0x3a2   :  { %2316 = vmatpush.msrb.mxu2 %v8253_v61  ;;  %2336 = vmatpush.msrb.mxu3 %v8254_v6  ;;  %v8316_v61 = vld [vmem:[#allocation156_spill] sm:$0xff]  ;;  %v8317_v6 = vld [vmem:[#allocation157_spill] sm:$0xff] }
 0x3a3   :  { %2341 = vmatpush.msrb.mxu0 %v8255_v30  ;;  %2361 = vmatpush.msra.mxu1 %v8256_v63  ;;  %v8318_v30 = vld [vmem:[#allocation158_spill] sm:$0xff] }
 0x3a4   :  { %2381 = vmatpush.msra.mxu2 %v8257_v19  ;;  %2401 = vmatpush.msra.mxu3 %v8258_v15  ;;  %v8319_v63 = vld [vmem:[#allocation46_spill] sm:$0xff]  ;;  %v8320_v19 = vld [vmem:[#allocation15_spill] sm:$0xff] }
 0x3a5   :  { %2342 = vmatpush.msrb.mxu0 %v8259_v48  ;;  %2362 = vmatpush.msra.mxu1 %v8260_v17  ;;  %v185_v15 = vadd.f32 %v8320_v19, %v8319_v63  ;;  %v8321_v48 = vld [vmem:[#allocation44_spill] sm:$0xff]  ;;  %v8322_v17 = vld [vmem:[#allocation18_spill] sm:$0xff] }
 0x3a6   :  { %2382 = vmatpush.msra.mxu2 %v8261_v33  ;;  %2402 = vmatpush.msra.mxu3 %v8262_v16  ;;  %v226_v33 = vadd.f32 %v8322_v17, %v8321_v48 }
 0x3a7   :  { %2343 = vmatpush.msrb.mxu0 %v8263_v45  ;;  %2363 = vmatpush.msra.mxu1 %v8264_v57 }
 0x3a8   :  { %2383 = vmatpush.msra.mxu2 %v8265_v51  ;;  %2403 = vmatpush.msra.mxu3 %v8266_v10 }
 0x3a9   :  { %2344 = vmatpush.msrb.mxu0 %v8267_v56  ;;  %2364 = vmatpush.msra.mxu1 %v8268_v41  ;;  %v8323_v41 = vld [vmem:[#allocation55_spill] sm:$0xff] }
 0x3aa   :  { %2384 = vmatpush.msra.mxu2 %v8269_v58  ;;  %2404 = vmatpush.msra.mxu3 %v8270_v5  ;;  %v8324_v58 = vld [vmem:[#allocation21_spill] sm:$0xff] }
 0x3ab   :  { %2345 = vmatpush.msrb.mxu0 %v8271_v32  ;;  %2365 = vmatpush.msra.mxu1 %v8272_v26  ;;  %v267_v5 = vadd.f32 %v8324_v58, %v8323_v41  ;;  %v8325_v32 = vld [vmem:[#allocation48_spill] sm:$0xff]  ;;  %v8326_v26 = vld [vmem:[#allocation14_spill] sm:$0xff] }
 0x3ac   :  { %2385 = vmatpush.msra.mxu2 %v8273_v1  ;;  %2405 = vmatpush.msra.mxu3 %v8274_v22  ;;  %v308_v1 = vadd.f32 %v8326_v26, %v8325_v32 }
 0x3ad   :  { %2346 = vmatpush.msrb.mxu0 %v8275_v34  ;;  %2366 = vmatpush.msra.mxu1 %v8276_v14 }
 0x3ae   :  { %2386 = vmatpush.msra.mxu2 %v8277_v55  ;;  %2406 = vmatpush.msra.mxu3 %v8278_v31 }
 0x3af   :  { %2347 = vmatpush.msrb.mxu0 %v8279_v46  ;;  %2367 = vmatpush.msra.mxu1 %v8280_v44  ;;  %v8327_v44 = vld [vmem:[#allocation31_spill] sm:$0xff] }
 0x3b0   :  { %2387 = vmatpush.msra.mxu2 %v8281_v11  ;;  %2407 = vmatpush.msra.mxu3 %v8282_v23  ;;  %v8328_v23 = vld [vmem:[#allocation43_spill] sm:$0xff] }
 0x3b1   :  { %2348 = vmatpush.msrb.mxu0 %v8283_v2  ;;  %2368 = vmatpush.msra.mxu1 %v8284_v18 }
 0x3b2   :  { %2388 = vmatpush.msra.mxu2 %v8285_v20  ;;  %2408 = vmatpush.msra.mxu3 %v8286_v21 }
 0x3b3   :  { %2349 = vmatpush.msrb.mxu0 %v8287_v37  ;;  %2369 = vmatpush.msra.mxu1 %v8288_v50 }
 0x3b4   :  { %2389 = vmatpush.msra.mxu2 %v8289_v35  ;;  %2409 = vmatpush.msra.mxu3 %v8290_v4 }
 0x3b5   :  { %2350 = vmatpush.msrb.mxu0 %v8291_v8  ;;  %2370 = vmatpush.msra.mxu1 %v8292_v38 }
 0x3b6   :  { %2390 = vmatpush.msra.mxu2 %v8293_v9  ;;  %2410 = vmatpush.msra.mxu3 %v8294_v24 }
 0x3b7   :  { %2351 = vmatpush.msrb.mxu0 %v8295_v27  ;;  %2371 = vmatpush.msra.mxu1 %v8296_v40 }
 0x3b8   :  { %2391 = vmatpush.msra.mxu2 %v8297_v39  ;;  %2411 = vmatpush.msra.mxu3 %v8298_v60  ;;  %v8329_v60 = vld [vmem:[#allocation34_spill] sm:$0xff] }
 0x3b9   :  { %2352 = vmatpush.msrb.mxu0 %v8299_v42  ;;  %2372 = vmatpush.msra.mxu1 %v8300_v7 }
 0x3ba   :  { %2392 = vmatpush.msra.mxu2 %v8301_v0  ;;  %2412 = vmatpush.msra.mxu3 %v8302_v36 }
 0x3bb   :  { %2353 = vmatpush.msrb.mxu0 %v8303_v47  ;;  %2373 = vmatpush.msra.mxu1 %v8304_v29 }
 0x3bc   :  { %2393 = vmatpush.msra.mxu2 %v8305_v43  ;;  %2413 = vmatpush.msra.mxu3 %v8306_v53  ;;  %v2242_v43 = vstv %s6479_s24 }
 0x3bd   :  { %2354 = vmatpush.msrb.mxu0 %v8307_v54  ;;  %2374 = vmatpush.msra.mxu1 %v8308_v3 }
 0x3be   :  { %2394 = vmatpush.msra.mxu2 %v8309_v62  ;;  %2414 = vmatpush.msra.mxu3 %v8310_v52 }
 0x3bf   :  { %2355 = vmatpush.msrb.mxu0 %v8311_v49  ;;  %2375 = vmatpush.msra.mxu1 %v8312_v12 }
 0x3c0   :  { %2395 = vmatpush.msra.mxu2 %v8313_v25  ;;  %2415 = vmatpush.msra.mxu3 %v8314_v59 }
 0x3c1   :  { %2356 = vmatpush.msrb.mxu0 %v8315_v13  ;;  %2376 = vmatpush.msra.mxu1 %v8316_v61  ;;  %v8330_v61 = vld [vmem:[#allocation45_spill] sm:$0xff] }
 0x3c2   :  { %2396 = vmatpush.msra.mxu2 %v8317_v6  ;;  %2416 = vmatpush.msra.mxu3 %v8318_v30 }
 0x3fc   :  { %v1963_v16 = vpop.f32.mrf.mxu0  ;;  %v1983_v45 = vpop.f32.mrf.mxu1 }
 0x3fd   :  { %v2106_v57 = vadd.f32 %v1963_v16, %v185_v15  ;;  %v2107_v51 = vadd.f32 %v1983_v45, %v226_v33 }
 0x3ff   :  { %v3350_v10 = vmul.f32 -1.442695, %v2106_v57  ;;  %v3351_v56 = vmul.f32 -1.442695, %v2107_v51 }
 0x401   :  { %3526 = vpow2.f32 %v3350_v10 }
 0x402   :  { %3528 = vpow2.f32 %v3351_v56 }
 0x403   :  { %v2003_v22 = vpop.f32.mrf.mxu2  ;;  %v2023_v34 = vpop.f32.mrf.mxu3 }
 0x404   :  { %v2108_v14 = vadd.f32 %v2003_v22, %v267_v5  ;;  %v2109_v55 = vadd.f32 %v2023_v34, %v308_v1  ;;  %v2043_v31 = vpop.f32.mrf.mxu0  ;;  %v2063_v46 = vpop.f32.mrf.mxu1 }
 0x405   :  { %v2110_v11 = vadd.f32 %v2043_v31, %v8327_v44  ;;  %v2111_v2 = vadd.f32 %v2063_v46, %v8328_v23 }
 0x406   :  { %v3352_v18 = vmul.f32 -1.442695, %v2108_v14  ;;  %v3353_v20 = vmul.f32 -1.442695, %v2109_v55 }
 0x407   :  { %v3527_v21 = vpop.eup %3526  ;;  %v3354_v35 = vmul.f32 -1.442695, %v2110_v11  ;;  %v3355_v8 = vmul.f32 -1.442695, %v2111_v2 }
 0x408   :  { %v3529_v37 = vpop.eup %3528  ;;  %v2132_v50 = vadd.f32 1.0, %v3527_v21  ;;  %3530 = vpow2.f32 %v3352_v18 }
 0x409   :  { %v2133_v4 = vadd.f32 1.0, %v3529_v37  ;;  %3532 = vpow2.f32 %v3353_v20 }
 0x40a   :  { %3534 = vrcp.f32 %v2132_v50  ;;  %v2147_v29 = vand.u32 2147483647, %v2132_v50  ;;  %v2149_v49 = vand.u32 2147483648, %v2132_v50  ;;  %vm2143_vm3 = vweird.f32 %v2132_v50 }
 0x40b   :  { %3536 = vrcp.f32 %v2133_v4  ;;  %v2083_v38 = vpop.f32.mrf.mxu2  ;;  %v2103_v53 = vpop.f32.mrf.mxu3  ;;  %v2164_v62 = vand.u32 2147483648, %v2133_v4  ;;  %v2162_v59 = vand.u32 2147483647, %v2133_v4  ;;  %vm2158_vm4 = vweird.f32 %v2133_v4 }
 0x40c   :  { %3538 = vpow2.f32 %v3354_v35  ;;  %v2112_v42 = vadd.f32 %v2083_v38, %v8329_v60  ;;  %v2113_v6 = vadd.f32 %v2103_v53, %v8330_v61  ;;  %vm6498_vm5 = vcmp.eq.f32.partialorder %v2147_v29, 8.507059e+37 }
 0x40d   :  { %3540 = vpow2.f32 %v3355_v8  ;;  %v2150_v33 = vor.u32 1.1754944e-38, %v2149_v49  ;;  %v2165_v45 = vor.u32 1.1754944e-38, %v2164_v62  ;;  %vm2163_vm7 = vcmp.eq.f32.partialorder %v2162_v59, 8.507059e+37 }
 0x40e   :  { %v3531_v9 = vpop.eup %3530  ;;  %v2244_v61 = vstv %s6522_s25 }
 0x40f   :  { %v3533_v24 = vpop.eup %3532  ;;  %v6481_v27 = vadd.f32 1.0, %v3531_v9 }
 0x410   :  { %v3535_v40 = vpop.eup %3534  ;;  %v6483_v39 = vadd.f32 1.0, %v3533_v24 }
 0x411   :  { %v3537_v7 = vpop.eup %3536  ;;  %v2139_v0 = vmul.f32 %v3535_v40, %v2132_v50  ;;  %3542 = vrcp.f32 %v6481_v27  ;;  %vm2144_vm1 = vweird.f32 %v3535_v40  ;;  %vm2173_vm9 = vweird.f32 %v6481_v27 }
 0x412   :  { %v3539_v36 = vpop.eup %3538  ;;  %v2154_v47 = vmul.f32 %v3537_v7, %v2133_v4  ;;  %3544 = vrcp.f32 %v6483_v39  ;;  %vm2159_vm2 = vweird.f32 %v3537_v7  ;;  %vm2145_vm6 = vmor %vm2143_vm3, %vm2144_vm1  ;;  %v2179_v26 = vand.u32 2147483648, %v6481_v27 }
 0x413   :  { %v3541_v54 = vpop.eup %3540  ;;  %v2140_v3 = vsub.f32 1.0, %v2139_v0  ;;  %v6489_v52 = vadd.f32 1.0, %v3539_v36  ;;  %3546 = vtanh.f32 %v2112_v42  ;;  %vm2160_vm8 = vmor %vm2158_vm4, %vm2159_vm2  ;;  %v2194_v46 = vand.u32 2147483648, %v6483_v39  ;;  %v6650_v36 = vld [vmem:[#allocation7 + $0x218] sm:$0xff] }
 0x414   :  { %v2155_v12 = vsub.f32 1.0, %v2154_v47  ;;  %v6491_v25 = vadd.f32 1.0, %v3541_v54  ;;  %vm2188_vm10 = vweird.f32 %v6483_v39  ;;  %v2192_v21 = vand.u32 2147483647, %v6483_v39 }
 0x415   :  { %3548 = vrcp.f32 %v6489_v52  ;;  %v2141_v13 = vmul.f32 %v3535_v40, %v2140_v3  ;;  %v2209_v50 = vand.u32 2147483648, %v6489_v52  ;;  %v2195_v9 = vor.u32 1.1754944e-38, %v2194_v46  ;;  %v6587_v46 = vld [vmem:[#allocation7 + $0x350] sm:$0xff] }
 0x416   :  { %v2156_v30 = vmul.f32 %v3537_v7, %v2155_v12  ;;  %3550 = vrcp.f32 %v6491_v25  ;;  %v2207_v60 = vand.u32 2147483647, %v6489_v52  ;;  %v2177_v42 = vand.u32 2147483647, %v6481_v27 }
 0x417   :  { %v6496_v19 = vpop.eup %3542  ;;  %v2142_v15 = vadd.f32 %v3535_v40, %v2141_v13  ;;  %3552 = vtanh.f32 %v2113_v6  ;;  %vm2193_vm15 = vcmp.eq.f32.partialorder %v2192_v21, 8.507059e+37  ;;  %vm2203_vm1 = vweird.f32 %v6489_v52  ;;  %v6608_v21 = vld [vmem:[#allocation7 + $0x2c8] sm:$0xff] }
 0x418   :  { %v3545_v16 = vpop.eup %3544  ;;  %v2169_v57 = vmul.f32 %v6496_v19, %v6481_v27  ;;  %v2157_v51 = vadd.f32 %v3537_v7, %v2156_v30  ;;  %vm2174_vm12 = vweird.f32 %v6496_v19  ;;  %v2210_v53 = vor.u32 1.1754944e-38, %v2209_v50  ;;  %v6614_v50 = vld [vmem:[#allocation7 + $0x2d8] sm:$0xff] }
 0x419   :  { %v2184_v10 = vmul.f32 %v3545_v16, %v6483_v39  ;;  %v2146_v56 = vsel %vm2145_vm6, %v3535_v40, %v2142_v15  ;;  %v3547_v58 = vpop.eup %3546  ;;  %vm2189_vm11 = vweird.f32 %v3545_v16  ;;  %vm6535_vm0 = vmor %vm2173_vm9, %vm2174_vm12  ;;  %v2180_v3 = vor.u32 1.1754944e-38, %v2179_v26  ;;  %v6563_v26 = vld [vmem:[#allocation7 + $0x3d0] sm:$0xff] }
 0x41a   :  { %v2170_v5 = vsub.f32 1.0, %v2169_v57  ;;  %v2151_v1 = vsel %vm6498_vm5, %v2150_v33, %v2146_v56  ;;  %v2161_v22 = vsel %vm2160_vm8, %v3537_v7, %v2157_v51  ;;  %vm2190_vm14 = vmor %vm2188_vm10, %vm2189_vm11  ;;  %vm2208_vm3 = vcmp.eq.f32.partialorder %v2207_v60, 8.507059e+37  ;;  %v6638_v60 = vld [vmem:[#allocation7 + $0x258] sm:$0xff] }
 0x41b   :  { %v3549_v34 = vpop.eup %3548  ;;  %v2185_v14 = vsub.f32 1.0, %v2184_v10  ;;  %v2166_v55 = vsel %vm2163_vm7, %v2165_v45, %v2161_v22  ;;  %v2231_v31 = vmul.f32 %v3547_v58, %v2151_v1  ;;  %vm2178_vm4 = vcmp.eq.f32.partialorder %v2177_v42, 8.507059e+37  ;;  %v6566_v1 = vld [vmem:[#allocation7 + $0x3d8] sm:$0xff]  ;;  %v6572_v22 = vld [vmem:[#allocation7 + $0x388] sm:$0xff]  ;;  %v6641_v42 = vld [vmem:[#allocation7 + $0x200] sm:$0xff] }
 0x41c   :  { %v6510_v44 = vpop.eup %3550  ;;  %v2171_v11 = vmul.f32 %v6496_v19, %v2170_v5  ;;  %v2199_v23 = vmul.f32 %v3549_v34, %v6489_v52  ;;  %v2230_v2 = vmul.f32 %v2166_v55, %v6336_v28  ;;  %vm2204_vm13 = vweird.f32 %v3549_v34  ;;  %v6557_v5 = vld [vmem:[#allocation7 + $0x3c0] sm:$0xff] }
 0x41d   :  { %v2214_v18 = vmul.f32 %v6510_v44, %v6491_v25  ;;  %v2186_v20 = vmul.f32 %v3545_v16, %v2185_v14  ;;  %v3553_v4 = vpop.eup %3552  ;;  %vm2205_vm2 = vmor %vm2203_vm1, %vm2204_vm13  ;;  %vm2219_vm5 = vweird.f32 %v6510_v44  ;;  %vm2218_vm6 = vweird.f32 %v6491_v25  ;;  %v6578_v14 = vld [vmem:[#allocation7 + $0x398] sm:$0xff]  ;;  %v6581_v55 = vld [vmem:[#allocation7 + $0x340] sm:$0xff] }
 0x41e   :  { %v2200_v37 = vsub.f32 1.0, %v2199_v23  ;;  %v2232_v35 = vadd.f32 %v2231_v31, %v2230_v2  ;;  %v2172_v8 = vadd.f32 %v6496_v19, %v2171_v11  ;;  %v2222_v17 = vand.u32 2147483647, %v6491_v25  ;;  %vm2220_vm7 = vmor %vm2218_vm6, %vm2219_vm5  ;;  %v6584_v31 = vld [vmem:[#allocation7 + $0x348] sm:$0xff]  ;;  %v6593_v11 = vld [vmem:[#allocation7 + $0x300] sm:$0xff] }
 0x41f   :  { %v2187_v38 = vadd.f32 %v3545_v16, %v2186_v20  ;;  %v2215_v7 = vsub.f32 1.0, %v2214_v18  ;;  %v6596_v23 = vld [vmem:[#allocation7 + $0x308] sm:$0xff]  ;;  %v6599_v2 = vld [vmem:[#allocation7 + $0x310] sm:$0xff]  ;;  %v6602_v18 = vld [vmem:[#allocation7 + $0x318] sm:$0xff] }
 0x420   :  { %v2201_v24 = vmul.f32 %v3549_v34, %v2200_v37  ;;  %3554 = vtanh.f32 %v2232_v35  ;;  %v2247_v40 = vmul.f32 %v2242_v43, %v2232_v35  ;;  %v2176_v29 = vsel %vm6535_vm0, %v6496_v19, %v2172_v8  ;;  %v6605_v20 = vld [vmem:[#allocation7 + $0x2c0] sm:$0xff]  ;;  %v6611_v37 = vld [vmem:[#allocation7 + $0x2d0] sm:$0xff] }
 0x421   :  { %v2191_v0 = vsel %vm2190_vm14, %v3545_v16, %v2187_v38  ;;  %v2216_v27 = vmul.f32 %v6510_v44, %v2215_v7  ;;  %v2181_v52 = vsel %vm2178_vm4, %v2180_v3, %v2176_v29  ;;  %v2224_v19 = vand.u32 2147483648, %v6491_v25  ;;  %v6560_v25 = vld [vmem:[#allocation7 + $0x3c8] sm:$0xff]  ;;  %v6617_v35 = vld [vmem:[#allocation7 + $0x280] sm:$0xff]  ;;  %v6623_v8 = vld [vmem:[#allocation7 + $0x290] sm:$0xff] }
 0x422   :  { %v2196_v47 = vsel %vm2193_vm15, %v2195_v9, %v2191_v0  ;;  %v2202_v39 = vadd.f32 %v3549_v34, %v2201_v24  ;;  %vm2223_vm8 = vcmp.eq.f32.partialorder %v2222_v17, 8.507059e+37  ;;  %v6626_v38 = vld [vmem:[#allocation7 + $0x298] sm:$0xff]  ;;  %v6629_v9 = vld [vmem:[#allocation7 + $0x240] sm:$0xff]  ;;  %v6632_v24 = vld [vmem:[#allocation7 + $0x248] sm:$0xff] }
 0x423   :  { %v2234_v54 = vmul.f32 %v3553_v4, %v2196_v47  ;;  %v2217_v30 = vadd.f32 %v6510_v44, %v2216_v27  ;;  %v2225_v16 = vor.u32 1.1754944e-38, %v2224_v19  ;;  %v6620_v4 = vld [vmem:[#allocation7 + $0x288] sm:$0xff]  ;;  %v6647_v0 = vld [vmem:[#allocation7 + $0x210] sm:$0xff]  ;;  %v6653_v47 = vld [vmem:[#allocation7 + $0x1c0] sm:$0xff] }
 0x424   :  { %v2206_v62 = vsel %vm2205_vm2, %v3549_v34, %v2202_v39  ;;  %v6575_v34 = vld [vmem:[#allocation7 + $0x390] sm:$0xff]  ;;  %v6644_v7 = vld [vmem:[#allocation7 + $0x208] sm:$0xff]  ;;  %v6674_v27 = vld [vmem:[#allocation7 + $0x198] sm:$0xff] }
 0x425   :  { %v2211_v49 = vsel %vm2208_vm3, %v2210_v53, %v2206_v62  ;;  %v6656_v39 = vld [vmem:[#allocation7 + $0x1c8] sm:$0xff]  ;;  %v6659_v29 = vld [vmem:[#allocation7 + $0x1d0] sm:$0xff]  ;;  %v6662_v53 = vld [vmem:[#allocation7 + $0x1d8] sm:$0xff]  ;;  %8340 = vst [vmem:[#allocation27_spill] sm:$0xff] %v6674_v27 }
 0x426   :  { %v3555_v12 = vpop.eup %3554  ;;  %v2233_v59 = vmul.f32 %v2211_v49, %v6336_v28  ;;  %v2221_v28 = vsel %vm2220_vm7, %v6510_v44, %v2217_v30  ;;  %v6590_v44 = vld [vmem:[#allocation7 + $0x358] sm:$0xff]  ;;  %8335 = vst [vmem:[#allocation78_spill] sm:$0xff] %v6659_v29  ;;  %v6668_v3 = vld [vmem:[#allocation7 + $0x188] sm:$0xff]  ;;  %v6671_v62 = vld [vmem:[#allocation7 + $0x190] sm:$0xff] }
 0x427   :  { %v2237_v13 = vmul.f32 %v3555_v12, %v2181_v52  ;;  %v2226_v57 = vsel %vm2223_vm8, %v2225_v16, %v2221_v28  ;;  %8336 = vst [vmem:[#allocation80_spill] sm:$0xff] %v6662_v53  ;;  %v6677_v49 = vld [vmem:[#allocation7 + $0x140] sm:$0xff]  ;;  %v6680_v12 = vld [vmem:[#allocation7 + $0x148] sm:$0xff]  ;;  %v6683_v52 = vld [vmem:[#allocation7 + $0x150] sm:$0xff] }
 0x428   :  { %v2235_v6 = vadd.f32 %v2234_v54, %v2233_v59  ;;  %v6665_v54 = vld [vmem:[#allocation7 + $0x180] sm:$0xff]  ;;  %8338 = vst [vmem:[#allocation82_spill] sm:$0xff] %v6668_v3  ;;  %v6686_v59 = vld [vmem:[#allocation7 + $0x158] sm:$0xff]  ;;  %v6707_v17 = vld [vmem:[#allocation7 + $0xd0] sm:$0xff] }
 0x429   :  { %v2243_v10 = vmul.f32 %v2242_v43, %v2237_v13  ;;  %v6569_v43 = vld [vmem:[#allocation7 + $0x380] sm:$0xff]  ;;  %8337 = vst [vmem:[#allocation81_spill] sm:$0xff] %v6665_v54  ;;  %v6698_v30 = vld [vmem:[#allocation7 + $0x118] sm:$0xff] }
 0x42a   :  { %3556 = vtanh.f32 %v2235_v6  ;;  %v2248_v15 = vmul.f32 %v2244_v61, %v2235_v6  ;;  %8339 = vst [vmem:[#allocation24_spill] sm:$0xff] %v6671_v62  ;;  %v6689_v13 = vld [vmem:[#allocation7 + $0x100] sm:$0xff]  ;;  %v6695_v6 = vld [vmem:[#allocation7 + $0x110] sm:$0xff]  ;;  %v6710_v28 = vld [vmem:[#allocation7 + $0xd8] sm:$0xff] }
 0x42b   :  { %8341 = vst [vmem:[#allocation35_spill] sm:$0xff] %v6677_v49  ;;  %v6701_v19 = vld [vmem:[#allocation7 + $0xc0] sm:$0xff] }
 0x42c   :  { %v6552_v33 = vadd.f32 %v2248_v15, %v2247_v40  ;;  %v6635_v40 = vld [vmem:[#allocation7 + $0x250] sm:$0xff]  ;;  %8342 = vst [vmem:[#allocation37_spill] sm:$0xff] %v6680_v12  ;;  %v6704_v15 = vld [vmem:[#allocation7 + $0xc8] sm:$0xff]  ;;  %v6713_v16 = vld [vmem:[#allocation7 + $0x80] sm:$0xff] }
 0x42d   :  { %8343 = vst [vmem:[#allocation79_spill] sm:$0xff] %v6683_v52 }
 0x42e   :  { %8344 = vst [vmem:[#allocation83_spill] sm:$0xff] %v6686_v59 }
 0x42f   :  { %8345 = vst [vmem:[#allocation13_spill] sm:$0xff] %v6689_v13 }
 0x430   :  { %v3557_v45 = vpop.eup %3556  ;;  %8347 = vst [vmem:[#allocation29_spill] sm:$0xff] %v6695_v6 }
 0x431   :  { %v2239_v51 = vmul.f32 %v3557_v45, %v2226_v57  ;;  %8348 = vst [vmem:[#allocation39_spill] sm:$0xff] %v6698_v30  ;;  %v6716_v45 = vld [vmem:[#allocation7 + $0x88] sm:$0xff]  ;;  %v6719_v57 = vld [vmem:[#allocation7 + $0x90] sm:$0xff] }
 0x432   :  { %8349 = vst [vmem:[#allocation41_spill] sm:$0xff] %v6701_v19 }
 0x433   :  { %v2245_v56 = vmul.f32 %v2244_v61, %v2239_v51  ;;  %v6692_v61 = vld [vmem:[#allocation7 + $0x108] sm:$0xff]  ;;  %8350 = vst [vmem:[#allocation42_spill] sm:$0xff] %v6704_v15  ;;  %v6722_v51 = vld [vmem:[#allocation7 + $0x98] sm:$0xff] }
 0x434   :  { %8346 = vst [vmem:[#allocation17_spill] sm:$0xff] %v6692_v61 }
 0x435   :  { %v2246_v58 = vadd.f32 %v2245_v56, %v2243_v10  ;;  %8351 = vst [vmem:[#allocation56_spill] sm:$0xff] %v6707_v17  ;;  %v6725_v10 = vld [vmem:[#allocation7 + $0x40] sm:$0xff]  ;;  %v6728_v56 = vld [vmem:[#allocation7 + $0x48] sm:$0xff] }
 0x436   :  { %8352 = vst [vmem:[#allocation57_spill] sm:$0xff] %v6710_v28 }
 0x437   :  { %2277 = vmatmul.f32.vlgmr.msra.gmra.mxu0 %v2246_v58  ;;  %2297 = vmatmul.f32.vlgmr.msrb.gmra.mxu1 %v2246_v58  ;;  %8353 = vst [vmem:[#allocation58_spill] sm:$0xff] %v6713_v16 }
 0x438   :  { %2317 = vmatmul.f32.vlgmr.msrb.gmra.mxu2 %v2246_v58  ;;  %2337 = vmatmul.f32.vlgmr.msrb.gmra.mxu3 %v2246_v58  ;;  %8354 = vst [vmem:[#allocation59_spill] sm:$0xff] %v6716_v45 }
 0x439   :  { %2576 = vmatpush.msra.mxu0 %v6557_v5  ;;  %2596 = vmatpush.msrb.mxu1 %v6560_v25  ;;  %8355 = vst [vmem:[#allocation60_spill] sm:$0xff] %v6719_v57 }
 0x43a   :  { %2616 = vmatpush.msrb.mxu2 %v6563_v26  ;;  %2636 = vmatpush.msrb.mxu3 %v6566_v1  ;;  %8356 = vst [vmem:[#allocation61_spill] sm:$0xff] %v6722_v51 }
 0x43b   :  { %2577 = vmatpush.msra.mxu0 %v6569_v43  ;;  %2597 = vmatpush.msrb.mxu1 %v6572_v22  ;;  %8357 = vst [vmem:[#allocation62_spill] sm:$0xff] %v6725_v10 }
 0x43c   :  { %2617 = vmatpush.msrb.mxu2 %v6575_v34  ;;  %2637 = vmatpush.msrb.mxu3 %v6578_v14  ;;  %8358 = vst [vmem:[#allocation63_spill] sm:$0xff] %v6728_v56 }
 0x43d   :  { %2578 = vmatpush.msra.mxu0 %v6581_v55  ;;  %2598 = vmatpush.msrb.mxu1 %v6584_v31 }
 0x43e   :  { %2618 = vmatpush.msrb.mxu2 %v6587_v46  ;;  %2638 = vmatpush.msrb.mxu3 %v6590_v44 }
 0x43f   :  { %2357 = vmatmul.f32.vlgmr.msrb.gmra.mxu0 %v2246_v58  ;;  %2377 = vmatmul.f32.vlgmr.msra.gmra.mxu1 %v2246_v58 }
 0x440   :  { %2397 = vmatmul.f32.vlgmr.msra.gmra.mxu2 %v2246_v58  ;;  %2417 = vmatmul.f32.vlgmr.msra.gmra.mxu3 %v2246_v58  ;;  %v6731_v58 = vld [vmem:[#allocation7 + $0x50] sm:$0xff] }
 0x441   :  { %2579 = vmatpush.msra.mxu0 %v6593_v11  ;;  %2599 = vmatpush.msrb.mxu1 %v6596_v23  ;;  %8359 = vst [vmem:[#allocation64_spill] sm:$0xff] %v6731_v58 }
 0x442   :  { %2619 = vmatpush.msrb.mxu2 %v6599_v2  ;;  %2639 = vmatpush.msrb.mxu3 %v6602_v18 }
 0x443   :  { %2580 = vmatpush.msra.mxu0 %v6605_v20  ;;  %2600 = vmatpush.msrb.mxu1 %v6608_v21 }
 0x444   :  { %2620 = vmatpush.msrb.mxu2 %v6611_v37  ;;  %2640 = vmatpush.msrb.mxu3 %v6614_v50 }
 0x445   :  { %2581 = vmatpush.msra.mxu0 %v6617_v35  ;;  %2601 = vmatpush.msrb.mxu1 %v6620_v4 }
 0x446   :  { %2621 = vmatpush.msrb.mxu2 %v6623_v8  ;;  %2641 = vmatpush.msrb.mxu3 %v6626_v38 }
 0x447   :  { %2582 = vmatpush.msra.mxu0 %v6629_v9  ;;  %2602 = vmatpush.msrb.mxu1 %v6632_v24 }
 0x448   :  { %2622 = vmatpush.msrb.mxu2 %v6635_v40  ;;  %2642 = vmatpush.msrb.mxu3 %v6638_v60 }
 0x449   :  { %2583 = vmatpush.msra.mxu0 %v6641_v42  ;;  %2603 = vmatpush.msrb.mxu1 %v6644_v7 }
 0x44a   :  { %2623 = vmatpush.msrb.mxu2 %v6647_v0  ;;  %2643 = vmatpush.msrb.mxu3 %v6650_v36 }
 0x44b   :  { %2584 = vmatpush.msra.mxu0 %v6653_v47  ;;  %2604 = vmatpush.msrb.mxu1 %v6656_v39 }
 0x44c   :  { %2624 = vmatpush.msrb.mxu2 %v6659_v29  ;;  %2644 = vmatpush.msrb.mxu3 %v6662_v53 }
 0x44d   :  { %2585 = vmatpush.msra.mxu0 %v6665_v54  ;;  %2605 = vmatpush.msrb.mxu1 %v6668_v3 }
 0x44e   :  { %2625 = vmatpush.msrb.mxu2 %v6671_v62  ;;  %2645 = vmatpush.msrb.mxu3 %v6674_v27 }
 0x44f   :  { %2586 = vmatpush.msra.mxu0 %v6677_v49  ;;  %2606 = vmatpush.msrb.mxu1 %v6680_v12  ;;  %v8436_v49 = vld [vmem:[#allocation49_spill] sm:$0xff] }
 0x450   :  { %2626 = vmatpush.msrb.mxu2 %v6683_v52  ;;  %2646 = vmatpush.msrb.mxu3 %v6686_v59 }
 0x451   :  { %2587 = vmatpush.msra.mxu0 %v6689_v13  ;;  %2607 = vmatpush.msrb.mxu1 %v6692_v61  ;;  %v8432_v61 = vld [vmem:[#allocation25_spill] sm:$0xff] }
 0x452   :  { %2627 = vmatpush.msrb.mxu2 %v6695_v6  ;;  %2647 = vmatpush.msrb.mxu3 %v6698_v30  ;;  %v8431_v6 = vld [vmem:[#allocation22_spill] sm:$0xff]  ;;  %v311_v13 = vadd.f32 %v8432_v61, %v8325_v32 }
 0x453   :  { %2588 = vmatpush.msra.mxu0 %v6701_v19  ;;  %2608 = vmatpush.msrb.mxu1 %v6704_v15 }
 0x454   :  { %2628 = vmatpush.msrb.mxu2 %v6707_v17  ;;  %2648 = vmatpush.msrb.mxu3 %v6710_v28 }
 0x455   :  { %2589 = vmatpush.msra.mxu0 %v6713_v16  ;;  %2609 = vmatpush.msrb.mxu1 %v6716_v45  ;;  %v6734_v45 = vld [vmem:[#allocation7 + $0x58] sm:$0xff] }
 0x456   :  { %2629 = vmatpush.msrb.mxu2 %v6719_v57  ;;  %2649 = vmatpush.msrb.mxu3 %v6722_v51  ;;  %8360 = vst [vmem:[#allocation65_spill] sm:$0xff] %v6734_v45  ;;  %v6737_v57 = vld [vmem:[#allocation7] sm:$0xff]  ;;  %v6740_v51 = vld [vmem:[#allocation7 + $0x8] sm:$0xff] }
 0x457   :  { %2590 = vmatpush.msra.mxu0 %v6725_v10  ;;  %2610 = vmatpush.msrb.mxu1 %v6728_v56  ;;  %8361 = vst [vmem:[#allocation66_spill] sm:$0xff] %v6737_v57  ;;  %v6743_v10 = vld [vmem:[#allocation7 + $0x10] sm:$0xff]  ;;  %v6746_v56 = vld [vmem:[#allocation7 + $0x18] sm:$0xff] }
 0x458   :  { %2630 = vmatpush.msrb.mxu2 %v6731_v58  ;;  %2650 = vmatpush.msrb.mxu3 %v6734_v45  ;;  %8362 = vst [vmem:[#allocation67_spill] sm:$0xff] %v6740_v51  ;;  %v6749_v58 = vld [vmem:[#allocation7 + $0x3e0] sm:$0xff]  ;;  %v6752_v45 = vld [vmem:[#allocation7 + $0x3e8] sm:$0xff] }
 0x459   :  { %2591 = vmatpush.msra.mxu0 %v6737_v57  ;;  %2611 = vmatpush.msrb.mxu1 %v6740_v51  ;;  %8363 = vst [vmem:[#allocation69_spill] sm:$0xff] %v6743_v10  ;;  %v6755_v57 = vld [vmem:[#allocation7 + $0x3f0] sm:$0xff]  ;;  %v6758_v51 = vld [vmem:[#allocation7 + $0x3f8] sm:$0xff] }
 0x45a   :  { %2631 = vmatpush.msrb.mxu2 %v6743_v10  ;;  %8364 = vst [vmem:[#allocation68_spill] sm:$0xff] %v6746_v56  ;;  %2651 = vmatpush.msrb.mxu3 %v6746_v56  ;;  %v6761_v10 = vld [vmem:[#allocation7 + $0x3a0] sm:$0xff]  ;;  %v6764_v56 = vld [vmem:[#allocation7 + $0x3a8] sm:$0xff] }
 0x45b   :  { %8365 = vst [vmem:[#allocation70_spill] sm:$0xff] %v6749_v58  ;;  %2656 = vmatpush.msrb.mxu0 %v6749_v58  ;;  %2676 = vmatpush.msra.mxu1 %v6752_v45  ;;  %v6767_v58 = vld [vmem:[#allocation7 + $0x3b0] sm:$0xff] }
 0x45c   :  { %8366 = vst [vmem:[#allocation71_spill] sm:$0xff] %v6752_v45  ;;  %2696 = vmatpush.msra.mxu2 %v6755_v57  ;;  %2716 = vmatpush.msra.mxu3 %v6758_v51  ;;  %v6770_v45 = vld [vmem:[#allocation7 + $0x3b8] sm:$0xff] }
 0x45d   :  { %8367 = vst [vmem:[#allocation72_spill] sm:$0xff] %v6755_v57  ;;  %2657 = vmatpush.msrb.mxu0 %v6761_v10  ;;  %2677 = vmatpush.msra.mxu1 %v6764_v56  ;;  %v6773_v57 = vld [vmem:[#allocation7 + $0x360] sm:$0xff] }
 0x45e   :  { %8368 = vst [vmem:[#allocation75_spill] sm:$0xff] %v6758_v51  ;;  %2697 = vmatpush.msra.mxu2 %v6767_v58  ;;  %2717 = vmatpush.msra.mxu3 %v6770_v45  ;;  %v6776_v51 = vld [vmem:[#allocation7 + $0x368] sm:$0xff] }
 0x45f   :  { %8369 = vst [vmem:[#allocation73_spill] sm:$0xff] %v6761_v10  ;;  %2658 = vmatpush.msrb.mxu0 %v6773_v57  ;;  %2678 = vmatpush.msra.mxu1 %v6776_v51  ;;  %v6779_v10 = vld [vmem:[#allocation7 + $0x370] sm:$0xff] }
 0x460   :  { %8370 = vst [vmem:[#allocation84_spill] sm:$0xff] %v6764_v56  ;;  %2698 = vmatpush.msra.mxu2 %v6779_v10  ;;  %v6782_v56 = vld [vmem:[#allocation7 + $0x378] sm:$0xff] }
 0x461   :  { %8371 = vst [vmem:[#allocation85_spill] sm:$0xff] %v6767_v58  ;;  %2718 = vmatpush.msra.mxu3 %v6782_v56  ;;  %v6785_v58 = vld [vmem:[#allocation7 + $0x320] sm:$0xff] }
 0x462   :  { %8372 = vst [vmem:[#allocation86_spill] sm:$0xff] %v6770_v45  ;;  %2659 = vmatpush.msrb.mxu0 %v6785_v58  ;;  %v6788_v45 = vld [vmem:[#allocation7 + $0x328] sm:$0xff] }
 0x463   :  { %8373 = vst [vmem:[#allocation87_spill] sm:$0xff] %v6773_v57  ;;  %2679 = vmatpush.msra.mxu1 %v6788_v45  ;;  %v6791_v57 = vld [vmem:[#allocation7 + $0x330] sm:$0xff] }
 0x464   :  { %8374 = vst [vmem:[#allocation88_spill] sm:$0xff] %v6776_v51  ;;  %2699 = vmatpush.msra.mxu2 %v6791_v57  ;;  %v6794_v51 = vld [vmem:[#allocation7 + $0x338] sm:$0xff] }
 0x465   :  { %8375 = vst [vmem:[#allocation89_spill] sm:$0xff] %v6779_v10  ;;  %2719 = vmatpush.msra.mxu3 %v6794_v51  ;;  %v6797_v10 = vld [vmem:[#allocation7 + $0x2e0] sm:$0xff] }
 0x466   :  { %8376 = vst [vmem:[#allocation90_spill] sm:$0xff] %v6782_v56  ;;  %2660 = vmatpush.msrb.mxu0 %v6797_v10  ;;  %v6800_v56 = vld [vmem:[#allocation7 + $0x2e8] sm:$0xff] }
 0x467   :  { %8377 = vst [vmem:[#allocation91_spill] sm:$0xff] %v6785_v58  ;;  %2680 = vmatpush.msra.mxu1 %v6800_v56  ;;  %v6803_v58 = vld [vmem:[#allocation7 + $0x2f0] sm:$0xff] }
 0x468   :  { %8378 = vst [vmem:[#allocation92_spill] sm:$0xff] %v6788_v45  ;;  %2700 = vmatpush.msra.mxu2 %v6803_v58  ;;  %v6806_v45 = vld [vmem:[#allocation7 + $0x2f8] sm:$0xff] }
 0x469   :  { %8379 = vst [vmem:[#allocation93_spill] sm:$0xff] %v6791_v57  ;;  %2720 = vmatpush.msra.mxu3 %v6806_v45  ;;  %v6809_v57 = vld [vmem:[#allocation7 + $0x2a0] sm:$0xff] }
 0x46a   :  { %8380 = vst [vmem:[#allocation94_spill] sm:$0xff] %v6794_v51  ;;  %2661 = vmatpush.msrb.mxu0 %v6809_v57  ;;  %v6812_v51 = vld [vmem:[#allocation7 + $0x2a8] sm:$0xff] }
 0x46b   :  { %8381 = vst [vmem:[#allocation95_spill] sm:$0xff] %v6797_v10  ;;  %2681 = vmatpush.msra.mxu1 %v6812_v51  ;;  %v6815_v10 = vld [vmem:[#allocation7 + $0x2b0] sm:$0xff] }
 0x46c   :  { %8382 = vst [vmem:[#allocation96_spill] sm:$0xff] %v6800_v56  ;;  %2701 = vmatpush.msra.mxu2 %v6815_v10  ;;  %v6818_v56 = vld [vmem:[#allocation7 + $0x2b8] sm:$0xff] }
 0x46d   :  { %8383 = vst [vmem:[#allocation97_spill] sm:$0xff] %v6803_v58  ;;  %2721 = vmatpush.msra.mxu3 %v6818_v56  ;;  %v6821_v58 = vld [vmem:[#allocation7 + $0x260] sm:$0xff] }
 0x46e   :  { %8384 = vst [vmem:[#allocation98_spill] sm:$0xff] %v6806_v45  ;;  %2662 = vmatpush.msrb.mxu0 %v6821_v58  ;;  %v6824_v45 = vld [vmem:[#allocation7 + $0x268] sm:$0xff] }
 0x46f   :  { %8385 = vst [vmem:[#allocation99_spill] sm:$0xff] %v6809_v57  ;;  %2682 = vmatpush.msra.mxu1 %v6824_v45  ;;  %v6827_v57 = vld [vmem:[#allocation7 + $0x270] sm:$0xff] }
 0x470   :  { %8386 = vst [vmem:[#allocation100_spill] sm:$0xff] %v6812_v51  ;;  %2702 = vmatpush.msra.mxu2 %v6827_v57  ;;  %v6830_v51 = vld [vmem:[#allocation7 + $0x278] sm:$0xff] }
 0x471   :  { %8387 = vst [vmem:[#allocation101_spill] sm:$0xff] %v6815_v10  ;;  %2722 = vmatpush.msra.mxu3 %v6830_v51  ;;  %v6833_v10 = vld [vmem:[#allocation7 + $0x220] sm:$0xff] }
 0x472   :  { %8388 = vst [vmem:[#allocation102_spill] sm:$0xff] %v6818_v56  ;;  %2663 = vmatpush.msrb.mxu0 %v6833_v10  ;;  %v6836_v56 = vld [vmem:[#allocation7 + $0x228] sm:$0xff] }
 0x473   :  { %8389 = vst [vmem:[#allocation103_spill] sm:$0xff] %v6821_v58  ;;  %2683 = vmatpush.msra.mxu1 %v6836_v56  ;;  %v6839_v58 = vld [vmem:[#allocation7 + $0x230] sm:$0xff] }
 0x474   :  { %8390 = vst [vmem:[#allocation104_spill] sm:$0xff] %v6824_v45  ;;  %2703 = vmatpush.msra.mxu2 %v6839_v58  ;;  %v6842_v45 = vld [vmem:[#allocation7 + $0x238] sm:$0xff] }
 0x475   :  { %8391 = vst [vmem:[#allocation105_spill] sm:$0xff] %v6827_v57  ;;  %2723 = vmatpush.msra.mxu3 %v6842_v45  ;;  %v6845_v57 = vld [vmem:[#allocation7 + $0x1e0] sm:$0xff] }
 0x476   :  { %8392 = vst [vmem:[#allocation106_spill] sm:$0xff] %v6830_v51  ;;  %2664 = vmatpush.msrb.mxu0 %v6845_v57  ;;  %v6848_v51 = vld [vmem:[#allocation7 + $0x1e8] sm:$0xff] }
 0x477   :  { %8393 = vst [vmem:[#allocation107_spill] sm:$0xff] %v6833_v10  ;;  %2684 = vmatpush.msra.mxu1 %v6848_v51  ;;  %v6851_v10 = vld [vmem:[#allocation7 + $0x1f0] sm:$0xff] }
 0x478   :  { %8394 = vst [vmem:[#allocation108_spill] sm:$0xff] %v6836_v56  ;;  %2704 = vmatpush.msra.mxu2 %v6851_v10  ;;  %v6854_v56 = vld [vmem:[#allocation7 + $0x1f8] sm:$0xff] }
 0x479   :  { %8395 = vst [vmem:[#allocation109_spill] sm:$0xff] %v6839_v58  ;;  %2724 = vmatpush.msra.mxu3 %v6854_v56  ;;  %v6857_v58 = vld [vmem:[#allocation7 + $0x1a0] sm:$0xff] }
 0x47a   :  { %8396 = vst [vmem:[#allocation110_spill] sm:$0xff] %v6842_v45  ;;  %2665 = vmatpush.msrb.mxu0 %v6857_v58  ;;  %v6860_v45 = vld [vmem:[#allocation7 + $0x1a8] sm:$0xff] }
 0x47b   :  { %8397 = vst [vmem:[#allocation111_spill] sm:$0xff] %v6845_v57  ;;  %2685 = vmatpush.msra.mxu1 %v6860_v45  ;;  %v6863_v57 = vld [vmem:[#allocation7 + $0x1b0] sm:$0xff] }
 0x47c   :  { %8398 = vst [vmem:[#allocation112_spill] sm:$0xff] %v6848_v51  ;;  %2705 = vmatpush.msra.mxu2 %v6863_v57  ;;  %v6866_v51 = vld [vmem:[#allocation7 + $0x1b8] sm:$0xff] }
 0x47d   :  { %8399 = vst [vmem:[#allocation113_spill] sm:$0xff] %v6851_v10  ;;  %2725 = vmatpush.msra.mxu3 %v6866_v51  ;;  %v6869_v10 = vld [vmem:[#allocation7 + $0x160] sm:$0xff] }
 0x47e   :  { %8400 = vst [vmem:[#allocation114_spill] sm:$0xff] %v6854_v56  ;;  %2666 = vmatpush.msrb.mxu0 %v6869_v10  ;;  %v6872_v56 = vld [vmem:[#allocation7 + $0x168] sm:$0xff] }
 0x47f   :  { %8401 = vst [vmem:[#allocation115_spill] sm:$0xff] %v6857_v58  ;;  %2686 = vmatpush.msra.mxu1 %v6872_v56  ;;  %v6875_v58 = vld [vmem:[#allocation7 + $0x170] sm:$0xff] }
 0x480   :  { %8402 = vst [vmem:[#allocation116_spill] sm:$0xff] %v6860_v45  ;;  %2706 = vmatpush.msra.mxu2 %v6875_v58  ;;  %v6878_v45 = vld [vmem:[#allocation7 + $0x178] sm:$0xff] }
 0x481   :  { %8403 = vst [vmem:[#allocation117_spill] sm:$0xff] %v6863_v57  ;;  %2726 = vmatpush.msra.mxu3 %v6878_v45  ;;  %v6881_v57 = vld [vmem:[#allocation7 + $0x120] sm:$0xff] }
 0x482   :  { %8404 = vst [vmem:[#allocation118_spill] sm:$0xff] %v6866_v51  ;;  %2667 = vmatpush.msrb.mxu0 %v6881_v57  ;;  %v6884_v51 = vld [vmem:[#allocation7 + $0x128] sm:$0xff] }
 0x483   :  { %8405 = vst [vmem:[#allocation119_spill] sm:$0xff] %v6869_v10  ;;  %2687 = vmatpush.msra.mxu1 %v6884_v51  ;;  %v6887_v10 = vld [vmem:[#allocation7 + $0x130] sm:$0xff] }
 0x484   :  { %8406 = vst [vmem:[#allocation120_spill] sm:$0xff] %v6872_v56  ;;  %2707 = vmatpush.msra.mxu2 %v6887_v10  ;;  %v6890_v56 = vld [vmem:[#allocation7 + $0x138] sm:$0xff] }
 0x485   :  { %8407 = vst [vmem:[#allocation121_spill] sm:$0xff] %v6875_v58  ;;  %2727 = vmatpush.msra.mxu3 %v6890_v56  ;;  %v6893_v58 = vld [vmem:[#allocation7 + $0xe0] sm:$0xff] }
 0x486   :  { %8408 = vst [vmem:[#allocation122_spill] sm:$0xff] %v6878_v45  ;;  %2668 = vmatpush.msrb.mxu0 %v6893_v58  ;;  %v6896_v45 = vld [vmem:[#allocation7 + $0xe8] sm:$0xff] }
 0x487   :  { %8409 = vst [vmem:[#allocation123_spill] sm:$0xff] %v6881_v57  ;;  %2688 = vmatpush.msra.mxu1 %v6896_v45  ;;  %v6899_v57 = vld [vmem:[#allocation7 + $0xf0] sm:$0xff] }
 0x488   :  { %8410 = vst [vmem:[#allocation124_spill] sm:$0xff] %v6884_v51  ;;  %2708 = vmatpush.msra.mxu2 %v6899_v57  ;;  %v6902_v51 = vld [vmem:[#allocation7 + $0xf8] sm:$0xff] }
 0x489   :  { %8411 = vst [vmem:[#allocation125_spill] sm:$0xff] %v6887_v10  ;;  %2728 = vmatpush.msra.mxu3 %v6902_v51  ;;  %v6905_v10 = vld [vmem:[#allocation7 + $0xa0] sm:$0xff] }
 0x48a   :  { %8412 = vst [vmem:[#allocation126_spill] sm:$0xff] %v6890_v56  ;;  %2669 = vmatpush.msrb.mxu0 %v6905_v10  ;;  %v6908_v56 = vld [vmem:[#allocation7 + $0xa8] sm:$0xff] }
 0x48b   :  { %8413 = vst [vmem:[#allocation127_spill] sm:$0xff] %v6893_v58  ;;  %2689 = vmatpush.msra.mxu1 %v6908_v56  ;;  %v6911_v58 = vld [vmem:[#allocation7 + $0xb0] sm:$0xff] }
 0x48c   :  { %8414 = vst [vmem:[#allocation128_spill] sm:$0xff] %v6896_v45  ;;  %2709 = vmatpush.msra.mxu2 %v6911_v58  ;;  %v6914_v45 = vld [vmem:[#allocation7 + $0xb8] sm:$0xff] }
 0x48d   :  { %8415 = vst [vmem:[#allocation129_spill] sm:$0xff] %v6899_v57  ;;  %2729 = vmatpush.msra.mxu3 %v6914_v45  ;;  %v6917_v57 = vld [vmem:[#allocation7 + $0x60] sm:$0xff] }
 0x48e   :  { %8416 = vst [vmem:[#allocation130_spill] sm:$0xff] %v6902_v51  ;;  %2670 = vmatpush.msrb.mxu0 %v6917_v57  ;;  %v6920_v51 = vld [vmem:[#allocation7 + $0x68] sm:$0xff] }
 0x48f   :  { %8417 = vst [vmem:[#allocation131_spill] sm:$0xff] %v6905_v10  ;;  %2690 = vmatpush.msra.mxu1 %v6920_v51  ;;  %v6923_v10 = vld [vmem:[#allocation7 + $0x70] sm:$0xff] }
 0x490   :  { %8418 = vst [vmem:[#allocation132_spill] sm:$0xff] %v6908_v56  ;;  %2710 = vmatpush.msra.mxu2 %v6923_v10  ;;  %v6926_v56 = vld [vmem:[#allocation7 + $0x78] sm:$0xff] }
 0x491   :  { %8419 = vst [vmem:[#allocation133_spill] sm:$0xff] %v6911_v58  ;;  %2730 = vmatpush.msra.mxu3 %v6926_v56  ;;  %v6929_v58 = vld [vmem:[#allocation7 + $0x20] sm:$0xff] }
 0x492   :  { %8420 = vst [vmem:[#allocation134_spill] sm:$0xff] %v6914_v45  ;;  %2671 = vmatpush.msrb.mxu0 %v6929_v58  ;;  %v6932_v45 = vld [vmem:[#allocation7 + $0x28] sm:$0xff] }
 0x493   :  { %8421 = vst [vmem:[#allocation135_spill] sm:$0xff] %v6917_v57  ;;  %2691 = vmatpush.msra.mxu1 %v6932_v45  ;;  %v6935_v57 = vld [vmem:[#allocation7 + $0x30] sm:$0xff] }
 0x494   :  { %8422 = vst [vmem:[#allocation136_spill] sm:$0xff] %v6920_v51  ;;  %2711 = vmatpush.msra.mxu2 %v6935_v57  ;;  %v6938_v51 = vld [vmem:[#allocation7 + $0x38] sm:$0xff] }
 0x495   :  { %8423 = vst [vmem:[#allocation137_spill] sm:$0xff] %v6923_v10  ;;  %2731 = vmatpush.msra.mxu3 %v6938_v51  ;;  %v8429_v10 = vld [vmem:[#allocation74_spill] sm:$0xff] }
 0x496   :  { %8424 = vst [vmem:[#allocation138_spill] sm:$0xff] %v6926_v56  ;;  %v188_v16 = vadd.f32 %v8429_v10, %v8319_v63  ;;  %v8430_v56 = vld [vmem:[#allocation20_spill] sm:$0xff] }
 0x497   :  { %8425 = vst [vmem:[#allocation139_spill] sm:$0xff] %v6929_v58  ;;  %v229_v28 = vadd.f32 %v8430_v56, %v8321_v48  ;;  %v8433_v48 = vld [vmem:[#allocation33_spill] sm:$0xff] }
 0x498   :  { %8426 = vst [vmem:[#allocation140_spill] sm:$0xff] %v6932_v45 }
 0x499   :  { %8427 = vst [vmem:[#allocation141_spill] sm:$0xff] %v6935_v57  ;;  %v270_v57 = vadd.f32 %v8431_v6, %v8323_v41 }
 0x49a   :  { %8428 = vst [vmem:[#allocation142_spill] sm:$0xff] %v6938_v51 }
 0x4b4   :  { %v2278_v17 = vpop.f32.mrf.mxu0  ;;  %v2298_v58 = vpop.f32.mrf.mxu1 }
 0x4b5   :  { %v2421_v15 = vadd.f32 %v2278_v17, %v188_v16  ;;  %v2422_v19 = vadd.f32 %v2298_v58, %v229_v28  ;;  %v8434_v17 = vld [vmem:[#allocation47_spill] sm:$0xff] }
 0x4b7   :  { %v3358_v30 = vmul.f32 -1.442695, %v2421_v15  ;;  %v3359_v45 = vmul.f32 -1.442695, %v2422_v19 }
 0x4b9   :  { %3558 = vpow2.f32 %v3358_v30 }
 0x4ba   :  { %3560 = vpow2.f32 %v3359_v45 }
 0x4bb   :  { %v2318_v51 = vpop.f32.mrf.mxu2  ;;  %v2338_v59 = vpop.f32.mrf.mxu3 }
 0x4bc   :  { %v2423_v10 = vadd.f32 %v2318_v51, %v270_v57  ;;  %v2424_v63 = vadd.f32 %v2338_v59, %v311_v13  ;;  %v2358_v52 = vpop.f32.mrf.mxu0  ;;  %v2378_v56 = vpop.f32.mrf.mxu1  ;;  %v8435_v57 = vld [vmem:[#allocation38_spill] sm:$0xff] }
 0x4bd   :  { %v2425_v12 = vadd.f32 %v2358_v52, %v8433_v48  ;;  %v2426_v28 = vadd.f32 %v2378_v56, %v8434_v17 }
 0x4be   :  { %v3360_v15 = vmul.f32 -1.442695, %v2423_v10  ;;  %v3361_v19 = vmul.f32 -1.442695, %v2424_v63 }
 0x4bf   :  { %v3559_v30 = vpop.eup %3558  ;;  %v3362_v6 = vmul.f32 -1.442695, %v2425_v12  ;;  %v3363_v61 = vmul.f32 -1.442695, %v2426_v28 }
 0x4c0   :  { %v3561_v16 = vpop.eup %3560  ;;  %v2447_v58 = vadd.f32 1.0, %v3559_v30  ;;  %3562 = vpow2.f32 %v3360_v15 }
 0x4c1   :  { %v2448_v41 = vadd.f32 1.0, %v3561_v16  ;;  %3564 = vpow2.f32 %v3361_v19 }
 0x4c2   :  { %3566 = vrcp.f32 %v2447_v58  ;;  %v2462_v28 = vand.u32 2147483647, %v2447_v58  ;;  %vm2458_vm11 = vweird.f32 %v2447_v58 }
 0x4c3   :  { %3568 = vrcp.f32 %v2448_v41  ;;  %v2398_v48 = vpop.f32.mrf.mxu2  ;;  %v2418_v19 = vpop.f32.mrf.mxu3  ;;  %vm2473_vm12 = vweird.f32 %v2448_v41 }
 0x4c4   :  { %3570 = vpow2.f32 %v3362_v6  ;;  %v2427_v12 = vadd.f32 %v2398_v48, %v8435_v57  ;;  %v2479_v6 = vand.u32 2147483648, %v2448_v41  ;;  %v2477_v48 = vand.u32 2147483647, %v2448_v41 }
 0x4c5   :  { %3572 = vpow2.f32 %v3363_v61  ;;  %v2428_v27 = vadd.f32 %v2418_v19, %v8436_v49  ;;  %vm6970_vm13 = vcmp.eq.f32.partialorder %v2462_v28, 8.507059e+37 }
 0x4c6   :  { %v3563_v52 = vpop.eup %3562  ;;  %v2480_v15 = vor.u32 1.1754944e-38, %v2479_v6  ;;  %vm2478_vm15 = vcmp.eq.f32.partialorder %v2477_v48, 8.507059e+37 }
 0x4c7   :  { %v3565_v59 = vpop.eup %3564  ;;  %v6953_v13 = vadd.f32 1.0, %v3563_v52  ;;  %v2464_v52 = vand.u32 2147483648, %v2447_v58 }
 0x4c8   :  { %v3567_v63 = vpop.eup %3566  ;;  %v6955_v45 = vadd.f32 1.0, %v3565_v59 }
 0x4c9   :  { %v3569_v51 = vpop.eup %3568  ;;  %v2454_v10 = vmul.f32 %v3567_v63, %v2447_v58  ;;  %3574 = vrcp.f32 %v6953_v13  ;;  %vm2459_vm9 = vweird.f32 %v3567_v63  ;;  %vm2488_vm1 = vweird.f32 %v6953_v13 }
 0x4ca   :  { %v3571_v56 = vpop.eup %3570  ;;  %v2469_v17 = vmul.f32 %v3569_v51, %v2448_v41  ;;  %3576 = vrcp.f32 %v6955_v45  ;;  %vm2474_vm10 = vweird.f32 %v3569_v51  ;;  %vm2460_vm14 = vmor %vm2458_vm11, %vm2459_vm9  ;;  %v2509_v48 = vand.u32 2147483648, %v6955_v45 }
 0x4cb   :  { %v3573_v30 = vpop.eup %3572  ;;  %v2455_v16 = vsub.f32 1.0, %v2454_v10  ;;  %v6961_v61 = vadd.f32 1.0, %v3571_v56  ;;  %3578 = vtanh.f32 %v2427_v12  ;;  %v2465_v12 = vor.u32 1.1754944e-38, %v2464_v52  ;;  %vm2475_vm0 = vmor %vm2473_vm12, %vm2474_vm10 }
 0x4cc   :  { %v2470_v59 = vsub.f32 1.0, %v2469_v17  ;;  %v6963_v32 = vadd.f32 1.0, %v3573_v30  ;;  %vm2503_vm2 = vweird.f32 %v6955_v45 }
 0x4cd   :  { %3580 = vrcp.f32 %v6961_v61  ;;  %v2456_v57 = vmul.f32 %v3567_v63, %v2455_v16  ;;  %vm2518_vm9 = vweird.f32 %v6961_v61 }
 0x4ce   :  { %v2471_v62 = vmul.f32 %v3569_v51, %v2470_v59  ;;  %3582 = vrcp.f32 %v6963_v32  ;;  %v2494_v59 = vand.u32 2147483648, %v6953_v13 }
 0x4cf   :  { %v6968_v10 = vpop.eup %3574  ;;  %v2457_v56 = vadd.f32 %v3567_v63, %v2456_v57  ;;  %3584 = vtanh.f32 %v2428_v27 }
 0x4d0   :  { %v3577_v30 = vpop.eup %3576  ;;  %v2484_v16 = vmul.f32 %v6968_v10, %v6953_v13  ;;  %v2472_v49 = vadd.f32 %v3569_v51, %v2471_v62  ;;  %vm2489_vm4 = vweird.f32 %v6968_v10 }
 0x4d1   :  { %v2499_v58 = vmul.f32 %v3577_v30, %v6955_v45  ;;  %v2461_v41 = vsel %vm2460_vm14, %v3567_v63, %v2457_v56  ;;  %v3579_v28 = vpop.eup %3578  ;;  %vm2504_vm3 = vweird.f32 %v3577_v30  ;;  %vm7007_vm8 = vmor %vm2488_vm1, %vm2489_vm4  ;;  %vm2533_vm14 = vweird.f32 %v6963_v32 }
 0x4d2   :  { %v2485_v19 = vsub.f32 1.0, %v2484_v16  ;;  %v2466_v6 = vsel %vm6970_vm13, %v2465_v12, %v2461_v41  ;;  %v2476_v52 = vsel %vm2475_vm0, %v3569_v51, %v2472_v49  ;;  %v2524_v12 = vand.u32 2147483648, %v6961_v61  ;;  %vm2505_vm6 = vmor %vm2503_vm2, %vm2504_vm3 }
 0x4d3   :  { %v3581_v57 = vpop.eup %3580  ;;  %v2500_v3 = vsub.f32 1.0, %v2499_v58  ;;  %v2481_v54 = vsel %vm2478_vm15, %v2480_v15, %v2476_v52  ;;  %v2546_v62 = vmul.f32 %v3579_v28, %v2466_v6  ;;  %v2507_v15 = vand.u32 2147483647, %v6955_v45 }
 0x4d4   :  { %v6982_v53 = vpop.eup %3582  ;;  %v2486_v29 = vmul.f32 %v6968_v10, %v2485_v19  ;;  %v2514_v27 = vmul.f32 %v3581_v57, %v6961_v61  ;;  %v2545_v63 = vmul.f32 %v2481_v54, %v6552_v33  ;;  %vm2519_vm5 = vweird.f32 %v3581_v57 }
 0x4d5   :  { %v2529_v56 = vmul.f32 %v6982_v53, %v6963_v32  ;;  %v2501_v51 = vmul.f32 %v3577_v30, %v2500_v3  ;;  %v3585_v49 = vpop.eup %3584  ;;  %v2510_v41 = vor.u32 1.1754944e-38, %v2509_v48  ;;  %v8439_v3 = vstv %s6951_s2  ;;  %vm2520_vm10 = vmor %vm2518_vm9, %vm2519_vm5 }
 0x4d6   :  { %v2515_v17 = vsub.f32 1.0, %v2514_v27  ;;  %v2547_v16 = vadd.f32 %v2546_v62, %v2545_v63  ;;  %v2487_v58 = vadd.f32 %v6968_v10, %v2486_v29  ;;  %v2522_v6 = vand.u32 2147483647, %v6961_v61 }
 0x4d7   :  { %v2502_v54 = vadd.f32 %v3577_v30, %v2501_v51  ;;  %v2492_v52 = vand.u32 2147483647, %v6953_v13  ;;  %v2530_v62 = vsub.f32 1.0, %v2529_v56  ;;  %vm2508_vm7 = vcmp.eq.f32.partialorder %v2507_v15, 8.507059e+37 }
 0x4d8   :  { %v2516_v28 = vmul.f32 %v3581_v57, %v2515_v17  ;;  %3586 = vtanh.f32 %v2547_v16  ;;  %v2562_v19 = vmul.f32 %v8439_v3, %v2547_v16  ;;  %v2491_v63 = vsel %vm7007_vm8, %v6968_v10, %v2487_v58 }
 0x4d9   :  { %v2506_v27 = vsel %vm2505_vm6, %v3577_v30, %v2502_v54  ;;  %v2525_v30 = vor.u32 1.1754944e-38, %v2524_v12  ;;  %v2495_v51 = vor.u32 1.1754944e-38, %v2494_v59  ;;  %vm2523_vm11 = vcmp.eq.f32.partialorder %v2522_v6, 8.507059e+37 }
 0x4da   :  { %v2511_v48 = vsel %vm2508_vm7, %v2510_v41, %v2506_v27  ;;  %v2517_v45 = vadd.f32 %v3581_v57, %v2516_v28  ;;  %vm2493_vm12 = vcmp.eq.f32.partialorder %v2492_v52, 8.507059e+37  ;;  %v2531_v13 = vmul.f32 %v6982_v53, %v2530_v62 }
 0x4db   :  { %v2549_v56 = vmul.f32 %v3585_v49, %v2511_v48  ;;  %v2496_v61 = vsel %vm2493_vm12, %v2495_v51, %v2491_v63  ;;  %v2559_v28 = vstv %s6994_s5  ;;  %vm2534_vm13 = vweird.f32 %v6982_v53  ;;  %v8480_v63 = vld [vmem:[#allocation86_spill] sm:$0xff]  ;;  %v8483_v51 = vld [vmem:[#allocation89_spill] sm:$0xff] }
 0x4dc   :  { %v2521_v15 = vsel %vm2520_vm10, %v3581_v57, %v2517_v45  ;;  %v2532_v10 = vadd.f32 %v6982_v53, %v2531_v13  ;;  %v2539_v59 = vand.u32 2147483648, %v6963_v32  ;;  %v2537_v12 = vand.u32 2147483647, %v6963_v32  ;;  %vm2535_vm15 = vmor %vm2533_vm14, %vm2534_vm13  ;;  %v8443_v32 = vld [vmem:[#allocation78_spill] sm:$0xff]  ;;  %v8485_v13 = vld [vmem:[#allocation91_spill] sm:$0xff] }
 0x4dd   :  { %v2526_v17 = vsel %vm2523_vm11, %v2525_v30, %v2521_v15  ;;  %v8442_v27 = vstv %s6951_s2  ;;  %v8481_v30 = vld [vmem:[#allocation87_spill] sm:$0xff]  ;;  %v8484_v15 = vld [vmem:[#allocation90_spill] sm:$0xff] }
 0x4de   :  { %v3587_v16 = vpop.eup %3586  ;;  %v2548_v54 = vmul.f32 %v2526_v17, %v6552_v33  ;;  %v2536_v33 = vsel %vm2535_vm15, %v6982_v53, %v2532_v10  ;;  %v2540_v58 = vor.u32 1.1754944e-38, %v2539_v59  ;;  %vm2538_vm0 = vcmp.eq.f32.partialorder %v2537_v12, 8.507059e+37  ;;  %v8478_v53 = vld [vmem:[#allocation84_spill] sm:$0xff]  ;;  %v8493_v10 = vld [vmem:[#allocation99_spill] sm:$0xff]  ;;  %v8496_v12 = vld [vmem:[#allocation102_spill] sm:$0xff] }
 0x4df   :  { %v2552_v41 = vmul.f32 %v3587_v16, %v2496_v61  ;;  %v8486_v17 = vld [vmem:[#allocation92_spill] sm:$0xff]  ;;  %v8487_v16 = vld [vmem:[#allocation93_spill] sm:$0xff]  ;;  %v8488_v61 = vld [vmem:[#allocation94_spill] sm:$0xff] }
 0x4e0   :  { %v2550_v3 = vadd.f32 %v2549_v56, %v2548_v54  ;;  %v2541_v52 = vsel %vm2538_vm0, %v2540_v58, %v2536_v33  ;;  %v8482_v56 = vld [vmem:[#allocation88_spill] sm:$0xff]  ;;  %v8489_v54 = vld [vmem:[#allocation95_spill] sm:$0xff] }
 0x4e1   :  { %v2558_v29 = vmul.f32 %v8442_v27, %v2552_v41  ;;  %v8490_v41 = vld [vmem:[#allocation96_spill] sm:$0xff]  ;;  %v8497_v33 = vld [vmem:[#allocation103_spill] sm:$0xff] }
 0x4e2   :  { %3588 = vtanh.f32 %v2550_v3  ;;  %v2563_v57 = vmul.f32 %v2559_v28, %v2550_v3  ;;  %v8492_v3 = vld [vmem:[#allocation98_spill] sm:$0xff]  ;;  %v8494_v59 = vld [vmem:[#allocation100_spill] sm:$0xff] }
 0x4e3   :  { %v8498_v58 = vld [vmem:[#allocation104_spill] sm:$0xff] }
 0x4e4   :  { %v7024_v49 = vadd.f32 %v2563_v57, %v2562_v19  ;;  %v8479_v19 = vld [vmem:[#allocation85_spill] sm:$0xff]  ;;  %v8502_v27 = vld [vmem:[#allocation108_spill] sm:$0xff] }
 0x4e5   :  { %v8495_v57 = vld [vmem:[#allocation101_spill] sm:$0xff] }
 0x4e8   :  { %v3589_v6 = vpop.eup %3588 }
 0x4e9   :  { %v2554_v62 = vmul.f32 %v3589_v6, %v2541_v52  ;;  %v8499_v6 = vld [vmem:[#allocation105_spill] sm:$0xff]  ;;  %v8500_v52 = vld [vmem:[#allocation106_spill] sm:$0xff] }
 0x4eb   :  { %v2560_v48 = vmul.f32 %v2559_v28, %v2554_v62  ;;  %v8491_v28 = vld [vmem:[#allocation97_spill] sm:$0xff]  ;;  %v8501_v62 = vld [vmem:[#allocation107_spill] sm:$0xff] }
 0x4ed   :  { %v2561_v45 = vadd.f32 %v2560_v48, %v2558_v29  ;;  %v8503_v29 = vld [vmem:[#allocation109_spill] sm:$0xff]  ;;  %v8504_v48 = vld [vmem:[#allocation110_spill] sm:$0xff] }
 0x4ef   :  { %2592 = vmatmul.f32.vlgmr.msra.gmra.mxu0 %v2561_v45  ;;  %2612 = vmatmul.f32.vlgmr.msrb.gmra.mxu1 %v2561_v45 }
 0x4f0   :  { %2632 = vmatmul.f32.vlgmr.msrb.gmra.mxu2 %v2561_v45  ;;  %2652 = vmatmul.f32.vlgmr.msrb.gmra.mxu3 %v2561_v45 }
 0x4f1   :  { %2891 = vmatpush.msra.mxu0 %v6557_v5  ;;  %2911 = vmatpush.msrb.mxu1 %v6560_v25  ;;  %v8444_v5 = vld [vmem:[#allocation80_spill] sm:$0xff]  ;;  %v8445_v25 = vld [vmem:[#allocation81_spill] sm:$0xff] }
 0x4f2   :  { %2931 = vmatpush.msrb.mxu2 %v6563_v26  ;;  %2951 = vmatpush.msrb.mxu3 %v6566_v1  ;;  %v8446_v26 = vld [vmem:[#allocation82_spill] sm:$0xff]  ;;  %v8447_v1 = vld [vmem:[#allocation24_spill] sm:$0xff] }
 0x4f3   :  { %2892 = vmatpush.msra.mxu0 %v6569_v43  ;;  %2912 = vmatpush.msrb.mxu1 %v6572_v22  ;;  %v8448_v43 = vld [vmem:[#allocation27_spill] sm:$0xff] }
 0x4f4   :  { %2932 = vmatpush.msrb.mxu2 %v6575_v34  ;;  %2952 = vmatpush.msrb.mxu3 %v6578_v14  ;;  %v8449_v22 = vld [vmem:[#allocation35_spill] sm:$0xff]  ;;  %v8450_v34 = vld [vmem:[#allocation37_spill] sm:$0xff] }
 0x4f5   :  { %2893 = vmatpush.msra.mxu0 %v6581_v55  ;;  %2913 = vmatpush.msrb.mxu1 %v6584_v31  ;;  %v8451_v14 = vld [vmem:[#allocation79_spill] sm:$0xff]  ;;  %v8453_v31 = vld [vmem:[#allocation13_spill] sm:$0xff] }
 0x4f6   :  { %2933 = vmatpush.msrb.mxu2 %v6587_v46  ;;  %2953 = vmatpush.msrb.mxu3 %v6590_v44  ;;  %v8452_v55 = vld [vmem:[#allocation83_spill] sm:$0xff]  ;;  %v8454_v46 = vld [vmem:[#allocation17_spill] sm:$0xff] }
 0x4f7   :  { %2672 = vmatmul.f32.vlgmr.msrb.gmra.mxu0 %v2561_v45  ;;  %2692 = vmatmul.f32.vlgmr.msra.gmra.mxu1 %v2561_v45  ;;  %v8455_v44 = vld [vmem:[#allocation29_spill] sm:$0xff] }
 0x4f8   :  { %2712 = vmatmul.f32.vlgmr.msra.gmra.mxu2 %v2561_v45  ;;  %2732 = vmatmul.f32.vlgmr.msra.gmra.mxu3 %v2561_v45  ;;  %v8505_v45 = vld [vmem:[#allocation111_spill] sm:$0xff] }
 0x4f9   :  { %2894 = vmatpush.msra.mxu0 %v6593_v11  ;;  %2914 = vmatpush.msrb.mxu1 %v6596_v23  ;;  %v8456_v11 = vld [vmem:[#allocation39_spill] sm:$0xff]  ;;  %v8457_v23 = vld [vmem:[#allocation41_spill] sm:$0xff] }
 0x4fa   :  { %2934 = vmatpush.msrb.mxu2 %v6599_v2  ;;  %2954 = vmatpush.msrb.mxu3 %v6602_v18  ;;  %v8458_v2 = vld [vmem:[#allocation42_spill] sm:$0xff]  ;;  %v8459_v18 = vld [vmem:[#allocation56_spill] sm:$0xff] }
 0x4fb   :  { %2895 = vmatpush.msra.mxu0 %v6605_v20  ;;  %2915 = vmatpush.msrb.mxu1 %v6608_v21  ;;  %v8460_v20 = vld [vmem:[#allocation57_spill] sm:$0xff]  ;;  %v8461_v21 = vld [vmem:[#allocation58_spill] sm:$0xff] }
 0x4fc   :  { %2935 = vmatpush.msrb.mxu2 %v6611_v37  ;;  %2955 = vmatpush.msrb.mxu3 %v6614_v50  ;;  %v8462_v37 = vld [vmem:[#allocation59_spill] sm:$0xff]  ;;  %v8463_v50 = vld [vmem:[#allocation60_spill] sm:$0xff] }
 0x4fd   :  { %2896 = vmatpush.msra.mxu0 %v6617_v35  ;;  %2916 = vmatpush.msrb.mxu1 %v6620_v4  ;;  %v8464_v35 = vld [vmem:[#allocation61_spill] sm:$0xff]  ;;  %v8465_v4 = vld [vmem:[#allocation62_spill] sm:$0xff] }
 0x4fe   :  { %2936 = vmatpush.msrb.mxu2 %v6623_v8  ;;  %2956 = vmatpush.msrb.mxu3 %v6626_v38  ;;  %v8466_v8 = vld [vmem:[#allocation63_spill] sm:$0xff]  ;;  %v8467_v38 = vld [vmem:[#allocation64_spill] sm:$0xff] }
 0x4ff   :  { %2897 = vmatpush.msra.mxu0 %v6629_v9  ;;  %2917 = vmatpush.msrb.mxu1 %v6632_v24  ;;  %v8468_v9 = vld [vmem:[#allocation65_spill] sm:$0xff]  ;;  %v8469_v24 = vld [vmem:[#allocation66_spill] sm:$0xff] }
 0x500   :  { %2937 = vmatpush.msrb.mxu2 %v6635_v40  ;;  %2957 = vmatpush.msrb.mxu3 %v6638_v60  ;;  %v8470_v40 = vld [vmem:[#allocation67_spill] sm:$0xff]  ;;  %v8471_v60 = vld [vmem:[#allocation69_spill] sm:$0xff] }
 0x501   :  { %2898 = vmatpush.msra.mxu0 %v6641_v42  ;;  %2918 = vmatpush.msrb.mxu1 %v6644_v7  ;;  %v8472_v42 = vld [vmem:[#allocation68_spill] sm:$0xff]  ;;  %v8473_v7 = vld [vmem:[#allocation70_spill] sm:$0xff] }
 0x502   :  { %2938 = vmatpush.msrb.mxu2 %v6647_v0  ;;  %2958 = vmatpush.msrb.mxu3 %v6650_v36  ;;  %v8474_v0 = vld [vmem:[#allocation71_spill] sm:$0xff]  ;;  %v8475_v36 = vld [vmem:[#allocation72_spill] sm:$0xff] }
 0x503   :  { %2899 = vmatpush.msra.mxu0 %v6653_v47  ;;  %2919 = vmatpush.msrb.mxu1 %v6656_v39  ;;  %v8476_v47 = vld [vmem:[#allocation75_spill] sm:$0xff]  ;;  %v8477_v39 = vld [vmem:[#allocation73_spill] sm:$0xff] }
 0x504   :  { %2939 = vmatpush.msrb.mxu2 %v8443_v32  ;;  %2959 = vmatpush.msrb.mxu3 %v8444_v5  ;;  %v8506_v32 = vld [vmem:[#allocation112_spill] sm:$0xff]  ;;  %v8507_v5 = vld [vmem:[#allocation113_spill] sm:$0xff] }
 0x505   :  { %2900 = vmatpush.msra.mxu0 %v8445_v25  ;;  %2920 = vmatpush.msrb.mxu1 %v8446_v26  ;;  %v8508_v25 = vld [vmem:[#allocation114_spill] sm:$0xff]  ;;  %v8509_v26 = vld [vmem:[#allocation115_spill] sm:$0xff] }
 0x506   :  { %2940 = vmatpush.msrb.mxu2 %v8447_v1  ;;  %2960 = vmatpush.msrb.mxu3 %v8448_v43  ;;  %v8510_v1 = vld [vmem:[#allocation116_spill] sm:$0xff]  ;;  %v8511_v43 = vld [vmem:[#allocation117_spill] sm:$0xff] }
 0x507   :  { %2901 = vmatpush.msra.mxu0 %v8449_v22  ;;  %2921 = vmatpush.msrb.mxu1 %v8450_v34  ;;  %v8512_v22 = vld [vmem:[#allocation118_spill] sm:$0xff]  ;;  %v8513_v34 = vld [vmem:[#allocation119_spill] sm:$0xff] }
 0x508   :  { %2941 = vmatpush.msrb.mxu2 %v8451_v14  ;;  %2961 = vmatpush.msrb.mxu3 %v8452_v55  ;;  %v8514_v14 = vld [vmem:[#allocation120_spill] sm:$0xff]  ;;  %v8515_v55 = vld [vmem:[#allocation121_spill] sm:$0xff] }
 0x509   :  { %2902 = vmatpush.msra.mxu0 %v8453_v31  ;;  %2922 = vmatpush.msrb.mxu1 %v8454_v46  ;;  %v8516_v31 = vld [vmem:[#allocation122_spill] sm:$0xff]  ;;  %v8517_v46 = vld [vmem:[#allocation123_spill] sm:$0xff] }
 0x50a   :  { %2942 = vmatpush.msrb.mxu2 %v8455_v44  ;;  %2962 = vmatpush.msrb.mxu3 %v8456_v11  ;;  %v8518_v44 = vld [vmem:[#allocation124_spill] sm:$0xff]  ;;  %v8519_v11 = vld [vmem:[#allocation125_spill] sm:$0xff] }
 0x50b   :  { %2903 = vmatpush.msra.mxu0 %v8457_v23  ;;  %2923 = vmatpush.msrb.mxu1 %v8458_v2  ;;  %v8520_v23 = vld [vmem:[#allocation126_spill] sm:$0xff]  ;;  %v8521_v2 = vld [vmem:[#allocation127_spill] sm:$0xff] }
 0x50c   :  { %2943 = vmatpush.msrb.mxu2 %v8459_v18  ;;  %2963 = vmatpush.msrb.mxu3 %v8460_v20  ;;  %v8522_v18 = vld [vmem:[#allocation128_spill] sm:$0xff]  ;;  %v8523_v20 = vld [vmem:[#allocation129_spill] sm:$0xff] }
 0x50d   :  { %2904 = vmatpush.msra.mxu0 %v8461_v21  ;;  %2924 = vmatpush.msrb.mxu1 %v8462_v37  ;;  %v8524_v21 = vld [vmem:[#allocation130_spill] sm:$0xff]  ;;  %v8525_v37 = vld [vmem:[#allocation131_spill] sm:$0xff] }
 0x50e   :  { %2944 = vmatpush.msrb.mxu2 %v8463_v50  ;;  %2964 = vmatpush.msrb.mxu3 %v8464_v35  ;;  %v8526_v50 = vld [vmem:[#allocation132_spill] sm:$0xff]  ;;  %v8527_v35 = vld [vmem:[#allocation133_spill] sm:$0xff] }
 0x50f   :  { %2905 = vmatpush.msra.mxu0 %v8465_v4  ;;  %2925 = vmatpush.msrb.mxu1 %v8466_v8  ;;  %v8528_v4 = vld [vmem:[#allocation134_spill] sm:$0xff]  ;;  %v8529_v8 = vld [vmem:[#allocation135_spill] sm:$0xff] }
 0x510   :  { %2945 = vmatpush.msrb.mxu2 %v8467_v38  ;;  %2965 = vmatpush.msrb.mxu3 %v8468_v9  ;;  %v8530_v38 = vld [vmem:[#allocation136_spill] sm:$0xff]  ;;  %v8531_v9 = vld [vmem:[#allocation137_spill] sm:$0xff] }
 0x511   :  { %2906 = vmatpush.msra.mxu0 %v8469_v24  ;;  %2926 = vmatpush.msrb.mxu1 %v8470_v40  ;;  %v8532_v24 = vld [vmem:[#allocation138_spill] sm:$0xff]  ;;  %v8533_v40 = vld [vmem:[#allocation139_spill] sm:$0xff] }
 0x512   :  { %2946 = vmatpush.msrb.mxu2 %v8471_v60  ;;  %2966 = vmatpush.msrb.mxu3 %v8472_v42  ;;  %v8534_v60 = vld [vmem:[#allocation140_spill] sm:$0xff]  ;;  %v8535_v42 = vld [vmem:[#allocation141_spill] sm:$0xff] }
 0x513   :  { %2971 = vmatpush.msrb.mxu0 %v8473_v7  ;;  %2991 = vmatpush.msra.mxu1 %v8474_v0  ;;  %v8536_v7 = vld [vmem:[#allocation142_spill] sm:$0xff] }
 0x514   :  { %3011 = vmatpush.msra.mxu2 %v8475_v36  ;;  %3031 = vmatpush.msra.mxu3 %v8476_v47  ;;  %v8537_v0 = vld [vmem:[#allocation46_spill] sm:$0xff]  ;;  %v8538_v36 = vld [vmem:[#allocation76_spill] sm:$0xff] }
 0x515   :  { %2972 = vmatpush.msrb.mxu0 %v8477_v39  ;;  %2992 = vmatpush.msra.mxu1 %v8478_v53  ;;  %v191_v47 = vadd.f32 %v8538_v36, %v8537_v0  ;;  %v8539_v39 = vld [vmem:[#allocation44_spill] sm:$0xff] }
 0x516   :  { %3012 = vmatpush.msra.mxu2 %v8479_v19  ;;  %3032 = vmatpush.msra.mxu3 %v8480_v63  ;;  %v8540_v53 = vld [vmem:[#allocation16_spill] sm:$0xff] }
 0x517   :  { %2973 = vmatpush.msrb.mxu0 %v8481_v30  ;;  %2993 = vmatpush.msra.mxu1 %v8482_v56  ;;  %v232_v19 = vadd.f32 %v8540_v53, %v8539_v39 }
 0x518   :  { %3013 = vmatpush.msra.mxu2 %v8483_v51  ;;  %3033 = vmatpush.msra.mxu3 %v8484_v15 }
 0x519   :  { %2974 = vmatpush.msrb.mxu0 %v8485_v13  ;;  %2994 = vmatpush.msra.mxu1 %v8486_v17  ;;  %v8541_v17 = vld [vmem:[#allocation55_spill] sm:$0xff] }
 0x51a   :  { %3014 = vmatpush.msra.mxu2 %v8487_v16  ;;  %3034 = vmatpush.msra.mxu3 %v8488_v61  ;;  %v8542_v16 = vld [vmem:[#allocation26_spill] sm:$0xff] }
 0x51b   :  { %2975 = vmatpush.msrb.mxu0 %v8489_v54  ;;  %2995 = vmatpush.msra.mxu1 %v8490_v41  ;;  %v273_v61 = vadd.f32 %v8542_v16, %v8541_v17  ;;  %v8543_v54 = vld [vmem:[#allocation48_spill] sm:$0xff]  ;;  %v8544_v41 = vld [vmem:[#allocation19_spill] sm:$0xff] }
 0x51c   :  { %3015 = vmatpush.msra.mxu2 %v8491_v28  ;;  %3035 = vmatpush.msra.mxu3 %v8492_v3  ;;  %v314_v28 = vadd.f32 %v8544_v41, %v8543_v54 }
 0x51d   :  { %2976 = vmatpush.msrb.mxu0 %v8493_v10  ;;  %2996 = vmatpush.msra.mxu1 %v8494_v59 }
 0x51e   :  { %3016 = vmatpush.msra.mxu2 %v8495_v57  ;;  %3036 = vmatpush.msra.mxu3 %v8496_v12 }
 0x51f   :  { %2977 = vmatpush.msrb.mxu0 %v8497_v33  ;;  %2997 = vmatpush.msra.mxu1 %v8498_v58  ;;  %v8545_v58 = vld [vmem:[#allocation36_spill] sm:$0xff] }
 0x520   :  { %3017 = vmatpush.msra.mxu2 %v8499_v6  ;;  %3037 = vmatpush.msra.mxu3 %v8500_v52  ;;  %v8546_v52 = vld [vmem:[#allocation50_spill] sm:$0xff] }
 0x521   :  { %2978 = vmatpush.msrb.mxu0 %v8501_v62  ;;  %2998 = vmatpush.msra.mxu1 %v8502_v27 }
 0x522   :  { %3018 = vmatpush.msra.mxu2 %v8503_v29  ;;  %3038 = vmatpush.msra.mxu3 %v8504_v48 }
 0x523   :  { %2979 = vmatpush.msrb.mxu0 %v8505_v45  ;;  %2999 = vmatpush.msra.mxu1 %v8506_v32 }
 0x524   :  { %3019 = vmatpush.msra.mxu2 %v8507_v5  ;;  %3039 = vmatpush.msra.mxu3 %v8508_v25 }
 0x525   :  { %2980 = vmatpush.msrb.mxu0 %v8509_v26  ;;  %3000 = vmatpush.msra.mxu1 %v8510_v1 }
 0x526   :  { %3020 = vmatpush.msra.mxu2 %v8511_v43  ;;  %3040 = vmatpush.msra.mxu3 %v8512_v22 }
 0x527   :  { %2981 = vmatpush.msrb.mxu0 %v8513_v34  ;;  %3001 = vmatpush.msra.mxu1 %v8514_v14 }
 0x528   :  { %3021 = vmatpush.msra.mxu2 %v8515_v55  ;;  %3041 = vmatpush.msra.mxu3 %v8516_v31  ;;  %v8547_v31 = vld [vmem:[#allocation40_spill] sm:$0xff] }
 0x529   :  { %2982 = vmatpush.msrb.mxu0 %v8517_v46  ;;  %3002 = vmatpush.msra.mxu1 %v8518_v44 }
 0x52a   :  { %3022 = vmatpush.msra.mxu2 %v8519_v11  ;;  %3042 = vmatpush.msra.mxu3 %v8520_v23 }
 0x52b   :  { %2983 = vmatpush.msrb.mxu0 %v8521_v2  ;;  %3003 = vmatpush.msra.mxu1 %v8522_v18 }
 0x52c   :  { %3023 = vmatpush.msra.mxu2 %v8523_v20  ;;  %3043 = vmatpush.msra.mxu3 %v8524_v21  ;;  %v2872_v20 = vstv %s7167_s26 }
 0x52d   :  { %2984 = vmatpush.msrb.mxu0 %v8525_v37  ;;  %3004 = vmatpush.msra.mxu1 %v8526_v50 }
 0x52e   :  { %3024 = vmatpush.msra.mxu2 %v8527_v35  ;;  %3044 = vmatpush.msra.mxu3 %v8528_v4 }
 0x52f   :  { %2985 = vmatpush.msrb.mxu0 %v8529_v8  ;;  %3005 = vmatpush.msra.mxu1 %v8530_v38 }
 0x530   :  { %3025 = vmatpush.msra.mxu2 %v8531_v9  ;;  %3045 = vmatpush.msra.mxu3 %v8532_v24 }
 0x531   :  { %2986 = vmatpush.msrb.mxu0 %v8533_v40  ;;  %3006 = vmatpush.msra.mxu1 %v8534_v60  ;;  %v8548_v60 = vld [vmem:[#allocation51_spill] sm:$0xff] }
 0x532   :  { %3026 = vmatpush.msra.mxu2 %v8535_v42  ;;  %3046 = vmatpush.msra.mxu3 %v8536_v7 }
 0x56c   :  { %v2593_v63 = vpop.f32.mrf.mxu0  ;;  %v2613_v30 = vpop.f32.mrf.mxu1 }
 0x56d   :  { %v2736_v56 = vadd.f32 %v2593_v63, %v191_v47  ;;  %v2737_v51 = vadd.f32 %v2613_v30, %v232_v19 }
 0x56f   :  { %v3366_v15 = vmul.f32 -1.442695, %v2736_v56  ;;  %v3367_v13 = vmul.f32 -1.442695, %v2737_v51 }
 0x571   :  { %3590 = vpow2.f32 %v3366_v15 }
 0x572   :  { %3592 = vpow2.f32 %v3367_v13 }
 0x573   :  { %v2633_v3 = vpop.f32.mrf.mxu2  ;;  %v2653_v10 = vpop.f32.mrf.mxu3 }
 0x574   :  { %v2738_v59 = vadd.f32 %v2633_v3, %v273_v61  ;;  %v2739_v57 = vadd.f32 %v2653_v10, %v314_v28  ;;  %v2673_v12 = vpop.f32.mrf.mxu0  ;;  %v2693_v33 = vpop.f32.mrf.mxu1 }
 0x575   :  { %v2740_v6 = vadd.f32 %v2673_v12, %v8545_v58  ;;  %v2741_v62 = vadd.f32 %v2693_v33, %v8546_v52 }
 0x576   :  { %v3368_v27 = vmul.f32 -1.442695, %v2738_v59  ;;  %v3369_v29 = vmul.f32 -1.442695, %v2739_v57 }
 0x577   :  { %v3591_v48 = vpop.eup %3590  ;;  %v3370_v5 = vmul.f32 -1.442695, %v2740_v6  ;;  %v3371_v26 = vmul.f32 -1.442695, %v2741_v62 }
 0x578   :  { %v3593_v45 = vpop.eup %3592  ;;  %v2762_v32 = vadd.f32 1.0, %v3591_v48  ;;  %3594 = vpow2.f32 %v3368_v27 }
 0x579   :  { %v2763_v25 = vadd.f32 1.0, %v3593_v45  ;;  %3596 = vpow2.f32 %v3369_v29 }
 0x57a   :  { %3598 = vrcp.f32 %v2762_v32  ;;  %v2777_v18 = vand.u32 2147483647, %v2762_v32  ;;  %v2779_v8 = vand.u32 2147483648, %v2762_v32  ;;  %vm2773_vm3 = vweird.f32 %v2762_v32 }
 0x57b   :  { %3600 = vrcp.f32 %v2763_v25  ;;  %v2713_v1 = vpop.f32.mrf.mxu2  ;;  %v2733_v21 = vpop.f32.mrf.mxu3  ;;  %v2794_v35 = vand.u32 2147483648, %v2763_v25  ;;  %v2792_v24 = vand.u32 2147483647, %v2763_v25  ;;  %vm2788_vm4 = vweird.f32 %v2763_v25 }
 0x57c   :  { %3602 = vpow2.f32 %v3370_v5  ;;  %v2742_v46 = vadd.f32 %v2713_v1, %v8547_v31  ;;  %v2743_v42 = vadd.f32 %v2733_v21, %v8548_v60  ;;  %vm7186_vm5 = vcmp.eq.f32.partialorder %v2777_v18, 8.507059e+37 }
 0x57d   :  { %3604 = vpow2.f32 %v3371_v26  ;;  %v2780_v19 = vor.u32 1.1754944e-38, %v2779_v8  ;;  %v2795_v30 = vor.u32 1.1754944e-38, %v2794_v35  ;;  %vm2793_vm7 = vcmp.eq.f32.partialorder %v2792_v24, 8.507059e+37 }
 0x57e   :  { %v3595_v43 = vpop.eup %3594  ;;  %v2874_v60 = vstv %s7210_s27 }
 0x57f   :  { %v3597_v22 = vpop.eup %3596  ;;  %v7169_v34 = vadd.f32 1.0, %v3595_v43 }
 0x580   :  { %v3599_v14 = vpop.eup %3598  ;;  %v7171_v55 = vadd.f32 1.0, %v3597_v22 }
 0x581   :  { %v3601_v44 = vpop.eup %3600  ;;  %v2769_v11 = vmul.f32 %v3599_v14, %v2762_v32  ;;  %3606 = vrcp.f32 %v7169_v34  ;;  %vm2774_vm1 = vweird.f32 %v3599_v14  ;;  %vm2803_vm9 = vweird.f32 %v7169_v34 }
 0x582   :  { %v3603_v23 = vpop.eup %3602  ;;  %v2784_v2 = vmul.f32 %v3601_v44, %v2763_v25  ;;  %3608 = vrcp.f32 %v7171_v55  ;;  %vm2789_vm2 = vweird.f32 %v3601_v44  ;;  %vm2775_vm6 = vmor %vm2773_vm3, %vm2774_vm1  ;;  %v2809_v41 = vand.u32 2147483648, %v7169_v34 }
 0x583   :  { %v3605_v37 = vpop.eup %3604  ;;  %v2770_v50 = vsub.f32 1.0, %v2769_v11  ;;  %v7177_v4 = vadd.f32 1.0, %v3603_v23  ;;  %3610 = vtanh.f32 %v2742_v46  ;;  %vm2790_vm8 = vmor %vm2788_vm4, %vm2789_vm2  ;;  %v2824_v33 = vand.u32 2147483648, %v7171_v55 }
 0x584   :  { %v2785_v38 = vsub.f32 1.0, %v2784_v2  ;;  %v7179_v9 = vadd.f32 1.0, %v3605_v37  ;;  %vm2818_vm10 = vweird.f32 %v7171_v55  ;;  %v2822_v48 = vand.u32 2147483647, %v7171_v55 }
 0x585   :  { %3612 = vrcp.f32 %v7177_v4  ;;  %v2771_v40 = vmul.f32 %v3599_v14, %v2770_v50  ;;  %v2839_v32 = vand.u32 2147483648, %v7177_v4  ;;  %v2825_v43 = vor.u32 1.1754944e-38, %v2824_v33  ;;  %v3210_v33 = vld [vmem:[#allocation9 + $0x78] sm:$0xff] }
 0x586   :  { %v2786_v7 = vmul.f32 %v3601_v44, %v2785_v38  ;;  %3614 = vrcp.f32 %v7179_v9  ;;  %v2837_v31 = vand.u32 2147483647, %v7177_v4  ;;  %v2807_v46 = vand.u32 2147483647, %v7169_v34 }
 0x587   :  { %v7184_v36 = vpop.eup %3606  ;;  %v2772_v47 = vadd.f32 %v3599_v14, %v2771_v40  ;;  %3616 = vtanh.f32 %v2743_v42  ;;  %vm2823_vm15 = vcmp.eq.f32.partialorder %v2822_v48, 8.507059e+37  ;;  %vm2833_vm1 = vweird.f32 %v7177_v4 }
 0x588   :  { %v3609_v63 = vpop.eup %3608  ;;  %v2799_v56 = vmul.f32 %v7184_v36, %v7169_v34  ;;  %v2787_v51 = vadd.f32 %v3601_v44, %v2786_v7  ;;  %vm2804_vm12 = vweird.f32 %v7184_v36  ;;  %v2840_v21 = vor.u32 1.1754944e-38, %v2839_v32 }
 0x589   :  { %v2814_v15 = vmul.f32 %v3609_v63, %v7171_v55  ;;  %v2776_v13 = vsel %vm2775_vm6, %v3599_v14, %v2772_v47  ;;  %v3611_v16 = vpop.eup %3610  ;;  %vm2819_vm11 = vweird.f32 %v3609_v63  ;;  %vm7223_vm0 = vmor %vm2803_vm9, %vm2804_vm12  ;;  %v2810_v50 = vor.u32 1.1754944e-38, %v2809_v41  ;;  %v8554_v41 = vld [vmem:[#allocation28_spill] sm:$0xff] }
 0x58a   :  { %v2800_v61 = vsub.f32 1.0, %v2799_v56  ;;  %v2781_v28 = vsel %vm7186_vm5, %v2780_v19, %v2776_v13  ;;  %v2791_v3 = vsel %vm2790_vm8, %v3601_v44, %v2787_v51  ;;  %vm2820_vm14 = vmor %vm2818_vm10, %vm2819_vm11  ;;  %vm2838_vm3 = vcmp.eq.f32.partialorder %v2837_v31, 8.507059e+37 }
 0x58b   :  { %v3613_v10 = vpop.eup %3612  ;;  %v2815_v59 = vsub.f32 1.0, %v2814_v15  ;;  %v2796_v57 = vsel %vm2793_vm7, %v2795_v30, %v2791_v3  ;;  %v2861_v12 = vmul.f32 %v3611_v16, %v2781_v28  ;;  %vm2808_vm4 = vcmp.eq.f32.partialorder %v2807_v46, 8.507059e+37 }
 0x58c   :  { %v7198_v58 = vpop.eup %3614  ;;  %v2801_v6 = vmul.f32 %v7184_v36, %v2800_v61  ;;  %v2829_v52 = vmul.f32 %v3613_v10, %v7177_v4  ;;  %v2860_v62 = vmul.f32 %v2796_v57, %v7024_v49  ;;  %vm2834_vm13 = vweird.f32 %v3613_v10 }
 0x58d   :  { %v2844_v27 = vmul.f32 %v7198_v58, %v7179_v9  ;;  %v2816_v29 = vmul.f32 %v3609_v63, %v2815_v59  ;;  %v3617_v25 = vpop.eup %3616  ;;  %vm2835_vm2 = vmor %vm2833_vm1, %vm2834_vm13  ;;  %vm2849_vm5 = vweird.f32 %v7198_v58  ;;  %vm2848_vm6 = vweird.f32 %v7179_v9 }
 0x58e   :  { %v2830_v45 = vsub.f32 1.0, %v2829_v52  ;;  %v2862_v5 = vadd.f32 %v2861_v12, %v2860_v62  ;;  %v2802_v26 = vadd.f32 %v7184_v36, %v2801_v6  ;;  %v2852_v53 = vand.u32 2147483647, %v7179_v9  ;;  %vm2850_vm7 = vmor %vm2848_vm6, %vm2849_vm5  ;;  %v8556_v52 = vld [vmem:[#allocation23_spill] sm:$0xff] }
 0x58f   :  { %v2817_v1 = vadd.f32 %v3609_v63, %v2816_v29  ;;  %v2845_v44 = vsub.f32 1.0, %v2844_v27  ;;  %v235_v28 = vadd.f32 %v8554_v41, %v8539_v39  ;;  %v317_v62 = vadd.f32 %v8556_v52, %v8543_v54  ;;  %v3209_v29 = vld [vmem:[#allocation9 + $0x70] sm:$0xff]  ;;  %v3207_v54 = vld [vmem:[#allocation9 + $0x60] sm:$0xff] }
 0x590   :  { %v2831_v22 = vmul.f32 %v3613_v10, %v2830_v45  ;;  %3618 = vtanh.f32 %v2862_v5  ;;  %v2877_v14 = vmul.f32 %v2872_v20, %v2862_v5  ;;  %v2806_v18 = vsel %vm7223_vm0, %v7184_v36, %v2802_v26  ;;  %v8557_v5 = vld [vmem:[#allocation30_spill] sm:$0xff]  ;;  %v8558_v26 = vld [vmem:[#allocation52_spill] sm:$0xff] }
 0x591   :  { %v2821_v11 = vsel %vm2820_vm14, %v3609_v63, %v2817_v1  ;;  %v2846_v34 = vmul.f32 %v7198_v58, %v2845_v44  ;;  %v2811_v4 = vsel %vm2808_vm4, %v2810_v50, %v2806_v18  ;;  %v2854_v36 = vand.u32 2147483648, %v7179_v9  ;;  %v8553_v9 = vld [vmem:[#allocation77_spill] sm:$0xff] }
 0x592   :  { %v2826_v2 = vsel %vm2823_vm15, %v2825_v43, %v2821_v11  ;;  %v2832_v55 = vadd.f32 %v3613_v10, %v2831_v22  ;;  %vm2853_vm8 = vcmp.eq.f32.partialorder %v2852_v53, 8.507059e+37  ;;  %v194_v61 = vadd.f32 %v8553_v9, %v8537_v0  ;;  %v3208_v43 = vld [vmem:[#allocation9 + $0x68] sm:$0xff]  ;;  %v3203_v50 = vld [vmem:[#allocation9 + $0x40] sm:$0xff] }
 0x593   :  { %v2864_v37 = vmul.f32 %v3617_v25, %v2826_v2  ;;  %v2847_v7 = vadd.f32 %v7198_v58, %v2846_v34  ;;  %v2855_v63 = vor.u32 1.1754944e-38, %v2854_v36  ;;  %v3206_v2 = vld [vmem:[#allocation9 + $0x58] sm:$0xff] }
 0x594   :  { %v2836_v35 = vsel %vm2835_vm2, %v3613_v10, %v2832_v55  ;;  %v3205_v55 = vld [vmem:[#allocation9 + $0x50] sm:$0xff] }
 0x595   :  { %v2841_v8 = vsel %vm2838_vm3, %v2840_v21, %v2836_v35  ;;  %v3204_v21 = vld [vmem:[#allocation9 + $0x48] sm:$0xff] }
 0x596   :  { %v3619_v38 = vpop.eup %3618  ;;  %v2863_v24 = vmul.f32 %v2841_v8, %v7024_v49  ;;  %v2851_v49 = vsel %vm2850_vm7, %v7198_v58, %v2847_v7  ;;  %v8555_v58 = vld [vmem:[#allocation32_spill] sm:$0xff]  ;;  %v3201_v7 = vld [vmem:[#allocation9 + $0x30] sm:$0xff] }
 0x597   :  { %v2867_v40 = vmul.f32 %v3619_v38, %v2811_v4  ;;  %v2856_v56 = vsel %vm2853_vm8, %v2855_v63, %v2851_v49  ;;  %v276_v6 = vadd.f32 %v8555_v58, %v8541_v17  ;;  %v3202_v8 = vld [vmem:[#allocation9 + $0x38] sm:$0xff] }
 0x598   :  { %v2865_v42 = vadd.f32 %v2864_v37, %v2863_v24  ;;  %v8559_v24 = vld [vmem:[#allocation53_spill] sm:$0xff] }
 0x599   :  { %v2873_v15 = vmul.f32 %v2872_v20, %v2867_v40 }
 0x59a   :  { %3620 = vtanh.f32 %v2865_v42  ;;  %v2878_v47 = vmul.f32 %v2874_v60, %v2865_v42 }
 0x59c   :  { %v7240_v19 = vadd.f32 %v2878_v47, %v2877_v14 }
 0x5a0   :  { %v3621_v30 = vpop.eup %3620 }
 0x5a1   :  { %v2869_v51 = vmul.f32 %v3621_v30, %v2856_v56 }
 0x5a3   :  { %v2875_v13 = vmul.f32 %v2874_v60, %v2869_v51 }
 0x5a5   :  { %v2876_v16 = vadd.f32 %v2875_v13, %v2873_v15  ;;  %v3200_v13 = vld [vmem:[#allocation9 + $0x28] sm:$0xff] }
 0x5a7   :  { %2907 = vmatmul.f32.vlgmr.msra.gmra.mxu0 %v2876_v16  ;;  %2927 = vmatmul.f32.vlgmr.msrb.gmra.mxu1 %v2876_v16 }
 0x5a8   :  { %2947 = vmatmul.f32.vlgmr.msrb.gmra.mxu2 %v2876_v16  ;;  %2967 = vmatmul.f32.vlgmr.msrb.gmra.mxu3 %v2876_v16 }
 0x5a9   :  { %3215 = vmatpush.msra.mxu0 %v3210_v33  ;;  %v3198_v33 = vld [vmem:[#allocation9 + $0x18] sm:$0xff] }
 0x5ab   :  { %3216 = vmatpush.msra.mxu0 %v3209_v29 }
 0x5ad   :  { %3217 = vmatpush.msra.mxu0 %v3208_v43 }
 0x5af   :  { %2987 = vmatmul.f32.vlgmr.msrb.gmra.mxu0 %v2876_v16  ;;  %3007 = vmatmul.f32.vlgmr.msra.gmra.mxu1 %v2876_v16 }
 0x5b0   :  { %3027 = vmatmul.f32.vlgmr.msra.gmra.mxu2 %v2876_v16  ;;  %3047 = vmatmul.f32.vlgmr.msra.gmra.mxu3 %v2876_v16 }
 0x5b1   :  { %3218 = vmatpush.msra.mxu0 %v3207_v54 }
 0x5b3   :  { %3219 = vmatpush.msra.mxu0 %v3206_v2 }
 0x5b5   :  { %3220 = vmatpush.msra.mxu0 %v3205_v55 }
 0x5b7   :  { %3221 = vmatpush.msra.mxu0 %v3204_v21 }
 0x5b9   :  { %3222 = vmatpush.msra.mxu0 %v3203_v50 }
 0x5bb   :  { %3223 = vmatpush.msra.mxu0 %v3202_v8 }
 0x5bd   :  { %3224 = vmatpush.msra.mxu0 %v3201_v7 }
 0x5bf   :  { %3225 = vmatpush.msra.mxu0 %v3200_v13 }
 0x624   :  { %v2908_v3 = vpop.f32.mrf.mxu0  ;;  %v2928_v10 = vpop.f32.mrf.mxu1 }
 0x625   :  { %v3051_v59 = vadd.f32 %v2908_v3, %v194_v61  ;;  %v3052_v20 = vadd.f32 %v2928_v10, %v235_v28  ;;  %v8560_v28 = vld [vmem:[#allocation54_spill] sm:$0xff]  ;;  %v3199_v10 = vld [vmem:[#allocation9 + $0x20] sm:$0xff] }
 0x626   :  { %3226 = vmatpush.msra.mxu0 %v3199_v10 }
 0x627   :  { %v3374_v57 = vmul.f32 -1.442695, %v3051_v59  ;;  %v3375_v12 = vmul.f32 -1.442695, %v3052_v20 }
 0x628   :  { %3227 = vmatpush.msra.mxu0 %v3198_v33 }
 0x629   :  { %3622 = vpow2.f32 %v3374_v57 }
 0x62a   :  { %3624 = vpow2.f32 %v3375_v12 }
 0x62b   :  { %v2948_v0 = vpop.f32.mrf.mxu2  ;;  %v2968_v27 = vpop.f32.mrf.mxu3 }
 0x62c   :  { %v3053_v39 = vadd.f32 %v2948_v0, %v276_v6  ;;  %v3054_v48 = vadd.f32 %v2968_v27, %v317_v62  ;;  %v2988_v45 = vpop.f32.mrf.mxu0  ;;  %v3008_v32 = vpop.f32.mrf.mxu1 }
 0x62d   :  { %v3055_v25 = vadd.f32 %v2988_v45, %v8557_v5  ;;  %v3056_v1 = vadd.f32 %v3008_v32, %v8558_v26 }
 0x62e   :  { %v3376_v22 = vmul.f32 -1.442695, %v3053_v39  ;;  %v3377_v17 = vmul.f32 -1.442695, %v3054_v48  ;;  %v3197_v48 = vld [vmem:[#allocation9 + $0x10] sm:$0xff] }
 0x62f   :  { %v3623_v14 = vpop.eup %3622  ;;  %v3378_v44 = vmul.f32 -1.442695, %v3055_v25  ;;  %v3379_v23 = vmul.f32 -1.442695, %v3056_v1  ;;  %3228 = vmatpush.msra.mxu0 %v3197_v48 }
 0x630   :  { %v3625_v31 = vpop.eup %3624  ;;  %v7255_v46 = vadd.f32 1.0, %v3623_v14  ;;  %3626 = vpow2.f32 %v3376_v22  ;;  %v3196_v14 = vld [vmem:[#allocation9 + $0x8] sm:$0xff] }
 0x631   :  { %v7257_v11 = vadd.f32 1.0, %v3625_v31  ;;  %3628 = vpow2.f32 %v3377_v17  ;;  %3229 = vmatpush.msra.mxu0 %v3196_v14 }
 0x632   :  { %3630 = vrcp.f32 %v7255_v46  ;;  %v3092_v53 = vand.u32 2147483647, %v7255_v46  ;;  %v3094_v15 = vand.u32 2147483648, %v7255_v46  ;;  %vm3088_vm12 = vweird.f32 %v7255_v46 }
 0x633   :  { %3632 = vrcp.f32 %v7257_v11  ;;  %v3028_v18 = vpop.f32.mrf.mxu2  ;;  %v3048_v49 = vpop.f32.mrf.mxu3  ;;  %v3109_v56 = vand.u32 2147483648, %v7257_v11  ;;  %v3107_v61 = vand.u32 2147483647, %v7257_v11  ;;  %vm3103_vm11 = vweird.f32 %v7257_v11 }
 0x634   :  { %3634 = vpow2.f32 %v3378_v44  ;;  %v3057_v40 = vadd.f32 %v3028_v18, %v8559_v24  ;;  %v3058_v3 = vadd.f32 %v3048_v49, %v8560_v28  ;;  %vm7285_vm13 = vcmp.eq.f32.partialorder %v3092_v53, 8.507059e+37  ;;  %v3195_v18 = vld [vmem:[#allocation9] sm:$0xff] }
 0x635   :  { %3636 = vpow2.f32 %v3379_v23  ;;  %v3110_v6 = vor.u32 1.1754944e-38, %v3109_v56  ;;  %v3095_v62 = vor.u32 1.1754944e-38, %v3094_v15  ;;  %vm3108_vm0 = vcmp.eq.f32.partialorder %v3107_v61, 8.507059e+37  ;;  %3230 = vmatpush.msra.mxu0 %v3195_v18 }
 0x636   :  { %v3627_v37 = vpop.eup %3626  ;;  %v3189_v28 = vstv %s7319_s29 }
 0x637   :  { %v3629_v35 = vpop.eup %3628  ;;  %v7261_v34 = vadd.f32 1.0, %v3627_v37 }
 0x638   :  { %v3631_v38 = vpop.eup %3630  ;;  %v7263_v4 = vadd.f32 1.0, %v3629_v35 }
 0x639   :  { %v3633_v60 = vpop.eup %3632  ;;  %v3084_v42 = vmul.f32 %v3631_v38, %v7255_v46  ;;  %3638 = vrcp.f32 %v7261_v34  ;;  %vm3089_vm9 = vweird.f32 %v3631_v38  ;;  %vm3118_vm1 = vweird.f32 %v7261_v34 }
 0x63a   :  { %v3635_v36 = vpop.eup %3634  ;;  %v3099_v47 = vmul.f32 %v3633_v60, %v7257_v11  ;;  %3640 = vrcp.f32 %v7263_v4  ;;  %vm3104_vm10 = vweird.f32 %v3633_v60  ;;  %vm3090_vm14 = vmor %vm3088_vm12, %vm3089_vm9  ;;  %v3124_v1 = vand.u32 2147483648, %v7261_v34 }
 0x63b   :  { %v3637_v63 = vpop.eup %3636  ;;  %v3085_v30 = vsub.f32 1.0, %v3084_v42  ;;  %v7272_v51 = vadd.f32 1.0, %v3635_v36  ;;  %3642 = vtanh.f32 %v3057_v40  ;;  %vm7293_vm15 = vmor %vm3103_vm11, %vm3104_vm10  ;;  %v3139_v11 = vand.u32 2147483648, %v7263_v4 }
 0x63c   :  { %v3100_v16 = vsub.f32 1.0, %v3099_v47  ;;  %v7275_v9 = vadd.f32 1.0, %v3637_v63  ;;  %v3137_v55 = vand.u32 2147483647, %v7263_v4  ;;  %vm3133_vm3 = vweird.f32 %v7263_v4 }
 0x63d   :  { %3644 = vrcp.f32 %v7272_v51  ;;  %v3086_v41 = vmul.f32 %v3631_v38, %v3085_v30  ;;  %v3154_v37 = vand.u32 2147483648, %v7272_v51  ;;  %v3140_v40 = vor.u32 1.1754944e-38, %v3139_v11 }
 0x63e   :  { %v3101_v59 = vmul.f32 %v3633_v60, %v3100_v16  ;;  %3646 = vrcp.f32 %v7275_v9  ;;  %vm3138_vm7 = vcmp.eq.f32.partialorder %v3137_v55, 8.507059e+37  ;;  %vm3148_vm9 = vweird.f32 %v7272_v51 }
 0x63f   :  { %v7281_v20 = vpop.eup %3638  ;;  %v3087_v57 = vadd.f32 %v3631_v38, %v3086_v41  ;;  %3648 = vtanh.f32 %v3058_v3  ;;  %v3155_v63 = vor.u32 1.1754944e-38, %v3154_v37  ;;  %v3125_v56 = vor.u32 1.1754944e-38, %v3124_v1 }
 0x640   :  { %v3641_v58 = vpop.eup %3640  ;;  %v3114_v52 = vmul.f32 %v7281_v20, %v7261_v34  ;;  %v3102_v0 = vadd.f32 %v3633_v60, %v3101_v59  ;;  %vm3119_vm4 = vweird.f32 %v7281_v20  ;;  %v3187_v41 = vstv %s7314_s28 }
 0x641   :  { %v3129_v29 = vmul.f32 %v3641_v58, %v7263_v4  ;;  %v3091_v39 = vsel %vm3090_vm14, %v3631_v38, %v3087_v57  ;;  %v3643_v45 = vpop.eup %3642  ;;  %vm3134_vm2 = vweird.f32 %v3641_v58  ;;  %v3122_v4 = vand.u32 2147483647, %v7261_v34  ;;  %vm7326_vm8 = vmor %vm3118_vm1, %vm3119_vm4 }
 0x642   :  { %v3115_v32 = vsub.f32 1.0, %v3114_v52  ;;  %v3096_v5 = vsel %vm7285_vm13, %v3095_v62, %v3091_v39  ;;  %v3106_v25 = vsel %vm7293_vm15, %v3633_v60, %v3102_v0  ;;  %vm3135_vm6 = vmor %vm3133_vm3, %vm3134_vm2  ;;  %v3152_v60 = vand.u32 2147483647, %v7272_v51 }
 0x643   :  { %v3645_v26 = vpop.eup %3644  ;;  %v3130_v43 = vsub.f32 1.0, %v3129_v29  ;;  %v3111_v22 = vsel %vm3108_vm0, %v3110_v6, %v3106_v25  ;;  %v3176_v17 = vmul.f32 %v3643_v45, %v3096_v5  ;;  %vm3123_vm12 = vcmp.eq.f32.partialorder %v3122_v4, 8.507059e+37 }
 0x644   :  { %v7304_v54 = vpop.eup %3646  ;;  %v3116_v31 = vmul.f32 %v7281_v20, %v3115_v32  ;;  %v3144_v46 = vmul.f32 %v3645_v26, %v7272_v51  ;;  %v3175_v44 = vmul.f32 %v3111_v22, %v7240_v19  ;;  %vm3149_vm5 = vweird.f32 %v3645_v26 }
 0x645   :  { %v3159_v23 = vmul.f32 %v7304_v54, %v7275_v9  ;;  %v3131_v2 = vmul.f32 %v3641_v58, %v3130_v43  ;;  %v3649_v35 = vpop.eup %3648  ;;  %vm3150_vm10 = vmor %vm3148_vm9, %vm3149_vm5  ;;  %vm3153_vm11 = vcmp.eq.f32.partialorder %v3152_v60, 8.507059e+37  ;;  %vm3164_vm13 = vweird.f32 %v7304_v54 }
 0x646   :  { %v3145_v21 = vsub.f32 1.0, %v3144_v46  ;;  %v3177_v50 = vadd.f32 %v3176_v17, %v3175_v44  ;;  %v3117_v8 = vadd.f32 %v7281_v20, %v3116_v31  ;;  %vm3163_vm14 = vweird.f32 %v7275_v9 }
 0x647   :  { %v3132_v38 = vadd.f32 %v3641_v58, %v3131_v2  ;;  %v3160_v42 = vsub.f32 1.0, %v3159_v23  ;;  %v3167_v33 = vand.u32 2147483647, %v7275_v9  ;;  %vm3165_vm15 = vmor %vm3163_vm14, %vm3164_vm13 }
 0x648   :  { %v3146_v24 = vmul.f32 %v3645_v26, %v3145_v21  ;;  %3650 = vtanh.f32 %v3177_v50  ;;  %v3121_v49 = vsel %vm7326_vm8, %v7281_v20, %v3117_v8  ;;  %v3169_v20 = vand.u32 2147483648, %v7275_v9  ;;  %v3397_v9 = vld [vmem:[%s7360_s6] ss:$0 sm:$0xff] }
 0x649   :  { %v3136_v7 = vsel %vm3135_vm6, %v3641_v58, %v3132_v38  ;;  %v3161_v15 = vmul.f32 %v7304_v54, %v3160_v42  ;;  %v3126_v61 = vsel %vm3123_vm12, %v3125_v56, %v3121_v49  ;;  %v3192_v57 = vmul.f32 %v3187_v41, %v3177_v50 }
 0x64a   :  { %v3141_v47 = vsel %vm3138_vm7, %v3140_v40, %v3136_v7  ;;  %v3147_v53 = vadd.f32 %v3645_v26, %v3146_v24  ;;  %v3170_v6 = vor.u32 1.1754944e-38, %v3169_v20  ;;  %vm3168_vm0 = vcmp.eq.f32.partialorder %v3167_v33, 8.507059e+37 }
 0x64b   :  { %v3179_v30 = vmul.f32 %v3649_v35, %v3141_v47  ;;  %v3162_v59 = vadd.f32 %v7304_v54, %v3161_v15 }
 0x64c   :  { %v3151_v34 = vsel %vm3150_vm10, %v3645_v26, %v3147_v53 }
 0x64d   :  { %v3156_v13 = vsel %vm3153_vm11, %v3155_v63, %v3151_v34  ;;  %v3166_v58 = vsel %vm3165_vm15, %v7304_v54, %v3162_v59 }
 0x64e   :  { %v3651_v51 = vpop.eup %3650  ;;  %v3178_v16 = vmul.f32 %v3156_v13, %v7240_v19  ;;  %v3171_v62 = vsel %vm3168_vm0, %v3170_v6, %v3166_v58 }
 0x64f   :  { %v3182_v3 = vmul.f32 %v3651_v51, %v3126_v61 }
 0x650   :  { %v3180_v10 = vadd.f32 %v3179_v30, %v3178_v16 }
 0x651   :  { %v3188_v27 = vmul.f32 %v3187_v41, %v3182_v3 }
 0x652   :  { %3652 = vtanh.f32 %v3180_v10  ;;  %v3193_v12 = vmul.f32 %v3189_v28, %v3180_v10 }
 0x654   :  { %v3194_v19 = vadd.f32 %v3193_v12, %v3192_v57 }
 0x656   :  { %3236 = vst [vmem:[%s7362_s8] sm:$0xff] %v3194_v19 }
 0x658   :  { %v3653_v52 = vpop.eup %3652 }
 0x659   :  { %v3184_v0 = vmul.f32 %v3653_v52, %v3171_v62 }
 0x65b   :  { %v3190_v29 = vmul.f32 %v3189_v28, %v3184_v0 }
 0x65d   :  { %v3191_v39 = vadd.f32 %v3190_v29, %v3188_v27 }
 0x65f   :  { %3231 = vmatmul.f32.vlgmr.msra.gmra.mxu0 %v3191_v39 }
 0x6dc   :  { %v3232_v48 = vpop.f32.mrf.mxu0 }
 0x6dd   :  { %v3233_v45 = vadd.f32 %v3397_v9, %v3232_v48 }
 0x6df   :  { %3235 = vst [vmem:[%s7361_s7] sm:$0xff] %v3233_v45 }
 0x6e0   :  { %3245 = vsyncpa [#allocation4], 1 }
 0x6e1   :  { %3246 = vsyncpa [#allocation8], 1 }
 0x6e2   :  { %3247 = vsyncpa [#allocation5], 1 }

</bundles_post_ra>
